<compile_context>
chip_gen: v7x
topology: tpu7x:2x2x1
jax: 0.10.0
libtpu: 0.0.40
codegen_flags: <defaults>
</compile_context>

<pallas_src>
import jax
import jax.numpy as jnp
import numpy as np
from jax.experimental import pallas as pl
from jax.experimental.pallas import tpu as pltpu


# ----------------------------------------------------------------------------
# Fused Pallas kernel (3 x LSTM layer + FC + sigmoid)
# ----------------------------------------------------------------------------
def make_fused_kernel(depth, T):
    """Build a kernel taking refs:
       x, (w_ih, w_hh, b) * depth, w_fc, b_fc, out
    x      : (B, T, D_in)           batch_first, as PyTorch provides it
    w_ih   : (4, D_in, H)           per-gate input weights  (gate order i,f,g,o)
    w_hh   : (4, H, H)              per-gate recurrent weights
    b      : (4, 1, H)              per-gate bias (b_ih + b_hh)
    w_fc   : (H, O), b_fc : (1, O)
    out    : (B, O)
    """

    def kernel(*refs):
        x_ref = refs[0]
        wfc_ref = refs[1 + 3 * depth]
        bfc_ref = refs[2 + 3 * depth]
        out_ref = refs[3 + 3 * depth]

        B = x_ref.shape[0]

        # Load the (tiny) input sequence once; index it with static t below.
        x_all = x_ref[...]                              # (B, T, D_in)
        hs = [x_all[:, t, :] for t in range(T)]         # list of (B, D_in)

        for layer in range(depth):
            wih_ref = refs[1 + 3 * layer]
            whh_ref = refs[2 + 3 * layer]
            b_ref = refs[3 + 3 * layer]
            H = whh_ref.shape[-1]

            # Hoist weight loads / bias broadcast out of the time loop.
            wih = [wih_ref[g] for g in range(4)]                      # (D_in, H)
            whh = [whh_ref[g] for g in range(4)]                      # (H, H)
            bias = [jnp.broadcast_to(b_ref[g], (B, H)) for g in range(4)]

            h = jnp.zeros((B, H), jnp.float32)
            c = jnp.zeros((B, H), jnp.float32)
            outs = []
            for t in range(T):
                x_t = hs[t]
                pre = [
                    jnp.dot(x_t, wih[g], preferred_element_type=jnp.float32)
                    + jnp.dot(h, whh[g], preferred_element_type=jnp.float32)
                    + bias[g]
                    for g in range(4)
                ]
                i_g = jax.nn.sigmoid(pre[0])
                f_g = jax.nn.sigmoid(pre[1])
                g_g = jnp.tanh(pre[2])
                o_g = jax.nn.sigmoid(pre[3])
                c = f_g * c + i_g * g_g
                h = o_g * jnp.tanh(c)
                outs.append(h)
            hs = outs                                   # feed next layer (stays in vregs)

        # Only out_seq[:, -1] is consumed -> fuse FC + sigmoid, single HBM store.
        out_ref[...] = jax.nn.sigmoid(
            jnp.dot(hs[-1], wfc_ref[...], preferred_element_type=jnp.float32)
            + bfc_ref[...]
        )

    return kernel


# ----------------------------------------------------------------------------
# Wrapper
# ----------------------------------------------------------------------------
def discriminator_lstm_gaussian_forward(x_btd, params):
    """Full forward.  x_btd: (B, T, input_size) batch_first, like PyTorch."""
    B, T, D = x_btd.shape
    depth = len(params["lstm"])
    O = params["fc_w_t"].shape[-1]

    inputs = [x_btd]
    in_specs = [pl.BlockSpec((B, T, D), lambda: (0, 0, 0))]
    for (wih_g, whh_g, b_g) in params["lstm"]:
        inputs += [wih_g, whh_g, b_g]
        in_specs += [
            pl.BlockSpec(wih_g.shape, lambda: (0, 0, 0)),
            pl.BlockSpec(whh_g.shape, lambda: (0, 0, 0)),
            pl.BlockSpec(b_g.shape, lambda: (0, 0, 0)),
        ]
    inputs += [params["fc_w_t"], params["fc_b"]]
    in_specs += [
        pl.BlockSpec(params["fc_w_t"].shape, lambda: (0, 0)),
        pl.BlockSpec(params["fc_b"].shape, lambda: (0, 0)),
    ]

    return pl.pallas_call(
        make_fused_kernel(depth, T),
        out_shape=jax.ShapeDtypeStruct((B, O), jnp.float32),
        grid=(),
        in_specs=in_specs,
        out_specs=pl.BlockSpec((B, O), lambda: (0, 0)),
    )(*inputs)


# ----------------------------------------------------------------------------
# Deterministic parameter construction (shapes match nn.LSTM / nn.Linear),
# then pre-split per gate for the kernel.
# ----------------------------------------------------------------------------
def make_params(key, input_size, hidden, output_size, depth):
    params = {"lstm": []}
    bound = 1.0 / np.sqrt(hidden)
    d_in = input_size
    for _ in range(depth):
        key, k1, k2, k3, k4 = jax.random.split(key, 5)
        w_ih = jax.random.uniform(k1, (4 * hidden, d_in), jnp.float32, -bound, bound)
        w_hh = jax.random.uniform(k2, (4 * hidden, hidden), jnp.float32, -bound, bound)
        b_ih = jax.random.uniform(k3, (4 * hidden,), jnp.float32, -bound, bound)
        b_hh = jax.random.uniform(k4, (4 * hidden,), jnp.float32, -bound, bound)
        # PyTorch layout (4H, D_in) -> per-gate transposed blocks (4, D_in, H)
        wih_g = jnp.transpose(w_ih.T.reshape(d_in, 4, hidden), (1, 0, 2))
        whh_g = jnp.transpose(w_hh.T.reshape(hidden, 4, hidden), (1, 0, 2))
        b_g = (b_ih + b_hh).reshape(4, hidden)[:, None, :]          # (4, 1, H)
        params["lstm"].append((wih_g, whh_g, b_g))
        d_in = hidden
    key, k5, k6 = jax.random.split(key, 3)
    fb = 1.0 / np.sqrt(hidden)
    w_fc = jax.random.uniform(k5, (output_size, hidden), jnp.float32, -fb, fb)
    b_fc = jax.random.uniform(k6, (output_size,), jnp.float32, -fb, fb)
    params["fc_w_t"] = w_fc.T                                       # (H, O)
    params["fc_b"] = b_fc[None, :]                                  # (1, O)
    return params


# ----------------------------------------------------------------------------
# Pure-JAX reference (mirrors PyTorch LSTM + Linear + Sigmoid semantics)
# ----------------------------------------------------------------------------
def reference_forward(x_btd, params):
    B, T, _ = x_btd.shape
    h_seq = [x_btd[:, t, :] for t in range(T)]
    for (wih_g, whh_g, b_g) in params["lstm"]:
        H = whh_g.shape[-1]
        h = jnp.zeros((B, H), jnp.float32)
        c = jnp.zeros((B, H), jnp.float32)
        outs = []
        for t in range(T):
            x_t = h_seq[t]
            pre = [x_t @ wih_g[g] + h @ whh_g[g] + b_g[g] for g in range(4)]
            i = jax.nn.sigmoid(pre[0])
            f = jax.nn.sigmoid(pre[1])
            g = jnp.tanh(pre[2])
            o = jax.nn.sigmoid(pre[3])
            c = f * c + i * g
            h = o * jnp.tanh(c)
            outs.append(h)
        h_seq = outs
    return jax.nn.sigmoid(h_seq[-1] @ params["fc_w_t"] + params["fc_b"])


if __name__ == "__main__":
    # Small shapes consistent with the module: (batch, seq, input_size)
    batch, seq, input_size = 2, 8, 4
    hidden, output_size, depth = 32, 1, 3

    key = jax.random.PRNGKey(0)
    key, kx = jax.random.split(key)
    x = jax.random.normal(kx, (batch, seq, input_size), jnp.float32)

    params = make_params(key, input_size, hidden, output_size, depth)

    out = discriminator_lstm_gaussian_forward(x, params)
    out = jax.block_until_ready(out)

    ref = reference_forward(x, params)
    assert out.shape == (batch, output_size)
    assert np.allclose(np.asarray(out), np.asarray(ref), atol=1e-2, rtol=1e-2)

    print("KERNEL_OK")
</pallas_src>

<mosaic_0001>
module attributes {stable_mosaic.version = 11 : i64} {
  func.func @kernel(%arg0: memref<2x8x4xf32, #tpu.memory_space<vmem>>, %arg1: memref<4x4x32xf32, #tpu.memory_space<vmem>>, %arg2: memref<4x32x32xf32, #tpu.memory_space<vmem>>, %arg3: memref<4x1x32xf32, #tpu.memory_space<vmem>>, %arg4: memref<4x32x32xf32, #tpu.memory_space<vmem>>, %arg5: memref<4x32x32xf32, #tpu.memory_space<vmem>>, %arg6: memref<4x1x32xf32, #tpu.memory_space<vmem>>, %arg7: memref<4x32x32xf32, #tpu.memory_space<vmem>>, %arg8: memref<4x32x32xf32, #tpu.memory_space<vmem>>, %arg9: memref<4x1x32xf32, #tpu.memory_space<vmem>>, %arg10: memref<32x1xf32, #tpu.memory_space<vmem>>, %arg11: memref<1x1xf32, #tpu.memory_space<vmem>>, %arg12: memref<2x1xf32, #tpu.memory_space<vmem>>) attributes {dimension_semantics = [], scalar_prefetch = 0 : i64, scratch_operands = 0 : i64, tpu.core_type = #tpu.core_type<tc>} {
    %c0 = arith.constant 0 : index
    %c0_0 = arith.constant 0 : index
    %c0_1 = arith.constant 0 : index
    %0 = vector.load %arg0[%c0, %c0_0, %c0_1] : memref<2x8x4xf32, #tpu.memory_space<vmem>>, vector<2x8x4xf32>
    %1 = vector.extract_strided_slice %0 {offsets = [0, 0, 0], sizes = [2, 1, 4], strides = [1, 1, 1]} : vector<2x8x4xf32> to vector<2x1x4xf32>
    %2 = vector.shape_cast %1 : vector<2x1x4xf32> to vector<2x4xf32>
    %3 = vector.extract_strided_slice %0 {offsets = [0, 1, 0], sizes = [2, 1, 4], strides = [1, 1, 1]} : vector<2x8x4xf32> to vector<2x1x4xf32>
    %4 = vector.shape_cast %3 : vector<2x1x4xf32> to vector<2x4xf32>
    %5 = vector.extract_strided_slice %0 {offsets = [0, 2, 0], sizes = [2, 1, 4], strides = [1, 1, 1]} : vector<2x8x4xf32> to vector<2x1x4xf32>
    %6 = vector.shape_cast %5 : vector<2x1x4xf32> to vector<2x4xf32>
    %7 = vector.extract_strided_slice %0 {offsets = [0, 3, 0], sizes = [2, 1, 4], strides = [1, 1, 1]} : vector<2x8x4xf32> to vector<2x1x4xf32>
    %8 = vector.shape_cast %7 : vector<2x1x4xf32> to vector<2x4xf32>
    %9 = vector.extract_strided_slice %0 {offsets = [0, 4, 0], sizes = [2, 1, 4], strides = [1, 1, 1]} : vector<2x8x4xf32> to vector<2x1x4xf32>
    %10 = vector.shape_cast %9 : vector<2x1x4xf32> to vector<2x4xf32>
    %11 = vector.extract_strided_slice %0 {offsets = [0, 5, 0], sizes = [2, 1, 4], strides = [1, 1, 1]} : vector<2x8x4xf32> to vector<2x1x4xf32>
    %12 = vector.shape_cast %11 : vector<2x1x4xf32> to vector<2x4xf32>
    %13 = vector.extract_strided_slice %0 {offsets = [0, 6, 0], sizes = [2, 1, 4], strides = [1, 1, 1]} : vector<2x8x4xf32> to vector<2x1x4xf32>
    %14 = vector.shape_cast %13 : vector<2x1x4xf32> to vector<2x4xf32>
    %15 = vector.extract_strided_slice %0 {offsets = [0, 7, 0], sizes = [2, 1, 4], strides = [1, 1, 1]} : vector<2x8x4xf32> to vector<2x1x4xf32>
    %16 = vector.shape_cast %15 : vector<2x1x4xf32> to vector<2x4xf32>
    %c0_2 = arith.constant 0 : index
    %c0_3 = arith.constant 0 : index
    %c0_4 = arith.constant 0 : index
    %17 = vector.load %arg1[%c0_2, %c0_3, %c0_4] : memref<4x4x32xf32, #tpu.memory_space<vmem>>, vector<1x4x32xf32>
    %18 = vector.shape_cast %17 : vector<1x4x32xf32> to vector<4x32xf32>
    %c1 = arith.constant 1 : index
    %c0_5 = arith.constant 0 : index
    %c0_6 = arith.constant 0 : index
    %19 = vector.load %arg1[%c1, %c0_5, %c0_6] : memref<4x4x32xf32, #tpu.memory_space<vmem>>, vector<1x4x32xf32>
    %20 = vector.shape_cast %19 : vector<1x4x32xf32> to vector<4x32xf32>
    %c2 = arith.constant 2 : index
    %c0_7 = arith.constant 0 : index
    %c0_8 = arith.constant 0 : index
    %21 = vector.load %arg1[%c2, %c0_7, %c0_8] : memref<4x4x32xf32, #tpu.memory_space<vmem>>, vector<1x4x32xf32>
    %22 = vector.shape_cast %21 : vector<1x4x32xf32> to vector<4x32xf32>
    %c3 = arith.constant 3 : index
    %c0_9 = arith.constant 0 : index
    %c0_10 = arith.constant 0 : index
    %23 = vector.load %arg1[%c3, %c0_9, %c0_10] : memref<4x4x32xf32, #tpu.memory_space<vmem>>, vector<1x4x32xf32>
    %24 = vector.shape_cast %23 : vector<1x4x32xf32> to vector<4x32xf32>
    %c0_11 = arith.constant 0 : index
    %c0_12 = arith.constant 0 : index
    %c0_13 = arith.constant 0 : index
    %25 = vector.load %arg2[%c0_11, %c0_12, %c0_13] : memref<4x32x32xf32, #tpu.memory_space<vmem>>, vector<1x32x32xf32>
    %26 = vector.shape_cast %25 : vector<1x32x32xf32> to vector<32x32xf32>
    %c1_14 = arith.constant 1 : index
    %c0_15 = arith.constant 0 : index
    %c0_16 = arith.constant 0 : index
    %27 = vector.load %arg2[%c1_14, %c0_15, %c0_16] : memref<4x32x32xf32, #tpu.memory_space<vmem>>, vector<1x32x32xf32>
    %28 = vector.shape_cast %27 : vector<1x32x32xf32> to vector<32x32xf32>
    %c2_17 = arith.constant 2 : index
    %c0_18 = arith.constant 0 : index
    %c0_19 = arith.constant 0 : index
    %29 = vector.load %arg2[%c2_17, %c0_18, %c0_19] : memref<4x32x32xf32, #tpu.memory_space<vmem>>, vector<1x32x32xf32>
    %30 = vector.shape_cast %29 : vector<1x32x32xf32> to vector<32x32xf32>
    %c3_20 = arith.constant 3 : index
    %c0_21 = arith.constant 0 : index
    %c0_22 = arith.constant 0 : index
    %31 = vector.load %arg2[%c3_20, %c0_21, %c0_22] : memref<4x32x32xf32, #tpu.memory_space<vmem>>, vector<1x32x32xf32>
    %32 = vector.shape_cast %31 : vector<1x32x32xf32> to vector<32x32xf32>
    %c0_23 = arith.constant 0 : index
    %c0_24 = arith.constant 0 : index
    %c0_25 = arith.constant 0 : index
    %33 = vector.load %arg3[%c0_23, %c0_24, %c0_25] : memref<4x1x32xf32, #tpu.memory_space<vmem>>, vector<1x1x32xf32>
    %34 = vector.shape_cast %33 : vector<1x1x32xf32> to vector<1x32xf32>
    %35 = vector.shape_cast %34 : vector<1x32xf32> to vector<1x32xf32>
    %36 = vector.broadcast %35 : vector<1x32xf32> to vector<2x32xf32>
    %c1_26 = arith.constant 1 : index
    %c0_27 = arith.constant 0 : index
    %c0_28 = arith.constant 0 : index
    %37 = vector.load %arg3[%c1_26, %c0_27, %c0_28] : memref<4x1x32xf32, #tpu.memory_space<vmem>>, vector<1x1x32xf32>
    %38 = vector.shape_cast %37 : vector<1x1x32xf32> to vector<1x32xf32>
    %39 = vector.shape_cast %38 : vector<1x32xf32> to vector<1x32xf32>
    %40 = vector.broadcast %39 : vector<1x32xf32> to vector<2x32xf32>
    %c2_29 = arith.constant 2 : index
    %c0_30 = arith.constant 0 : index
    %c0_31 = arith.constant 0 : index
    %41 = vector.load %arg3[%c2_29, %c0_30, %c0_31] : memref<4x1x32xf32, #tpu.memory_space<vmem>>, vector<1x1x32xf32>
    %42 = vector.shape_cast %41 : vector<1x1x32xf32> to vector<1x32xf32>
    %43 = vector.shape_cast %42 : vector<1x32xf32> to vector<1x32xf32>
    %44 = vector.broadcast %43 : vector<1x32xf32> to vector<2x32xf32>
    %c3_32 = arith.constant 3 : index
    %c0_33 = arith.constant 0 : index
    %c0_34 = arith.constant 0 : index
    %45 = vector.load %arg3[%c3_32, %c0_33, %c0_34] : memref<4x1x32xf32, #tpu.memory_space<vmem>>, vector<1x1x32xf32>
    %46 = vector.shape_cast %45 : vector<1x1x32xf32> to vector<1x32xf32>
    %47 = vector.shape_cast %46 : vector<1x32xf32> to vector<1x32xf32>
    %48 = vector.broadcast %47 : vector<1x32xf32> to vector<2x32xf32>
    %cst = arith.constant 0.000000e+00 : f32
    %49 = vector.broadcast %cst : f32 to vector<2x32xf32>
    %cst_35 = arith.constant 0.000000e+00 : f32
    %50 = vector.broadcast %cst_35 : f32 to vector<2x32xf32>
    %cst_36 = arith.constant dense<0.000000e+00> : vector<2x32xf32>
    %51 = tpu.matmul %2, %18, %cst_36 {dimension_numbers = #tpu.dot_dimension_numbers<[1], [0], [0], [1], [0, 0, 1, 1], [], []>} : vector<2x4xf32>, vector<4x32xf32>, vector<2x32xf32> -> vector<2x32xf32>
    %cst_37 = arith.constant dense<0.000000e+00> : vector<2x32xf32>
    %52 = tpu.matmul %49, %26, %cst_37 {dimension_numbers = #tpu.dot_dimension_numbers<[1], [0], [0], [1], [0, 0, 1, 1], [], []>} : vector<2x32xf32>, vector<32x32xf32>, vector<2x32xf32> -> vector<2x32xf32>
    %53 = arith.addf %51, %52 : vector<2x32xf32>
    %54 = arith.addf %53, %36 : vector<2x32xf32>
    %cst_38 = arith.constant dense<0.000000e+00> : vector<2x32xf32>
    %55 = tpu.matmul %2, %20, %cst_38 {dimension_numbers = #tpu.dot_dimension_numbers<[1], [0], [0], [1], [0, 0, 1, 1], [], []>} : vector<2x4xf32>, vector<4x32xf32>, vector<2x32xf32> -> vector<2x32xf32>
    %cst_39 = arith.constant dense<0.000000e+00> : vector<2x32xf32>
    %56 = tpu.matmul %49, %28, %cst_39 {dimension_numbers = #tpu.dot_dimension_numbers<[1], [0], [0], [1], [0, 0, 1, 1], [], []>} : vector<2x32xf32>, vector<32x32xf32>, vector<2x32xf32> -> vector<2x32xf32>
    %57 = arith.addf %55, %56 : vector<2x32xf32>
    %58 = arith.addf %57, %40 : vector<2x32xf32>
    %cst_40 = arith.constant dense<0.000000e+00> : vector<2x32xf32>
    %59 = tpu.matmul %2, %22, %cst_40 {dimension_numbers = #tpu.dot_dimension_numbers<[1], [0], [0], [1], [0, 0, 1, 1], [], []>} : vector<2x4xf32>, vector<4x32xf32>, vector<2x32xf32> -> vector<2x32xf32>
    %cst_41 = arith.constant dense<0.000000e+00> : vector<2x32xf32>
    %60 = tpu.matmul %49, %30, %cst_41 {dimension_numbers = #tpu.dot_dimension_numbers<[1], [0], [0], [1], [0, 0, 1, 1], [], []>} : vector<2x32xf32>, vector<32x32xf32>, vector<2x32xf32> -> vector<2x32xf32>
    %61 = arith.addf %59, %60 : vector<2x32xf32>
    %62 = arith.addf %61, %44 : vector<2x32xf32>
    %cst_42 = arith.constant dense<0.000000e+00> : vector<2x32xf32>
    %63 = tpu.matmul %2, %24, %cst_42 {dimension_numbers = #tpu.dot_dimension_numbers<[1], [0], [0], [1], [0, 0, 1, 1], [], []>} : vector<2x4xf32>, vector<4x32xf32>, vector<2x32xf32> -> vector<2x32xf32>
    %cst_43 = arith.constant dense<0.000000e+00> : vector<2x32xf32>
    %64 = tpu.matmul %49, %32, %cst_43 {dimension_numbers = #tpu.dot_dimension_numbers<[1], [0], [0], [1], [0, 0, 1, 1], [], []>} : vector<2x32xf32>, vector<32x32xf32>, vector<2x32xf32> -> vector<2x32xf32>
    %65 = arith.addf %63, %64 : vector<2x32xf32>
    %66 = arith.addf %65, %48 : vector<2x32xf32>
    %67 = arith.negf %54 : vector<2x32xf32>
    %68 = math.exp %67 : vector<2x32xf32>
    %cst_44 = arith.constant 1.000000e+00 : f32
    %69 = vector.broadcast %cst_44 : f32 to vector<2x32xf32>
    %70 = arith.addf %69, %68 : vector<2x32xf32>
    %71 = arith.divf %69, %70 : vector<2x32xf32>
    %72 = arith.negf %58 : vector<2x32xf32>
    %73 = math.exp %72 : vector<2x32xf32>
    %cst_45 = arith.constant 1.000000e+00 : f32
    %74 = vector.broadcast %cst_45 : f32 to vector<2x32xf32>
    %75 = arith.addf %74, %73 : vector<2x32xf32>
    %76 = arith.divf %74, %75 : vector<2x32xf32>
    %77 = math.tanh %62 : vector<2x32xf32>
    %78 = arith.negf %66 : vector<2x32xf32>
    %79 = math.exp %78 : vector<2x32xf32>
    %cst_46 = arith.constant 1.000000e+00 : f32
    %80 = vector.broadcast %cst_46 : f32 to vector<2x32xf32>
    %81 = arith.addf %80, %79 : vector<2x32xf32>
    %82 = arith.divf %80, %81 : vector<2x32xf32>
    %83 = arith.mulf %76, %50 : vector<2x32xf32>
    %84 = arith.mulf %71, %77 : vector<2x32xf32>
    %85 = arith.addf %83, %84 : vector<2x32xf32>
    %86 = math.tanh %85 : vector<2x32xf32>
    %87 = arith.mulf %82, %86 : vector<2x32xf32>
    %cst_47 = arith.constant dense<0.000000e+00> : vector<2x32xf32>
    %88 = tpu.matmul %4, %18, %cst_47 {dimension_numbers = #tpu.dot_dimension_numbers<[1], [0], [0], [1], [0, 0, 1, 1], [], []>} : vector<2x4xf32>, vector<4x32xf32>, vector<2x32xf32> -> vector<2x32xf32>
    %cst_48 = arith.constant dense<0.000000e+00> : vector<2x32xf32>
    %89 = tpu.matmul %87, %26, %cst_48 {dimension_numbers = #tpu.dot_dimension_numbers<[1], [0], [0], [1], [0, 0, 1, 1], [], []>} : vector<2x32xf32>, vector<32x32xf32>, vector<2x32xf32> -> vector<2x32xf32>
    %90 = arith.addf %88, %89 : vector<2x32xf32>
    %91 = arith.addf %90, %36 : vector<2x32xf32>
    %cst_49 = arith.constant dense<0.000000e+00> : vector<2x32xf32>
    %92 = tpu.matmul %4, %20, %cst_49 {dimension_numbers = #tpu.dot_dimension_numbers<[1], [0], [0], [1], [0, 0, 1, 1], [], []>} : vector<2x4xf32>, vector<4x32xf32>, vector<2x32xf32> -> vector<2x32xf32>
    %cst_50 = arith.constant dense<0.000000e+00> : vector<2x32xf32>
    %93 = tpu.matmul %87, %28, %cst_50 {dimension_numbers = #tpu.dot_dimension_numbers<[1], [0], [0], [1], [0, 0, 1, 1], [], []>} : vector<2x32xf32>, vector<32x32xf32>, vector<2x32xf32> -> vector<2x32xf32>
    %94 = arith.addf %92, %93 : vector<2x32xf32>
    %95 = arith.addf %94, %40 : vector<2x32xf32>
    %cst_51 = arith.constant dense<0.000000e+00> : vector<2x32xf32>
    %96 = tpu.matmul %4, %22, %cst_51 {dimension_numbers = #tpu.dot_dimension_numbers<[1], [0], [0], [1], [0, 0, 1, 1], [], []>} : vector<2x4xf32>, vector<4x32xf32>, vector<2x32xf32> -> vector<2x32xf32>
    %cst_52 = arith.constant dense<0.000000e+00> : vector<2x32xf32>
    %97 = tpu.matmul %87, %30, %cst_52 {dimension_numbers = #tpu.dot_dimension_numbers<[1], [0], [0], [1], [0, 0, 1, 1], [], []>} : vector<2x32xf32>, vector<32x32xf32>, vector<2x32xf32> -> vector<2x32xf32>
    %98 = arith.addf %96, %97 : vector<2x32xf32>
    %99 = arith.addf %98, %44 : vector<2x32xf32>
    %cst_53 = arith.constant dense<0.000000e+00> : vector<2x32xf32>
    %100 = tpu.matmul %4, %24, %cst_53 {dimension_numbers = #tpu.dot_dimension_numbers<[1], [0], [0], [1], [0, 0, 1, 1], [], []>} : vector<2x4xf32>, vector<4x32xf32>, vector<2x32xf32> -> vector<2x32xf32>
    %cst_54 = arith.constant dense<0.000000e+00> : vector<2x32xf32>
    %101 = tpu.matmul %87, %32, %cst_54 {dimension_numbers = #tpu.dot_dimension_numbers<[1], [0], [0], [1], [0, 0, 1, 1], [], []>} : vector<2x32xf32>, vector<32x32xf32>, vector<2x32xf32> -> vector<2x32xf32>
    %102 = arith.addf %100, %101 : vector<2x32xf32>
    %103 = arith.addf %102, %48 : vector<2x32xf32>
    %104 = arith.negf %91 : vector<2x32xf32>
    %105 = math.exp %104 : vector<2x32xf32>
    %cst_55 = arith.constant 1.000000e+00 : f32
    %106 = vector.broadcast %cst_55 : f32 to vector<2x32xf32>
    %107 = arith.addf %106, %105 : vector<2x32xf32>
    %108 = arith.divf %106, %107 : vector<2x32xf32>
    %109 = arith.negf %95 : vector<2x32xf32>
    %110 = math.exp %109 : vector<2x32xf32>
    %cst_56 = arith.constant 1.000000e+00 : f32
    %111 = vector.broadcast %cst_56 : f32 to vector<2x32xf32>
    %112 = arith.addf %111, %110 : vector<2x32xf32>
    %113 = arith.divf %111, %112 : vector<2x32xf32>
    %114 = math.tanh %99 : vector<2x32xf32>
    %115 = arith.negf %103 : vector<2x32xf32>
    %116 = math.exp %115 : vector<2x32xf32>
    %cst_57 = arith.constant 1.000000e+00 : f32
    %117 = vector.broadcast %cst_57 : f32 to vector<2x32xf32>
    %118 = arith.addf %117, %116 : vector<2x32xf32>
    %119 = arith.divf %117, %118 : vector<2x32xf32>
    %120 = arith.mulf %113, %85 : vector<2x32xf32>
    %121 = arith.mulf %108, %114 : vector<2x32xf32>
    %122 = arith.addf %120, %121 : vector<2x32xf32>
    %123 = math.tanh %122 : vector<2x32xf32>
    %124 = arith.mulf %119, %123 : vector<2x32xf32>
    %cst_58 = arith.constant dense<0.000000e+00> : vector<2x32xf32>
    %125 = tpu.matmul %6, %18, %cst_58 {dimension_numbers = #tpu.dot_dimension_numbers<[1], [0], [0], [1], [0, 0, 1, 1], [], []>} : vector<2x4xf32>, vector<4x32xf32>, vector<2x32xf32> -> vector<2x32xf32>
    %cst_59 = arith.constant dense<0.000000e+00> : vector<2x32xf32>
    %126 = tpu.matmul %124, %26, %cst_59 {dimension_numbers = #tpu.dot_dimension_numbers<[1], [0], [0], [1], [0, 0, 1, 1], [], []>} : vector<2x32xf32>, vector<32x32xf32>, vector<2x32xf32> -> vector<2x32xf32>
    %127 = arith.addf %125, %126 : vector<2x32xf32>
    %128 = arith.addf %127, %36 : vector<2x32xf32>
    %cst_60 = arith.constant dense<0.000000e+00> : vector<2x32xf32>
    %129 = tpu.matmul %6, %20, %cst_60 {dimension_numbers = #tpu.dot_dimension_numbers<[1], [0], [0], [1], [0, 0, 1, 1], [], []>} : vector<2x4xf32>, vector<4x32xf32>, vector<2x32xf32> -> vector<2x32xf32>
    %cst_61 = arith.constant dense<0.000000e+00> : vector<2x32xf32>
    %130 = tpu.matmul %124, %28, %cst_61 {dimension_numbers = #tpu.dot_dimension_numbers<[1], [0], [0], [1], [0, 0, 1, 1], [], []>} : vector<2x32xf32>, vector<32x32xf32>, vector<2x32xf32> -> vector<2x32xf32>
    %131 = arith.addf %129, %130 : vector<2x32xf32>
    %132 = arith.addf %131, %40 : vector<2x32xf32>
    %cst_62 = arith.constant dense<0.000000e+00> : vector<2x32xf32>
    %133 = tpu.matmul %6, %22, %cst_62 {dimension_numbers = #tpu.dot_dimension_numbers<[1], [0], [0], [1], [0, 0, 1, 1], [], []>} : vector<2x4xf32>, vector<4x32xf32>, vector<2x32xf32> -> vector<2x32xf32>
    %cst_63 = arith.constant dense<0.000000e+00> : vector<2x32xf32>
    %134 = tpu.matmul %124, %30, %cst_63 {dimension_numbers = #tpu.dot_dimension_numbers<[1], [0], [0], [1], [0, 0, 1, 1], [], []>} : vector<2x32xf32>, vector<32x32xf32>, vector<2x32xf32> -> vector<2x32xf32>
    %135 = arith.addf %133, %134 : vector<2x32xf32>
    %136 = arith.addf %135, %44 : vector<2x32xf32>
    %cst_64 = arith.constant dense<0.000000e+00> : vector<2x32xf32>
    %137 = tpu.matmul %6, %24, %cst_64 {dimension_numbers = #tpu.dot_dimension_numbers<[1], [0], [0], [1], [0, 0, 1, 1], [], []>} : vector<2x4xf32>, vector<4x32xf32>, vector<2x32xf32> -> vector<2x32xf32>
    %cst_65 = arith.constant dense<0.000000e+00> : vector<2x32xf32>
    %138 = tpu.matmul %124, %32, %cst_65 {dimension_numbers = #tpu.dot_dimension_numbers<[1], [0], [0], [1], [0, 0, 1, 1], [], []>} : vector<2x32xf32>, vector<32x32xf32>, vector<2x32xf32> -> vector<2x32xf32>
    %139 = arith.addf %137, %138 : vector<2x32xf32>
    %140 = arith.addf %139, %48 : vector<2x32xf32>
    %141 = arith.negf %128 : vector<2x32xf32>
    %142 = math.exp %141 : vector<2x32xf32>
    %cst_66 = arith.constant 1.000000e+00 : f32
    %143 = vector.broadcast %cst_66 : f32 to vector<2x32xf32>
    %144 = arith.addf %143, %142 : vector<2x32xf32>
    %145 = arith.divf %143, %144 : vector<2x32xf32>
    %146 = arith.negf %132 : vector<2x32xf32>
    %147 = math.exp %146 : vector<2x32xf32>
    %cst_67 = arith.constant 1.000000e+00 : f32
    %148 = vector.broadcast %cst_67 : f32 to vector<2x32xf32>
    %149 = arith.addf %148, %147 : vector<2x32xf32>
    %150 = arith.divf %148, %149 : vector<2x32xf32>
    %151 = math.tanh %136 : vector<2x32xf32>
    %152 = arith.negf %140 : vector<2x32xf32>
    %153 = math.exp %152 : vector<2x32xf32>
    %cst_68 = arith.constant 1.000000e+00 : f32
    %154 = vector.broadcast %cst_68 : f32 to vector<2x32xf32>
    %155 = arith.addf %154, %153 : vector<2x32xf32>
    %156 = arith.divf %154, %155 : vector<2x32xf32>
    %157 = arith.mulf %150, %122 : vector<2x32xf32>
    %158 = arith.mulf %145, %151 : vector<2x32xf32>
    %159 = arith.addf %157, %158 : vector<2x32xf32>
    %160 = math.tanh %159 : vector<2x32xf32>
    %161 = arith.mulf %156, %160 : vector<2x32xf32>
    %cst_69 = arith.constant dense<0.000000e+00> : vector<2x32xf32>
    %162 = tpu.matmul %8, %18, %cst_69 {dimension_numbers = #tpu.dot_dimension_numbers<[1], [0], [0], [1], [0, 0, 1, 1], [], []>} : vector<2x4xf32>, vector<4x32xf32>, vector<2x32xf32> -> vector<2x32xf32>
    %cst_70 = arith.constant dense<0.000000e+00> : vector<2x32xf32>
    %163 = tpu.matmul %161, %26, %cst_70 {dimension_numbers = #tpu.dot_dimension_numbers<[1], [0], [0], [1], [0, 0, 1, 1], [], []>} : vector<2x32xf32>, vector<32x32xf32>, vector<2x32xf32> -> vector<2x32xf32>
    %164 = arith.addf %162, %163 : vector<2x32xf32>
    %165 = arith.addf %164, %36 : vector<2x32xf32>
    %cst_71 = arith.constant dense<0.000000e+00> : vector<2x32xf32>
    %166 = tpu.matmul %8, %20, %cst_71 {dimension_numbers = #tpu.dot_dimension_numbers<[1], [0], [0], [1], [0, 0, 1, 1], [], []>} : vector<2x4xf32>, vector<4x32xf32>, vector<2x32xf32> -> vector<2x32xf32>
    %cst_72 = arith.constant dense<0.000000e+00> : vector<2x32xf32>
    %167 = tpu.matmul %161, %28, %cst_72 {dimension_numbers = #tpu.dot_dimension_numbers<[1], [0], [0], [1], [0, 0, 1, 1], [], []>} : vector<2x32xf32>, vector<32x32xf32>, vector<2x32xf32> -> vector<2x32xf32>
    %168 = arith.addf %166, %167 : vector<2x32xf32>
    %169 = arith.addf %168, %40 : vector<2x32xf32>
    %cst_73 = arith.constant dense<0.000000e+00> : vector<2x32xf32>
    %170 = tpu.matmul %8, %22, %cst_73 {dimension_numbers = #tpu.dot_dimension_numbers<[1], [0], [0], [1], [0, 0, 1, 1], [], []>} : vector<2x4xf32>, vector<4x32xf32>, vector<2x32xf32> -> vector<2x32xf32>
    %cst_74 = arith.constant dense<0.000000e+00> : vector<2x32xf32>
    %171 = tpu.matmul %161, %30, %cst_74 {dimension_numbers = #tpu.dot_dimension_numbers<[1], [0], [0], [1], [0, 0, 1, 1], [], []>} : vector<2x32xf32>, vector<32x32xf32>, vector<2x32xf32> -> vector<2x32xf32>
    %172 = arith.addf %170, %171 : vector<2x32xf32>
    %173 = arith.addf %172, %44 : vector<2x32xf32>
    %cst_75 = arith.constant dense<0.000000e+00> : vector<2x32xf32>
    %174 = tpu.matmul %8, %24, %cst_75 {dimension_numbers = #tpu.dot_dimension_numbers<[1], [0], [0], [1], [0, 0, 1, 1], [], []>} : vector<2x4xf32>, vector<4x32xf32>, vector<2x32xf32> -> vector<2x32xf32>
    %cst_76 = arith.constant dense<0.000000e+00> : vector<2x32xf32>
    %175 = tpu.matmul %161, %32, %cst_76 {dimension_numbers = #tpu.dot_dimension_numbers<[1], [0], [0], [1], [0, 0, 1, 1], [], []>} : vector<2x32xf32>, vector<32x32xf32>, vector<2x32xf32> -> vector<2x32xf32>
    %176 = arith.addf %174, %175 : vector<2x32xf32>
    %177 = arith.addf %176, %48 : vector<2x32xf32>
    %178 = arith.negf %165 : vector<2x32xf32>
    %179 = math.exp %178 : vector<2x32xf32>
    %cst_77 = arith.constant 1.000000e+00 : f32
    %180 = vector.broadcast %cst_77 : f32 to vector<2x32xf32>
    %181 = arith.addf %180, %179 : vector<2x32xf32>
    %182 = arith.divf %180, %181 : vector<2x32xf32>
    %183 = arith.negf %169 : vector<2x32xf32>
    %184 = math.exp %183 : vector<2x32xf32>
    %cst_78 = arith.constant 1.000000e+00 : f32
    %185 = vector.broadcast %cst_78 : f32 to vector<2x32xf32>
    %186 = arith.addf %185, %184 : vector<2x32xf32>
    %187 = arith.divf %185, %186 : vector<2x32xf32>
    %188 = math.tanh %173 : vector<2x32xf32>
    %189 = arith.negf %177 : vector<2x32xf32>
    %190 = math.exp %189 : vector<2x32xf32>
    %cst_79 = arith.constant 1.000000e+00 : f32
    %191 = vector.broadcast %cst_79 : f32 to vector<2x32xf32>
    %192 = arith.addf %191, %190 : vector<2x32xf32>
    %193 = arith.divf %191, %192 : vector<2x32xf32>
    %194 = arith.mulf %187, %159 : vector<2x32xf32>
    %195 = arith.mulf %182, %188 : vector<2x32xf32>
    %196 = arith.addf %194, %195 : vector<2x32xf32>
    %197 = math.tanh %196 : vector<2x32xf32>
    %198 = arith.mulf %193, %197 : vector<2x32xf32>
    %cst_80 = arith.constant dense<0.000000e+00> : vector<2x32xf32>
    %199 = tpu.matmul %10, %18, %cst_80 {dimension_numbers = #tpu.dot_dimension_numbers<[1], [0], [0], [1], [0, 0, 1, 1], [], []>} : vector<2x4xf32>, vector<4x32xf32>, vector<2x32xf32> -> vector<2x32xf32>
    %cst_81 = arith.constant dense<0.000000e+00> : vector<2x32xf32>
    %200 = tpu.matmul %198, %26, %cst_81 {dimension_numbers = #tpu.dot_dimension_numbers<[1], [0], [0], [1], [0, 0, 1, 1], [], []>} : vector<2x32xf32>, vector<32x32xf32>, vector<2x32xf32> -> vector<2x32xf32>
    %201 = arith.addf %199, %200 : vector<2x32xf32>
    %202 = arith.addf %201, %36 : vector<2x32xf32>
    %cst_82 = arith.constant dense<0.000000e+00> : vector<2x32xf32>
    %203 = tpu.matmul %10, %20, %cst_82 {dimension_numbers = #tpu.dot_dimension_numbers<[1], [0], [0], [1], [0, 0, 1, 1], [], []>} : vector<2x4xf32>, vector<4x32xf32>, vector<2x32xf32> -> vector<2x32xf32>
    %cst_83 = arith.constant dense<0.000000e+00> : vector<2x32xf32>
    %204 = tpu.matmul %198, %28, %cst_83 {dimension_numbers = #tpu.dot_dimension_numbers<[1], [0], [0], [1], [0, 0, 1, 1], [], []>} : vector<2x32xf32>, vector<32x32xf32>, vector<2x32xf32> -> vector<2x32xf32>
    %205 = arith.addf %203, %204 : vector<2x32xf32>
    %206 = arith.addf %205, %40 : vector<2x32xf32>
    %cst_84 = arith.constant dense<0.000000e+00> : vector<2x32xf32>
    %207 = tpu.matmul %10, %22, %cst_84 {dimension_numbers = #tpu.dot_dimension_numbers<[1], [0], [0], [1], [0, 0, 1, 1], [], []>} : vector<2x4xf32>, vector<4x32xf32>, vector<2x32xf32> -> vector<2x32xf32>
    %cst_85 = arith.constant dense<0.000000e+00> : vector<2x32xf32>
    %208 = tpu.matmul %198, %30, %cst_85 {dimension_numbers = #tpu.dot_dimension_numbers<[1], [0], [0], [1], [0, 0, 1, 1], [], []>} : vector<2x32xf32>, vector<32x32xf32>, vector<2x32xf32> -> vector<2x32xf32>
    %209 = arith.addf %207, %208 : vector<2x32xf32>
    %210 = arith.addf %209, %44 : vector<2x32xf32>
    %cst_86 = arith.constant dense<0.000000e+00> : vector<2x32xf32>
    %211 = tpu.matmul %10, %24, %cst_86 {dimension_numbers = #tpu.dot_dimension_numbers<[1], [0], [0], [1], [0, 0, 1, 1], [], []>} : vector<2x4xf32>, vector<4x32xf32>, vector<2x32xf32> -> vector<2x32xf32>
    %cst_87 = arith.constant dense<0.000000e+00> : vector<2x32xf32>
    %212 = tpu.matmul %198, %32, %cst_87 {dimension_numbers = #tpu.dot_dimension_numbers<[1], [0], [0], [1], [0, 0, 1, 1], [], []>} : vector<2x32xf32>, vector<32x32xf32>, vector<2x32xf32> -> vector<2x32xf32>
    %213 = arith.addf %211, %212 : vector<2x32xf32>
    %214 = arith.addf %213, %48 : vector<2x32xf32>
    %215 = arith.negf %202 : vector<2x32xf32>
    %216 = math.exp %215 : vector<2x32xf32>
    %cst_88 = arith.constant 1.000000e+00 : f32
    %217 = vector.broadcast %cst_88 : f32 to vector<2x32xf32>
    %218 = arith.addf %217, %216 : vector<2x32xf32>
    %219 = arith.divf %217, %218 : vector<2x32xf32>
    %220 = arith.negf %206 : vector<2x32xf32>
    %221 = math.exp %220 : vector<2x32xf32>
    %cst_89 = arith.constant 1.000000e+00 : f32
    %222 = vector.broadcast %cst_89 : f32 to vector<2x32xf32>
    %223 = arith.addf %222, %221 : vector<2x32xf32>
    %224 = arith.divf %222, %223 : vector<2x32xf32>
    %225 = math.tanh %210 : vector<2x32xf32>
    %226 = arith.negf %214 : vector<2x32xf32>
    %227 = math.exp %226 : vector<2x32xf32>
    %cst_90 = arith.constant 1.000000e+00 : f32
    %228 = vector.broadcast %cst_90 : f32 to vector<2x32xf32>
    %229 = arith.addf %228, %227 : vector<2x32xf32>
    %230 = arith.divf %228, %229 : vector<2x32xf32>
    %231 = arith.mulf %224, %196 : vector<2x32xf32>
    %232 = arith.mulf %219, %225 : vector<2x32xf32>
    %233 = arith.addf %231, %232 : vector<2x32xf32>
    %234 = math.tanh %233 : vector<2x32xf32>
    %235 = arith.mulf %230, %234 : vector<2x32xf32>
    %cst_91 = arith.constant dense<0.000000e+00> : vector<2x32xf32>
    %236 = tpu.matmul %12, %18, %cst_91 {dimension_numbers = #tpu.dot_dimension_numbers<[1], [0], [0], [1], [0, 0, 1, 1], [], []>} : vector<2x4xf32>, vector<4x32xf32>, vector<2x32xf32> -> vector<2x32xf32>
    %cst_92 = arith.constant dense<0.000000e+00> : vector<2x32xf32>
    %237 = tpu.matmul %235, %26, %cst_92 {dimension_numbers = #tpu.dot_dimension_numbers<[1], [0], [0], [1], [0, 0, 1, 1], [], []>} : vector<2x32xf32>, vector<32x32xf32>, vector<2x32xf32> -> vector<2x32xf32>
    %238 = arith.addf %236, %237 : vector<2x32xf32>
    %239 = arith.addf %238, %36 : vector<2x32xf32>
    %cst_93 = arith.constant dense<0.000000e+00> : vector<2x32xf32>
    %240 = tpu.matmul %12, %20, %cst_93 {dimension_numbers = #tpu.dot_dimension_numbers<[1], [0], [0], [1], [0, 0, 1, 1], [], []>} : vector<2x4xf32>, vector<4x32xf32>, vector<2x32xf32> -> vector<2x32xf32>
    %cst_94 = arith.constant dense<0.000000e+00> : vector<2x32xf32>
    %241 = tpu.matmul %235, %28, %cst_94 {dimension_numbers = #tpu.dot_dimension_numbers<[1], [0], [0], [1], [0, 0, 1, 1], [], []>} : vector<2x32xf32>, vector<32x32xf32>, vector<2x32xf32> -> vector<2x32xf32>
    %242 = arith.addf %240, %241 : vector<2x32xf32>
    %243 = arith.addf %242, %40 : vector<2x32xf32>
    %cst_95 = arith.constant dense<0.000000e+00> : vector<2x32xf32>
    %244 = tpu.matmul %12, %22, %cst_95 {dimension_numbers = #tpu.dot_dimension_numbers<[1], [0], [0], [1], [0, 0, 1, 1], [], []>} : vector<2x4xf32>, vector<4x32xf32>, vector<2x32xf32> -> vector<2x32xf32>
    %cst_96 = arith.constant dense<0.000000e+00> : vector<2x32xf32>
    %245 = tpu.matmul %235, %30, %cst_96 {dimension_numbers = #tpu.dot_dimension_numbers<[1], [0], [0], [1], [0, 0, 1, 1], [], []>} : vector<2x32xf32>, vector<32x32xf32>, vector<2x32xf32> -> vector<2x32xf32>
    %246 = arith.addf %244, %245 : vector<2x32xf32>
    %247 = arith.addf %246, %44 : vector<2x32xf32>
    %cst_97 = arith.constant dense<0.000000e+00> : vector<2x32xf32>
    %248 = tpu.matmul %12, %24, %cst_97 {dimension_numbers = #tpu.dot_dimension_numbers<[1], [0], [0], [1], [0, 0, 1, 1], [], []>} : vector<2x4xf32>, vector<4x32xf32>, vector<2x32xf32> -> vector<2x32xf32>
    %cst_98 = arith.constant dense<0.000000e+00> : vector<2x32xf32>
    %249 = tpu.matmul %235, %32, %cst_98 {dimension_numbers = #tpu.dot_dimension_numbers<[1], [0], [0], [1], [0, 0, 1, 1], [], []>} : vector<2x32xf32>, vector<32x32xf32>, vector<2x32xf32> -> vector<2x32xf32>
    %250 = arith.addf %248, %249 : vector<2x32xf32>
    %251 = arith.addf %250, %48 : vector<2x32xf32>
    %252 = arith.negf %239 : vector<2x32xf32>
    %253 = math.exp %252 : vector<2x32xf32>
    %cst_99 = arith.constant 1.000000e+00 : f32
    %254 = vector.broadcast %cst_99 : f32 to vector<2x32xf32>
    %255 = arith.addf %254, %253 : vector<2x32xf32>
    %256 = arith.divf %254, %255 : vector<2x32xf32>
    %257 = arith.negf %243 : vector<2x32xf32>
    %258 = math.exp %257 : vector<2x32xf32>
    %cst_100 = arith.constant 1.000000e+00 : f32
    %259 = vector.broadcast %cst_100 : f32 to vector<2x32xf32>
    %260 = arith.addf %259, %258 : vector<2x32xf32>
    %261 = arith.divf %259, %260 : vector<2x32xf32>
    %262 = math.tanh %247 : vector<2x32xf32>
    %263 = arith.negf %251 : vector<2x32xf32>
    %264 = math.exp %263 : vector<2x32xf32>
    %cst_101 = arith.constant 1.000000e+00 : f32
    %265 = vector.broadcast %cst_101 : f32 to vector<2x32xf32>
    %266 = arith.addf %265, %264 : vector<2x32xf32>
    %267 = arith.divf %265, %266 : vector<2x32xf32>
    %268 = arith.mulf %261, %233 : vector<2x32xf32>
    %269 = arith.mulf %256, %262 : vector<2x32xf32>
    %270 = arith.addf %268, %269 : vector<2x32xf32>
    %271 = math.tanh %270 : vector<2x32xf32>
    %272 = arith.mulf %267, %271 : vector<2x32xf32>
    %cst_102 = arith.constant dense<0.000000e+00> : vector<2x32xf32>
    %273 = tpu.matmul %14, %18, %cst_102 {dimension_numbers = #tpu.dot_dimension_numbers<[1], [0], [0], [1], [0, 0, 1, 1], [], []>} : vector<2x4xf32>, vector<4x32xf32>, vector<2x32xf32> -> vector<2x32xf32>
    %cst_103 = arith.constant dense<0.000000e+00> : vector<2x32xf32>
    %274 = tpu.matmul %272, %26, %cst_103 {dimension_numbers = #tpu.dot_dimension_numbers<[1], [0], [0], [1], [0, 0, 1, 1], [], []>} : vector<2x32xf32>, vector<32x32xf32>, vector<2x32xf32> -> vector<2x32xf32>
    %275 = arith.addf %273, %274 : vector<2x32xf32>
    %276 = arith.addf %275, %36 : vector<2x32xf32>
    %cst_104 = arith.constant dense<0.000000e+00> : vector<2x32xf32>
    %277 = tpu.matmul %14, %20, %cst_104 {dimension_numbers = #tpu.dot_dimension_numbers<[1], [0], [0], [1], [0, 0, 1, 1], [], []>} : vector<2x4xf32>, vector<4x32xf32>, vector<2x32xf32> -> vector<2x32xf32>
    %cst_105 = arith.constant dense<0.000000e+00> : vector<2x32xf32>
    %278 = tpu.matmul %272, %28, %cst_105 {dimension_numbers = #tpu.dot_dimension_numbers<[1], [0], [0], [1], [0, 0, 1, 1], [], []>} : vector<2x32xf32>, vector<32x32xf32>, vector<2x32xf32> -> vector<2x32xf32>
    %279 = arith.addf %277, %278 : vector<2x32xf32>
    %280 = arith.addf %279, %40 : vector<2x32xf32>
    %cst_106 = arith.constant dense<0.000000e+00> : vector<2x32xf32>
    %281 = tpu.matmul %14, %22, %cst_106 {dimension_numbers = #tpu.dot_dimension_numbers<[1], [0], [0], [1], [0, 0, 1, 1], [], []>} : vector<2x4xf32>, vector<4x32xf32>, vector<2x32xf32> -> vector<2x32xf32>
    %cst_107 = arith.constant dense<0.000000e+00> : vector<2x32xf32>
    %282 = tpu.matmul %272, %30, %cst_107 {dimension_numbers = #tpu.dot_dimension_numbers<[1], [0], [0], [1], [0, 0, 1, 1], [], []>} : vector<2x32xf32>, vector<32x32xf32>, vector<2x32xf32> -> vector<2x32xf32>
    %283 = arith.addf %281, %282 : vector<2x32xf32>
    %284 = arith.addf %283, %44 : vector<2x32xf32>
    %cst_108 = arith.constant dense<0.000000e+00> : vector<2x32xf32>
    %285 = tpu.matmul %14, %24, %cst_108 {dimension_numbers = #tpu.dot_dimension_numbers<[1], [0], [0], [1], [0, 0, 1, 1], [], []>} : vector<2x4xf32>, vector<4x32xf32>, vector<2x32xf32> -> vector<2x32xf32>
    %cst_109 = arith.constant dense<0.000000e+00> : vector<2x32xf32>
    %286 = tpu.matmul %272, %32, %cst_109 {dimension_numbers = #tpu.dot_dimension_numbers<[1], [0], [0], [1], [0, 0, 1, 1], [], []>} : vector<2x32xf32>, vector<32x32xf32>, vector<2x32xf32> -> vector<2x32xf32>
    %287 = arith.addf %285, %286 : vector<2x32xf32>
    %288 = arith.addf %287, %48 : vector<2x32xf32>
    %289 = arith.negf %276 : vector<2x32xf32>
    %290 = math.exp %289 : vector<2x32xf32>
    %cst_110 = arith.constant 1.000000e+00 : f32
    %291 = vector.broadcast %cst_110 : f32 to vector<2x32xf32>
    %292 = arith.addf %291, %290 : vector<2x32xf32>
    %293 = arith.divf %291, %292 : vector<2x32xf32>
    %294 = arith.negf %280 : vector<2x32xf32>
    %295 = math.exp %294 : vector<2x32xf32>
    %cst_111 = arith.constant 1.000000e+00 : f32
    %296 = vector.broadcast %cst_111 : f32 to vector<2x32xf32>
    %297 = arith.addf %296, %295 : vector<2x32xf32>
    %298 = arith.divf %296, %297 : vector<2x32xf32>
    %299 = math.tanh %284 : vector<2x32xf32>
    %300 = arith.negf %288 : vector<2x32xf32>
    %301 = math.exp %300 : vector<2x32xf32>
    %cst_112 = arith.constant 1.000000e+00 : f32
    %302 = vector.broadcast %cst_112 : f32 to vector<2x32xf32>
    %303 = arith.addf %302, %301 : vector<2x32xf32>
    %304 = arith.divf %302, %303 : vector<2x32xf32>
    %305 = arith.mulf %298, %270 : vector<2x32xf32>
    %306 = arith.mulf %293, %299 : vector<2x32xf32>
    %307 = arith.addf %305, %306 : vector<2x32xf32>
    %308 = math.tanh %307 : vector<2x32xf32>
    %309 = arith.mulf %304, %308 : vector<2x32xf32>
    %cst_113 = arith.constant dense<0.000000e+00> : vector<2x32xf32>
    %310 = tpu.matmul %16, %18, %cst_113 {dimension_numbers = #tpu.dot_dimension_numbers<[1], [0], [0], [1], [0, 0, 1, 1], [], []>} : vector<2x4xf32>, vector<4x32xf32>, vector<2x32xf32> -> vector<2x32xf32>
    %cst_114 = arith.constant dense<0.000000e+00> : vector<2x32xf32>
    %311 = tpu.matmul %309, %26, %cst_114 {dimension_numbers = #tpu.dot_dimension_numbers<[1], [0], [0], [1], [0, 0, 1, 1], [], []>} : vector<2x32xf32>, vector<32x32xf32>, vector<2x32xf32> -> vector<2x32xf32>
    %312 = arith.addf %310, %311 : vector<2x32xf32>
    %313 = arith.addf %312, %36 : vector<2x32xf32>
    %cst_115 = arith.constant dense<0.000000e+00> : vector<2x32xf32>
    %314 = tpu.matmul %16, %20, %cst_115 {dimension_numbers = #tpu.dot_dimension_numbers<[1], [0], [0], [1], [0, 0, 1, 1], [], []>} : vector<2x4xf32>, vector<4x32xf32>, vector<2x32xf32> -> vector<2x32xf32>
    %cst_116 = arith.constant dense<0.000000e+00> : vector<2x32xf32>
    %315 = tpu.matmul %309, %28, %cst_116 {dimension_numbers = #tpu.dot_dimension_numbers<[1], [0], [0], [1], [0, 0, 1, 1], [], []>} : vector<2x32xf32>, vector<32x32xf32>, vector<2x32xf32> -> vector<2x32xf32>
    %316 = arith.addf %314, %315 : vector<2x32xf32>
    %317 = arith.addf %316, %40 : vector<2x32xf32>
    %cst_117 = arith.constant dense<0.000000e+00> : vector<2x32xf32>
    %318 = tpu.matmul %16, %22, %cst_117 {dimension_numbers = #tpu.dot_dimension_numbers<[1], [0], [0], [1], [0, 0, 1, 1], [], []>} : vector<2x4xf32>, vector<4x32xf32>, vector<2x32xf32> -> vector<2x32xf32>
    %cst_118 = arith.constant dense<0.000000e+00> : vector<2x32xf32>
    %319 = tpu.matmul %309, %30, %cst_118 {dimension_numbers = #tpu.dot_dimension_numbers<[1], [0], [0], [1], [0, 0, 1, 1], [], []>} : vector<2x32xf32>, vector<32x32xf32>, vector<2x32xf32> -> vector<2x32xf32>
    %320 = arith.addf %318, %319 : vector<2x32xf32>
    %321 = arith.addf %320, %44 : vector<2x32xf32>
    %cst_119 = arith.constant dense<0.000000e+00> : vector<2x32xf32>
    %322 = tpu.matmul %16, %24, %cst_119 {dimension_numbers = #tpu.dot_dimension_numbers<[1], [0], [0], [1], [0, 0, 1, 1], [], []>} : vector<2x4xf32>, vector<4x32xf32>, vector<2x32xf32> -> vector<2x32xf32>
    %cst_120 = arith.constant dense<0.000000e+00> : vector<2x32xf32>
    %323 = tpu.matmul %309, %32, %cst_120 {dimension_numbers = #tpu.dot_dimension_numbers<[1], [0], [0], [1], [0, 0, 1, 1], [], []>} : vector<2x32xf32>, vector<32x32xf32>, vector<2x32xf32> -> vector<2x32xf32>
    %324 = arith.addf %322, %323 : vector<2x32xf32>
    %325 = arith.addf %324, %48 : vector<2x32xf32>
    %326 = arith.negf %313 : vector<2x32xf32>
    %327 = math.exp %326 : vector<2x32xf32>
    %cst_121 = arith.constant 1.000000e+00 : f32
    %328 = vector.broadcast %cst_121 : f32 to vector<2x32xf32>
    %329 = arith.addf %328, %327 : vector<2x32xf32>
    %330 = arith.divf %328, %329 : vector<2x32xf32>
    %331 = arith.negf %317 : vector<2x32xf32>
    %332 = math.exp %331 : vector<2x32xf32>
    %cst_122 = arith.constant 1.000000e+00 : f32
    %333 = vector.broadcast %cst_122 : f32 to vector<2x32xf32>
    %334 = arith.addf %333, %332 : vector<2x32xf32>
    %335 = arith.divf %333, %334 : vector<2x32xf32>
    %336 = math.tanh %321 : vector<2x32xf32>
    %337 = arith.negf %325 : vector<2x32xf32>
    %338 = math.exp %337 : vector<2x32xf32>
    %cst_123 = arith.constant 1.000000e+00 : f32
    %339 = vector.broadcast %cst_123 : f32 to vector<2x32xf32>
    %340 = arith.addf %339, %338 : vector<2x32xf32>
    %341 = arith.divf %339, %340 : vector<2x32xf32>
    %342 = arith.mulf %335, %307 : vector<2x32xf32>
    %343 = arith.mulf %330, %336 : vector<2x32xf32>
    %344 = arith.addf %342, %343 : vector<2x32xf32>
    %345 = math.tanh %344 : vector<2x32xf32>
    %346 = arith.mulf %341, %345 : vector<2x32xf32>
    %c0_124 = arith.constant 0 : index
    %c0_125 = arith.constant 0 : index
    %c0_126 = arith.constant 0 : index
    %347 = vector.load %arg4[%c0_124, %c0_125, %c0_126] : memref<4x32x32xf32, #tpu.memory_space<vmem>>, vector<1x32x32xf32>
    %348 = vector.shape_cast %347 : vector<1x32x32xf32> to vector<32x32xf32>
    %c1_127 = arith.constant 1 : index
    %c0_128 = arith.constant 0 : index
    %c0_129 = arith.constant 0 : index
    %349 = vector.load %arg4[%c1_127, %c0_128, %c0_129] : memref<4x32x32xf32, #tpu.memory_space<vmem>>, vector<1x32x32xf32>
    %350 = vector.shape_cast %349 : vector<1x32x32xf32> to vector<32x32xf32>
    %c2_130 = arith.constant 2 : index
    %c0_131 = arith.constant 0 : index
    %c0_132 = arith.constant 0 : index
    %351 = vector.load %arg4[%c2_130, %c0_131, %c0_132] : memref<4x32x32xf32, #tpu.memory_space<vmem>>, vector<1x32x32xf32>
    %352 = vector.shape_cast %351 : vector<1x32x32xf32> to vector<32x32xf32>
    %c3_133 = arith.constant 3 : index
    %c0_134 = arith.constant 0 : index
    %c0_135 = arith.constant 0 : index
    %353 = vector.load %arg4[%c3_133, %c0_134, %c0_135] : memref<4x32x32xf32, #tpu.memory_space<vmem>>, vector<1x32x32xf32>
    %354 = vector.shape_cast %353 : vector<1x32x32xf32> to vector<32x32xf32>
    %c0_136 = arith.constant 0 : index
    %c0_137 = arith.constant 0 : index
    %c0_138 = arith.constant 0 : index
    %355 = vector.load %arg5[%c0_136, %c0_137, %c0_138] : memref<4x32x32xf32, #tpu.memory_space<vmem>>, vector<1x32x32xf32>
    %356 = vector.shape_cast %355 : vector<1x32x32xf32> to vector<32x32xf32>
    %c1_139 = arith.constant 1 : index
    %c0_140 = arith.constant 0 : index
    %c0_141 = arith.constant 0 : index
    %357 = vector.load %arg5[%c1_139, %c0_140, %c0_141] : memref<4x32x32xf32, #tpu.memory_space<vmem>>, vector<1x32x32xf32>
    %358 = vector.shape_cast %357 : vector<1x32x32xf32> to vector<32x32xf32>
    %c2_142 = arith.constant 2 : index
    %c0_143 = arith.constant 0 : index
    %c0_144 = arith.constant 0 : index
    %359 = vector.load %arg5[%c2_142, %c0_143, %c0_144] : memref<4x32x32xf32, #tpu.memory_space<vmem>>, vector<1x32x32xf32>
    %360 = vector.shape_cast %359 : vector<1x32x32xf32> to vector<32x32xf32>
    %c3_145 = arith.constant 3 : index
    %c0_146 = arith.constant 0 : index
    %c0_147 = arith.constant 0 : index
    %361 = vector.load %arg5[%c3_145, %c0_146, %c0_147] : memref<4x32x32xf32, #tpu.memory_space<vmem>>, vector<1x32x32xf32>
    %362 = vector.shape_cast %361 : vector<1x32x32xf32> to vector<32x32xf32>
    %c0_148 = arith.constant 0 : index
    %c0_149 = arith.constant 0 : index
    %c0_150 = arith.constant 0 : index
    %363 = vector.load %arg6[%c0_148, %c0_149, %c0_150] : memref<4x1x32xf32, #tpu.memory_space<vmem>>, vector<1x1x32xf32>
    %364 = vector.shape_cast %363 : vector<1x1x32xf32> to vector<1x32xf32>
    %365 = vector.shape_cast %364 : vector<1x32xf32> to vector<1x32xf32>
    %366 = vector.broadcast %365 : vector<1x32xf32> to vector<2x32xf32>
    %c1_151 = arith.constant 1 : index
    %c0_152 = arith.constant 0 : index
    %c0_153 = arith.constant 0 : index
    %367 = vector.load %arg6[%c1_151, %c0_152, %c0_153] : memref<4x1x32xf32, #tpu.memory_space<vmem>>, vector<1x1x32xf32>
    %368 = vector.shape_cast %367 : vector<1x1x32xf32> to vector<1x32xf32>
    %369 = vector.shape_cast %368 : vector<1x32xf32> to vector<1x32xf32>
    %370 = vector.broadcast %369 : vector<1x32xf32> to vector<2x32xf32>
    %c2_154 = arith.constant 2 : index
    %c0_155 = arith.constant 0 : index
    %c0_156 = arith.constant 0 : index
    %371 = vector.load %arg6[%c2_154, %c0_155, %c0_156] : memref<4x1x32xf32, #tpu.memory_space<vmem>>, vector<1x1x32xf32>
    %372 = vector.shape_cast %371 : vector<1x1x32xf32> to vector<1x32xf32>
    %373 = vector.shape_cast %372 : vector<1x32xf32> to vector<1x32xf32>
    %374 = vector.broadcast %373 : vector<1x32xf32> to vector<2x32xf32>
    %c3_157 = arith.constant 3 : index
    %c0_158 = arith.constant 0 : index
    %c0_159 = arith.constant 0 : index
    %375 = vector.load %arg6[%c3_157, %c0_158, %c0_159] : memref<4x1x32xf32, #tpu.memory_space<vmem>>, vector<1x1x32xf32>
    %376 = vector.shape_cast %375 : vector<1x1x32xf32> to vector<1x32xf32>
    %377 = vector.shape_cast %376 : vector<1x32xf32> to vector<1x32xf32>
    %378 = vector.broadcast %377 : vector<1x32xf32> to vector<2x32xf32>
    %cst_160 = arith.constant 0.000000e+00 : f32
    %379 = vector.broadcast %cst_160 : f32 to vector<2x32xf32>
    %cst_161 = arith.constant 0.000000e+00 : f32
    %380 = vector.broadcast %cst_161 : f32 to vector<2x32xf32>
    %cst_162 = arith.constant dense<0.000000e+00> : vector<2x32xf32>
    %381 = tpu.matmul %87, %348, %cst_162 {dimension_numbers = #tpu.dot_dimension_numbers<[1], [0], [0], [1], [0, 0, 1, 1], [], []>} : vector<2x32xf32>, vector<32x32xf32>, vector<2x32xf32> -> vector<2x32xf32>
    %cst_163 = arith.constant dense<0.000000e+00> : vector<2x32xf32>
    %382 = tpu.matmul %379, %356, %cst_163 {dimension_numbers = #tpu.dot_dimension_numbers<[1], [0], [0], [1], [0, 0, 1, 1], [], []>} : vector<2x32xf32>, vector<32x32xf32>, vector<2x32xf32> -> vector<2x32xf32>
    %383 = arith.addf %381, %382 : vector<2x32xf32>
    %384 = arith.addf %383, %366 : vector<2x32xf32>
    %cst_164 = arith.constant dense<0.000000e+00> : vector<2x32xf32>
    %385 = tpu.matmul %87, %350, %cst_164 {dimension_numbers = #tpu.dot_dimension_numbers<[1], [0], [0], [1], [0, 0, 1, 1], [], []>} : vector<2x32xf32>, vector<32x32xf32>, vector<2x32xf32> -> vector<2x32xf32>
    %cst_165 = arith.constant dense<0.000000e+00> : vector<2x32xf32>
    %386 = tpu.matmul %379, %358, %cst_165 {dimension_numbers = #tpu.dot_dimension_numbers<[1], [0], [0], [1], [0, 0, 1, 1], [], []>} : vector<2x32xf32>, vector<32x32xf32>, vector<2x32xf32> -> vector<2x32xf32>
    %387 = arith.addf %385, %386 : vector<2x32xf32>
    %388 = arith.addf %387, %370 : vector<2x32xf32>
    %cst_166 = arith.constant dense<0.000000e+00> : vector<2x32xf32>
    %389 = tpu.matmul %87, %352, %cst_166 {dimension_numbers = #tpu.dot_dimension_numbers<[1], [0], [0], [1], [0, 0, 1, 1], [], []>} : vector<2x32xf32>, vector<32x32xf32>, vector<2x32xf32> -> vector<2x32xf32>
    %cst_167 = arith.constant dense<0.000000e+00> : vector<2x32xf32>
    %390 = tpu.matmul %379, %360, %cst_167 {dimension_numbers = #tpu.dot_dimension_numbers<[1], [0], [0], [1], [0, 0, 1, 1], [], []>} : vector<2x32xf32>, vector<32x32xf32>, vector<2x32xf32> -> vector<2x32xf32>
    %391 = arith.addf %389, %390 : vector<2x32xf32>
    %392 = arith.addf %391, %374 : vector<2x32xf32>
    %cst_168 = arith.constant dense<0.000000e+00> : vector<2x32xf32>
    %393 = tpu.matmul %87, %354, %cst_168 {dimension_numbers = #tpu.dot_dimension_numbers<[1], [0], [0], [1], [0, 0, 1, 1], [], []>} : vector<2x32xf32>, vector<32x32xf32>, vector<2x32xf32> -> vector<2x32xf32>
    %cst_169 = arith.constant dense<0.000000e+00> : vector<2x32xf32>
    %394 = tpu.matmul %379, %362, %cst_169 {dimension_numbers = #tpu.dot_dimension_numbers<[1], [0], [0], [1], [0, 0, 1, 1], [], []>} : vector<2x32xf32>, vector<32x32xf32>, vector<2x32xf32> -> vector<2x32xf32>
    %395 = arith.addf %393, %394 : vector<2x32xf32>
    %396 = arith.addf %395, %378 : vector<2x32xf32>
    %397 = arith.negf %384 : vector<2x32xf32>
    %398 = math.exp %397 : vector<2x32xf32>
    %cst_170 = arith.constant 1.000000e+00 : f32
    %399 = vector.broadcast %cst_170 : f32 to vector<2x32xf32>
    %400 = arith.addf %399, %398 : vector<2x32xf32>
    %401 = arith.divf %399, %400 : vector<2x32xf32>
    %402 = arith.negf %388 : vector<2x32xf32>
    %403 = math.exp %402 : vector<2x32xf32>
    %cst_171 = arith.constant 1.000000e+00 : f32
    %404 = vector.broadcast %cst_171 : f32 to vector<2x32xf32>
    %405 = arith.addf %404, %403 : vector<2x32xf32>
    %406 = arith.divf %404, %405 : vector<2x32xf32>
    %407 = math.tanh %392 : vector<2x32xf32>
    %408 = arith.negf %396 : vector<2x32xf32>
    %409 = math.exp %408 : vector<2x32xf32>
    %cst_172 = arith.constant 1.000000e+00 : f32
    %410 = vector.broadcast %cst_172 : f32 to vector<2x32xf32>
    %411 = arith.addf %410, %409 : vector<2x32xf32>
    %412 = arith.divf %410, %411 : vector<2x32xf32>
    %413 = arith.mulf %406, %380 : vector<2x32xf32>
    %414 = arith.mulf %401, %407 : vector<2x32xf32>
    %415 = arith.addf %413, %414 : vector<2x32xf32>
    %416 = math.tanh %415 : vector<2x32xf32>
    %417 = arith.mulf %412, %416 : vector<2x32xf32>
    %cst_173 = arith.constant dense<0.000000e+00> : vector<2x32xf32>
    %418 = tpu.matmul %124, %348, %cst_173 {dimension_numbers = #tpu.dot_dimension_numbers<[1], [0], [0], [1], [0, 0, 1, 1], [], []>} : vector<2x32xf32>, vector<32x32xf32>, vector<2x32xf32> -> vector<2x32xf32>
    %cst_174 = arith.constant dense<0.000000e+00> : vector<2x32xf32>
    %419 = tpu.matmul %417, %356, %cst_174 {dimension_numbers = #tpu.dot_dimension_numbers<[1], [0], [0], [1], [0, 0, 1, 1], [], []>} : vector<2x32xf32>, vector<32x32xf32>, vector<2x32xf32> -> vector<2x32xf32>
    %420 = arith.addf %418, %419 : vector<2x32xf32>
    %421 = arith.addf %420, %366 : vector<2x32xf32>
    %cst_175 = arith.constant dense<0.000000e+00> : vector<2x32xf32>
    %422 = tpu.matmul %124, %350, %cst_175 {dimension_numbers = #tpu.dot_dimension_numbers<[1], [0], [0], [1], [0, 0, 1, 1], [], []>} : vector<2x32xf32>, vector<32x32xf32>, vector<2x32xf32> -> vector<2x32xf32>
    %cst_176 = arith.constant dense<0.000000e+00> : vector<2x32xf32>
    %423 = tpu.matmul %417, %358, %cst_176 {dimension_numbers = #tpu.dot_dimension_numbers<[1], [0], [0], [1], [0, 0, 1, 1], [], []>} : vector<2x32xf32>, vector<32x32xf32>, vector<2x32xf32> -> vector<2x32xf32>
    %424 = arith.addf %422, %423 : vector<2x32xf32>
    %425 = arith.addf %424, %370 : vector<2x32xf32>
    %cst_177 = arith.constant dense<0.000000e+00> : vector<2x32xf32>
    %426 = tpu.matmul %124, %352, %cst_177 {dimension_numbers = #tpu.dot_dimension_numbers<[1], [0], [0], [1], [0, 0, 1, 1], [], []>} : vector<2x32xf32>, vector<32x32xf32>, vector<2x32xf32> -> vector<2x32xf32>
    %cst_178 = arith.constant dense<0.000000e+00> : vector<2x32xf32>
    %427 = tpu.matmul %417, %360, %cst_178 {dimension_numbers = #tpu.dot_dimension_numbers<[1], [0], [0], [1], [0, 0, 1, 1], [], []>} : vector<2x32xf32>, vector<32x32xf32>, vector<2x32xf32> -> vector<2x32xf32>
    %428 = arith.addf %426, %427 : vector<2x32xf32>
    %429 = arith.addf %428, %374 : vector<2x32xf32>
    %cst_179 = arith.constant dense<0.000000e+00> : vector<2x32xf32>
    %430 = tpu.matmul %124, %354, %cst_179 {dimension_numbers = #tpu.dot_dimension_numbers<[1], [0], [0], [1], [0, 0, 1, 1], [], []>} : vector<2x32xf32>, vector<32x32xf32>, vector<2x32xf32> -> vector<2x32xf32>
    %cst_180 = arith.constant dense<0.000000e+00> : vector<2x32xf32>
    %431 = tpu.matmul %417, %362, %cst_180 {dimension_numbers = #tpu.dot_dimension_numbers<[1], [0], [0], [1], [0, 0, 1, 1], [], []>} : vector<2x32xf32>, vector<32x32xf32>, vector<2x32xf32> -> vector<2x32xf32>
    %432 = arith.addf %430, %431 : vector<2x32xf32>
    %433 = arith.addf %432, %378 : vector<2x32xf32>
    %434 = arith.negf %421 : vector<2x32xf32>
    %435 = math.exp %434 : vector<2x32xf32>
    %cst_181 = arith.constant 1.000000e+00 : f32
    %436 = vector.broadcast %cst_181 : f32 to vector<2x32xf32>
    %437 = arith.addf %436, %435 : vector<2x32xf32>
    %438 = arith.divf %436, %437 : vector<2x32xf32>
    %439 = arith.negf %425 : vector<2x32xf32>
    %440 = math.exp %439 : vector<2x32xf32>
    %cst_182 = arith.constant 1.000000e+00 : f32
    %441 = vector.broadcast %cst_182 : f32 to vector<2x32xf32>
    %442 = arith.addf %441, %440 : vector<2x32xf32>
    %443 = arith.divf %441, %442 : vector<2x32xf32>
    %444 = math.tanh %429 : vector<2x32xf32>
    %445 = arith.negf %433 : vector<2x32xf32>
    %446 = math.exp %445 : vector<2x32xf32>
    %cst_183 = arith.constant 1.000000e+00 : f32
    %447 = vector.broadcast %cst_183 : f32 to vector<2x32xf32>
    %448 = arith.addf %447, %446 : vector<2x32xf32>
    %449 = arith.divf %447, %448 : vector<2x32xf32>
    %450 = arith.mulf %443, %415 : vector<2x32xf32>
    %451 = arith.mulf %438, %444 : vector<2x32xf32>
    %452 = arith.addf %450, %451 : vector<2x32xf32>
    %453 = math.tanh %452 : vector<2x32xf32>
    %454 = arith.mulf %449, %453 : vector<2x32xf32>
    %cst_184 = arith.constant dense<0.000000e+00> : vector<2x32xf32>
    %455 = tpu.matmul %161, %348, %cst_184 {dimension_numbers = #tpu.dot_dimension_numbers<[1], [0], [0], [1], [0, 0, 1, 1], [], []>} : vector<2x32xf32>, vector<32x32xf32>, vector<2x32xf32> -> vector<2x32xf32>
    %cst_185 = arith.constant dense<0.000000e+00> : vector<2x32xf32>
    %456 = tpu.matmul %454, %356, %cst_185 {dimension_numbers = #tpu.dot_dimension_numbers<[1], [0], [0], [1], [0, 0, 1, 1], [], []>} : vector<2x32xf32>, vector<32x32xf32>, vector<2x32xf32> -> vector<2x32xf32>
    %457 = arith.addf %455, %456 : vector<2x32xf32>
    %458 = arith.addf %457, %366 : vector<2x32xf32>
    %cst_186 = arith.constant dense<0.000000e+00> : vector<2x32xf32>
    %459 = tpu.matmul %161, %350, %cst_186 {dimension_numbers = #tpu.dot_dimension_numbers<[1], [0], [0], [1], [0, 0, 1, 1], [], []>} : vector<2x32xf32>, vector<32x32xf32>, vector<2x32xf32> -> vector<2x32xf32>
    %cst_187 = arith.constant dense<0.000000e+00> : vector<2x32xf32>
    %460 = tpu.matmul %454, %358, %cst_187 {dimension_numbers = #tpu.dot_dimension_numbers<[1], [0], [0], [1], [0, 0, 1, 1], [], []>} : vector<2x32xf32>, vector<32x32xf32>, vector<2x32xf32> -> vector<2x32xf32>
    %461 = arith.addf %459, %460 : vector<2x32xf32>
    %462 = arith.addf %461, %370 : vector<2x32xf32>
    %cst_188 = arith.constant dense<0.000000e+00> : vector<2x32xf32>
    %463 = tpu.matmul %161, %352, %cst_188 {dimension_numbers = #tpu.dot_dimension_numbers<[1], [0], [0], [1], [0, 0, 1, 1], [], []>} : vector<2x32xf32>, vector<32x32xf32>, vector<2x32xf32> -> vector<2x32xf32>
    %cst_189 = arith.constant dense<0.000000e+00> : vector<2x32xf32>
    %464 = tpu.matmul %454, %360, %cst_189 {dimension_numbers = #tpu.dot_dimension_numbers<[1], [0], [0], [1], [0, 0, 1, 1], [], []>} : vector<2x32xf32>, vector<32x32xf32>, vector<2x32xf32> -> vector<2x32xf32>
    %465 = arith.addf %463, %464 : vector<2x32xf32>
    %466 = arith.addf %465, %374 : vector<2x32xf32>
    %cst_190 = arith.constant dense<0.000000e+00> : vector<2x32xf32>
    %467 = tpu.matmul %161, %354, %cst_190 {dimension_numbers = #tpu.dot_dimension_numbers<[1], [0], [0], [1], [0, 0, 1, 1], [], []>} : vector<2x32xf32>, vector<32x32xf32>, vector<2x32xf32> -> vector<2x32xf32>
    %cst_191 = arith.constant dense<0.000000e+00> : vector<2x32xf32>
    %468 = tpu.matmul %454, %362, %cst_191 {dimension_numbers = #tpu.dot_dimension_numbers<[1], [0], [0], [1], [0, 0, 1, 1], [], []>} : vector<2x32xf32>, vector<32x32xf32>, vector<2x32xf32> -> vector<2x32xf32>
    %469 = arith.addf %467, %468 : vector<2x32xf32>
    %470 = arith.addf %469, %378 : vector<2x32xf32>
    %471 = arith.negf %458 : vector<2x32xf32>
    %472 = math.exp %471 : vector<2x32xf32>
    %cst_192 = arith.constant 1.000000e+00 : f32
    %473 = vector.broadcast %cst_192 : f32 to vector<2x32xf32>
    %474 = arith.addf %473, %472 : vector<2x32xf32>
    %475 = arith.divf %473, %474 : vector<2x32xf32>
    %476 = arith.negf %462 : vector<2x32xf32>
    %477 = math.exp %476 : vector<2x32xf32>
    %cst_193 = arith.constant 1.000000e+00 : f32
    %478 = vector.broadcast %cst_193 : f32 to vector<2x32xf32>
    %479 = arith.addf %478, %477 : vector<2x32xf32>
    %480 = arith.divf %478, %479 : vector<2x32xf32>
    %481 = math.tanh %466 : vector<2x32xf32>
    %482 = arith.negf %470 : vector<2x32xf32>
    %483 = math.exp %482 : vector<2x32xf32>
    %cst_194 = arith.constant 1.000000e+00 : f32
    %484 = vector.broadcast %cst_194 : f32 to vector<2x32xf32>
    %485 = arith.addf %484, %483 : vector<2x32xf32>
    %486 = arith.divf %484, %485 : vector<2x32xf32>
    %487 = arith.mulf %480, %452 : vector<2x32xf32>
    %488 = arith.mulf %475, %481 : vector<2x32xf32>
    %489 = arith.addf %487, %488 : vector<2x32xf32>
    %490 = math.tanh %489 : vector<2x32xf32>
    %491 = arith.mulf %486, %490 : vector<2x32xf32>
    %cst_195 = arith.constant dense<0.000000e+00> : vector<2x32xf32>
    %492 = tpu.matmul %198, %348, %cst_195 {dimension_numbers = #tpu.dot_dimension_numbers<[1], [0], [0], [1], [0, 0, 1, 1], [], []>} : vector<2x32xf32>, vector<32x32xf32>, vector<2x32xf32> -> vector<2x32xf32>
    %cst_196 = arith.constant dense<0.000000e+00> : vector<2x32xf32>
    %493 = tpu.matmul %491, %356, %cst_196 {dimension_numbers = #tpu.dot_dimension_numbers<[1], [0], [0], [1], [0, 0, 1, 1], [], []>} : vector<2x32xf32>, vector<32x32xf32>, vector<2x32xf32> -> vector<2x32xf32>
    %494 = arith.addf %492, %493 : vector<2x32xf32>
    %495 = arith.addf %494, %366 : vector<2x32xf32>
    %cst_197 = arith.constant dense<0.000000e+00> : vector<2x32xf32>
    %496 = tpu.matmul %198, %350, %cst_197 {dimension_numbers = #tpu.dot_dimension_numbers<[1], [0], [0], [1], [0, 0, 1, 1], [], []>} : vector<2x32xf32>, vector<32x32xf32>, vector<2x32xf32> -> vector<2x32xf32>
    %cst_198 = arith.constant dense<0.000000e+00> : vector<2x32xf32>
    %497 = tpu.matmul %491, %358, %cst_198 {dimension_numbers = #tpu.dot_dimension_numbers<[1], [0], [0], [1], [0, 0, 1, 1], [], []>} : vector<2x32xf32>, vector<32x32xf32>, vector<2x32xf32> -> vector<2x32xf32>
    %498 = arith.addf %496, %497 : vector<2x32xf32>
    %499 = arith.addf %498, %370 : vector<2x32xf32>
    %cst_199 = arith.constant dense<0.000000e+00> : vector<2x32xf32>
    %500 = tpu.matmul %198, %352, %cst_199 {dimension_numbers = #tpu.dot_dimension_numbers<[1], [0], [0], [1], [0, 0, 1, 1], [], []>} : vector<2x32xf32>, vector<32x32xf32>, vector<2x32xf32> -> vector<2x32xf32>
    %cst_200 = arith.constant dense<0.000000e+00> : vector<2x32xf32>
    %501 = tpu.matmul %491, %360, %cst_200 {dimension_numbers = #tpu.dot_dimension_numbers<[1], [0], [0], [1], [0, 0, 1, 1], [], []>} : vector<2x32xf32>, vector<32x32xf32>, vector<2x32xf32> -> vector<2x32xf32>
    %502 = arith.addf %500, %501 : vector<2x32xf32>
    %503 = arith.addf %502, %374 : vector<2x32xf32>
    %cst_201 = arith.constant dense<0.000000e+00> : vector<2x32xf32>
    %504 = tpu.matmul %198, %354, %cst_201 {dimension_numbers = #tpu.dot_dimension_numbers<[1], [0], [0], [1], [0, 0, 1, 1], [], []>} : vector<2x32xf32>, vector<32x32xf32>, vector<2x32xf32> -> vector<2x32xf32>
    %cst_202 = arith.constant dense<0.000000e+00> : vector<2x32xf32>
    %505 = tpu.matmul %491, %362, %cst_202 {dimension_numbers = #tpu.dot_dimension_numbers<[1], [0], [0], [1], [0, 0, 1, 1], [], []>} : vector<2x32xf32>, vector<32x32xf32>, vector<2x32xf32> -> vector<2x32xf32>
    %506 = arith.addf %504, %505 : vector<2x32xf32>
    %507 = arith.addf %506, %378 : vector<2x32xf32>
    %508 = arith.negf %495 : vector<2x32xf32>
    %509 = math.exp %508 : vector<2x32xf32>
    %cst_203 = arith.constant 1.000000e+00 : f32
    %510 = vector.broadcast %cst_203 : f32 to vector<2x32xf32>
    %511 = arith.addf %510, %509 : vector<2x32xf32>
    %512 = arith.divf %510, %511 : vector<2x32xf32>
    %513 = arith.negf %499 : vector<2x32xf32>
    %514 = math.exp %513 : vector<2x32xf32>
    %cst_204 = arith.constant 1.000000e+00 : f32
    %515 = vector.broadcast %cst_204 : f32 to vector<2x32xf32>
    %516 = arith.addf %515, %514 : vector<2x32xf32>
    %517 = arith.divf %515, %516 : vector<2x32xf32>
    %518 = math.tanh %503 : vector<2x32xf32>
    %519 = arith.negf %507 : vector<2x32xf32>
    %520 = math.exp %519 : vector<2x32xf32>
    %cst_205 = arith.constant 1.000000e+00 : f32
    %521 = vector.broadcast %cst_205 : f32 to vector<2x32xf32>
    %522 = arith.addf %521, %520 : vector<2x32xf32>
    %523 = arith.divf %521, %522 : vector<2x32xf32>
    %524 = arith.mulf %517, %489 : vector<2x32xf32>
    %525 = arith.mulf %512, %518 : vector<2x32xf32>
    %526 = arith.addf %524, %525 : vector<2x32xf32>
    %527 = math.tanh %526 : vector<2x32xf32>
    %528 = arith.mulf %523, %527 : vector<2x32xf32>
    %cst_206 = arith.constant dense<0.000000e+00> : vector<2x32xf32>
    %529 = tpu.matmul %235, %348, %cst_206 {dimension_numbers = #tpu.dot_dimension_numbers<[1], [0], [0], [1], [0, 0, 1, 1], [], []>} : vector<2x32xf32>, vector<32x32xf32>, vector<2x32xf32> -> vector<2x32xf32>
    %cst_207 = arith.constant dense<0.000000e+00> : vector<2x32xf32>
    %530 = tpu.matmul %528, %356, %cst_207 {dimension_numbers = #tpu.dot_dimension_numbers<[1], [0], [0], [1], [0, 0, 1, 1], [], []>} : vector<2x32xf32>, vector<32x32xf32>, vector<2x32xf32> -> vector<2x32xf32>
    %531 = arith.addf %529, %530 : vector<2x32xf32>
    %532 = arith.addf %531, %366 : vector<2x32xf32>
    %cst_208 = arith.constant dense<0.000000e+00> : vector<2x32xf32>
    %533 = tpu.matmul %235, %350, %cst_208 {dimension_numbers = #tpu.dot_dimension_numbers<[1], [0], [0], [1], [0, 0, 1, 1], [], []>} : vector<2x32xf32>, vector<32x32xf32>, vector<2x32xf32> -> vector<2x32xf32>
    %cst_209 = arith.constant dense<0.000000e+00> : vector<2x32xf32>
    %534 = tpu.matmul %528, %358, %cst_209 {dimension_numbers = #tpu.dot_dimension_numbers<[1], [0], [0], [1], [0, 0, 1, 1], [], []>} : vector<2x32xf32>, vector<32x32xf32>, vector<2x32xf32> -> vector<2x32xf32>
    %535 = arith.addf %533, %534 : vector<2x32xf32>
    %536 = arith.addf %535, %370 : vector<2x32xf32>
    %cst_210 = arith.constant dense<0.000000e+00> : vector<2x32xf32>
    %537 = tpu.matmul %235, %352, %cst_210 {dimension_numbers = #tpu.dot_dimension_numbers<[1], [0], [0], [1], [0, 0, 1, 1], [], []>} : vector<2x32xf32>, vector<32x32xf32>, vector<2x32xf32> -> vector<2x32xf32>
    %cst_211 = arith.constant dense<0.000000e+00> : vector<2x32xf32>
    %538 = tpu.matmul %528, %360, %cst_211 {dimension_numbers = #tpu.dot_dimension_numbers<[1], [0], [0], [1], [0, 0, 1, 1], [], []>} : vector<2x32xf32>, vector<32x32xf32>, vector<2x32xf32> -> vector<2x32xf32>
    %539 = arith.addf %537, %538 : vector<2x32xf32>
    %540 = arith.addf %539, %374 : vector<2x32xf32>
    %cst_212 = arith.constant dense<0.000000e+00> : vector<2x32xf32>
    %541 = tpu.matmul %235, %354, %cst_212 {dimension_numbers = #tpu.dot_dimension_numbers<[1], [0], [0], [1], [0, 0, 1, 1], [], []>} : vector<2x32xf32>, vector<32x32xf32>, vector<2x32xf32> -> vector<2x32xf32>
    %cst_213 = arith.constant dense<0.000000e+00> : vector<2x32xf32>
    %542 = tpu.matmul %528, %362, %cst_213 {dimension_numbers = #tpu.dot_dimension_numbers<[1], [0], [0], [1], [0, 0, 1, 1], [], []>} : vector<2x32xf32>, vector<32x32xf32>, vector<2x32xf32> -> vector<2x32xf32>
    %543 = arith.addf %541, %542 : vector<2x32xf32>
    %544 = arith.addf %543, %378 : vector<2x32xf32>
    %545 = arith.negf %532 : vector<2x32xf32>
    %546 = math.exp %545 : vector<2x32xf32>
    %cst_214 = arith.constant 1.000000e+00 : f32
    %547 = vector.broadcast %cst_214 : f32 to vector<2x32xf32>
    %548 = arith.addf %547, %546 : vector<2x32xf32>
    %549 = arith.divf %547, %548 : vector<2x32xf32>
    %550 = arith.negf %536 : vector<2x32xf32>
    %551 = math.exp %550 : vector<2x32xf32>
    %cst_215 = arith.constant 1.000000e+00 : f32
    %552 = vector.broadcast %cst_215 : f32 to vector<2x32xf32>
    %553 = arith.addf %552, %551 : vector<2x32xf32>
    %554 = arith.divf %552, %553 : vector<2x32xf32>
    %555 = math.tanh %540 : vector<2x32xf32>
    %556 = arith.negf %544 : vector<2x32xf32>
    %557 = math.exp %556 : vector<2x32xf32>
    %cst_216 = arith.constant 1.000000e+00 : f32
    %558 = vector.broadcast %cst_216 : f32 to vector<2x32xf32>
    %559 = arith.addf %558, %557 : vector<2x32xf32>
    %560 = arith.divf %558, %559 : vector<2x32xf32>
    %561 = arith.mulf %554, %526 : vector<2x32xf32>
    %562 = arith.mulf %549, %555 : vector<2x32xf32>
    %563 = arith.addf %561, %562 : vector<2x32xf32>
    %564 = math.tanh %563 : vector<2x32xf32>
    %565 = arith.mulf %560, %564 : vector<2x32xf32>
    %cst_217 = arith.constant dense<0.000000e+00> : vector<2x32xf32>
    %566 = tpu.matmul %272, %348, %cst_217 {dimension_numbers = #tpu.dot_dimension_numbers<[1], [0], [0], [1], [0, 0, 1, 1], [], []>} : vector<2x32xf32>, vector<32x32xf32>, vector<2x32xf32> -> vector<2x32xf32>
    %cst_218 = arith.constant dense<0.000000e+00> : vector<2x32xf32>
    %567 = tpu.matmul %565, %356, %cst_218 {dimension_numbers = #tpu.dot_dimension_numbers<[1], [0], [0], [1], [0, 0, 1, 1], [], []>} : vector<2x32xf32>, vector<32x32xf32>, vector<2x32xf32> -> vector<2x32xf32>
    %568 = arith.addf %566, %567 : vector<2x32xf32>
    %569 = arith.addf %568, %366 : vector<2x32xf32>
    %cst_219 = arith.constant dense<0.000000e+00> : vector<2x32xf32>
    %570 = tpu.matmul %272, %350, %cst_219 {dimension_numbers = #tpu.dot_dimension_numbers<[1], [0], [0], [1], [0, 0, 1, 1], [], []>} : vector<2x32xf32>, vector<32x32xf32>, vector<2x32xf32> -> vector<2x32xf32>
    %cst_220 = arith.constant dense<0.000000e+00> : vector<2x32xf32>
    %571 = tpu.matmul %565, %358, %cst_220 {dimension_numbers = #tpu.dot_dimension_numbers<[1], [0], [0], [1], [0, 0, 1, 1], [], []>} : vector<2x32xf32>, vector<32x32xf32>, vector<2x32xf32> -> vector<2x32xf32>
    %572 = arith.addf %570, %571 : vector<2x32xf32>
    %573 = arith.addf %572, %370 : vector<2x32xf32>
    %cst_221 = arith.constant dense<0.000000e+00> : vector<2x32xf32>
    %574 = tpu.matmul %272, %352, %cst_221 {dimension_numbers = #tpu.dot_dimension_numbers<[1], [0], [0], [1], [0, 0, 1, 1], [], []>} : vector<2x32xf32>, vector<32x32xf32>, vector<2x32xf32> -> vector<2x32xf32>
    %cst_222 = arith.constant dense<0.000000e+00> : vector<2x32xf32>
    %575 = tpu.matmul %565, %360, %cst_222 {dimension_numbers = #tpu.dot_dimension_numbers<[1], [0], [0], [1], [0, 0, 1, 1], [], []>} : vector<2x32xf32>, vector<32x32xf32>, vector<2x32xf32> -> vector<2x32xf32>
    %576 = arith.addf %574, %575 : vector<2x32xf32>
    %577 = arith.addf %576, %374 : vector<2x32xf32>
    %cst_223 = arith.constant dense<0.000000e+00> : vector<2x32xf32>
    %578 = tpu.matmul %272, %354, %cst_223 {dimension_numbers = #tpu.dot_dimension_numbers<[1], [0], [0], [1], [0, 0, 1, 1], [], []>} : vector<2x32xf32>, vector<32x32xf32>, vector<2x32xf32> -> vector<2x32xf32>
    %cst_224 = arith.constant dense<0.000000e+00> : vector<2x32xf32>
    %579 = tpu.matmul %565, %362, %cst_224 {dimension_numbers = #tpu.dot_dimension_numbers<[1], [0], [0], [1], [0, 0, 1, 1], [], []>} : vector<2x32xf32>, vector<32x32xf32>, vector<2x32xf32> -> vector<2x32xf32>
    %580 = arith.addf %578, %579 : vector<2x32xf32>
    %581 = arith.addf %580, %378 : vector<2x32xf32>
    %582 = arith.negf %569 : vector<2x32xf32>
    %583 = math.exp %582 : vector<2x32xf32>
    %cst_225 = arith.constant 1.000000e+00 : f32
    %584 = vector.broadcast %cst_225 : f32 to vector<2x32xf32>
    %585 = arith.addf %584, %583 : vector<2x32xf32>
    %586 = arith.divf %584, %585 : vector<2x32xf32>
    %587 = arith.negf %573 : vector<2x32xf32>
    %588 = math.exp %587 : vector<2x32xf32>
    %cst_226 = arith.constant 1.000000e+00 : f32
    %589 = vector.broadcast %cst_226 : f32 to vector<2x32xf32>
    %590 = arith.addf %589, %588 : vector<2x32xf32>
    %591 = arith.divf %589, %590 : vector<2x32xf32>
    %592 = math.tanh %577 : vector<2x32xf32>
    %593 = arith.negf %581 : vector<2x32xf32>
    %594 = math.exp %593 : vector<2x32xf32>
    %cst_227 = arith.constant 1.000000e+00 : f32
    %595 = vector.broadcast %cst_227 : f32 to vector<2x32xf32>
    %596 = arith.addf %595, %594 : vector<2x32xf32>
    %597 = arith.divf %595, %596 : vector<2x32xf32>
    %598 = arith.mulf %591, %563 : vector<2x32xf32>
    %599 = arith.mulf %586, %592 : vector<2x32xf32>
    %600 = arith.addf %598, %599 : vector<2x32xf32>
    %601 = math.tanh %600 : vector<2x32xf32>
    %602 = arith.mulf %597, %601 : vector<2x32xf32>
    %cst_228 = arith.constant dense<0.000000e+00> : vector<2x32xf32>
    %603 = tpu.matmul %309, %348, %cst_228 {dimension_numbers = #tpu.dot_dimension_numbers<[1], [0], [0], [1], [0, 0, 1, 1], [], []>} : vector<2x32xf32>, vector<32x32xf32>, vector<2x32xf32> -> vector<2x32xf32>
    %cst_229 = arith.constant dense<0.000000e+00> : vector<2x32xf32>
    %604 = tpu.matmul %602, %356, %cst_229 {dimension_numbers = #tpu.dot_dimension_numbers<[1], [0], [0], [1], [0, 0, 1, 1], [], []>} : vector<2x32xf32>, vector<32x32xf32>, vector<2x32xf32> -> vector<2x32xf32>
    %605 = arith.addf %603, %604 : vector<2x32xf32>
    %606 = arith.addf %605, %366 : vector<2x32xf32>
    %cst_230 = arith.constant dense<0.000000e+00> : vector<2x32xf32>
    %607 = tpu.matmul %309, %350, %cst_230 {dimension_numbers = #tpu.dot_dimension_numbers<[1], [0], [0], [1], [0, 0, 1, 1], [], []>} : vector<2x32xf32>, vector<32x32xf32>, vector<2x32xf32> -> vector<2x32xf32>
    %cst_231 = arith.constant dense<0.000000e+00> : vector<2x32xf32>
    %608 = tpu.matmul %602, %358, %cst_231 {dimension_numbers = #tpu.dot_dimension_numbers<[1], [0], [0], [1], [0, 0, 1, 1], [], []>} : vector<2x32xf32>, vector<32x32xf32>, vector<2x32xf32> -> vector<2x32xf32>
    %609 = arith.addf %607, %608 : vector<2x32xf32>
    %610 = arith.addf %609, %370 : vector<2x32xf32>
    %cst_232 = arith.constant dense<0.000000e+00> : vector<2x32xf32>
    %611 = tpu.matmul %309, %352, %cst_232 {dimension_numbers = #tpu.dot_dimension_numbers<[1], [0], [0], [1], [0, 0, 1, 1], [], []>} : vector<2x32xf32>, vector<32x32xf32>, vector<2x32xf32> -> vector<2x32xf32>
    %cst_233 = arith.constant dense<0.000000e+00> : vector<2x32xf32>
    %612 = tpu.matmul %602, %360, %cst_233 {dimension_numbers = #tpu.dot_dimension_numbers<[1], [0], [0], [1], [0, 0, 1, 1], [], []>} : vector<2x32xf32>, vector<32x32xf32>, vector<2x32xf32> -> vector<2x32xf32>
    %613 = arith.addf %611, %612 : vector<2x32xf32>
    %614 = arith.addf %613, %374 : vector<2x32xf32>
    %cst_234 = arith.constant dense<0.000000e+00> : vector<2x32xf32>
    %615 = tpu.matmul %309, %354, %cst_234 {dimension_numbers = #tpu.dot_dimension_numbers<[1], [0], [0], [1], [0, 0, 1, 1], [], []>} : vector<2x32xf32>, vector<32x32xf32>, vector<2x32xf32> -> vector<2x32xf32>
    %cst_235 = arith.constant dense<0.000000e+00> : vector<2x32xf32>
    %616 = tpu.matmul %602, %362, %cst_235 {dimension_numbers = #tpu.dot_dimension_numbers<[1], [0], [0], [1], [0, 0, 1, 1], [], []>} : vector<2x32xf32>, vector<32x32xf32>, vector<2x32xf32> -> vector<2x32xf32>
    %617 = arith.addf %615, %616 : vector<2x32xf32>
    %618 = arith.addf %617, %378 : vector<2x32xf32>
    %619 = arith.negf %606 : vector<2x32xf32>
    %620 = math.exp %619 : vector<2x32xf32>
    %cst_236 = arith.constant 1.000000e+00 : f32
    %621 = vector.broadcast %cst_236 : f32 to vector<2x32xf32>
    %622 = arith.addf %621, %620 : vector<2x32xf32>
    %623 = arith.divf %621, %622 : vector<2x32xf32>
    %624 = arith.negf %610 : vector<2x32xf32>
    %625 = math.exp %624 : vector<2x32xf32>
    %cst_237 = arith.constant 1.000000e+00 : f32
    %626 = vector.broadcast %cst_237 : f32 to vector<2x32xf32>
    %627 = arith.addf %626, %625 : vector<2x32xf32>
    %628 = arith.divf %626, %627 : vector<2x32xf32>
    %629 = math.tanh %614 : vector<2x32xf32>
    %630 = arith.negf %618 : vector<2x32xf32>
    %631 = math.exp %630 : vector<2x32xf32>
    %cst_238 = arith.constant 1.000000e+00 : f32
    %632 = vector.broadcast %cst_238 : f32 to vector<2x32xf32>
    %633 = arith.addf %632, %631 : vector<2x32xf32>
    %634 = arith.divf %632, %633 : vector<2x32xf32>
    %635 = arith.mulf %628, %600 : vector<2x32xf32>
    %636 = arith.mulf %623, %629 : vector<2x32xf32>
    %637 = arith.addf %635, %636 : vector<2x32xf32>
    %638 = math.tanh %637 : vector<2x32xf32>
    %639 = arith.mulf %634, %638 : vector<2x32xf32>
    %cst_239 = arith.constant dense<0.000000e+00> : vector<2x32xf32>
    %640 = tpu.matmul %346, %348, %cst_239 {dimension_numbers = #tpu.dot_dimension_numbers<[1], [0], [0], [1], [0, 0, 1, 1], [], []>} : vector<2x32xf32>, vector<32x32xf32>, vector<2x32xf32> -> vector<2x32xf32>
    %cst_240 = arith.constant dense<0.000000e+00> : vector<2x32xf32>
    %641 = tpu.matmul %639, %356, %cst_240 {dimension_numbers = #tpu.dot_dimension_numbers<[1], [0], [0], [1], [0, 0, 1, 1], [], []>} : vector<2x32xf32>, vector<32x32xf32>, vector<2x32xf32> -> vector<2x32xf32>
    %642 = arith.addf %640, %641 : vector<2x32xf32>
    %643 = arith.addf %642, %366 : vector<2x32xf32>
    %cst_241 = arith.constant dense<0.000000e+00> : vector<2x32xf32>
    %644 = tpu.matmul %346, %350, %cst_241 {dimension_numbers = #tpu.dot_dimension_numbers<[1], [0], [0], [1], [0, 0, 1, 1], [], []>} : vector<2x32xf32>, vector<32x32xf32>, vector<2x32xf32> -> vector<2x32xf32>
    %cst_242 = arith.constant dense<0.000000e+00> : vector<2x32xf32>
    %645 = tpu.matmul %639, %358, %cst_242 {dimension_numbers = #tpu.dot_dimension_numbers<[1], [0], [0], [1], [0, 0, 1, 1], [], []>} : vector<2x32xf32>, vector<32x32xf32>, vector<2x32xf32> -> vector<2x32xf32>
    %646 = arith.addf %644, %645 : vector<2x32xf32>
    %647 = arith.addf %646, %370 : vector<2x32xf32>
    %cst_243 = arith.constant dense<0.000000e+00> : vector<2x32xf32>
    %648 = tpu.matmul %346, %352, %cst_243 {dimension_numbers = #tpu.dot_dimension_numbers<[1], [0], [0], [1], [0, 0, 1, 1], [], []>} : vector<2x32xf32>, vector<32x32xf32>, vector<2x32xf32> -> vector<2x32xf32>
    %cst_244 = arith.constant dense<0.000000e+00> : vector<2x32xf32>
    %649 = tpu.matmul %639, %360, %cst_244 {dimension_numbers = #tpu.dot_dimension_numbers<[1], [0], [0], [1], [0, 0, 1, 1], [], []>} : vector<2x32xf32>, vector<32x32xf32>, vector<2x32xf32> -> vector<2x32xf32>
    %650 = arith.addf %648, %649 : vector<2x32xf32>
    %651 = arith.addf %650, %374 : vector<2x32xf32>
    %cst_245 = arith.constant dense<0.000000e+00> : vector<2x32xf32>
    %652 = tpu.matmul %346, %354, %cst_245 {dimension_numbers = #tpu.dot_dimension_numbers<[1], [0], [0], [1], [0, 0, 1, 1], [], []>} : vector<2x32xf32>, vector<32x32xf32>, vector<2x32xf32> -> vector<2x32xf32>
    %cst_246 = arith.constant dense<0.000000e+00> : vector<2x32xf32>
    %653 = tpu.matmul %639, %362, %cst_246 {dimension_numbers = #tpu.dot_dimension_numbers<[1], [0], [0], [1], [0, 0, 1, 1], [], []>} : vector<2x32xf32>, vector<32x32xf32>, vector<2x32xf32> -> vector<2x32xf32>
    %654 = arith.addf %652, %653 : vector<2x32xf32>
    %655 = arith.addf %654, %378 : vector<2x32xf32>
    %656 = arith.negf %643 : vector<2x32xf32>
    %657 = math.exp %656 : vector<2x32xf32>
    %cst_247 = arith.constant 1.000000e+00 : f32
    %658 = vector.broadcast %cst_247 : f32 to vector<2x32xf32>
    %659 = arith.addf %658, %657 : vector<2x32xf32>
    %660 = arith.divf %658, %659 : vector<2x32xf32>
    %661 = arith.negf %647 : vector<2x32xf32>
    %662 = math.exp %661 : vector<2x32xf32>
    %cst_248 = arith.constant 1.000000e+00 : f32
    %663 = vector.broadcast %cst_248 : f32 to vector<2x32xf32>
    %664 = arith.addf %663, %662 : vector<2x32xf32>
    %665 = arith.divf %663, %664 : vector<2x32xf32>
    %666 = math.tanh %651 : vector<2x32xf32>
    %667 = arith.negf %655 : vector<2x32xf32>
    %668 = math.exp %667 : vector<2x32xf32>
    %cst_249 = arith.constant 1.000000e+00 : f32
    %669 = vector.broadcast %cst_249 : f32 to vector<2x32xf32>
    %670 = arith.addf %669, %668 : vector<2x32xf32>
    %671 = arith.divf %669, %670 : vector<2x32xf32>
    %672 = arith.mulf %665, %637 : vector<2x32xf32>
    %673 = arith.mulf %660, %666 : vector<2x32xf32>
    %674 = arith.addf %672, %673 : vector<2x32xf32>
    %675 = math.tanh %674 : vector<2x32xf32>
    %676 = arith.mulf %671, %675 : vector<2x32xf32>
    %c0_250 = arith.constant 0 : index
    %c0_251 = arith.constant 0 : index
    %c0_252 = arith.constant 0 : index
    %677 = vector.load %arg7[%c0_250, %c0_251, %c0_252] : memref<4x32x32xf32, #tpu.memory_space<vmem>>, vector<1x32x32xf32>
    %678 = vector.shape_cast %677 : vector<1x32x32xf32> to vector<32x32xf32>
    %c1_253 = arith.constant 1 : index
    %c0_254 = arith.constant 0 : index
    %c0_255 = arith.constant 0 : index
    %679 = vector.load %arg7[%c1_253, %c0_254, %c0_255] : memref<4x32x32xf32, #tpu.memory_space<vmem>>, vector<1x32x32xf32>
    %680 = vector.shape_cast %679 : vector<1x32x32xf32> to vector<32x32xf32>
    %c2_256 = arith.constant 2 : index
    %c0_257 = arith.constant 0 : index
    %c0_258 = arith.constant 0 : index
    %681 = vector.load %arg7[%c2_256, %c0_257, %c0_258] : memref<4x32x32xf32, #tpu.memory_space<vmem>>, vector<1x32x32xf32>
    %682 = vector.shape_cast %681 : vector<1x32x32xf32> to vector<32x32xf32>
    %c3_259 = arith.constant 3 : index
    %c0_260 = arith.constant 0 : index
    %c0_261 = arith.constant 0 : index
    %683 = vector.load %arg7[%c3_259, %c0_260, %c0_261] : memref<4x32x32xf32, #tpu.memory_space<vmem>>, vector<1x32x32xf32>
    %684 = vector.shape_cast %683 : vector<1x32x32xf32> to vector<32x32xf32>
    %c0_262 = arith.constant 0 : index
    %c0_263 = arith.constant 0 : index
    %c0_264 = arith.constant 0 : index
    %685 = vector.load %arg8[%c0_262, %c0_263, %c0_264] : memref<4x32x32xf32, #tpu.memory_space<vmem>>, vector<1x32x32xf32>
    %686 = vector.shape_cast %685 : vector<1x32x32xf32> to vector<32x32xf32>
    %c1_265 = arith.constant 1 : index
    %c0_266 = arith.constant 0 : index
    %c0_267 = arith.constant 0 : index
    %687 = vector.load %arg8[%c1_265, %c0_266, %c0_267] : memref<4x32x32xf32, #tpu.memory_space<vmem>>, vector<1x32x32xf32>
    %688 = vector.shape_cast %687 : vector<1x32x32xf32> to vector<32x32xf32>
    %c2_268 = arith.constant 2 : index
    %c0_269 = arith.constant 0 : index
    %c0_270 = arith.constant 0 : index
    %689 = vector.load %arg8[%c2_268, %c0_269, %c0_270] : memref<4x32x32xf32, #tpu.memory_space<vmem>>, vector<1x32x32xf32>
    %690 = vector.shape_cast %689 : vector<1x32x32xf32> to vector<32x32xf32>
    %c3_271 = arith.constant 3 : index
    %c0_272 = arith.constant 0 : index
    %c0_273 = arith.constant 0 : index
    %691 = vector.load %arg8[%c3_271, %c0_272, %c0_273] : memref<4x32x32xf32, #tpu.memory_space<vmem>>, vector<1x32x32xf32>
    %692 = vector.shape_cast %691 : vector<1x32x32xf32> to vector<32x32xf32>
    %c0_274 = arith.constant 0 : index
    %c0_275 = arith.constant 0 : index
    %c0_276 = arith.constant 0 : index
    %693 = vector.load %arg9[%c0_274, %c0_275, %c0_276] : memref<4x1x32xf32, #tpu.memory_space<vmem>>, vector<1x1x32xf32>
    %694 = vector.shape_cast %693 : vector<1x1x32xf32> to vector<1x32xf32>
    %695 = vector.shape_cast %694 : vector<1x32xf32> to vector<1x32xf32>
    %696 = vector.broadcast %695 : vector<1x32xf32> to vector<2x32xf32>
    %c1_277 = arith.constant 1 : index
    %c0_278 = arith.constant 0 : index
    %c0_279 = arith.constant 0 : index
    %697 = vector.load %arg9[%c1_277, %c0_278, %c0_279] : memref<4x1x32xf32, #tpu.memory_space<vmem>>, vector<1x1x32xf32>
    %698 = vector.shape_cast %697 : vector<1x1x32xf32> to vector<1x32xf32>
    %699 = vector.shape_cast %698 : vector<1x32xf32> to vector<1x32xf32>
    %700 = vector.broadcast %699 : vector<1x32xf32> to vector<2x32xf32>
    %c2_280 = arith.constant 2 : index
    %c0_281 = arith.constant 0 : index
    %c0_282 = arith.constant 0 : index
    %701 = vector.load %arg9[%c2_280, %c0_281, %c0_282] : memref<4x1x32xf32, #tpu.memory_space<vmem>>, vector<1x1x32xf32>
    %702 = vector.shape_cast %701 : vector<1x1x32xf32> to vector<1x32xf32>
    %703 = vector.shape_cast %702 : vector<1x32xf32> to vector<1x32xf32>
    %704 = vector.broadcast %703 : vector<1x32xf32> to vector<2x32xf32>
    %c3_283 = arith.constant 3 : index
    %c0_284 = arith.constant 0 : index
    %c0_285 = arith.constant 0 : index
    %705 = vector.load %arg9[%c3_283, %c0_284, %c0_285] : memref<4x1x32xf32, #tpu.memory_space<vmem>>, vector<1x1x32xf32>
    %706 = vector.shape_cast %705 : vector<1x1x32xf32> to vector<1x32xf32>
    %707 = vector.shape_cast %706 : vector<1x32xf32> to vector<1x32xf32>
    %708 = vector.broadcast %707 : vector<1x32xf32> to vector<2x32xf32>
    %cst_286 = arith.constant 0.000000e+00 : f32
    %709 = vector.broadcast %cst_286 : f32 to vector<2x32xf32>
    %cst_287 = arith.constant 0.000000e+00 : f32
    %710 = vector.broadcast %cst_287 : f32 to vector<2x32xf32>
    %cst_288 = arith.constant dense<0.000000e+00> : vector<2x32xf32>
    %711 = tpu.matmul %417, %678, %cst_288 {dimension_numbers = #tpu.dot_dimension_numbers<[1], [0], [0], [1], [0, 0, 1, 1], [], []>} : vector<2x32xf32>, vector<32x32xf32>, vector<2x32xf32> -> vector<2x32xf32>
    %cst_289 = arith.constant dense<0.000000e+00> : vector<2x32xf32>
    %712 = tpu.matmul %709, %686, %cst_289 {dimension_numbers = #tpu.dot_dimension_numbers<[1], [0], [0], [1], [0, 0, 1, 1], [], []>} : vector<2x32xf32>, vector<32x32xf32>, vector<2x32xf32> -> vector<2x32xf32>
    %713 = arith.addf %711, %712 : vector<2x32xf32>
    %714 = arith.addf %713, %696 : vector<2x32xf32>
    %cst_290 = arith.constant dense<0.000000e+00> : vector<2x32xf32>
    %715 = tpu.matmul %417, %680, %cst_290 {dimension_numbers = #tpu.dot_dimension_numbers<[1], [0], [0], [1], [0, 0, 1, 1], [], []>} : vector<2x32xf32>, vector<32x32xf32>, vector<2x32xf32> -> vector<2x32xf32>
    %cst_291 = arith.constant dense<0.000000e+00> : vector<2x32xf32>
    %716 = tpu.matmul %709, %688, %cst_291 {dimension_numbers = #tpu.dot_dimension_numbers<[1], [0], [0], [1], [0, 0, 1, 1], [], []>} : vector<2x32xf32>, vector<32x32xf32>, vector<2x32xf32> -> vector<2x32xf32>
    %717 = arith.addf %715, %716 : vector<2x32xf32>
    %718 = arith.addf %717, %700 : vector<2x32xf32>
    %cst_292 = arith.constant dense<0.000000e+00> : vector<2x32xf32>
    %719 = tpu.matmul %417, %682, %cst_292 {dimension_numbers = #tpu.dot_dimension_numbers<[1], [0], [0], [1], [0, 0, 1, 1], [], []>} : vector<2x32xf32>, vector<32x32xf32>, vector<2x32xf32> -> vector<2x32xf32>
    %cst_293 = arith.constant dense<0.000000e+00> : vector<2x32xf32>
    %720 = tpu.matmul %709, %690, %cst_293 {dimension_numbers = #tpu.dot_dimension_numbers<[1], [0], [0], [1], [0, 0, 1, 1], [], []>} : vector<2x32xf32>, vector<32x32xf32>, vector<2x32xf32> -> vector<2x32xf32>
    %721 = arith.addf %719, %720 : vector<2x32xf32>
    %722 = arith.addf %721, %704 : vector<2x32xf32>
    %cst_294 = arith.constant dense<0.000000e+00> : vector<2x32xf32>
    %723 = tpu.matmul %417, %684, %cst_294 {dimension_numbers = #tpu.dot_dimension_numbers<[1], [0], [0], [1], [0, 0, 1, 1], [], []>} : vector<2x32xf32>, vector<32x32xf32>, vector<2x32xf32> -> vector<2x32xf32>
    %cst_295 = arith.constant dense<0.000000e+00> : vector<2x32xf32>
    %724 = tpu.matmul %709, %692, %cst_295 {dimension_numbers = #tpu.dot_dimension_numbers<[1], [0], [0], [1], [0, 0, 1, 1], [], []>} : vector<2x32xf32>, vector<32x32xf32>, vector<2x32xf32> -> vector<2x32xf32>
    %725 = arith.addf %723, %724 : vector<2x32xf32>
    %726 = arith.addf %725, %708 : vector<2x32xf32>
    %727 = arith.negf %714 : vector<2x32xf32>
    %728 = math.exp %727 : vector<2x32xf32>
    %cst_296 = arith.constant 1.000000e+00 : f32
    %729 = vector.broadcast %cst_296 : f32 to vector<2x32xf32>
    %730 = arith.addf %729, %728 : vector<2x32xf32>
    %731 = arith.divf %729, %730 : vector<2x32xf32>
    %732 = arith.negf %718 : vector<2x32xf32>
    %733 = math.exp %732 : vector<2x32xf32>
    %cst_297 = arith.constant 1.000000e+00 : f32
    %734 = vector.broadcast %cst_297 : f32 to vector<2x32xf32>
    %735 = arith.addf %734, %733 : vector<2x32xf32>
    %736 = arith.divf %734, %735 : vector<2x32xf32>
    %737 = math.tanh %722 : vector<2x32xf32>
    %738 = arith.negf %726 : vector<2x32xf32>
    %739 = math.exp %738 : vector<2x32xf32>
    %cst_298 = arith.constant 1.000000e+00 : f32
    %740 = vector.broadcast %cst_298 : f32 to vector<2x32xf32>
    %741 = arith.addf %740, %739 : vector<2x32xf32>
    %742 = arith.divf %740, %741 : vector<2x32xf32>
    %743 = arith.mulf %736, %710 : vector<2x32xf32>
    %744 = arith.mulf %731, %737 : vector<2x32xf32>
    %745 = arith.addf %743, %744 : vector<2x32xf32>
    %746 = math.tanh %745 : vector<2x32xf32>
    %747 = arith.mulf %742, %746 : vector<2x32xf32>
    %cst_299 = arith.constant dense<0.000000e+00> : vector<2x32xf32>
    %748 = tpu.matmul %454, %678, %cst_299 {dimension_numbers = #tpu.dot_dimension_numbers<[1], [0], [0], [1], [0, 0, 1, 1], [], []>} : vector<2x32xf32>, vector<32x32xf32>, vector<2x32xf32> -> vector<2x32xf32>
    %cst_300 = arith.constant dense<0.000000e+00> : vector<2x32xf32>
    %749 = tpu.matmul %747, %686, %cst_300 {dimension_numbers = #tpu.dot_dimension_numbers<[1], [0], [0], [1], [0, 0, 1, 1], [], []>} : vector<2x32xf32>, vector<32x32xf32>, vector<2x32xf32> -> vector<2x32xf32>
    %750 = arith.addf %748, %749 : vector<2x32xf32>
    %751 = arith.addf %750, %696 : vector<2x32xf32>
    %cst_301 = arith.constant dense<0.000000e+00> : vector<2x32xf32>
    %752 = tpu.matmul %454, %680, %cst_301 {dimension_numbers = #tpu.dot_dimension_numbers<[1], [0], [0], [1], [0, 0, 1, 1], [], []>} : vector<2x32xf32>, vector<32x32xf32>, vector<2x32xf32> -> vector<2x32xf32>
    %cst_302 = arith.constant dense<0.000000e+00> : vector<2x32xf32>
    %753 = tpu.matmul %747, %688, %cst_302 {dimension_numbers = #tpu.dot_dimension_numbers<[1], [0], [0], [1], [0, 0, 1, 1], [], []>} : vector<2x32xf32>, vector<32x32xf32>, vector<2x32xf32> -> vector<2x32xf32>
    %754 = arith.addf %752, %753 : vector<2x32xf32>
    %755 = arith.addf %754, %700 : vector<2x32xf32>
    %cst_303 = arith.constant dense<0.000000e+00> : vector<2x32xf32>
    %756 = tpu.matmul %454, %682, %cst_303 {dimension_numbers = #tpu.dot_dimension_numbers<[1], [0], [0], [1], [0, 0, 1, 1], [], []>} : vector<2x32xf32>, vector<32x32xf32>, vector<2x32xf32> -> vector<2x32xf32>
    %cst_304 = arith.constant dense<0.000000e+00> : vector<2x32xf32>
    %757 = tpu.matmul %747, %690, %cst_304 {dimension_numbers = #tpu.dot_dimension_numbers<[1], [0], [0], [1], [0, 0, 1, 1], [], []>} : vector<2x32xf32>, vector<32x32xf32>, vector<2x32xf32> -> vector<2x32xf32>
    %758 = arith.addf %756, %757 : vector<2x32xf32>
    %759 = arith.addf %758, %704 : vector<2x32xf32>
    %cst_305 = arith.constant dense<0.000000e+00> : vector<2x32xf32>
    %760 = tpu.matmul %454, %684, %cst_305 {dimension_numbers = #tpu.dot_dimension_numbers<[1], [0], [0], [1], [0, 0, 1, 1], [], []>} : vector<2x32xf32>, vector<32x32xf32>, vector<2x32xf32> -> vector<2x32xf32>
    %cst_306 = arith.constant dense<0.000000e+00> : vector<2x32xf32>
    %761 = tpu.matmul %747, %692, %cst_306 {dimension_numbers = #tpu.dot_dimension_numbers<[1], [0], [0], [1], [0, 0, 1, 1], [], []>} : vector<2x32xf32>, vector<32x32xf32>, vector<2x32xf32> -> vector<2x32xf32>
    %762 = arith.addf %760, %761 : vector<2x32xf32>
    %763 = arith.addf %762, %708 : vector<2x32xf32>
    %764 = arith.negf %751 : vector<2x32xf32>
    %765 = math.exp %764 : vector<2x32xf32>
    %cst_307 = arith.constant 1.000000e+00 : f32
    %766 = vector.broadcast %cst_307 : f32 to vector<2x32xf32>
    %767 = arith.addf %766, %765 : vector<2x32xf32>
    %768 = arith.divf %766, %767 : vector<2x32xf32>
    %769 = arith.negf %755 : vector<2x32xf32>
    %770 = math.exp %769 : vector<2x32xf32>
    %cst_308 = arith.constant 1.000000e+00 : f32
    %771 = vector.broadcast %cst_308 : f32 to vector<2x32xf32>
    %772 = arith.addf %771, %770 : vector<2x32xf32>
    %773 = arith.divf %771, %772 : vector<2x32xf32>
    %774 = math.tanh %759 : vector<2x32xf32>
    %775 = arith.negf %763 : vector<2x32xf32>
    %776 = math.exp %775 : vector<2x32xf32>
    %cst_309 = arith.constant 1.000000e+00 : f32
    %777 = vector.broadcast %cst_309 : f32 to vector<2x32xf32>
    %778 = arith.addf %777, %776 : vector<2x32xf32>
    %779 = arith.divf %777, %778 : vector<2x32xf32>
    %780 = arith.mulf %773, %745 : vector<2x32xf32>
    %781 = arith.mulf %768, %774 : vector<2x32xf32>
    %782 = arith.addf %780, %781 : vector<2x32xf32>
    %783 = math.tanh %782 : vector<2x32xf32>
    %784 = arith.mulf %779, %783 : vector<2x32xf32>
    %cst_310 = arith.constant dense<0.000000e+00> : vector<2x32xf32>
    %785 = tpu.matmul %491, %678, %cst_310 {dimension_numbers = #tpu.dot_dimension_numbers<[1], [0], [0], [1], [0, 0, 1, 1], [], []>} : vector<2x32xf32>, vector<32x32xf32>, vector<2x32xf32> -> vector<2x32xf32>
    %cst_311 = arith.constant dense<0.000000e+00> : vector<2x32xf32>
    %786 = tpu.matmul %784, %686, %cst_311 {dimension_numbers = #tpu.dot_dimension_numbers<[1], [0], [0], [1], [0, 0, 1, 1], [], []>} : vector<2x32xf32>, vector<32x32xf32>, vector<2x32xf32> -> vector<2x32xf32>
    %787 = arith.addf %785, %786 : vector<2x32xf32>
    %788 = arith.addf %787, %696 : vector<2x32xf32>
    %cst_312 = arith.constant dense<0.000000e+00> : vector<2x32xf32>
    %789 = tpu.matmul %491, %680, %cst_312 {dimension_numbers = #tpu.dot_dimension_numbers<[1], [0], [0], [1], [0, 0, 1, 1], [], []>} : vector<2x32xf32>, vector<32x32xf32>, vector<2x32xf32> -> vector<2x32xf32>
    %cst_313 = arith.constant dense<0.000000e+00> : vector<2x32xf32>
    %790 = tpu.matmul %784, %688, %cst_313 {dimension_numbers = #tpu.dot_dimension_numbers<[1], [0], [0], [1], [0, 0, 1, 1], [], []>} : vector<2x32xf32>, vector<32x32xf32>, vector<2x32xf32> -> vector<2x32xf32>
    %791 = arith.addf %789, %790 : vector<2x32xf32>
    %792 = arith.addf %791, %700 : vector<2x32xf32>
    %cst_314 = arith.constant dense<0.000000e+00> : vector<2x32xf32>
    %793 = tpu.matmul %491, %682, %cst_314 {dimension_numbers = #tpu.dot_dimension_numbers<[1], [0], [0], [1], [0, 0, 1, 1], [], []>} : vector<2x32xf32>, vector<32x32xf32>, vector<2x32xf32> -> vector<2x32xf32>
    %cst_315 = arith.constant dense<0.000000e+00> : vector<2x32xf32>
    %794 = tpu.matmul %784, %690, %cst_315 {dimension_numbers = #tpu.dot_dimension_numbers<[1], [0], [0], [1], [0, 0, 1, 1], [], []>} : vector<2x32xf32>, vector<32x32xf32>, vector<2x32xf32> -> vector<2x32xf32>
    %795 = arith.addf %793, %794 : vector<2x32xf32>
    %796 = arith.addf %795, %704 : vector<2x32xf32>
    %cst_316 = arith.constant dense<0.000000e+00> : vector<2x32xf32>
    %797 = tpu.matmul %491, %684, %cst_316 {dimension_numbers = #tpu.dot_dimension_numbers<[1], [0], [0], [1], [0, 0, 1, 1], [], []>} : vector<2x32xf32>, vector<32x32xf32>, vector<2x32xf32> -> vector<2x32xf32>
    %cst_317 = arith.constant dense<0.000000e+00> : vector<2x32xf32>
    %798 = tpu.matmul %784, %692, %cst_317 {dimension_numbers = #tpu.dot_dimension_numbers<[1], [0], [0], [1], [0, 0, 1, 1], [], []>} : vector<2x32xf32>, vector<32x32xf32>, vector<2x32xf32> -> vector<2x32xf32>
    %799 = arith.addf %797, %798 : vector<2x32xf32>
    %800 = arith.addf %799, %708 : vector<2x32xf32>
    %801 = arith.negf %788 : vector<2x32xf32>
    %802 = math.exp %801 : vector<2x32xf32>
    %cst_318 = arith.constant 1.000000e+00 : f32
    %803 = vector.broadcast %cst_318 : f32 to vector<2x32xf32>
    %804 = arith.addf %803, %802 : vector<2x32xf32>
    %805 = arith.divf %803, %804 : vector<2x32xf32>
    %806 = arith.negf %792 : vector<2x32xf32>
    %807 = math.exp %806 : vector<2x32xf32>
    %cst_319 = arith.constant 1.000000e+00 : f32
    %808 = vector.broadcast %cst_319 : f32 to vector<2x32xf32>
    %809 = arith.addf %808, %807 : vector<2x32xf32>
    %810 = arith.divf %808, %809 : vector<2x32xf32>
    %811 = math.tanh %796 : vector<2x32xf32>
    %812 = arith.negf %800 : vector<2x32xf32>
    %813 = math.exp %812 : vector<2x32xf32>
    %cst_320 = arith.constant 1.000000e+00 : f32
    %814 = vector.broadcast %cst_320 : f32 to vector<2x32xf32>
    %815 = arith.addf %814, %813 : vector<2x32xf32>
    %816 = arith.divf %814, %815 : vector<2x32xf32>
    %817 = arith.mulf %810, %782 : vector<2x32xf32>
    %818 = arith.mulf %805, %811 : vector<2x32xf32>
    %819 = arith.addf %817, %818 : vector<2x32xf32>
    %820 = math.tanh %819 : vector<2x32xf32>
    %821 = arith.mulf %816, %820 : vector<2x32xf32>
    %cst_321 = arith.constant dense<0.000000e+00> : vector<2x32xf32>
    %822 = tpu.matmul %528, %678, %cst_321 {dimension_numbers = #tpu.dot_dimension_numbers<[1], [0], [0], [1], [0, 0, 1, 1], [], []>} : vector<2x32xf32>, vector<32x32xf32>, vector<2x32xf32> -> vector<2x32xf32>
    %cst_322 = arith.constant dense<0.000000e+00> : vector<2x32xf32>
    %823 = tpu.matmul %821, %686, %cst_322 {dimension_numbers = #tpu.dot_dimension_numbers<[1], [0], [0], [1], [0, 0, 1, 1], [], []>} : vector<2x32xf32>, vector<32x32xf32>, vector<2x32xf32> -> vector<2x32xf32>
    %824 = arith.addf %822, %823 : vector<2x32xf32>
    %825 = arith.addf %824, %696 : vector<2x32xf32>
    %cst_323 = arith.constant dense<0.000000e+00> : vector<2x32xf32>
    %826 = tpu.matmul %528, %680, %cst_323 {dimension_numbers = #tpu.dot_dimension_numbers<[1], [0], [0], [1], [0, 0, 1, 1], [], []>} : vector<2x32xf32>, vector<32x32xf32>, vector<2x32xf32> -> vector<2x32xf32>
    %cst_324 = arith.constant dense<0.000000e+00> : vector<2x32xf32>
    %827 = tpu.matmul %821, %688, %cst_324 {dimension_numbers = #tpu.dot_dimension_numbers<[1], [0], [0], [1], [0, 0, 1, 1], [], []>} : vector<2x32xf32>, vector<32x32xf32>, vector<2x32xf32> -> vector<2x32xf32>
    %828 = arith.addf %826, %827 : vector<2x32xf32>
    %829 = arith.addf %828, %700 : vector<2x32xf32>
    %cst_325 = arith.constant dense<0.000000e+00> : vector<2x32xf32>
    %830 = tpu.matmul %528, %682, %cst_325 {dimension_numbers = #tpu.dot_dimension_numbers<[1], [0], [0], [1], [0, 0, 1, 1], [], []>} : vector<2x32xf32>, vector<32x32xf32>, vector<2x32xf32> -> vector<2x32xf32>
    %cst_326 = arith.constant dense<0.000000e+00> : vector<2x32xf32>
    %831 = tpu.matmul %821, %690, %cst_326 {dimension_numbers = #tpu.dot_dimension_numbers<[1], [0], [0], [1], [0, 0, 1, 1], [], []>} : vector<2x32xf32>, vector<32x32xf32>, vector<2x32xf32> -> vector<2x32xf32>
    %832 = arith.addf %830, %831 : vector<2x32xf32>
    %833 = arith.addf %832, %704 : vector<2x32xf32>
    %cst_327 = arith.constant dense<0.000000e+00> : vector<2x32xf32>
    %834 = tpu.matmul %528, %684, %cst_327 {dimension_numbers = #tpu.dot_dimension_numbers<[1], [0], [0], [1], [0, 0, 1, 1], [], []>} : vector<2x32xf32>, vector<32x32xf32>, vector<2x32xf32> -> vector<2x32xf32>
    %cst_328 = arith.constant dense<0.000000e+00> : vector<2x32xf32>
    %835 = tpu.matmul %821, %692, %cst_328 {dimension_numbers = #tpu.dot_dimension_numbers<[1], [0], [0], [1], [0, 0, 1, 1], [], []>} : vector<2x32xf32>, vector<32x32xf32>, vector<2x32xf32> -> vector<2x32xf32>
    %836 = arith.addf %834, %835 : vector<2x32xf32>
    %837 = arith.addf %836, %708 : vector<2x32xf32>
    %838 = arith.negf %825 : vector<2x32xf32>
    %839 = math.exp %838 : vector<2x32xf32>
    %cst_329 = arith.constant 1.000000e+00 : f32
    %840 = vector.broadcast %cst_329 : f32 to vector<2x32xf32>
    %841 = arith.addf %840, %839 : vector<2x32xf32>
    %842 = arith.divf %840, %841 : vector<2x32xf32>
    %843 = arith.negf %829 : vector<2x32xf32>
    %844 = math.exp %843 : vector<2x32xf32>
    %cst_330 = arith.constant 1.000000e+00 : f32
    %845 = vector.broadcast %cst_330 : f32 to vector<2x32xf32>
    %846 = arith.addf %845, %844 : vector<2x32xf32>
    %847 = arith.divf %845, %846 : vector<2x32xf32>
    %848 = math.tanh %833 : vector<2x32xf32>
    %849 = arith.negf %837 : vector<2x32xf32>
    %850 = math.exp %849 : vector<2x32xf32>
    %cst_331 = arith.constant 1.000000e+00 : f32
    %851 = vector.broadcast %cst_331 : f32 to vector<2x32xf32>
    %852 = arith.addf %851, %850 : vector<2x32xf32>
    %853 = arith.divf %851, %852 : vector<2x32xf32>
    %854 = arith.mulf %847, %819 : vector<2x32xf32>
    %855 = arith.mulf %842, %848 : vector<2x32xf32>
    %856 = arith.addf %854, %855 : vector<2x32xf32>
    %857 = math.tanh %856 : vector<2x32xf32>
    %858 = arith.mulf %853, %857 : vector<2x32xf32>
    %cst_332 = arith.constant dense<0.000000e+00> : vector<2x32xf32>
    %859 = tpu.matmul %565, %678, %cst_332 {dimension_numbers = #tpu.dot_dimension_numbers<[1], [0], [0], [1], [0, 0, 1, 1], [], []>} : vector<2x32xf32>, vector<32x32xf32>, vector<2x32xf32> -> vector<2x32xf32>
    %cst_333 = arith.constant dense<0.000000e+00> : vector<2x32xf32>
    %860 = tpu.matmul %858, %686, %cst_333 {dimension_numbers = #tpu.dot_dimension_numbers<[1], [0], [0], [1], [0, 0, 1, 1], [], []>} : vector<2x32xf32>, vector<32x32xf32>, vector<2x32xf32> -> vector<2x32xf32>
    %861 = arith.addf %859, %860 : vector<2x32xf32>
    %862 = arith.addf %861, %696 : vector<2x32xf32>
    %cst_334 = arith.constant dense<0.000000e+00> : vector<2x32xf32>
    %863 = tpu.matmul %565, %680, %cst_334 {dimension_numbers = #tpu.dot_dimension_numbers<[1], [0], [0], [1], [0, 0, 1, 1], [], []>} : vector<2x32xf32>, vector<32x32xf32>, vector<2x32xf32> -> vector<2x32xf32>
    %cst_335 = arith.constant dense<0.000000e+00> : vector<2x32xf32>
    %864 = tpu.matmul %858, %688, %cst_335 {dimension_numbers = #tpu.dot_dimension_numbers<[1], [0], [0], [1], [0, 0, 1, 1], [], []>} : vector<2x32xf32>, vector<32x32xf32>, vector<2x32xf32> -> vector<2x32xf32>
    %865 = arith.addf %863, %864 : vector<2x32xf32>
    %866 = arith.addf %865, %700 : vector<2x32xf32>
    %cst_336 = arith.constant dense<0.000000e+00> : vector<2x32xf32>
    %867 = tpu.matmul %565, %682, %cst_336 {dimension_numbers = #tpu.dot_dimension_numbers<[1], [0], [0], [1], [0, 0, 1, 1], [], []>} : vector<2x32xf32>, vector<32x32xf32>, vector<2x32xf32> -> vector<2x32xf32>
    %cst_337 = arith.constant dense<0.000000e+00> : vector<2x32xf32>
    %868 = tpu.matmul %858, %690, %cst_337 {dimension_numbers = #tpu.dot_dimension_numbers<[1], [0], [0], [1], [0, 0, 1, 1], [], []>} : vector<2x32xf32>, vector<32x32xf32>, vector<2x32xf32> -> vector<2x32xf32>
    %869 = arith.addf %867, %868 : vector<2x32xf32>
    %870 = arith.addf %869, %704 : vector<2x32xf32>
    %cst_338 = arith.constant dense<0.000000e+00> : vector<2x32xf32>
    %871 = tpu.matmul %565, %684, %cst_338 {dimension_numbers = #tpu.dot_dimension_numbers<[1], [0], [0], [1], [0, 0, 1, 1], [], []>} : vector<2x32xf32>, vector<32x32xf32>, vector<2x32xf32> -> vector<2x32xf32>
    %cst_339 = arith.constant dense<0.000000e+00> : vector<2x32xf32>
    %872 = tpu.matmul %858, %692, %cst_339 {dimension_numbers = #tpu.dot_dimension_numbers<[1], [0], [0], [1], [0, 0, 1, 1], [], []>} : vector<2x32xf32>, vector<32x32xf32>, vector<2x32xf32> -> vector<2x32xf32>
    %873 = arith.addf %871, %872 : vector<2x32xf32>
    %874 = arith.addf %873, %708 : vector<2x32xf32>
    %875 = arith.negf %862 : vector<2x32xf32>
    %876 = math.exp %875 : vector<2x32xf32>
    %cst_340 = arith.constant 1.000000e+00 : f32
    %877 = vector.broadcast %cst_340 : f32 to vector<2x32xf32>
    %878 = arith.addf %877, %876 : vector<2x32xf32>
    %879 = arith.divf %877, %878 : vector<2x32xf32>
    %880 = arith.negf %866 : vector<2x32xf32>
    %881 = math.exp %880 : vector<2x32xf32>
    %cst_341 = arith.constant 1.000000e+00 : f32
    %882 = vector.broadcast %cst_341 : f32 to vector<2x32xf32>
    %883 = arith.addf %882, %881 : vector<2x32xf32>
    %884 = arith.divf %882, %883 : vector<2x32xf32>
    %885 = math.tanh %870 : vector<2x32xf32>
    %886 = arith.negf %874 : vector<2x32xf32>
    %887 = math.exp %886 : vector<2x32xf32>
    %cst_342 = arith.constant 1.000000e+00 : f32
    %888 = vector.broadcast %cst_342 : f32 to vector<2x32xf32>
    %889 = arith.addf %888, %887 : vector<2x32xf32>
    %890 = arith.divf %888, %889 : vector<2x32xf32>
    %891 = arith.mulf %884, %856 : vector<2x32xf32>
    %892 = arith.mulf %879, %885 : vector<2x32xf32>
    %893 = arith.addf %891, %892 : vector<2x32xf32>
    %894 = math.tanh %893 : vector<2x32xf32>
    %895 = arith.mulf %890, %894 : vector<2x32xf32>
    %cst_343 = arith.constant dense<0.000000e+00> : vector<2x32xf32>
    %896 = tpu.matmul %602, %678, %cst_343 {dimension_numbers = #tpu.dot_dimension_numbers<[1], [0], [0], [1], [0, 0, 1, 1], [], []>} : vector<2x32xf32>, vector<32x32xf32>, vector<2x32xf32> -> vector<2x32xf32>
    %cst_344 = arith.constant dense<0.000000e+00> : vector<2x32xf32>
    %897 = tpu.matmul %895, %686, %cst_344 {dimension_numbers = #tpu.dot_dimension_numbers<[1], [0], [0], [1], [0, 0, 1, 1], [], []>} : vector<2x32xf32>, vector<32x32xf32>, vector<2x32xf32> -> vector<2x32xf32>
    %898 = arith.addf %896, %897 : vector<2x32xf32>
    %899 = arith.addf %898, %696 : vector<2x32xf32>
    %cst_345 = arith.constant dense<0.000000e+00> : vector<2x32xf32>
    %900 = tpu.matmul %602, %680, %cst_345 {dimension_numbers = #tpu.dot_dimension_numbers<[1], [0], [0], [1], [0, 0, 1, 1], [], []>} : vector<2x32xf32>, vector<32x32xf32>, vector<2x32xf32> -> vector<2x32xf32>
    %cst_346 = arith.constant dense<0.000000e+00> : vector<2x32xf32>
    %901 = tpu.matmul %895, %688, %cst_346 {dimension_numbers = #tpu.dot_dimension_numbers<[1], [0], [0], [1], [0, 0, 1, 1], [], []>} : vector<2x32xf32>, vector<32x32xf32>, vector<2x32xf32> -> vector<2x32xf32>
    %902 = arith.addf %900, %901 : vector<2x32xf32>
    %903 = arith.addf %902, %700 : vector<2x32xf32>
    %cst_347 = arith.constant dense<0.000000e+00> : vector<2x32xf32>
    %904 = tpu.matmul %602, %682, %cst_347 {dimension_numbers = #tpu.dot_dimension_numbers<[1], [0], [0], [1], [0, 0, 1, 1], [], []>} : vector<2x32xf32>, vector<32x32xf32>, vector<2x32xf32> -> vector<2x32xf32>
    %cst_348 = arith.constant dense<0.000000e+00> : vector<2x32xf32>
    %905 = tpu.matmul %895, %690, %cst_348 {dimension_numbers = #tpu.dot_dimension_numbers<[1], [0], [0], [1], [0, 0, 1, 1], [], []>} : vector<2x32xf32>, vector<32x32xf32>, vector<2x32xf32> -> vector<2x32xf32>
    %906 = arith.addf %904, %905 : vector<2x32xf32>
    %907 = arith.addf %906, %704 : vector<2x32xf32>
    %cst_349 = arith.constant dense<0.000000e+00> : vector<2x32xf32>
    %908 = tpu.matmul %602, %684, %cst_349 {dimension_numbers = #tpu.dot_dimension_numbers<[1], [0], [0], [1], [0, 0, 1, 1], [], []>} : vector<2x32xf32>, vector<32x32xf32>, vector<2x32xf32> -> vector<2x32xf32>
    %cst_350 = arith.constant dense<0.000000e+00> : vector<2x32xf32>
    %909 = tpu.matmul %895, %692, %cst_350 {dimension_numbers = #tpu.dot_dimension_numbers<[1], [0], [0], [1], [0, 0, 1, 1], [], []>} : vector<2x32xf32>, vector<32x32xf32>, vector<2x32xf32> -> vector<2x32xf32>
    %910 = arith.addf %908, %909 : vector<2x32xf32>
    %911 = arith.addf %910, %708 : vector<2x32xf32>
    %912 = arith.negf %899 : vector<2x32xf32>
    %913 = math.exp %912 : vector<2x32xf32>
    %cst_351 = arith.constant 1.000000e+00 : f32
    %914 = vector.broadcast %cst_351 : f32 to vector<2x32xf32>
    %915 = arith.addf %914, %913 : vector<2x32xf32>
    %916 = arith.divf %914, %915 : vector<2x32xf32>
    %917 = arith.negf %903 : vector<2x32xf32>
    %918 = math.exp %917 : vector<2x32xf32>
    %cst_352 = arith.constant 1.000000e+00 : f32
    %919 = vector.broadcast %cst_352 : f32 to vector<2x32xf32>
    %920 = arith.addf %919, %918 : vector<2x32xf32>
    %921 = arith.divf %919, %920 : vector<2x32xf32>
    %922 = math.tanh %907 : vector<2x32xf32>
    %923 = arith.negf %911 : vector<2x32xf32>
    %924 = math.exp %923 : vector<2x32xf32>
    %cst_353 = arith.constant 1.000000e+00 : f32
    %925 = vector.broadcast %cst_353 : f32 to vector<2x32xf32>
    %926 = arith.addf %925, %924 : vector<2x32xf32>
    %927 = arith.divf %925, %926 : vector<2x32xf32>
    %928 = arith.mulf %921, %893 : vector<2x32xf32>
    %929 = arith.mulf %916, %922 : vector<2x32xf32>
    %930 = arith.addf %928, %929 : vector<2x32xf32>
    %931 = math.tanh %930 : vector<2x32xf32>
    %932 = arith.mulf %927, %931 : vector<2x32xf32>
    %cst_354 = arith.constant dense<0.000000e+00> : vector<2x32xf32>
    %933 = tpu.matmul %639, %678, %cst_354 {dimension_numbers = #tpu.dot_dimension_numbers<[1], [0], [0], [1], [0, 0, 1, 1], [], []>} : vector<2x32xf32>, vector<32x32xf32>, vector<2x32xf32> -> vector<2x32xf32>
    %cst_355 = arith.constant dense<0.000000e+00> : vector<2x32xf32>
    %934 = tpu.matmul %932, %686, %cst_355 {dimension_numbers = #tpu.dot_dimension_numbers<[1], [0], [0], [1], [0, 0, 1, 1], [], []>} : vector<2x32xf32>, vector<32x32xf32>, vector<2x32xf32> -> vector<2x32xf32>
    %935 = arith.addf %933, %934 : vector<2x32xf32>
    %936 = arith.addf %935, %696 : vector<2x32xf32>
    %cst_356 = arith.constant dense<0.000000e+00> : vector<2x32xf32>
    %937 = tpu.matmul %639, %680, %cst_356 {dimension_numbers = #tpu.dot_dimension_numbers<[1], [0], [0], [1], [0, 0, 1, 1], [], []>} : vector<2x32xf32>, vector<32x32xf32>, vector<2x32xf32> -> vector<2x32xf32>
    %cst_357 = arith.constant dense<0.000000e+00> : vector<2x32xf32>
    %938 = tpu.matmul %932, %688, %cst_357 {dimension_numbers = #tpu.dot_dimension_numbers<[1], [0], [0], [1], [0, 0, 1, 1], [], []>} : vector<2x32xf32>, vector<32x32xf32>, vector<2x32xf32> -> vector<2x32xf32>
    %939 = arith.addf %937, %938 : vector<2x32xf32>
    %940 = arith.addf %939, %700 : vector<2x32xf32>
    %cst_358 = arith.constant dense<0.000000e+00> : vector<2x32xf32>
    %941 = tpu.matmul %639, %682, %cst_358 {dimension_numbers = #tpu.dot_dimension_numbers<[1], [0], [0], [1], [0, 0, 1, 1], [], []>} : vector<2x32xf32>, vector<32x32xf32>, vector<2x32xf32> -> vector<2x32xf32>
    %cst_359 = arith.constant dense<0.000000e+00> : vector<2x32xf32>
    %942 = tpu.matmul %932, %690, %cst_359 {dimension_numbers = #tpu.dot_dimension_numbers<[1], [0], [0], [1], [0, 0, 1, 1], [], []>} : vector<2x32xf32>, vector<32x32xf32>, vector<2x32xf32> -> vector<2x32xf32>
    %943 = arith.addf %941, %942 : vector<2x32xf32>
    %944 = arith.addf %943, %704 : vector<2x32xf32>
    %cst_360 = arith.constant dense<0.000000e+00> : vector<2x32xf32>
    %945 = tpu.matmul %639, %684, %cst_360 {dimension_numbers = #tpu.dot_dimension_numbers<[1], [0], [0], [1], [0, 0, 1, 1], [], []>} : vector<2x32xf32>, vector<32x32xf32>, vector<2x32xf32> -> vector<2x32xf32>
    %cst_361 = arith.constant dense<0.000000e+00> : vector<2x32xf32>
    %946 = tpu.matmul %932, %692, %cst_361 {dimension_numbers = #tpu.dot_dimension_numbers<[1], [0], [0], [1], [0, 0, 1, 1], [], []>} : vector<2x32xf32>, vector<32x32xf32>, vector<2x32xf32> -> vector<2x32xf32>
    %947 = arith.addf %945, %946 : vector<2x32xf32>
    %948 = arith.addf %947, %708 : vector<2x32xf32>
    %949 = arith.negf %936 : vector<2x32xf32>
    %950 = math.exp %949 : vector<2x32xf32>
    %cst_362 = arith.constant 1.000000e+00 : f32
    %951 = vector.broadcast %cst_362 : f32 to vector<2x32xf32>
    %952 = arith.addf %951, %950 : vector<2x32xf32>
    %953 = arith.divf %951, %952 : vector<2x32xf32>
    %954 = arith.negf %940 : vector<2x32xf32>
    %955 = math.exp %954 : vector<2x32xf32>
    %cst_363 = arith.constant 1.000000e+00 : f32
    %956 = vector.broadcast %cst_363 : f32 to vector<2x32xf32>
    %957 = arith.addf %956, %955 : vector<2x32xf32>
    %958 = arith.divf %956, %957 : vector<2x32xf32>
    %959 = math.tanh %944 : vector<2x32xf32>
    %960 = arith.negf %948 : vector<2x32xf32>
    %961 = math.exp %960 : vector<2x32xf32>
    %cst_364 = arith.constant 1.000000e+00 : f32
    %962 = vector.broadcast %cst_364 : f32 to vector<2x32xf32>
    %963 = arith.addf %962, %961 : vector<2x32xf32>
    %964 = arith.divf %962, %963 : vector<2x32xf32>
    %965 = arith.mulf %958, %930 : vector<2x32xf32>
    %966 = arith.mulf %953, %959 : vector<2x32xf32>
    %967 = arith.addf %965, %966 : vector<2x32xf32>
    %968 = math.tanh %967 : vector<2x32xf32>
    %969 = arith.mulf %964, %968 : vector<2x32xf32>
    %cst_365 = arith.constant dense<0.000000e+00> : vector<2x32xf32>
    %970 = tpu.matmul %676, %678, %cst_365 {dimension_numbers = #tpu.dot_dimension_numbers<[1], [0], [0], [1], [0, 0, 1, 1], [], []>} : vector<2x32xf32>, vector<32x32xf32>, vector<2x32xf32> -> vector<2x32xf32>
    %cst_366 = arith.constant dense<0.000000e+00> : vector<2x32xf32>
    %971 = tpu.matmul %969, %686, %cst_366 {dimension_numbers = #tpu.dot_dimension_numbers<[1], [0], [0], [1], [0, 0, 1, 1], [], []>} : vector<2x32xf32>, vector<32x32xf32>, vector<2x32xf32> -> vector<2x32xf32>
    %972 = arith.addf %970, %971 : vector<2x32xf32>
    %973 = arith.addf %972, %696 : vector<2x32xf32>
    %cst_367 = arith.constant dense<0.000000e+00> : vector<2x32xf32>
    %974 = tpu.matmul %676, %680, %cst_367 {dimension_numbers = #tpu.dot_dimension_numbers<[1], [0], [0], [1], [0, 0, 1, 1], [], []>} : vector<2x32xf32>, vector<32x32xf32>, vector<2x32xf32> -> vector<2x32xf32>
    %cst_368 = arith.constant dense<0.000000e+00> : vector<2x32xf32>
    %975 = tpu.matmul %969, %688, %cst_368 {dimension_numbers = #tpu.dot_dimension_numbers<[1], [0], [0], [1], [0, 0, 1, 1], [], []>} : vector<2x32xf32>, vector<32x32xf32>, vector<2x32xf32> -> vector<2x32xf32>
    %976 = arith.addf %974, %975 : vector<2x32xf32>
    %977 = arith.addf %976, %700 : vector<2x32xf32>
    %cst_369 = arith.constant dense<0.000000e+00> : vector<2x32xf32>
    %978 = tpu.matmul %676, %682, %cst_369 {dimension_numbers = #tpu.dot_dimension_numbers<[1], [0], [0], [1], [0, 0, 1, 1], [], []>} : vector<2x32xf32>, vector<32x32xf32>, vector<2x32xf32> -> vector<2x32xf32>
    %cst_370 = arith.constant dense<0.000000e+00> : vector<2x32xf32>
    %979 = tpu.matmul %969, %690, %cst_370 {dimension_numbers = #tpu.dot_dimension_numbers<[1], [0], [0], [1], [0, 0, 1, 1], [], []>} : vector<2x32xf32>, vector<32x32xf32>, vector<2x32xf32> -> vector<2x32xf32>
    %980 = arith.addf %978, %979 : vector<2x32xf32>
    %981 = arith.addf %980, %704 : vector<2x32xf32>
    %cst_371 = arith.constant dense<0.000000e+00> : vector<2x32xf32>
    %982 = tpu.matmul %676, %684, %cst_371 {dimension_numbers = #tpu.dot_dimension_numbers<[1], [0], [0], [1], [0, 0, 1, 1], [], []>} : vector<2x32xf32>, vector<32x32xf32>, vector<2x32xf32> -> vector<2x32xf32>
    %cst_372 = arith.constant dense<0.000000e+00> : vector<2x32xf32>
    %983 = tpu.matmul %969, %692, %cst_372 {dimension_numbers = #tpu.dot_dimension_numbers<[1], [0], [0], [1], [0, 0, 1, 1], [], []>} : vector<2x32xf32>, vector<32x32xf32>, vector<2x32xf32> -> vector<2x32xf32>
    %984 = arith.addf %982, %983 : vector<2x32xf32>
    %985 = arith.addf %984, %708 : vector<2x32xf32>
    %986 = arith.negf %973 : vector<2x32xf32>
    %987 = math.exp %986 : vector<2x32xf32>
    %cst_373 = arith.constant 1.000000e+00 : f32
    %988 = vector.broadcast %cst_373 : f32 to vector<2x32xf32>
    %989 = arith.addf %988, %987 : vector<2x32xf32>
    %990 = arith.divf %988, %989 : vector<2x32xf32>
    %991 = arith.negf %977 : vector<2x32xf32>
    %992 = math.exp %991 : vector<2x32xf32>
    %cst_374 = arith.constant 1.000000e+00 : f32
    %993 = vector.broadcast %cst_374 : f32 to vector<2x32xf32>
    %994 = arith.addf %993, %992 : vector<2x32xf32>
    %995 = arith.divf %993, %994 : vector<2x32xf32>
    %996 = math.tanh %981 : vector<2x32xf32>
    %997 = arith.negf %985 : vector<2x32xf32>
    %998 = math.exp %997 : vector<2x32xf32>
    %cst_375 = arith.constant 1.000000e+00 : f32
    %999 = vector.broadcast %cst_375 : f32 to vector<2x32xf32>
    %1000 = arith.addf %999, %998 : vector<2x32xf32>
    %1001 = arith.divf %999, %1000 : vector<2x32xf32>
    %1002 = arith.mulf %995, %967 : vector<2x32xf32>
    %1003 = arith.mulf %990, %996 : vector<2x32xf32>
    %1004 = arith.addf %1002, %1003 : vector<2x32xf32>
    %1005 = math.tanh %1004 : vector<2x32xf32>
    %1006 = arith.mulf %1001, %1005 : vector<2x32xf32>
    %c0_376 = arith.constant 0 : index
    %c0_377 = arith.constant 0 : index
    %1007 = vector.load %arg10[%c0_376, %c0_377] : memref<32x1xf32, #tpu.memory_space<vmem>>, vector<32x1xf32>
    %cst_378 = arith.constant dense<0.000000e+00> : vector<2x1xf32>
    %1008 = tpu.matmul %1006, %1007, %cst_378 {dimension_numbers = #tpu.dot_dimension_numbers<[1], [0], [0], [1], [0, 0, 1, 1], [], []>} : vector<2x32xf32>, vector<32x1xf32>, vector<2x1xf32> -> vector<2x1xf32>
    %c0_379 = arith.constant 0 : index
    %c0_380 = arith.constant 0 : index
    %1009 = vector.load %arg11[%c0_379, %c0_380] : memref<1x1xf32, #tpu.memory_space<vmem>>, vector<1x1xf32>
    %1010 = vector.broadcast %1009 : vector<1x1xf32> to vector<2x1xf32>
    %1011 = arith.addf %1008, %1010 : vector<2x1xf32>
    %1012 = arith.negf %1011 : vector<2x1xf32>
    %1013 = math.exp %1012 : vector<2x1xf32>
    %cst_381 = arith.constant 1.000000e+00 : f32
    %1014 = vector.broadcast %cst_381 : f32 to vector<2x1xf32>
    %1015 = arith.addf %1014, %1013 : vector<2x1xf32>
    %1016 = arith.divf %1014, %1015 : vector<2x1xf32>
    %c0_382 = arith.constant 0 : index
    %c0_383 = arith.constant 0 : index
    %1017 = vector.load %arg12[%c0_382, %c0_383] : memref<2x1xf32, #tpu.memory_space<vmem>>, vector<2x1xf32>
    tpu.vector_store %arg12[%c0_382, %c0_383], %1016 {strides = array<i32>} : memref<2x1xf32, #tpu.memory_space<vmem>>, vector<2x1xf32>,
    return
  }
}

</mosaic_0001>

<bundles_post_ra>
// kernel: tpu_custom_call.1
= control target key start
LH: loop header
LB: loop body
LE: loop exit
PB: predicated region body
PF: predicated region fallthrough
CT: control target
= control target key end

     0   :  { %s21500_s0 = inlined_call_operand.vmem [shape: f32[2,8,4], index: 0, kind: input, shape index: {}]   ;;  %s21501_s1 = inlined_call_operand.vmem [shape: f32[4,4,32], index: 1, kind: input, shape index: {}]   ;;  %s21502_s2 = inlined_call_operand.hbm [shape: f32[4,32,32], index: 2, kind: input, shape index: {}]   ;;  %s21503_s3 = inlined_call_operand.vmem [shape: f32[4,1,32], index: 3, kind: input, shape index: {}]   ;;  %s21504_s4 = inlined_call_operand.hbm [shape: f32[4,32,32], index: 4, kind: input, shape index: {}]   ;;  %s21505_s5 = inlined_call_operand.hbm [shape: f32[4,32,32], index: 5, kind: input, shape index: {}]   ;;  %s21506_s6 = inlined_call_operand.vmem [shape: f32[4,1,32], index: 6, kind: input, shape index: {}]   ;;  %s21507_s7 = inlined_call_operand.hbm [shape: f32[4,32,32], index: 7, kind: input, shape index: {}]   ;;  %s21508_s8 = inlined_call_operand.hbm [shape: f32[4,32,32], index: 8, kind: input, shape index: {}]   ;;  %s21509_s9 = inlined_call_operand.vmem [shape: f32[4,1,32], index: 9, kind: input, shape index: {}]   ;;  %s21510_s10 = inlined_call_operand.vmem [shape: f32[32,1], index: 10, kind: input, shape index: {}]   ;;  %s21511_s11 = inlined_call_operand.<no memory space> [shape: f32[1,1], index: 11, kind: input, shape index: {}]   ;;  %s21512_s12 = inlined_call_operand.vmem [shape: f32[2,1], index: 12, kind: output, shape index: {}]  }
   0x1   :  { %v17_v0 = vstv %s21511_s11 }
   0x2   :  { %18 = vst [vmem:[#allocation2] sm:$0x1] %v17_v0 }
   0x3   :  { %19 = vsyncpa [#allocation4], 0 }
   0x4   :  { %20 = vsyncpa [#allocation6], 0 }
   0x5   :  { %21 = vsyncpa [#allocation9], 0  ;;  %s19252_s23 = smov [#allocation5]   ;;  %s19253_s25 = smov [#allocation8]  }
   0x6   :  { %s45_s24 = sshll.u32 %s19252_s23, 4  ;;  %s71_s26 = sshll.u32 %s19253_s25, 4  ;;  %s46_s24 = int_to_ptr.vmem [resolvable:$true] %s45_s24  ;;  %s19330_s26 = int_to_ptr.vmem [resolvable:$true] %s71_s26 }
   0x7   :  { %s19136_s29 = scalar_lea.hbm %s21504_s4, 2048 }
   0x8   :  { %p19137_p0 = scmp.ne.s32.totalorder %s21504_s4, %s19136_s29  ;;  %p19140_p1 = scmp.lt.u32.totalorder %s19136_s29, %s21504_s4 }
   0xa   :  { %p19142_p2 = pnand %p19140_p1, %p19137_p0 }
   0xc   :  { %19145 = shalt.err (!%p19142_p2)
}
   0xd   :  { %s19146_s15 = scalar_lea.vmem %s46_s24, 2048  ;;  %p19151_p4 = scmp.lt.s32.totalorder %s46_s24, %s46_s24 }
   0xe   :  { %p19147_p3 = scmp.ne.s32.totalorder %s46_s24, %s19146_s15  ;;  %p19152_p5 = scmp.lt.s32.totalorder %s19146_s15, %s19146_s15 }
  0x10   :  { %p19153_p6 = por %p19152_p5, %p19151_p4 }
  0x12   :  { %p19154_p7 = pnand %p19153_p6, %p19147_p3 }
  0x14   :  { %19157 = shalt.err (!%p19154_p7)
}
  0x15   :  { %s19254_s16 = smov 128   ;;  %s19255_s17 = smov 8  }
  0x16   :  { %51 = dma.hbm_to_vmem [thread:$0]  %s21504_s4, 2048, %s46_s24, [#allocation6], %s19254_s16, %s19254_s16, %s19255_s17  }
  0x17   :  { %s19158_s22 = scalar_lea.hbm %s21507_s7, 2048 }
  0x18   :  { %p19159_p8 = scmp.ne.s32.totalorder %s21507_s7, %s19158_s22  ;;  %p19162_p9 = scmp.lt.u32.totalorder %s19158_s22, %s21507_s7 }
  0x1a   :  { %p19164_p10 = pnand %p19162_p9, %p19159_p8 }
  0x1c   :  { %19167 = shalt.err (!%p19164_p10)
}
  0x1d   :  { %s19168_s29 = scalar_lea.vmem %s19330_s26, 2048  ;;  %p19173_p12 = scmp.lt.s32.totalorder %s19330_s26, %s19330_s26 }
  0x1e   :  { %p19169_p11 = scmp.ne.s32.totalorder %s19330_s26, %s19168_s29  ;;  %p19174_p13 = scmp.lt.s32.totalorder %s19168_s29, %s19168_s29 }
  0x20   :  { %p19175_p0 = por %p19174_p13, %p19173_p12 }
  0x22   :  { %p19176_p1 = pnand %p19175_p0, %p19169_p11 }
  0x24   :  { %19179 = shalt.err (!%p19176_p1)
}
  0x25   :  { %77 = dma.hbm_to_vmem [thread:$0]  %s21507_s7, 2048, %s19330_s26, [#allocation9], %s19254_s16, %s19254_s16, %s19255_s17  }
  0x26   :  { %s19256_s30 = smov [#allocation3]   ;;  %s19257_s11 = smov [#allocation7]  }
  0x27   :  { %s31_s13 = sshll.u32 %s19256_s30, 4  ;;  %s57_s14 = sshll.u32 %s19257_s11, 4  ;;  %s32_s13 = int_to_ptr.vmem [resolvable:$true] %s31_s13  ;;  %s19367_s14 = int_to_ptr.vmem [resolvable:$true] %s57_s14 }
  0x28   :  { %s19180_s19 = scalar_lea.hbm %s21502_s2, 2048 }
  0x29   :  { %p19181_p2 = scmp.ne.s32.totalorder %s21502_s2, %s19180_s19  ;;  %p19184_p3 = scmp.lt.u32.totalorder %s19180_s19, %s21502_s2 }
  0x2b   :  { %p19186_p4 = pnand %p19184_p3, %p19181_p2 }
  0x2d   :  { %19189 = shalt.err (!%p19186_p4)
}
  0x2e   :  { %s19190_s7 = scalar_lea.vmem %s32_s13, 2048  ;;  %p19195_p6 = scmp.lt.s32.totalorder %s32_s13, %s32_s13 }
  0x2f   :  { %p19191_p5 = scmp.ne.s32.totalorder %s32_s13, %s19190_s7  ;;  %p19196_p7 = scmp.lt.s32.totalorder %s19190_s7, %s19190_s7 }
  0x31   :  { %p19197_p8 = por %p19196_p7, %p19195_p6 }
  0x33   :  { %p19198_p9 = pnand %p19197_p8, %p19191_p5 }
  0x35   :  { %19201 = shalt.err (!%p19198_p9)
}
  0x36   :  { %37 = dma.hbm_to_vmem [thread:$0]  %s21502_s2, 2048, %s32_s13, [#allocation4], %s19254_s16, %s19254_s16, %s19255_s17  }
  0x37   :  { %s19202_s29 = scalar_lea.hbm %s21505_s5, 2048 }
  0x38   :  { %p19203_p10 = scmp.ne.s32.totalorder %s21505_s5, %s19202_s29  ;;  %p19206_p11 = scmp.lt.u32.totalorder %s19202_s29, %s21505_s5 }
  0x3a   :  { %p19208_p12 = pnand %p19206_p11, %p19203_p10 }
  0x3c   :  { %19211 = shalt.err (!%p19208_p12)
}
  0x3d   :  { %s19212_s15 = scalar_lea.vmem %s19367_s14, 2048  ;;  %p19217_p0 = scmp.lt.s32.totalorder %s19367_s14, %s19367_s14 }
  0x3e   :  { %p19213_p13 = scmp.ne.s32.totalorder %s19367_s14, %s19212_s15  ;;  %p19218_p1 = scmp.lt.s32.totalorder %s19212_s15, %s19212_s15 }
  0x40   :  { %p19219_p2 = por %p19218_p1, %p19217_p0 }
  0x42   :  { %p19220_p3 = pnand %p19219_p2, %p19213_p13 }
  0x44   :  { %19223 = shalt.err (!%p19220_p3)
}
  0x45   :  { %63 = dma.hbm_to_vmem [thread:$0]  %s21505_s5, 2048, %s19367_s14, [#allocation6], %s19254_s16, %s19254_s16, %s19255_s17  }
  0x46   :  { %s19258_s18 = smov [#allocation10]   ;;  %s19224_s22 = scalar_lea.hbm %s21508_s8, 2048 }
  0x47   :  { %s83_s19 = sshll.u32 %s19258_s18, 4  ;;  %p19225_p4 = scmp.ne.s32.totalorder %s21508_s8, %s19224_s22  ;;  %s84_s19 = int_to_ptr.vmem [resolvable:$true] %s83_s19 }
  0x48   :  { %p19228_p5 = scmp.lt.u32.totalorder %s19224_s22, %s21508_s8 }
  0x4a   :  { %p19230_p6 = pnand %p19228_p5, %p19225_p4 }
  0x4c   :  { %19233 = shalt.err (!%p19230_p6)
}
  0x4d   :  { %s19234_s27 = scalar_lea.vmem %s84_s19, 2048  ;;  %p19239_p8 = scmp.lt.s32.totalorder %s84_s19, %s84_s19 }
  0x4e   :  { %p19235_p7 = scmp.ne.s32.totalorder %s84_s19, %s19234_s27  ;;  %p19240_p9 = scmp.lt.s32.totalorder %s19234_s27, %s19234_s27 }
  0x50   :  { %p19241_p10 = por %p19240_p9, %p19239_p8 }
  0x52   :  { %p19242_p11 = pnand %p19241_p10, %p19235_p7 }
  0x54   :  { %19245 = shalt.err (!%p19242_p11)
}
  0x55   :  { %89 = dma.hbm_to_vmem [thread:$0]  %s21508_s8, 2048, %s84_s19, [#allocation9], %s19254_s16, %s19254_s16, %s19255_s17  }
  0x56   :  { %19246 = dma.done.wait [#allocation4], 2048  }
  0x57   :  { %19247 = vsyncadd [#allocation4], 4294965248 }
  0x58   :  { %19248 = dma.done.wait [#allocation6], 4096  }
  0x59   :  { %19249 = vsyncadd [#allocation6], 4294963200 }
  0x5a   :  { %19250 = dma.done.wait [#allocation9], 4096  }
  0x5b   :  { %19251 = vsyncadd [#allocation9], 4294963200  ;;  %v21515_v1 = vmov 0.0|0.0   ;;  %vm19260_vm0 = vmmov 0   ;;  %v21513_v2 = vmov 0.0   ;;  %v120_v3 = vld [vmem:[#allocation3] sm:$0xff] }
  0x5c   :  { %17758 = vmatprep.subr.bf16.mxu0 %v21515_v1  ;;  %15835 = vmatprep.mubr.msk.f32.mxu0 %vm19260_vm0, %v21513_v2  ;;  %v121_v4 = vld [vmem:[#allocation3 + $0x8] sm:$0xff]  ;;  %v122_v5 = vld [vmem:[#allocation3 + $0x10] sm:$0xff]  ;;  %v123_v7 = vld [vmem:[#allocation3 + $0x18] sm:$0xff]  ;;  %vm252_vm1 = vcmask 1043456   ;;  %vm247_vm2 = vcmask 1041409   ;;  %vm249_vm3 = vcmask 31744  }
  0x5d   :  { %17764 = vmatprep.subr.bf16.mxu1 %v21515_v1  ;;  %15851 = vmatprep.mubr.msk.f32.mxu1 %vm19260_vm0, %v21513_v2  ;;  %v19425_v6 = vpack.c.bf16 %v121_v4, %v120_v3  ;;  %v125_v8 = vld [vmem:[#allocation3 + $0x20] sm:$0xff]  ;;  %v126_v9 = vld [vmem:[#allocation3 + $0x28] sm:$0xff]  ;;  %v19430_v11 = vpack.c.bf16 %v123_v7, %v122_v5  ;;  %v127_v12 = vld [vmem:[#allocation3 + $0x30] sm:$0xff]  ;;  %vm170_vm4 = vcmask 261120   ;;  %vm14638_vm5 = vcmask 1024  }
  0x5e   :  { %v19427_v10 = vpack.c.bf16 %v126_v9, %v125_v8  ;;  %v128_v13 = vld [vmem:[#allocation3 + $0x38] sm:$0xff]  ;;  %v19437_v14 = vld [vmem:[%s21500_s0 + $0x8] sm:$0xff]  ;;  %v132_v22 = vld [vmem:[#allocation3 + $0x50] sm:$0xff] }
  0x5f   :  { %17760 = vmatpush3.bf16.msra.mxu0 %v19425_v6  ;;  %v19439_v15 = vpack.c.bf16 %v128_v13, %v127_v12  ;;  %v130_v16 = vld [vmem:[#allocation3 + $0x40] sm:$0xff]  ;;  %v131_v17 = vld [vmem:[#allocation3 + $0x48] sm:$0xff]  ;;  %v246_v18 = vrot.slane %v19437_v14, 7  ;;  %v133_v23 = vld [vmem:[#allocation3 + $0x58] sm:$0xff] }
  0x60   :  { %17761 = vmatprep.subr.bf16.mxu0 %v21515_v1  ;;  %17766 = vmatpush3.bf16.msra.mxu1 %v19427_v10  ;;  %v19448_v19 = vld [vmem:[%s21501_s1] sm:$0xf]  ;;  %v19457_v21 = vpack.c.bf16 %v131_v17, %v130_v16  ;;  %v19470_v25 = vld [vmem:[%s21501_s1 + $0x4] sm:$0xf]  ;;  %v19474_v26 = vpack.c.bf16 %v133_v23, %v132_v22  ;;  %v19488_v27 = vld [vmem:[%s21501_s1 + $0x8] sm:$0xf] }
  0x61   :  { %17767 = vmatprep.subr.bf16.mxu1 %v21515_v1  ;;  %v19453_v20 = vld [vmem:[%s21500_s0] sm:$0xff]  ;;  %v136_v29 = vld [vmem:[#allocation3 + $0x68] sm:$0xff]  ;;  %v137_v32 = vld [vmem:[#allocation3 + $0x70] sm:$0xff] }
  0x62   :  { %v248_v24 = vsel %vm247_vm2, %v246_v18, %v19453_v20  ;;  %v135_v28 = vld [vmem:[#allocation3 + $0x60] sm:$0xff]  ;;  %v19496_v30 = vld [vmem:[%s21501_s1 + $0xc] sm:$0xf]  ;;  %v138_v33 = vld [vmem:[#allocation3 + $0x78] sm:$0xff]  ;;  %v856_v35 = vrot.slane %v19453_v20, 1 }
  0x63   :  { %17763 = vmatpush3.bf16.msra.mxu0 %v19430_v11  ;;  %v19502_v31 = vpack.c.bf16 %v136_v29, %v135_v28  ;;  %v19513_v34 = vpack.c.bf16 %v138_v33, %v137_v32  ;;  %v19549_v41 = vld [vmem:[%s21503_s3] ss:$0 sm:$0xff]  ;;  %v19555_v46 = vld [vmem:[%s21503_s3 + $0x1] ss:$0 sm:$0xff]  ;;  %v19561_v60 = vld [vmem:[%s21503_s3 + $0x2] ss:$0 sm:$0xff] }
  0x64   :  { %15838 = vmatprep.subr.mxu0 %v21513_v2  ;;  %17769 = vmatpush3.bf16.msra.mxu1 %v19439_v15  ;;  %v19536_v36 = vsel %vm247_vm2, %v19437_v14, %v856_v35  ;;  %v19567_v63 = vld [vmem:[%s21503_s3 + $0x3] ss:$0 sm:$0xff] }
  0x65   :  { %17770 = vmatprep.subr.bf16.mxu1 %v21515_v1 }
  0x66   :  { %15836 = vmatmul.mubr.f32.vlgmr.msra.gmra.mrb[0].mxu0 %v21513_v2 }
  0x67   :  { %15839 = vmatpush3.msk.msra.mxu0 %vm252_vm1, %v19448_v19  ;;  %15840 = vmatprep.mubr.msk.f32.mxu0 %vm19260_vm0, %v21513_v2 }
  0x68   :  { %15854 = vmatprep.subr.mxu0 %v21513_v2  ;;  %15852 = vmatmul.mubr.f32.vlgmr.msra.gmra.mrb[0].mxu1 %v21513_v2 }
  0x69   :  { %17772 = vmatpush3.bf16.msra.mxu1 %v19457_v21  ;;  %15867 = vmatprep.mubr.msk.f32.mxu1 %vm19260_vm0, %v21513_v2 }
  0x6a   :  { %15841 = vmatmul.mubr.msk.f32.vlgmr.msra.gmra.mrb[2].mxu0 %vm249_vm3, %v248_v24  ;;  %17773 = vmatprep.subr.bf16.mxu1 %v21515_v1 }
  0x6b   :  { %15855 = vmatpush3.msk.msra.mxu0 %vm252_vm1, %v19470_v25  ;;  %15856 = vmatprep.mubr.msk.f32.mxu0 %vm19260_vm0, %v21513_v2 }
  0x6c   :  { %15870 = vmatprep.subr.mxu0 %v21513_v2 }
  0x6d   :  { %17775 = vmatpush3.bf16.msra.mxu1 %v19474_v26 }
  0x6e   :  { %15857 = vmatmul.mubr.msk.f32.vlgmr.msra.gmra.mrb[4].mxu0 %vm249_vm3, %v248_v24  ;;  %15886 = vmatprep.subr.mxu1 %v21513_v2 }
  0x6f   :  { %15871 = vmatpush3.msk.msra.mxu0 %vm252_vm1, %v19488_v27  ;;  %15872 = vmatprep.mubr.msk.f32.mxu0 %vm19260_vm0, %v21513_v2 }
  0x70   :  { %17776 = vmatprep.subr.bf16.mxu0 %v21515_v1  ;;  %15868 = vmatmul.mubr.f32.vlgmr.msra.gmra.mrb[2].mxu1 %v21513_v2 }
  0x71   :  { %15887 = vmatpush3.msk.msra.mxu1 %vm252_vm1, %v19496_v30  ;;  %15888 = vmatprep.mubr.msk.f32.mxu1 %vm19260_vm0, %v21513_v2 }
  0x72   :  { %15873 = vmatmul.mubr.msk.f32.vlgmr.msra.gmra.mrb[6].mxu0 %vm249_vm3, %v248_v24  ;;  %17782 = vmatprep.subr.bf16.mxu1 %v21515_v1 }
  0x73   :  { %17778 = vmatpush3.bf16.msra.mxu0 %v19502_v31  ;;  %15883 = vmatprep.mubr.msk.f32.mxu0 %vm19260_vm0, %v21513_v2 }
  0x74   :  { %17779 = vmatprep.subr.bf16.mxu0 %v21515_v1  ;;  %15889 = vmatmul.mubr.msk.f32.vlgmr.msra.gmra.mrb[4].mxu1 %vm249_vm3, %v248_v24 }
  0x75   :  { %17784 = vmatpush3.bf16.msra.mxu1 %v19425_v6  ;;  %15899 = vmatprep.mubr.msk.f32.mxu1 %vm19260_vm0, %v21513_v2 }
  0x76   :  { %17785 = vmatprep.subr.bf16.mxu1 %v21515_v1 }
  0x77   :  { %17781 = vmatpush3.bf16.msra.mxu0 %v19513_v34 }
  0x78   :  { %15902 = vmatprep.subr.mxu0 %v21513_v2 }
  0x79   :  { %17787 = vmatpush3.bf16.msra.mxu1 %v19430_v11 }
  0x7a   :  { %15884 = vmatmul.mubr.f32.vlgmr.msra.gmra.mrb[8].mxu0 %v21513_v2  ;;  %15918 = vmatprep.subr.mxu1 %v21513_v2 }
  0x7b   :  { %15903 = vmatpush3.msk.msra.mxu0 %vm252_vm1, %v19448_v19  ;;  %15904 = vmatprep.mubr.msk.f32.mxu0 %vm19260_vm0, %v21513_v2 }
  0x7c   :  { %17788 = vmatprep.subr.bf16.mxu0 %v21515_v1 }
  0x7e   :  { %15905 = vmatmul.mubr.msk.f32.vlgmr.msra.gmra.mrb[10].mxu0 %vm249_vm3, %v19536_v36 }
  0x7f   :  { %17790 = vmatpush3.bf16.msra.mxu0 %v19427_v10  ;;  %15915 = vmatprep.mubr.msk.f32.mxu0 %vm19260_vm0, %v21513_v2 }
  0x80   :  { %17791 = vmatprep.subr.bf16.mxu0 %v21515_v1 }
  0x83   :  { %17793 = vmatpush3.bf16.msra.mxu0 %v19439_v15 }
  0x84   :  { %15934 = vmatprep.subr.mxu0 %v21513_v2 }
 0x139   :  { %v240_v37 = vpop.f32.mrb[0].mxu0 }
 0x13a   :  { %v15837_v38 = vpop.f32.mrb[1].mxu0 }
 0x13b   :  { %v393_v39 = vpop.f32.mrb[0].mxu1  ;;  %v1451_v38 = vrot.slane %v19453_v20, 2 }
 0x13c   :  { %v15853_v40 = vpop.f32.mrb[1].mxu1 }
 0x13d   :  { %v322_v42 = vpop.f32.mrb[2].mxu0 }
 0x13e   :  { %v323_v43 = vadd.f32 %v322_v42, %v240_v37  ;;  %v15842_v44 = vpop.f32.mrb[3].mxu0 }
 0x140   :  { %v326_v45 = vadd.f32 %v19549_v41, %v323_v43 }
 0x141   :  { %v466_v47 = vpop.f32.mrb[4].mxu0 }
 0x142   :  { %v14665_v48 = vmul.f32 -1.442695, %v326_v45  ;;  %v467_v49 = vadd.f32 %v466_v47, %v393_v39  ;;  %v15858_v50 = vpop.f32.mrb[5].mxu0  ;;  %v1452_v39 = vrot.slane %v19437_v14, 1 }
 0x143   :  { %v537_v51 = vpop.f32.mrb[2].mxu1 }
 0x144   :  { %18734 = vpow2.f32 %v14665_v48  ;;  %v470_v52 = vadd.f32 %v19555_v46, %v467_v49  ;;  %v15869_v53 = vpop.f32.mrb[3].mxu1  ;;  %v19630_v40 = vsel %vm247_vm2, %v1452_v39, %v1451_v38 }
 0x145   :  { %v610_v54 = vpop.f32.mrb[6].mxu0 }
 0x146   :  { %v14666_v55 = vmul.f32 -1.442695, %v470_v52  ;;  %v611_v56 = vadd.f32 %v610_v54, %v537_v51  ;;  %v15874_v57 = vpop.f32.mrb[7].mxu0 }
 0x147   :  { %v754_v58 = vpop.f32.mrb[4].mxu1 }
 0x148   :  { %18736 = vpow2.f32 %v14666_v55  ;;  %v15890_v59 = vpop.f32.mrb[5].mxu1  ;;  %v614_v61 = vadd.f32 %v19561_v60, %v611_v56 }
 0x14a   :  { %18738 = vtanh.f32 %v614_v61 }
 0x14d   :  { %v681_v62 = vpop.f32.mrb[8].mxu0 }
 0x14e   :  { %v18735_v0 = vpop.eup %18734  ;;  %v755_v3 = vadd.f32 %v754_v58, %v681_v62  ;;  %v15885_v4 = vpop.f32.mrb[9].mxu0 }
 0x14f   :  { %v762_v5 = vadd.f32 1.0, %v18735_v0 }
 0x150   :  { %v758_v7 = vadd.f32 %v19567_v63, %v755_v3 }
 0x151   :  { %18740 = vrcp.f32 %v762_v5  ;;  %v926_v35 = vpop.f32.mrb[10].mxu0 }
 0x152   :  { %v18737_v8 = vpop.eup %18736  ;;  %v14667_v9 = vmul.f32 -1.442695, %v758_v7  ;;  %v15906_v37 = vpop.f32.mrb[11].mxu0 }
 0x153   :  { %v768_v12 = vadd.f32 1.0, %v18737_v8 }
 0x154   :  { %18742 = vpow2.f32 %v14667_v9  ;;  %v18739_v13 = vpop.eup %18738 }
 0x155   :  { %18744 = vrcp.f32 %v768_v12 }
 0x15b   :  { %v18741_v16 = vpop.eup %18740 }
 0x15c   :  { %v779_v17 = vmul.f32 %v18741_v16, %v18739_v13 }
 0x15e   :  { %v18743_v18 = vpop.eup %18742 }
 0x15f   :  { %v18745_v22 = vpop.eup %18744  ;;  %v775_v23 = vadd.f32 1.0, %v18743_v18 }
 0x160   :  { %v778_v24 = vmul.f32 0.0, %v18745_v22 }
 0x161   :  { %18746 = vrcp.f32 %v775_v23 }
 0x162   :  { %v19570_v28 = vadd.f32 %v779_v17, %v778_v24 }
 0x164   :  { %18748 = vtanh.f32 %v19570_v28 }
 0x16b   :  { %v18747_v29 = vpop.eup %18746 }
 0x16e   :  { %v18749_v32 = vpop.eup %18748 }
 0x16f   :  { %v19573_v33 = vmul.f32 %v18749_v32, %v18747_v29 }
 0x171   :  { %15900 = vmatmul.mubr.msk.f32.vlgmr.msra.gmra.mrb[6].mxu1 %vm170_vm4, %v19573_v33  ;;  %15916 = vmatmul.mubr.msk.f32.vlgmr.msra.gmra.mrb[12].mxu0 %vm170_vm4, %v19573_v33 }
 0x172   :  { %15919 = vmatpush3.msk.msra.mxu1 %vm252_vm1, %v19470_v25  ;;  %15935 = vmatpush3.msk.msra.mxu0 %vm252_vm1, %v19488_v27 }
 0x173   :  { %15920 = vmatprep.mubr.msk.f32.mxu1 %vm19260_vm0, %v21513_v2  ;;  %17794 = vmatprep.subr.bf16.mxu1 %v21515_v1 }
 0x174   :  { %15936 = vmatprep.mubr.msk.f32.mxu0 %vm19260_vm0, %v21513_v2  ;;  %17800 = vmatprep.subr.bf16.mxu0 %v21515_v1 }
 0x175   :  { %15921 = vmatmul.mubr.msk.f32.vlgmr.msra.gmra.mrb[8].mxu1 %vm249_vm3, %v19536_v36  ;;  %15937 = vmatmul.mubr.msk.f32.vlgmr.msra.gmra.mrb[14].mxu0 %vm249_vm3, %v19536_v36 }
 0x176   :  { %17796 = vmatpush3.bf16.msra.mxu1 %v19457_v21  ;;  %17802 = vmatpush3.bf16.msra.mxu0 %v19502_v31 }
 0x177   :  { %17797 = vmatprep.subr.bf16.mxu1 %v21515_v1  ;;  %17803 = vmatprep.subr.bf16.mxu0 %v21515_v1 }
 0x178   :  { %15931 = vmatprep.mubr.msk.f32.mxu1 %vm19260_vm0, %v21513_v2  ;;  %15947 = vmatprep.mubr.msk.f32.mxu0 %vm19260_vm0, %v21513_v2 }
 0x17a   :  { %17799 = vmatpush3.bf16.msra.mxu1 %v19474_v26  ;;  %17805 = vmatpush3.bf16.msra.mxu0 %v19513_v34 }
 0x17b   :  { %15950 = vmatprep.subr.mxu1 %v21513_v2  ;;  %15966 = vmatprep.subr.mxu0 %v21513_v2 }
 0x17d   :  { %15932 = vmatmul.mubr.msk.f32.vlgmr.msra.gmra.mrb[10].mxu1 %vm170_vm4, %v19573_v33  ;;  %15948 = vmatmul.mubr.msk.f32.vlgmr.msra.gmra.mrb[16].mxu0 %vm170_vm4, %v19573_v33 }
 0x17e   :  { %15951 = vmatpush3.msk.msra.mxu1 %vm252_vm1, %v19496_v30  ;;  %15952 = vmatprep.mubr.msk.f32.mxu1 %vm19260_vm0, %v21513_v2 }
 0x17f   :  { %15967 = vmatpush3.msk.msra.mxu0 %vm252_vm1, %v19448_v19  ;;  %17806 = vmatprep.subr.bf16.mxu1 %v21515_v1 }
 0x180   :  { %15968 = vmatprep.mubr.msk.f32.mxu0 %vm19260_vm0, %v21513_v2  ;;  %17812 = vmatprep.subr.bf16.mxu0 %v21515_v1 }
 0x181   :  { %15953 = vmatmul.mubr.msk.f32.vlgmr.msra.gmra.mrb[12].mxu1 %vm249_vm3, %v19536_v36  ;;  %15969 = vmatmul.mubr.msk.f32.vlgmr.msra.gmra.mrb[18].mxu0 %vm249_vm3, %v19630_v40 }
 0x182   :  { %17808 = vmatpush3.bf16.msra.mxu1 %v19425_v6  ;;  %15963 = vmatprep.mubr.msk.f32.mxu1 %vm19260_vm0, %v21513_v2 }
 0x183   :  { %17809 = vmatprep.subr.bf16.mxu1 %v21515_v1  ;;  %17814 = vmatpush3.bf16.msra.mxu0 %v19427_v10 }
 0x184   :  { %15979 = vmatprep.mubr.msk.f32.mxu0 %vm19260_vm0, %v21513_v2  ;;  %17815 = vmatprep.subr.bf16.mxu0 %v21515_v1 }
 0x186   :  { %17811 = vmatpush3.bf16.msra.mxu1 %v19430_v11 }
 0x187   :  { %15982 = vmatprep.subr.mxu1 %v21513_v2  ;;  %17817 = vmatpush3.bf16.msra.mxu0 %v19439_v15 }
 0x188   :  { %15998 = vmatprep.subr.mxu0 %v21513_v2 }
 0x244   :  { %v852_v36 = vpop.f32.mrb[6].mxu1  ;;  %v997_v42 = vpop.f32.mrb[12].mxu0 }
 0x245   :  { %v927_v43 = vadd.f32 %v926_v35, %v852_v36  ;;  %v15901_v44 = vpop.f32.mrb[7].mxu1  ;;  %v15917_v45 = vpop.f32.mrb[13].mxu0  ;;  %v2047_v36 = vrot.slane %v19453_v20, 3 }
 0x247   :  { %v930_v47 = vadd.f32 %v19549_v41, %v927_v43 }
 0x248   :  { %v1067_v48 = vpop.f32.mrb[8].mxu1  ;;  %v1208_v49 = vpop.f32.mrb[14].mxu0 }
 0x249   :  { %v14680_v50 = vmul.f32 -1.442695, %v930_v47  ;;  %v1068_v51 = vadd.f32 %v1067_v48, %v997_v42  ;;  %v15922_v52 = vpop.f32.mrb[9].mxu1  ;;  %v15938_v53 = vpop.f32.mrb[15].mxu0  ;;  %v2048_v42 = vrot.slane %v19437_v14, 2 }
 0x24b   :  { %18750 = vpow2.f32 %v14680_v50  ;;  %v1071_v54 = vadd.f32 %v19555_v46, %v1068_v51  ;;  %v19705_v43 = vsel %vm247_vm2, %v2048_v42, %v2047_v36 }
 0x24d   :  { %v14681_v55 = vmul.f32 -1.442695, %v1071_v54 }
 0x24f   :  { %18752 = vpow2.f32 %v14681_v55 }
 0x250   :  { %v1138_v56 = vpop.f32.mrb[10].mxu1  ;;  %v1279_v57 = vpop.f32.mrb[16].mxu0 }
 0x251   :  { %v1209_v58 = vadd.f32 %v1208_v49, %v1138_v56  ;;  %v15933_v59 = vpop.f32.mrb[11].mxu1  ;;  %v15949_v61 = vpop.f32.mrb[17].mxu0 }
 0x253   :  { %v1212_v62 = vadd.f32 %v19561_v60, %v1209_v58 }
 0x254   :  { %v1349_v0 = vpop.f32.mrb[12].mxu1 }
 0x255   :  { %v18751_v3 = vpop.eup %18750  ;;  %v1350_v4 = vadd.f32 %v1349_v0, %v1279_v57  ;;  %v15954_v5 = vpop.f32.mrb[13].mxu1  ;;  %18754 = vtanh.f32 %v1212_v62 }
 0x256   :  { %v1357_v7 = vadd.f32 1.0, %v18751_v3 }
 0x257   :  { %v1353_v8 = vadd.f32 %v19567_v63, %v1350_v4 }
 0x258   :  { %18756 = vrcp.f32 %v1357_v7 }
 0x259   :  { %v18753_v9 = vpop.eup %18752  ;;  %v14682_v12 = vmul.f32 -1.442695, %v1353_v8 }
 0x25a   :  { %v1363_v13 = vadd.f32 1.0, %v18753_v9 }
 0x25b   :  { %18758 = vpow2.f32 %v14682_v12 }
 0x25c   :  { %18760 = vrcp.f32 %v1363_v13 }
 0x25f   :  { %v18755_v16 = vpop.eup %18754 }
 0x262   :  { %v18757_v17 = vpop.eup %18756 }
 0x263   :  { %v1374_v18 = vmul.f32 %v18757_v17, %v18755_v16 }
 0x265   :  { %v18759_v22 = vpop.eup %18758 }
 0x266   :  { %v18761_v23 = vpop.eup %18760  ;;  %v1370_v24 = vadd.f32 1.0, %v18759_v22 }
 0x267   :  { %v1373_v29 = vmul.f32 %v18761_v23, %v19570_v28  ;;  %v1522_v28 = vpop.f32.mrb[18].mxu0 }
 0x268   :  { %18762 = vrcp.f32 %v1370_v24  ;;  %v15970_v39 = vpop.f32.mrb[19].mxu0 }
 0x269   :  { %v19645_v32 = vadd.f32 %v1374_v18, %v1373_v29 }
 0x26b   :  { %18764 = vtanh.f32 %v19645_v32 }
 0x272   :  { %v18763_v35 = vpop.eup %18762 }
 0x275   :  { %v18765_v37 = vpop.eup %18764 }
 0x276   :  { %v19648_v38 = vmul.f32 %v18765_v37, %v18763_v35 }
 0x278   :  { %15964 = vmatmul.mubr.msk.f32.vlgmr.msra.gmra.mrb[14].mxu1 %vm170_vm4, %v19648_v38  ;;  %15980 = vmatmul.mubr.msk.f32.vlgmr.msra.gmra.mrb[20].mxu0 %vm170_vm4, %v19648_v38 }
 0x279   :  { %15983 = vmatpush3.msk.msra.mxu1 %vm252_vm1, %v19470_v25  ;;  %15999 = vmatpush3.msk.msra.mxu0 %vm252_vm1, %v19488_v27 }
 0x27a   :  { %15984 = vmatprep.mubr.msk.f32.mxu1 %vm19260_vm0, %v21513_v2  ;;  %17818 = vmatprep.subr.bf16.mxu1 %v21515_v1 }
 0x27b   :  { %16000 = vmatprep.mubr.msk.f32.mxu0 %vm19260_vm0, %v21513_v2  ;;  %17824 = vmatprep.subr.bf16.mxu0 %v21515_v1 }
 0x27c   :  { %15985 = vmatmul.mubr.msk.f32.vlgmr.msra.gmra.mrb[16].mxu1 %vm249_vm3, %v19630_v40  ;;  %16001 = vmatmul.mubr.msk.f32.vlgmr.msra.gmra.mrb[22].mxu0 %vm249_vm3, %v19630_v40 }
 0x27d   :  { %17820 = vmatpush3.bf16.msra.mxu1 %v19457_v21  ;;  %17826 = vmatpush3.bf16.msra.mxu0 %v19502_v31 }
 0x27e   :  { %17821 = vmatprep.subr.bf16.mxu1 %v21515_v1  ;;  %17827 = vmatprep.subr.bf16.mxu0 %v21515_v1 }
 0x27f   :  { %15995 = vmatprep.mubr.msk.f32.mxu1 %vm19260_vm0, %v21513_v2  ;;  %16011 = vmatprep.mubr.msk.f32.mxu0 %vm19260_vm0, %v21513_v2 }
 0x281   :  { %17823 = vmatpush3.bf16.msra.mxu1 %v19474_v26  ;;  %17829 = vmatpush3.bf16.msra.mxu0 %v19513_v34 }
 0x282   :  { %16014 = vmatprep.subr.mxu1 %v21513_v2  ;;  %16030 = vmatprep.subr.mxu0 %v21513_v2 }
 0x284   :  { %15996 = vmatmul.mubr.msk.f32.vlgmr.msra.gmra.mrb[18].mxu1 %vm170_vm4, %v19648_v38  ;;  %16012 = vmatmul.mubr.msk.f32.vlgmr.msra.gmra.mrb[24].mxu0 %vm170_vm4, %v19648_v38 }
 0x285   :  { %16015 = vmatpush3.msk.msra.mxu1 %vm252_vm1, %v19496_v30  ;;  %16016 = vmatprep.mubr.msk.f32.mxu1 %vm19260_vm0, %v21513_v2 }
 0x286   :  { %16031 = vmatpush3.msk.msra.mxu0 %vm252_vm1, %v19448_v19  ;;  %17830 = vmatprep.subr.bf16.mxu1 %v21515_v1 }
 0x287   :  { %16032 = vmatprep.mubr.msk.f32.mxu0 %vm19260_vm0, %v21513_v2  ;;  %17836 = vmatprep.subr.bf16.mxu0 %v21515_v1 }
 0x288   :  { %16017 = vmatmul.mubr.msk.f32.vlgmr.msra.gmra.mrb[20].mxu1 %vm249_vm3, %v19630_v40  ;;  %16033 = vmatmul.mubr.msk.f32.vlgmr.msra.gmra.mrb[26].mxu0 %vm249_vm3, %v19705_v43 }
 0x289   :  { %17832 = vmatpush3.bf16.msra.mxu1 %v19425_v6  ;;  %16027 = vmatprep.mubr.msk.f32.mxu1 %vm19260_vm0, %v21513_v2 }
 0x28a   :  { %17833 = vmatprep.subr.bf16.mxu1 %v21515_v1  ;;  %17838 = vmatpush3.bf16.msra.mxu0 %v19427_v10 }
 0x28b   :  { %16043 = vmatprep.mubr.msk.f32.mxu0 %vm19260_vm0, %v21513_v2  ;;  %17839 = vmatprep.subr.bf16.mxu0 %v21515_v1 }
 0x28d   :  { %17835 = vmatpush3.bf16.msra.mxu1 %v19430_v11 }
 0x28e   :  { %16046 = vmatprep.subr.mxu1 %v21513_v2  ;;  %17841 = vmatpush3.bf16.msra.mxu0 %v19439_v15 }
 0x28f   :  { %16062 = vmatprep.subr.mxu0 %v21513_v2 }
 0x34b   :  { %v1447_v40 = vpop.f32.mrb[14].mxu1  ;;  %v1593_v44 = vpop.f32.mrb[20].mxu0 }
 0x34c   :  { %v1523_v45 = vadd.f32 %v1522_v28, %v1447_v40  ;;  %v15965_v47 = vpop.f32.mrb[15].mxu1  ;;  %v15981_v48 = vpop.f32.mrb[21].mxu0 }
 0x34e   :  { %v1526_v49 = vadd.f32 %v19549_v41, %v1523_v45  ;;  %v2644_v45 = vrot.slane %v19437_v14, 3 }
 0x34f   :  { %v1663_v50 = vpop.f32.mrb[16].mxu1  ;;  %v1804_v51 = vpop.f32.mrb[22].mxu0 }
 0x350   :  { %v14695_v52 = vmul.f32 -1.442695, %v1526_v49  ;;  %v1664_v53 = vadd.f32 %v1663_v50, %v1593_v44  ;;  %v15986_v54 = vpop.f32.mrb[17].mxu1  ;;  %v16002_v55 = vpop.f32.mrb[23].mxu0  ;;  %v2643_v44 = vrot.slane %v19453_v20, 4 }
 0x352   :  { %18766 = vpow2.f32 %v14695_v52  ;;  %v1667_v56 = vadd.f32 %v19555_v46, %v1664_v53  ;;  %v19780_v47 = vsel %vm247_vm2, %v2644_v45, %v2643_v44 }
 0x354   :  { %v14696_v57 = vmul.f32 -1.442695, %v1667_v56 }
 0x356   :  { %18768 = vpow2.f32 %v14696_v57 }
 0x357   :  { %v1734_v58 = vpop.f32.mrb[18].mxu1  ;;  %v1875_v59 = vpop.f32.mrb[24].mxu0 }
 0x358   :  { %v1805_v61 = vadd.f32 %v1804_v51, %v1734_v58  ;;  %v15997_v62 = vpop.f32.mrb[19].mxu1  ;;  %v16013_v0 = vpop.f32.mrb[25].mxu0 }
 0x35a   :  { %v1808_v3 = vadd.f32 %v19561_v60, %v1805_v61 }
 0x35b   :  { %v1945_v4 = vpop.f32.mrb[20].mxu1 }
 0x35c   :  { %v18767_v5 = vpop.eup %18766  ;;  %v1946_v7 = vadd.f32 %v1945_v4, %v1875_v59  ;;  %v16018_v8 = vpop.f32.mrb[21].mxu1  ;;  %18770 = vtanh.f32 %v1808_v3 }
 0x35d   :  { %v1953_v9 = vadd.f32 1.0, %v18767_v5 }
 0x35e   :  { %v1949_v12 = vadd.f32 %v19567_v63, %v1946_v7 }
 0x35f   :  { %18772 = vrcp.f32 %v1953_v9 }
 0x360   :  { %v18769_v13 = vpop.eup %18768  ;;  %v14697_v16 = vmul.f32 -1.442695, %v1949_v12 }
 0x361   :  { %v1959_v17 = vadd.f32 1.0, %v18769_v13 }
 0x362   :  { %18774 = vpow2.f32 %v14697_v16 }
 0x363   :  { %18776 = vrcp.f32 %v1959_v17 }
 0x366   :  { %v18771_v18 = vpop.eup %18770 }
 0x369   :  { %v18773_v22 = vpop.eup %18772 }
 0x36a   :  { %v1970_v23 = vmul.f32 %v18773_v22, %v18771_v18 }
 0x36c   :  { %v18775_v24 = vpop.eup %18774 }
 0x36d   :  { %v18777_v29 = vpop.eup %18776  ;;  %v1966_v35 = vadd.f32 1.0, %v18775_v24 }
 0x36e   :  { %v1969_v37 = vmul.f32 %v18777_v29, %v19645_v32  ;;  %v2118_v32 = vpop.f32.mrb[26].mxu0 }
 0x36f   :  { %18778 = vrcp.f32 %v1966_v35  ;;  %v16034_v40 = vpop.f32.mrb[27].mxu0 }
 0x370   :  { %v19720_v28 = vadd.f32 %v1970_v23, %v1969_v37 }
 0x372   :  { %18780 = vtanh.f32 %v19720_v28 }
 0x379   :  { %v18779_v39 = vpop.eup %18778 }
 0x37c   :  { %v18781_v36 = vpop.eup %18780 }
 0x37d   :  { %v19723_v42 = vmul.f32 %v18781_v36, %v18779_v39 }
 0x37f   :  { %16028 = vmatmul.mubr.msk.f32.vlgmr.msra.gmra.mrb[22].mxu1 %vm170_vm4, %v19723_v42  ;;  %16044 = vmatmul.mubr.msk.f32.vlgmr.msra.gmra.mrb[28].mxu0 %vm170_vm4, %v19723_v42 }
 0x380   :  { %16047 = vmatpush3.msk.msra.mxu1 %vm252_vm1, %v19470_v25  ;;  %16063 = vmatpush3.msk.msra.mxu0 %vm252_vm1, %v19488_v27 }
 0x381   :  { %16048 = vmatprep.mubr.msk.f32.mxu1 %vm19260_vm0, %v21513_v2  ;;  %17842 = vmatprep.subr.bf16.mxu1 %v21515_v1 }
 0x382   :  { %16064 = vmatprep.mubr.msk.f32.mxu0 %vm19260_vm0, %v21513_v2  ;;  %17848 = vmatprep.subr.bf16.mxu0 %v21515_v1 }
 0x383   :  { %16049 = vmatmul.mubr.msk.f32.vlgmr.msra.gmra.mrb[24].mxu1 %vm249_vm3, %v19705_v43  ;;  %16065 = vmatmul.mubr.msk.f32.vlgmr.msra.gmra.mrb[30].mxu0 %vm249_vm3, %v19705_v43 }
 0x384   :  { %17844 = vmatpush3.bf16.msra.mxu1 %v19457_v21  ;;  %17850 = vmatpush3.bf16.msra.mxu0 %v19502_v31 }
 0x385   :  { %17845 = vmatprep.subr.bf16.mxu1 %v21515_v1  ;;  %17851 = vmatprep.subr.bf16.mxu0 %v21515_v1 }
 0x386   :  { %16059 = vmatprep.mubr.msk.f32.mxu1 %vm19260_vm0, %v21513_v2  ;;  %16075 = vmatprep.mubr.msk.f32.mxu0 %vm19260_vm0, %v21513_v2 }
 0x388   :  { %17847 = vmatpush3.bf16.msra.mxu1 %v19474_v26  ;;  %17853 = vmatpush3.bf16.msra.mxu0 %v19513_v34 }
 0x389   :  { %16078 = vmatprep.subr.mxu1 %v21513_v2  ;;  %16094 = vmatprep.subr.mxu0 %v21513_v2 }
 0x38b   :  { %16060 = vmatmul.mubr.msk.f32.vlgmr.msra.gmra.mrb[26].mxu1 %vm170_vm4, %v19723_v42  ;;  %16076 = vmatmul.mubr.msk.f32.vlgmr.msra.gmra.mrb[32].mxu0 %vm170_vm4, %v19723_v42 }
 0x38c   :  { %16079 = vmatpush3.msk.msra.mxu1 %vm252_vm1, %v19496_v30  ;;  %16080 = vmatprep.mubr.msk.f32.mxu1 %vm19260_vm0, %v21513_v2 }
 0x38d   :  { %16095 = vmatpush3.msk.msra.mxu0 %vm252_vm1, %v19448_v19  ;;  %17854 = vmatprep.subr.bf16.mxu1 %v21515_v1 }
 0x38e   :  { %16096 = vmatprep.mubr.msk.f32.mxu0 %vm19260_vm0, %v21513_v2  ;;  %17860 = vmatprep.subr.bf16.mxu0 %v21515_v1 }
 0x38f   :  { %16081 = vmatmul.mubr.msk.f32.vlgmr.msra.gmra.mrb[28].mxu1 %vm249_vm3, %v19705_v43  ;;  %16097 = vmatmul.mubr.msk.f32.vlgmr.msra.gmra.mrb[34].mxu0 %vm249_vm3, %v19780_v47 }
 0x390   :  { %17856 = vmatpush3.bf16.msra.mxu1 %v19425_v6  ;;  %16091 = vmatprep.mubr.msk.f32.mxu1 %vm19260_vm0, %v21513_v2 }
 0x391   :  { %17857 = vmatprep.subr.bf16.mxu1 %v21515_v1  ;;  %17862 = vmatpush3.bf16.msra.mxu0 %v19427_v10 }
 0x392   :  { %16107 = vmatprep.mubr.msk.f32.mxu0 %vm19260_vm0, %v21513_v2  ;;  %17863 = vmatprep.subr.bf16.mxu0 %v21515_v1 }
 0x394   :  { %17859 = vmatpush3.bf16.msra.mxu1 %v19430_v11 }
 0x395   :  { %16110 = vmatprep.subr.mxu1 %v21513_v2  ;;  %17865 = vmatpush3.bf16.msra.mxu0 %v19439_v15 }
 0x396   :  { %16126 = vmatprep.subr.mxu0 %v21513_v2 }
 0x452   :  { %v2043_v43 = vpop.f32.mrb[22].mxu1  ;;  %v2189_v48 = vpop.f32.mrb[28].mxu0 }
 0x453   :  { %v2119_v49 = vadd.f32 %v2118_v32, %v2043_v43  ;;  %v16029_v50 = vpop.f32.mrb[23].mxu1  ;;  %v16045_v51 = vpop.f32.mrb[29].mxu0 }
 0x455   :  { %v2122_v52 = vadd.f32 %v19549_v41, %v2119_v49  ;;  %v3240_v49 = vrot.slane %v19437_v14, 4 }
 0x456   :  { %v2259_v53 = vpop.f32.mrb[24].mxu1  ;;  %v2400_v54 = vpop.f32.mrb[30].mxu0 }
 0x457   :  { %v14710_v55 = vmul.f32 -1.442695, %v2122_v52  ;;  %v2260_v56 = vadd.f32 %v2259_v53, %v2189_v48  ;;  %v16050_v57 = vpop.f32.mrb[25].mxu1  ;;  %v16066_v58 = vpop.f32.mrb[31].mxu0  ;;  %v3239_v48 = vrot.slane %v19453_v20, 5 }
 0x459   :  { %18782 = vpow2.f32 %v14710_v55  ;;  %v2263_v59 = vadd.f32 %v19555_v46, %v2260_v56  ;;  %v19855_v50 = vsel %vm247_vm2, %v3240_v49, %v3239_v48 }
 0x45b   :  { %v14711_v61 = vmul.f32 -1.442695, %v2263_v59 }
 0x45d   :  { %18784 = vpow2.f32 %v14711_v61 }
 0x45e   :  { %v2330_v62 = vpop.f32.mrb[26].mxu1  ;;  %v2471_v0 = vpop.f32.mrb[32].mxu0 }
 0x45f   :  { %v2401_v3 = vadd.f32 %v2400_v54, %v2330_v62  ;;  %v16061_v4 = vpop.f32.mrb[27].mxu1  ;;  %v16077_v5 = vpop.f32.mrb[33].mxu0 }
 0x461   :  { %v2404_v7 = vadd.f32 %v19561_v60, %v2401_v3 }
 0x462   :  { %v2541_v8 = vpop.f32.mrb[28].mxu1 }
 0x463   :  { %v18783_v9 = vpop.eup %18782  ;;  %v2542_v12 = vadd.f32 %v2541_v8, %v2471_v0  ;;  %v16082_v13 = vpop.f32.mrb[29].mxu1  ;;  %18786 = vtanh.f32 %v2404_v7 }
 0x464   :  { %v2549_v16 = vadd.f32 1.0, %v18783_v9 }
 0x465   :  { %v2545_v17 = vadd.f32 %v19567_v63, %v2542_v12 }
 0x466   :  { %18788 = vrcp.f32 %v2549_v16 }
 0x467   :  { %v18785_v18 = vpop.eup %18784  ;;  %v14712_v22 = vmul.f32 -1.442695, %v2545_v17 }
 0x468   :  { %v2555_v23 = vadd.f32 1.0, %v18785_v18 }
 0x469   :  { %18790 = vpow2.f32 %v14712_v22 }
 0x46a   :  { %18792 = vrcp.f32 %v2555_v23 }
 0x46d   :  { %v18787_v24 = vpop.eup %18786 }
 0x470   :  { %v18789_v29 = vpop.eup %18788 }
 0x471   :  { %v2566_v35 = vmul.f32 %v18789_v29, %v18787_v24 }
 0x473   :  { %v18791_v37 = vpop.eup %18790 }
 0x474   :  { %v18793_v39 = vpop.eup %18792  ;;  %v2562_v36 = vadd.f32 1.0, %v18791_v37 }
 0x475   :  { %v2565_v32 = vmul.f32 %v18793_v39, %v19720_v28 }
 0x476   :  { %18794 = vrcp.f32 %v2562_v36 }
 0x477   :  { %v19795_v40 = vadd.f32 %v2566_v35, %v2565_v32 }
 0x479   :  { %18796 = vtanh.f32 %v19795_v40 }
 0x480   :  { %v18795_v44 = vpop.eup %18794 }
 0x483   :  { %v18797_v45 = vpop.eup %18796 }
 0x484   :  { %v19798_v43 = vmul.f32 %v18797_v45, %v18795_v44 }
 0x486   :  { %16092 = vmatmul.mubr.msk.f32.vlgmr.msra.gmra.mrb[30].mxu1 %vm170_vm4, %v19798_v43  ;;  %16108 = vmatmul.mubr.msk.f32.vlgmr.msra.gmra.mrb[36].mxu0 %vm170_vm4, %v19798_v43 }
 0x487   :  { %16111 = vmatpush3.msk.msra.mxu1 %vm252_vm1, %v19470_v25  ;;  %16127 = vmatpush3.msk.msra.mxu0 %vm252_vm1, %v19488_v27 }
 0x488   :  { %16112 = vmatprep.mubr.msk.f32.mxu1 %vm19260_vm0, %v21513_v2  ;;  %17866 = vmatprep.subr.bf16.mxu1 %v21515_v1 }
 0x489   :  { %16128 = vmatprep.mubr.msk.f32.mxu0 %vm19260_vm0, %v21513_v2  ;;  %17872 = vmatprep.subr.bf16.mxu0 %v21515_v1 }
 0x48a   :  { %16113 = vmatmul.mubr.msk.f32.vlgmr.msra.gmra.mrb[32].mxu1 %vm249_vm3, %v19780_v47  ;;  %16129 = vmatmul.mubr.msk.f32.vlgmr.msra.gmra.mrb[38].mxu0 %vm249_vm3, %v19780_v47 }
 0x48b   :  { %17868 = vmatpush3.bf16.msra.mxu1 %v19457_v21  ;;  %17874 = vmatpush3.bf16.msra.mxu0 %v19502_v31 }
 0x48c   :  { %17869 = vmatprep.subr.bf16.mxu1 %v21515_v1  ;;  %17875 = vmatprep.subr.bf16.mxu0 %v21515_v1 }
 0x48d   :  { %16123 = vmatprep.mubr.msk.f32.mxu1 %vm19260_vm0, %v21513_v2  ;;  %16139 = vmatprep.mubr.msk.f32.mxu0 %vm19260_vm0, %v21513_v2 }
 0x48f   :  { %17871 = vmatpush3.bf16.msra.mxu1 %v19474_v26  ;;  %17877 = vmatpush3.bf16.msra.mxu0 %v19513_v34 }
 0x490   :  { %16142 = vmatprep.subr.mxu1 %v21513_v2  ;;  %16158 = vmatprep.subr.mxu0 %v21513_v2 }
 0x492   :  { %16124 = vmatmul.mubr.msk.f32.vlgmr.msra.gmra.mrb[34].mxu1 %vm170_vm4, %v19798_v43  ;;  %16140 = vmatmul.mubr.msk.f32.vlgmr.msra.gmra.mrb[40].mxu0 %vm170_vm4, %v19798_v43 }
 0x493   :  { %16143 = vmatpush3.msk.msra.mxu1 %vm252_vm1, %v19496_v30  ;;  %16144 = vmatprep.mubr.msk.f32.mxu1 %vm19260_vm0, %v21513_v2 }
 0x494   :  { %16159 = vmatpush3.msk.msra.mxu0 %vm252_vm1, %v19448_v19  ;;  %17878 = vmatprep.subr.bf16.mxu1 %v21515_v1  ;;  %v2714_v19 = vpop.f32.mrb[34].mxu0 }
 0x495   :  { %16160 = vmatprep.mubr.msk.f32.mxu0 %vm19260_vm0, %v21513_v2  ;;  %17884 = vmatprep.subr.bf16.mxu0 %v21515_v1  ;;  %v16098_v28 = vpop.f32.mrb[35].mxu0 }
 0x496   :  { %16145 = vmatmul.mubr.msk.f32.vlgmr.msra.gmra.mrb[36].mxu1 %vm249_vm3, %v19780_v47  ;;  %16161 = vmatmul.mubr.msk.f32.vlgmr.msra.gmra.mrb[42].mxu0 %vm249_vm3, %v19855_v50 }
 0x497   :  { %17880 = vmatpush3.bf16.msra.mxu1 %v19425_v6  ;;  %16155 = vmatprep.mubr.msk.f32.mxu1 %vm19260_vm0, %v21513_v2 }
 0x498   :  { %17881 = vmatprep.subr.bf16.mxu1 %v21515_v1  ;;  %17886 = vmatpush3.bf16.msra.mxu0 %v19427_v10 }
 0x499   :  { %16171 = vmatprep.mubr.msk.f32.mxu0 %vm19260_vm0, %v21513_v2  ;;  %17887 = vmatprep.subr.bf16.mxu0 %v21515_v1 }
 0x49b   :  { %17883 = vmatpush3.bf16.msra.mxu1 %v19430_v11 }
 0x49c   :  { %16174 = vmatprep.subr.mxu1 %v21513_v2  ;;  %17889 = vmatpush3.bf16.msra.mxu0 %v19439_v15 }
 0x49d   :  { %16190 = vmatprep.subr.mxu0 %v21513_v2 }
 0x559   :  { %v2639_v20 = vpop.f32.mrb[30].mxu1  ;;  %v2785_v47 = vpop.f32.mrb[36].mxu0 }
 0x55a   :  { %v2715_v14 = vadd.f32 %v2714_v19, %v2639_v20  ;;  %v16093_v51 = vpop.f32.mrb[31].mxu1  ;;  %v16109_v52 = vpop.f32.mrb[37].mxu0 }
 0x55c   :  { %v2718_v53 = vadd.f32 %v19549_v41, %v2715_v14 }
 0x55d   :  { %v2855_v54 = vpop.f32.mrb[32].mxu1  ;;  %v2996_v55 = vpop.f32.mrb[38].mxu0 }
 0x55e   :  { %v14725_v56 = vmul.f32 -1.442695, %v2718_v53  ;;  %v2856_v57 = vadd.f32 %v2855_v54, %v2785_v47  ;;  %v16114_v58 = vpop.f32.mrb[33].mxu1  ;;  %v16130_v59 = vpop.f32.mrb[39].mxu0 }
 0x560   :  { %18798 = vpow2.f32 %v14725_v56  ;;  %v2859_v61 = vadd.f32 %v19555_v46, %v2856_v57 }
 0x562   :  { %v14726_v62 = vmul.f32 -1.442695, %v2859_v61 }
 0x564   :  { %18800 = vpow2.f32 %v14726_v62 }
 0x565   :  { %v2926_v0 = vpop.f32.mrb[34].mxu1  ;;  %v3067_v3 = vpop.f32.mrb[40].mxu0 }
 0x566   :  { %v2997_v4 = vadd.f32 %v2996_v55, %v2926_v0  ;;  %v16125_v5 = vpop.f32.mrb[35].mxu1  ;;  %v16141_v7 = vpop.f32.mrb[41].mxu0 }
 0x568   :  { %v3000_v8 = vadd.f32 %v19561_v60, %v2997_v4 }
 0x569   :  { %v3137_v9 = vpop.f32.mrb[36].mxu1 }
 0x56a   :  { %v18799_v12 = vpop.eup %18798  ;;  %v3138_v13 = vadd.f32 %v3137_v9, %v3067_v3  ;;  %v16146_v16 = vpop.f32.mrb[37].mxu1  ;;  %18802 = vtanh.f32 %v3000_v8 }
 0x56b   :  { %v3145_v17 = vadd.f32 1.0, %v18799_v12 }
 0x56c   :  { %v3141_v18 = vadd.f32 %v19567_v63, %v3138_v13 }
 0x56d   :  { %18804 = vrcp.f32 %v3145_v17 }
 0x56e   :  { %v18801_v22 = vpop.eup %18800  ;;  %v14727_v23 = vmul.f32 -1.442695, %v3141_v18 }
 0x56f   :  { %v3151_v24 = vadd.f32 1.0, %v18801_v22 }
 0x570   :  { %18806 = vpow2.f32 %v14727_v23 }
 0x571   :  { %18808 = vrcp.f32 %v3151_v24 }
 0x574   :  { %v18803_v29 = vpop.eup %18802 }
 0x577   :  { %v18805_v35 = vpop.eup %18804 }
 0x578   :  { %v3162_v37 = vmul.f32 %v18805_v35, %v18803_v29 }
 0x57a   :  { %v18807_v39 = vpop.eup %18806 }
 0x57b   :  { %v18809_v36 = vpop.eup %18808  ;;  %v3158_v32 = vadd.f32 1.0, %v18807_v39 }
 0x57c   :  { %v3161_v44 = vmul.f32 %v18809_v36, %v19795_v40  ;;  %v19935_v40 = vld [vmem:[%s21500_s0] sm:$0xff] }
 0x57d   :  { %18810 = vrcp.f32 %v3158_v32  ;;  %v3835_v49 = vrot.slane %v19935_v40, 6 }
 0x57e   :  { %v19870_v45 = vadd.f32 %v3162_v37, %v3161_v44 }
 0x580   :  { %18812 = vtanh.f32 %v19870_v45 }
 0x587   :  { %v18811_v19 = vpop.eup %18810 }
 0x58a   :  { %v18813_v28 = vpop.eup %18812 }
 0x58b   :  { %v19873_v48 = vmul.f32 %v18813_v28, %v18811_v19 }
 0x58d   :  { %16156 = vmatmul.mubr.msk.f32.vlgmr.msra.gmra.mrb[38].mxu1 %vm170_vm4, %v19873_v48  ;;  %16172 = vmatmul.mubr.msk.f32.vlgmr.msra.gmra.mrb[44].mxu0 %vm170_vm4, %v19873_v48 }
 0x58e   :  { %16175 = vmatpush3.msk.msra.mxu1 %vm252_vm1, %v19470_v25  ;;  %16191 = vmatpush3.msk.msra.mxu0 %vm252_vm1, %v19488_v27  ;;  %v19916_v25 = vld [vmem:[%s21501_s1] sm:$0xf]  ;;  %v3310_v27 = vpop.f32.mrb[42].mxu0 }
 0x58f   :  { %16176 = vmatprep.mubr.msk.f32.mxu1 %vm19260_vm0, %v21513_v2  ;;  %17890 = vmatprep.subr.bf16.mxu1 %v21515_v1 }
 0x590   :  { %16192 = vmatprep.mubr.msk.f32.mxu0 %vm19260_vm0, %v21513_v2  ;;  %17896 = vmatprep.subr.bf16.mxu0 %v21515_v1 }
 0x591   :  { %16177 = vmatmul.mubr.msk.f32.vlgmr.msra.gmra.mrb[40].mxu1 %vm249_vm3, %v19855_v50  ;;  %16193 = vmatmul.mubr.msk.f32.vlgmr.msra.gmra.mrb[46].mxu0 %vm249_vm3, %v19855_v50 }
 0x592   :  { %17892 = vmatpush3.bf16.msra.mxu1 %v19457_v21  ;;  %17898 = vmatpush3.bf16.msra.mxu0 %v19502_v31 }
 0x593   :  { %17893 = vmatprep.subr.bf16.mxu1 %v21515_v1  ;;  %17899 = vmatprep.subr.bf16.mxu0 %v21515_v1 }
 0x594   :  { %16187 = vmatprep.mubr.msk.f32.mxu1 %vm19260_vm0, %v21513_v2  ;;  %16203 = vmatprep.mubr.msk.f32.mxu0 %vm19260_vm0, %v21513_v2 }
 0x596   :  { %17895 = vmatpush3.bf16.msra.mxu1 %v19474_v26  ;;  %17901 = vmatpush3.bf16.msra.mxu0 %v19513_v34 }
 0x597   :  { %16206 = vmatprep.subr.mxu1 %v21513_v2  ;;  %16222 = vmatprep.subr.mxu0 %v21513_v2 }
 0x599   :  { %16188 = vmatmul.mubr.msk.f32.vlgmr.msra.gmra.mrb[42].mxu1 %vm170_vm4, %v19873_v48  ;;  %16204 = vmatmul.mubr.msk.f32.vlgmr.msra.gmra.mrb[48].mxu0 %vm170_vm4, %v19873_v48 }
 0x59a   :  { %16207 = vmatpush3.msk.msra.mxu1 %vm252_vm1, %v19496_v30  ;;  %16208 = vmatprep.mubr.msk.f32.mxu1 %vm19260_vm0, %v21513_v2  ;;  %v16162_v30 = vpop.f32.mrb[43].mxu0 }
 0x59b   :  { %16223 = vmatpush3.msk.msra.mxu0 %vm252_vm1, %v19916_v25  ;;  %17902 = vmatprep.subr.bf16.mxu1 %v21515_v1  ;;  %v20012_v30 = vld [vmem:[%s21501_s1 + $0xc] sm:$0xf] }
 0x59c   :  { %16224 = vmatprep.mubr.msk.f32.mxu0 %vm19260_vm0, %v21513_v2  ;;  %17908 = vmatprep.subr.bf16.mxu0 %v21515_v1 }
 0x59d   :  { %16209 = vmatmul.mubr.msk.f32.vlgmr.msra.gmra.mrb[44].mxu1 %vm249_vm3, %v19855_v50  ;;  %v19941_v50 = vld [vmem:[%s21500_s0 + $0x8] sm:$0xff] }
 0x59e   :  { %17904 = vmatpush3.bf16.msra.mxu1 %v19425_v6  ;;  %16219 = vmatprep.mubr.msk.f32.mxu1 %vm19260_vm0, %v21513_v2  ;;  %v3836_v20 = vrot.slane %v19941_v50, 5 }
 0x59f   :  { %17905 = vmatprep.subr.bf16.mxu1 %v21515_v1 }
 0x5a0   :  { %v19945_v47 = vsel %vm247_vm2, %v3836_v20, %v3835_v49  ;;  %v4431_v20 = vrot.slane %v19935_v40, 7 }
 0x5a1   :  { %16225 = vmatmul.mubr.msk.f32.vlgmr.msra.gmra.mrb[50].mxu0 %vm249_vm3, %v19945_v47 }
 0x5a2   :  { %17907 = vmatpush3.bf16.msra.mxu1 %v19430_v11  ;;  %17910 = vmatpush3.bf16.msra.mxu0 %v19427_v10 }
 0x5a3   :  { %16238 = vmatprep.subr.mxu1 %v21513_v2  ;;  %16235 = vmatprep.mubr.msk.f32.mxu0 %vm19260_vm0, %v21513_v2 }
 0x5a4   :  { %17911 = vmatprep.subr.bf16.mxu0 %v21515_v1 }
 0x5a6   :  { %17913 = vmatpush3.bf16.msra.mxu0 %v19439_v15 }
 0x5a7   :  { %16254 = vmatprep.subr.mxu0 %v21513_v2 }
 0x660   :  { %v3235_v14 = vpop.f32.mrb[38].mxu1  ;;  %v3381_v51 = vpop.f32.mrb[44].mxu0 }
 0x661   :  { %v3311_v52 = vadd.f32 %v3310_v27, %v3235_v14  ;;  %v16157_v53 = vpop.f32.mrb[39].mxu1  ;;  %v16173_v54 = vpop.f32.mrb[45].mxu0  ;;  %v19972_v27 = vld [vmem:[%s21501_s1 + $0x4] sm:$0xf]  ;;  %v4432_v14 = vrot.slane %v19941_v50, 6 }
 0x663   :  { %v3314_v55 = vadd.f32 %v19549_v41, %v3311_v52  ;;  %v20048_v52 = vld [vmem:[%s21503_s3] ss:$0 sm:$0xff] }
 0x664   :  { %v3451_v56 = vpop.f32.mrb[40].mxu1  ;;  %v3592_v57 = vpop.f32.mrb[46].mxu0 }
 0x665   :  { %v14740_v58 = vmul.f32 -1.442695, %v3314_v55  ;;  %v3452_v59 = vadd.f32 %v3451_v56, %v3381_v51  ;;  %v16178_v61 = vpop.f32.mrb[41].mxu1  ;;  %v16194_v62 = vpop.f32.mrb[47].mxu0  ;;  %v20035_v51 = vsel %vm247_vm2, %v4432_v14, %v4431_v20  ;;  %v4957_v20 = vld [vmem:[#allocation5 + $0x18] sm:$0xff]  ;;  %v4975_v14 = vld [vmem:[#allocation7 + $0x10] sm:$0xff] }
 0x667   :  { %18814 = vpow2.f32 %v14740_v58  ;;  %v3455_v0 = vadd.f32 %v19555_v46, %v3452_v59  ;;  %v20054_v58 = vld [vmem:[%s21503_s3 + $0x1] ss:$0 sm:$0xff] }
 0x669   :  { %v14741_v3 = vmul.f32 -1.442695, %v3455_v0 }
 0x66b   :  { %18816 = vpow2.f32 %v14741_v3 }
 0x66c   :  { %v3522_v4 = vpop.f32.mrb[42].mxu1  ;;  %v3663_v5 = vpop.f32.mrb[48].mxu0 }
 0x66d   :  { %v3593_v7 = vadd.f32 %v3592_v57, %v3522_v4  ;;  %v16189_v8 = vpop.f32.mrb[43].mxu1  ;;  %v16205_v9 = vpop.f32.mrb[49].mxu0 }
 0x66f   :  { %v3596_v12 = vadd.f32 %v19561_v60, %v3593_v7  ;;  %v20060_v7 = vld [vmem:[%s21503_s3 + $0x2] ss:$0 sm:$0xff] }
 0x670   :  { %v3733_v13 = vpop.f32.mrb[44].mxu1 }
 0x671   :  { %v18815_v41 = vpop.eup %18814  ;;  %v3734_v16 = vadd.f32 %v3733_v13, %v3663_v5  ;;  %v16210_v17 = vpop.f32.mrb[45].mxu1  ;;  %18818 = vtanh.f32 %v3596_v12 }
 0x672   :  { %v3741_v18 = vadd.f32 1.0, %v18815_v41  ;;  %v20066_v17 = vld [vmem:[%s21503_s3 + $0x3] ss:$0 sm:$0xff] }
 0x673   :  { %v3737_v22 = vadd.f32 %v19567_v63, %v3734_v16 }
 0x674   :  { %18820 = vrcp.f32 %v3741_v18 }
 0x675   :  { %v18817_v23 = vpop.eup %18816  ;;  %v14742_v46 = vmul.f32 -1.442695, %v3737_v22 }
 0x676   :  { %v3747_v24 = vadd.f32 1.0, %v18817_v23 }
 0x677   :  { %18822 = vpow2.f32 %v14742_v46 }
 0x678   :  { %18824 = vrcp.f32 %v3747_v24 }
 0x67b   :  { %v18819_v29 = vpop.eup %18818 }
 0x67e   :  { %v18821_v35 = vpop.eup %18820 }
 0x67f   :  { %v3758_v37 = vmul.f32 %v18821_v35, %v18819_v29 }
 0x681   :  { %v18823_v39 = vpop.eup %18822 }
 0x682   :  { %v18825_v36 = vpop.eup %18824  ;;  %v3754_v60 = vadd.f32 1.0, %v18823_v39 }
 0x683   :  { %v3757_v32 = vmul.f32 %v18825_v36, %v19870_v45  ;;  %v19979_v45 = vld [vmem:[%s21501_s1 + $0x8] sm:$0xf] }
 0x684   :  { %18826 = vrcp.f32 %v3754_v60 }
 0x685   :  { %v19960_v44 = vadd.f32 %v3758_v37, %v3757_v32 }
 0x687   :  { %18828 = vtanh.f32 %v19960_v44 }
 0x68e   :  { %v18827_v63 = vpop.eup %18826 }
 0x691   :  { %v18829_v19 = vpop.eup %18828 }
 0x692   :  { %v19963_v28 = vmul.f32 %v18829_v19, %v18827_v63 }
 0x694   :  { %16220 = vmatmul.mubr.msk.f32.vlgmr.msra.gmra.mrb[46].mxu1 %vm170_vm4, %v19963_v28  ;;  %16236 = vmatmul.mubr.msk.f32.vlgmr.msra.gmra.mrb[52].mxu0 %vm170_vm4, %v19963_v28 }
 0x695   :  { %16239 = vmatpush3.msk.msra.mxu1 %vm252_vm1, %v19972_v27  ;;  %16255 = vmatpush3.msk.msra.mxu0 %vm252_vm1, %v19979_v45 }
 0x696   :  { %16240 = vmatprep.mubr.msk.f32.mxu1 %vm19260_vm0, %v21513_v2  ;;  %17914 = vmatprep.subr.bf16.mxu1 %v21515_v1 }
 0x697   :  { %16256 = vmatprep.mubr.msk.f32.mxu0 %vm19260_vm0, %v21513_v2  ;;  %17920 = vmatprep.subr.bf16.mxu0 %v21515_v1 }
 0x698   :  { %16241 = vmatmul.mubr.msk.f32.vlgmr.msra.gmra.mrb[48].mxu1 %vm249_vm3, %v19945_v47  ;;  %16257 = vmatmul.mubr.msk.f32.vlgmr.msra.gmra.mrb[54].mxu0 %vm249_vm3, %v19945_v47 }
 0x699   :  { %17916 = vmatpush3.bf16.msra.mxu1 %v19457_v21  ;;  %17922 = vmatpush3.bf16.msra.mxu0 %v19502_v31 }
 0x69a   :  { %17917 = vmatprep.subr.bf16.mxu1 %v21515_v1  ;;  %17923 = vmatprep.subr.bf16.mxu0 %v21515_v1 }
 0x69b   :  { %16251 = vmatprep.mubr.msk.f32.mxu1 %vm19260_vm0, %v21513_v2  ;;  %16267 = vmatprep.mubr.msk.f32.mxu0 %vm19260_vm0, %v21513_v2 }
 0x69d   :  { %17919 = vmatpush3.bf16.msra.mxu1 %v19474_v26  ;;  %17925 = vmatpush3.bf16.msra.mxu0 %v19513_v34 }
 0x69e   :  { %16270 = vmatprep.subr.mxu1 %v21513_v2  ;;  %16286 = vmatprep.subr.mxu0 %v21513_v2 }
 0x6a0   :  { %16252 = vmatmul.mubr.msk.f32.vlgmr.msra.gmra.mrb[50].mxu1 %vm170_vm4, %v19963_v28  ;;  %16268 = vmatmul.mubr.msk.f32.vlgmr.msra.gmra.mrb[56].mxu0 %vm170_vm4, %v19963_v28 }
 0x6a1   :  { %16271 = vmatpush3.msk.msra.mxu1 %vm252_vm1, %v20012_v30  ;;  %16272 = vmatprep.mubr.msk.f32.mxu1 %vm19260_vm0, %v21513_v2 }
 0x6a2   :  { %16287 = vmatpush3.msk.msra.mxu0 %vm252_vm1, %v19916_v25  ;;  %17926 = vmatprep.subr.bf16.mxu1 %v21515_v1  ;;  %v3906_v25 = vpop.f32.mrb[50].mxu0 }
 0x6a3   :  { %16288 = vmatprep.mubr.msk.f32.mxu0 %vm19260_vm0, %v21513_v2  ;;  %17932 = vmatprep.subr.bf16.mxu0 %v21515_v1  ;;  %v16226_v49 = vpop.f32.mrb[51].mxu0 }
 0x6a4   :  { %16273 = vmatmul.mubr.msk.f32.vlgmr.msra.gmra.mrb[52].mxu1 %vm249_vm3, %v19945_v47  ;;  %16289 = vmatmul.mubr.msk.f32.vlgmr.msra.gmra.mrb[58].mxu0 %vm249_vm3, %v20035_v51  ;;  %v4956_v49 = vld [vmem:[#allocation5 + $0x10] sm:$0xff] }
 0x6a5   :  { %17928 = vmatpush3.bf16.msra.mxu1 %v19425_v6  ;;  %16283 = vmatprep.mubr.msk.f32.mxu1 %vm19260_vm0, %v21513_v2 }
 0x6a6   :  { %17929 = vmatprep.subr.bf16.mxu1 %v21515_v1  ;;  %17934 = vmatpush3.bf16.msra.mxu0 %v19427_v10 }
 0x6a7   :  { %16299 = vmatprep.mubr.msk.f32.mxu0 %vm19260_vm0, %v21513_v2  ;;  %17935 = vmatprep.subr.bf16.mxu0 %v21515_v1 }
 0x6a9   :  { %17931 = vmatpush3.bf16.msra.mxu1 %v19430_v11 }
 0x6aa   :  { %16302 = vmatprep.subr.mxu1 %v21513_v2  ;;  %17937 = vmatpush3.bf16.msra.mxu0 %v19439_v15 }
 0x6ab   :  { %16318 = vmatprep.subr.mxu0 %v21513_v2 }
 0x767   :  { %v3831_v6 = vpop.f32.mrb[46].mxu1  ;;  %v3977_v11 = vpop.f32.mrb[52].mxu0 }
 0x768   :  { %v3907_v40 = vadd.f32 %v3906_v25, %v3831_v6  ;;  %v16221_v50 = vpop.f32.mrb[47].mxu1  ;;  %v16237_v47 = vpop.f32.mrb[53].mxu0  ;;  %v4976_v6 = vld [vmem:[#allocation7 + $0x18] sm:$0xff] }
 0x769   :  { %v4978_v47 = vld [vmem:[#allocation7 + $0x20] sm:$0xff] }
 0x76a   :  { %v3910_v10 = vadd.f32 %v20048_v52, %v3907_v40  ;;  %v4960_v40 = vld [vmem:[#allocation5 + $0x28] sm:$0xff] }
 0x76b   :  { %v4047_v53 = vpop.f32.mrb[48].mxu1  ;;  %v4188_v54 = vpop.f32.mrb[54].mxu0 }
 0x76c   :  { %v14755_v55 = vmul.f32 -1.442695, %v3910_v10  ;;  %v4048_v56 = vadd.f32 %v4047_v53, %v3977_v11  ;;  %v16242_v57 = vpop.f32.mrb[49].mxu1  ;;  %v16258_v15 = vpop.f32.mrb[55].mxu0  ;;  %v4959_v11 = vld [vmem:[#allocation5 + $0x20] sm:$0xff]  ;;  %v4979_v10 = vld [vmem:[#allocation7 + $0x28] sm:$0xff] }
 0x76d   :  { %v20130_v50 = vpack.c.bf16 %v4960_v40, %v4959_v11  ;;  %v4961_v53 = vld [vmem:[#allocation5 + $0x30] sm:$0xff]  ;;  %v4981_v57 = vld [vmem:[#allocation7 + $0x38] sm:$0xff]  ;;  %v4964_v15 = vld [vmem:[#allocation5 + $0x40] sm:$0xff] }
 0x76e   :  { %18830 = vpow2.f32 %v14755_v55  ;;  %v4051_v59 = vadd.f32 %v20054_v58, %v4048_v56  ;;  %v4980_v56 = vld [vmem:[#allocation7 + $0x30] sm:$0xff] }
 0x770   :  { %v14756_v61 = vmul.f32 -1.442695, %v4051_v59  ;;  %v4965_v59 = vld [vmem:[#allocation5 + $0x48] sm:$0xff] }
 0x772   :  { %18832 = vpow2.f32 %v14756_v61  ;;  %v20151_v61 = vpack.c.bf16 %v4981_v57, %v4980_v56 }
 0x773   :  { %v4118_v62 = vpop.f32.mrb[50].mxu1  ;;  %v4259_v0 = vpop.f32.mrb[56].mxu0 }
 0x774   :  { %v4189_v3 = vadd.f32 %v4188_v54, %v4118_v62  ;;  %v16253_v4 = vpop.f32.mrb[51].mxu1  ;;  %v16269_v5 = vpop.f32.mrb[57].mxu0  ;;  %v4962_v54 = vld [vmem:[#allocation5 + $0x38] sm:$0xff]  ;;  %v20153_v62 = vpack.c.bf16 %v4965_v59, %v4964_v15 }
 0x775   :  { %v20142_v55 = vpack.c.bf16 %v4962_v54, %v4961_v53  ;;  %v4966_v4 = vld [vmem:[#allocation5 + $0x50] sm:$0xff]  ;;  %v4967_v5 = vld [vmem:[#allocation5 + $0x58] sm:$0xff] }
 0x776   :  { %v4192_v8 = vadd.f32 %v20060_v7, %v4189_v3  ;;  %v4984_v3 = vld [vmem:[#allocation7 + $0x48] sm:$0xff] }
 0x777   :  { %v4329_v9 = vpop.f32.mrb[52].mxu1 }
 0x778   :  { %v18831_v12 = vpop.eup %18830  ;;  %v4330_v13 = vadd.f32 %v4329_v9, %v4259_v0  ;;  %v16274_v41 = vpop.f32.mrb[53].mxu1  ;;  %18834 = vtanh.f32 %v4192_v8  ;;  %v4983_v0 = vld [vmem:[#allocation7 + $0x40] sm:$0xff]  ;;  %v20165_v9 = vpack.c.bf16 %v4967_v5, %v4966_v4 }
 0x779   :  { %v4337_v16 = vadd.f32 1.0, %v18831_v12  ;;  %v20163_v8 = vpack.c.bf16 %v4984_v3, %v4983_v0  ;;  %v4985_v12 = vld [vmem:[#allocation7 + $0x50] sm:$0xff]  ;;  %v4969_v41 = vld [vmem:[#allocation5 + $0x60] sm:$0xff] }
 0x77a   :  { %v4333_v18 = vadd.f32 %v20066_v17, %v4330_v13  ;;  %v4986_v13 = vld [vmem:[#allocation7 + $0x58] sm:$0xff] }
 0x77b   :  { %18836 = vrcp.f32 %v4337_v16  ;;  %v4970_v16 = vld [vmem:[#allocation5 + $0x68] sm:$0xff] }
 0x77c   :  { %v18833_v22 = vpop.eup %18832  ;;  %v14757_v23 = vmul.f32 -1.442695, %v4333_v18  ;;  %v20174_v18 = vpack.c.bf16 %v4986_v13, %v4985_v12  ;;  %v20414_v12 = vld [vmem:[%s21506_s6] ss:$0 sm:$0xff] }
 0x77d   :  { %v4343_v46 = vadd.f32 1.0, %v18833_v22  ;;  %v20176_v22 = vpack.c.bf16 %v4970_v16, %v4969_v41 }
 0x77e   :  { %18838 = vpow2.f32 %v14757_v23  ;;  %v4988_v23 = vld [vmem:[#allocation7 + $0x60] sm:$0xff] }
 0x77f   :  { %18840 = vrcp.f32 %v4343_v46  ;;  %v4989_v46 = vld [vmem:[#allocation7 + $0x68] sm:$0xff] }
 0x782   :  { %v18835_v24 = vpop.eup %18834 }
 0x785   :  { %v18837_v29 = vpop.eup %18836 }
 0x786   :  { %v4354_v35 = vmul.f32 %v18837_v29, %v18835_v24  ;;  %v4971_v24 = vld [vmem:[#allocation5 + $0x70] sm:$0xff]  ;;  %v4972_v29 = vld [vmem:[#allocation5 + $0x78] sm:$0xff] }
 0x788   :  { %v18839_v37 = vpop.eup %18838 }
 0x789   :  { %v18841_v39 = vpop.eup %18840  ;;  %v4350_v36 = vadd.f32 1.0, %v18839_v37  ;;  %v20188_v37 = vpack.c.bf16 %v4972_v29, %v4971_v24 }
 0x78a   :  { %v4353_v60 = vmul.f32 %v18841_v39, %v19960_v44  ;;  %v4954_v44 = vld [vmem:[#allocation5] sm:$0xff]  ;;  %v4990_v39 = vld [vmem:[#allocation7 + $0x70] sm:$0xff] }
 0x78b   :  { %18842 = vrcp.f32 %v4350_v36  ;;  %v4991_v36 = vld [vmem:[#allocation7 + $0x78] sm:$0xff] }
 0x78c   :  { %v20070_v32 = vadd.f32 %v4354_v35, %v4353_v60  ;;  %v20186_v35 = vpack.c.bf16 %v4989_v46, %v4988_v23  ;;  %v20197_v60 = vpack.c.bf16 %v4991_v36, %v4990_v39 }
 0x78e   :  { %18844 = vtanh.f32 %v20070_v32 }
 0x795   :  { %v18843_v63 = vpop.eup %18842 }
 0x798   :  { %v18845_v19 = vpop.eup %18844 }
 0x799   :  { %v20073_v25 = vmul.f32 %v18845_v19, %v18843_v63 }
 0x79b   :  { %16284 = vmatmul.mubr.msk.f32.vlgmr.msra.gmra.mrb[54].mxu1 %vm170_vm4, %v20073_v25  ;;  %16300 = vmatmul.mubr.msk.f32.vlgmr.msra.gmra.mrb[60].mxu0 %vm170_vm4, %v20073_v25 }
 0x79c   :  { %16303 = vmatpush3.msk.msra.mxu1 %vm252_vm1, %v19972_v27  ;;  %16319 = vmatpush3.msk.msra.mxu0 %vm252_vm1, %v19979_v45  ;;  %v4955_v27 = vld [vmem:[#allocation5 + $0x8] sm:$0xff] }
 0x79d   :  { %16304 = vmatprep.mubr.msk.f32.mxu1 %vm19260_vm0, %v21513_v2  ;;  %17938 = vmatprep.subr.bf16.mxu1 %v21515_v1  ;;  %v20103_v45 = vpack.c.bf16 %v4955_v27, %v4954_v44 }
 0x79e   :  { %16320 = vmatprep.mubr.msk.f32.mxu0 %vm19260_vm0, %v21513_v2  ;;  %17944 = vmatprep.subr.bf16.mxu0 %v21515_v1 }
 0x79f   :  { %16305 = vmatmul.mubr.msk.f32.vlgmr.msra.gmra.mrb[56].mxu1 %vm249_vm3, %v20035_v51  ;;  %16321 = vmatmul.mubr.msk.f32.vlgmr.msra.gmra.mrb[62].mxu0 %vm249_vm3, %v20035_v51 }
 0x7a0   :  { %17940 = vmatpush3.bf16.msra.mxu1 %v19457_v21  ;;  %17946 = vmatpush3.bf16.msra.mxu0 %v19502_v31  ;;  %v4973_v21 = vld [vmem:[#allocation7] sm:$0xff]  ;;  %v4974_v31 = vld [vmem:[#allocation7 + $0x8] sm:$0xff] }
 0x7a1   :  { %17941 = vmatprep.subr.bf16.mxu1 %v21515_v1  ;;  %17947 = vmatprep.subr.bf16.mxu0 %v21515_v1 }
 0x7a2   :  { %16315 = vmatprep.mubr.msk.f32.mxu1 %vm19260_vm0, %v21513_v2  ;;  %16331 = vmatprep.mubr.msk.f32.mxu0 %vm19260_vm0, %v21513_v2 }
 0x7a4   :  { %17943 = vmatpush3.bf16.msra.mxu1 %v19474_v26  ;;  %17949 = vmatpush3.bf16.msra.mxu0 %v19513_v34  ;;  %v20114_v26 = vpack.c.bf16 %v4974_v31, %v4973_v21  ;;  %v20116_v34 = vpack.c.bf16 %v4957_v20, %v4956_v49 }
 0x7a5   :  { %16334 = vmatprep.subr.mxu1 %v21513_v2  ;;  %17956 = vmatprep.subr.bf16.mxu0 %v21515_v1 }
 0x7a7   :  { %16316 = vmatmul.mubr.msk.f32.vlgmr.msra.gmra.mrb[58].mxu1 %vm170_vm4, %v20073_v25  ;;  %16332 = vmatmul.mubr.msk.f32.vlgmr.msra.gmra.mrb[64].mxu0 %vm170_vm4, %v20073_v25 }
 0x7a8   :  { %16335 = vmatpush3.msk.msra.mxu1 %vm252_vm1, %v20012_v30  ;;  %17958 = vmatpush3.bf16.msra.mxu0 %v20103_v45  ;;  %v20128_v30 = vpack.c.bf16 %v4976_v6, %v4975_v14 }
 0x7a9   :  { %16336 = vmatprep.mubr.msk.f32.mxu1 %vm19260_vm0, %v21513_v2  ;;  %17950 = vmatprep.subr.bf16.mxu1 %v21515_v1 }
 0x7aa   :  { %17959 = vmatprep.subr.bf16.mxu0 %v21515_v1  ;;  %16358 = vmatprep.mubr.msk.f32.mxu0 %vm19260_vm0, %v21513_v2 }
 0x7ab   :  { %16337 = vmatmul.mubr.msk.f32.vlgmr.msra.gmra.mrb[60].mxu1 %vm249_vm3, %v20035_v51  ;;  %v20140_v51 = vpack.c.bf16 %v4979_v10, %v4978_v47 }
 0x7ac   :  { %17952 = vmatpush3.bf16.msra.mxu1 %v20114_v26  ;;  %17961 = vmatpush3.bf16.msra.mxu0 %v20116_v34 }
 0x7ad   :  { %17953 = vmatprep.subr.bf16.mxu1 %v21515_v1  ;;  %17968 = vmatprep.subr.bf16.mxu0 %v21515_v1 }
 0x7ae   :  { %16347 = vmatprep.mubr.msk.f32.mxu1 %vm19260_vm0, %v21513_v2 }
 0x7af   :  { %16359 = vmatmul.mubr.msk.f32.vlgmr.msra.gmra.mrb[66].mxu0 %vm170_vm4, %v19573_v33 }
 0x7b0   :  { %17955 = vmatpush3.bf16.msra.mxu1 %v20128_v30  ;;  %17970 = vmatpush3.bf16.msra.mxu0 %v20130_v50 }
 0x7b1   :  { %17962 = vmatprep.subr.bf16.mxu1 %v21515_v1  ;;  %17971 = vmatprep.subr.bf16.mxu0 %v21515_v1 }
 0x7b2   :  { %16380 = vmatprep.mubr.msk.f32.mxu0 %vm19260_vm0, %v21513_v2 }
 0x7b3   :  { %16348 = vmatmul.mubr.f32.vlgmr.msra.gmra.mrb[62].mxu1 %v21513_v2 }
 0x7b4   :  { %17964 = vmatpush3.bf16.msra.mxu1 %v20140_v51  ;;  %17973 = vmatpush3.bf16.msra.mxu0 %v20142_v55 }
 0x7b5   :  { %17965 = vmatprep.subr.bf16.mxu1 %v21515_v1  ;;  %17980 = vmatprep.subr.bf16.mxu0 %v21515_v1 }
 0x7b6   :  { %16369 = vmatprep.mubr.msk.f32.mxu1 %vm19260_vm0, %v21513_v2 }
 0x7b7   :  { %16381 = vmatmul.mubr.msk.f32.vlgmr.msra.gmra.mrb[68].mxu0 %vm170_vm4, %v19573_v33 }
 0x7b8   :  { %17967 = vmatpush3.bf16.msra.mxu1 %v20151_v61  ;;  %17982 = vmatpush3.bf16.msra.mxu0 %v20153_v62 }
 0x7b9   :  { %17974 = vmatprep.subr.bf16.mxu1 %v21515_v1  ;;  %17983 = vmatprep.subr.bf16.mxu0 %v21515_v1 }
 0x7ba   :  { %16402 = vmatprep.mubr.msk.f32.mxu0 %vm19260_vm0, %v21513_v2 }
 0x7bb   :  { %16370 = vmatmul.mubr.f32.vlgmr.msra.gmra.mrb[64].mxu1 %v21513_v2 }
 0x7bc   :  { %17976 = vmatpush3.bf16.msra.mxu1 %v20163_v8  ;;  %17985 = vmatpush3.bf16.msra.mxu0 %v20165_v9 }
 0x7bd   :  { %17977 = vmatprep.subr.bf16.mxu1 %v21515_v1  ;;  %17992 = vmatprep.subr.bf16.mxu0 %v21515_v1 }
 0x7be   :  { %16391 = vmatprep.mubr.msk.f32.mxu1 %vm19260_vm0, %v21513_v2 }
 0x7bf   :  { %16403 = vmatmul.mubr.msk.f32.vlgmr.msra.gmra.mrb[70].mxu0 %vm170_vm4, %v19573_v33 }
 0x7c0   :  { %17979 = vmatpush3.bf16.msra.mxu1 %v20174_v18  ;;  %17994 = vmatpush3.bf16.msra.mxu0 %v20176_v22 }
 0x7c1   :  { %17986 = vmatprep.subr.bf16.mxu1 %v21515_v1  ;;  %17995 = vmatprep.subr.bf16.mxu0 %v21515_v1 }
 0x7c2   :  { %16424 = vmatprep.mubr.msk.f32.mxu0 %vm19260_vm0, %v21513_v2 }
 0x7c3   :  { %16392 = vmatmul.mubr.f32.vlgmr.msra.gmra.mrb[66].mxu1 %v21513_v2 }
 0x7c4   :  { %17988 = vmatpush3.bf16.msra.mxu1 %v20186_v35  ;;  %17997 = vmatpush3.bf16.msra.mxu0 %v20188_v37 }
 0x7c5   :  { %17989 = vmatprep.subr.bf16.mxu1 %v21515_v1  ;;  %18004 = vmatprep.subr.bf16.mxu0 %v21515_v1 }
 0x7c6   :  { %16413 = vmatprep.mubr.msk.f32.mxu1 %vm19260_vm0, %v21513_v2 }
 0x7c7   :  { %16425 = vmatmul.mubr.msk.f32.vlgmr.msra.gmra.mrb[72].mxu0 %vm170_vm4, %v19573_v33  ;;  %v20249_v33 = vpop.f32.mrb[58].mxu0 }
 0x7c8   :  { %17991 = vmatpush3.bf16.msra.mxu1 %v20197_v60  ;;  %18006 = vmatpush3.bf16.msra.mxu0 %v20103_v45  ;;  %v16290_v63 = vpop.f32.mrb[59].mxu0 }
 0x7c9   :  { %18007 = vmatprep.subr.bf16.mxu0 %v21515_v1  ;;  %16446 = vmatprep.mubr.msk.f32.mxu0 %vm19260_vm0, %v21513_v2 }
 0x7ca   :  { %17998 = vmatprep.subr.bf16.mxu1 %v21515_v1 }
 0x7cb   :  { %16414 = vmatmul.mubr.f32.vlgmr.msra.gmra.mrb[68].mxu1 %v21513_v2 }
 0x7cc   :  { %18009 = vmatpush3.bf16.msra.mxu0 %v20116_v34  ;;  %18000 = vmatpush3.bf16.msra.mxu1 %v20114_v26 }
 0x7cd   :  { %18016 = vmatprep.subr.bf16.mxu0 %v21515_v1  ;;  %18001 = vmatprep.subr.bf16.mxu1 %v21515_v1 }
 0x7ce   :  { %16435 = vmatprep.mubr.msk.f32.mxu1 %vm19260_vm0, %v21513_v2 }
 0x7cf   :  { %16447 = vmatmul.mubr.msk.f32.vlgmr.msra.gmra.mrb[74].mxu0 %vm170_vm4, %v19648_v38 }
 0x7d0   :  { %18018 = vmatpush3.bf16.msra.mxu0 %v20130_v50  ;;  %16468 = vmatprep.mubr.msk.f32.mxu0 %vm19260_vm0, %v21513_v2 }
 0x7d1   :  { %18019 = vmatprep.subr.bf16.mxu0 %v21515_v1  ;;  %18003 = vmatpush3.bf16.msra.mxu1 %v20128_v30 }
 0x7d2   :  { %18010 = vmatprep.subr.bf16.mxu1 %v21515_v1 }
 0x7d4   :  { %18021 = vmatpush3.bf16.msra.mxu0 %v20142_v55 }
 0x7d5   :  { %18028 = vmatprep.subr.bf16.mxu0 %v21515_v1 }
 0x7d7   :  { %16469 = vmatmul.mubr.msk.f32.vlgmr.msra.gmra.mrb[76].mxu0 %vm170_vm4, %v19648_v38 }
 0x7d8   :  { %18030 = vmatpush3.bf16.msra.mxu0 %v20153_v62  ;;  %16490 = vmatprep.mubr.msk.f32.mxu0 %vm19260_vm0, %v21513_v2 }
 0x7d9   :  { %18031 = vmatprep.subr.bf16.mxu0 %v21515_v1 }
 0x7dc   :  { %18033 = vmatpush3.bf16.msra.mxu0 %v20165_v9 }
 0x7dd   :  { %18040 = vmatprep.subr.bf16.mxu0 %v21515_v1 }
 0x7df   :  { %16491 = vmatmul.mubr.msk.f32.vlgmr.msra.gmra.mrb[78].mxu0 %vm170_vm4, %v19648_v38 }
 0x7e0   :  { %18042 = vmatpush3.bf16.msra.mxu0 %v20176_v22  ;;  %16512 = vmatprep.mubr.msk.f32.mxu0 %vm19260_vm0, %v21513_v2 }
 0x7e1   :  { %18043 = vmatprep.subr.bf16.mxu0 %v21515_v1 }
 0x7e4   :  { %18045 = vmatpush3.bf16.msra.mxu0 %v20188_v37 }
 0x7e5   :  { %18052 = vmatprep.subr.bf16.mxu0 %v21515_v1 }
 0x7e7   :  { %16513 = vmatmul.mubr.msk.f32.vlgmr.msra.gmra.mrb[80].mxu0 %vm170_vm4, %v19648_v38 }
 0x7e8   :  { %18054 = vmatpush3.bf16.msra.mxu0 %v20103_v45  ;;  %16534 = vmatprep.mubr.msk.f32.mxu0 %vm19260_vm0, %v21513_v2 }
 0x7e9   :  { %18055 = vmatprep.subr.bf16.mxu0 %v21515_v1 }
 0x7ec   :  { %18057 = vmatpush3.bf16.msra.mxu0 %v20116_v34 }
 0x7ed   :  { %18064 = vmatprep.subr.bf16.mxu0 %v21515_v1 }
 0x7ef   :  { %16535 = vmatmul.mubr.msk.f32.vlgmr.msra.gmra.mrb[82].mxu0 %vm170_vm4, %v19723_v42 }
 0x7f0   :  { %18066 = vmatpush3.bf16.msra.mxu0 %v20130_v50  ;;  %16556 = vmatprep.mubr.msk.f32.mxu0 %vm19260_vm0, %v21513_v2 }
 0x7f1   :  { %18067 = vmatprep.subr.bf16.mxu0 %v21515_v1 }
 0x7f4   :  { %18069 = vmatpush3.bf16.msra.mxu0 %v20142_v55 }
 0x7f5   :  { %18076 = vmatprep.subr.bf16.mxu0 %v21515_v1 }
 0x7f7   :  { %16557 = vmatmul.mubr.msk.f32.vlgmr.msra.gmra.mrb[84].mxu0 %vm170_vm4, %v19723_v42 }
 0x7f8   :  { %18078 = vmatpush3.bf16.msra.mxu0 %v20153_v62  ;;  %16578 = vmatprep.mubr.msk.f32.mxu0 %vm19260_vm0, %v21513_v2 }
 0x7f9   :  { %18079 = vmatprep.subr.bf16.mxu0 %v21515_v1 }
 0x7fc   :  { %18081 = vmatpush3.bf16.msra.mxu0 %v20165_v9 }
 0x7fd   :  { %18088 = vmatprep.subr.bf16.mxu0 %v21515_v1 }
 0x7ff   :  { %16579 = vmatmul.mubr.msk.f32.vlgmr.msra.gmra.mrb[86].mxu0 %vm170_vm4, %v19723_v42 }
 0x800   :  { %18090 = vmatpush3.bf16.msra.mxu0 %v20176_v22  ;;  %16600 = vmatprep.mubr.msk.f32.mxu0 %vm19260_vm0, %v21513_v2 }
 0x801   :  { %18091 = vmatprep.subr.bf16.mxu0 %v21515_v1 }
 0x804   :  { %18093 = vmatpush3.bf16.msra.mxu0 %v20188_v37 }
 0x805   :  { %18100 = vmatprep.subr.bf16.mxu0 %v21515_v1 }
 0x807   :  { %16601 = vmatmul.mubr.msk.f32.vlgmr.msra.gmra.mrb[88].mxu0 %vm170_vm4, %v19723_v42 }
 0x808   :  { %18102 = vmatpush3.bf16.msra.mxu0 %v20103_v45  ;;  %16622 = vmatprep.mubr.msk.f32.mxu0 %vm19260_vm0, %v21513_v2 }
 0x809   :  { %18103 = vmatprep.subr.bf16.mxu0 %v21515_v1 }
 0x80c   :  { %18105 = vmatpush3.bf16.msra.mxu0 %v20116_v34 }
 0x80d   :  { %18112 = vmatprep.subr.bf16.mxu0 %v21515_v1 }
 0x80f   :  { %16623 = vmatmul.mubr.msk.f32.vlgmr.msra.gmra.mrb[90].mxu0 %vm170_vm4, %v19798_v43 }
 0x810   :  { %18114 = vmatpush3.bf16.msra.mxu0 %v20130_v50  ;;  %16644 = vmatprep.mubr.msk.f32.mxu0 %vm19260_vm0, %v21513_v2 }
 0x811   :  { %18115 = vmatprep.subr.bf16.mxu0 %v21515_v1 }
 0x814   :  { %18117 = vmatpush3.bf16.msra.mxu0 %v20142_v55 }
 0x815   :  { %18124 = vmatprep.subr.bf16.mxu0 %v21515_v1 }
 0x817   :  { %16645 = vmatmul.mubr.msk.f32.vlgmr.msra.gmra.mrb[92].mxu0 %vm170_vm4, %v19798_v43 }
 0x818   :  { %18126 = vmatpush3.bf16.msra.mxu0 %v20153_v62  ;;  %16666 = vmatprep.mubr.msk.f32.mxu0 %vm19260_vm0, %v21513_v2 }
 0x819   :  { %18127 = vmatprep.subr.bf16.mxu0 %v21515_v1 }
 0x81c   :  { %18129 = vmatpush3.bf16.msra.mxu0 %v20165_v9 }
 0x81d   :  { %18136 = vmatprep.subr.bf16.mxu0 %v21515_v1 }
 0x81f   :  { %16667 = vmatmul.mubr.msk.f32.vlgmr.msra.gmra.mrb[94].mxu0 %vm170_vm4, %v19798_v43 }
 0x820   :  { %18138 = vmatpush3.bf16.msra.mxu0 %v20176_v22  ;;  %16688 = vmatprep.mubr.msk.f32.mxu0 %vm19260_vm0, %v21513_v2 }
 0x821   :  { %18139 = vmatprep.subr.bf16.mxu0 %v21515_v1 }
 0x824   :  { %18141 = vmatpush3.bf16.msra.mxu0 %v20188_v37 }
 0x825   :  { %18148 = vmatprep.subr.bf16.mxu0 %v21515_v1 }
 0x827   :  { %16689 = vmatmul.mubr.msk.f32.vlgmr.msra.gmra.mrb[96].mxu0 %vm170_vm4, %v19798_v43 }
 0x828   :  { %18150 = vmatpush3.bf16.msra.mxu0 %v20103_v45  ;;  %16710 = vmatprep.mubr.msk.f32.mxu0 %vm19260_vm0, %v21513_v2 }
 0x829   :  { %18151 = vmatprep.subr.bf16.mxu0 %v21515_v1 }
 0x82c   :  { %18153 = vmatpush3.bf16.msra.mxu0 %v20116_v34 }
 0x82d   :  { %18160 = vmatprep.subr.bf16.mxu0 %v21515_v1 }
 0x82f   :  { %16711 = vmatmul.mubr.msk.f32.vlgmr.msra.gmra.mrb[98].mxu0 %vm170_vm4, %v19873_v48 }
 0x830   :  { %18162 = vmatpush3.bf16.msra.mxu0 %v20130_v50  ;;  %16732 = vmatprep.mubr.msk.f32.mxu0 %vm19260_vm0, %v21513_v2 }
 0x831   :  { %18163 = vmatprep.subr.bf16.mxu0 %v21515_v1 }
 0x834   :  { %18165 = vmatpush3.bf16.msra.mxu0 %v20142_v55 }
 0x835   :  { %18172 = vmatprep.subr.bf16.mxu0 %v21515_v1 }
 0x837   :  { %16733 = vmatmul.mubr.msk.f32.vlgmr.msra.gmra.mrb[100].mxu0 %vm170_vm4, %v19873_v48 }
 0x838   :  { %18174 = vmatpush3.bf16.msra.mxu0 %v20153_v62  ;;  %16754 = vmatprep.mubr.msk.f32.mxu0 %vm19260_vm0, %v21513_v2 }
 0x839   :  { %18175 = vmatprep.subr.bf16.mxu0 %v21515_v1 }
 0x83c   :  { %18177 = vmatpush3.bf16.msra.mxu0 %v20165_v9 }
 0x83d   :  { %18184 = vmatprep.subr.bf16.mxu0 %v21515_v1 }
 0x83f   :  { %16755 = vmatmul.mubr.msk.f32.vlgmr.msra.gmra.mrb[102].mxu0 %vm170_vm4, %v19873_v48 }
 0x840   :  { %18186 = vmatpush3.bf16.msra.mxu0 %v20176_v22  ;;  %16776 = vmatprep.mubr.msk.f32.mxu0 %vm19260_vm0, %v21513_v2 }
 0x841   :  { %18187 = vmatprep.subr.bf16.mxu0 %v21515_v1 }
 0x844   :  { %18189 = vmatpush3.bf16.msra.mxu0 %v20188_v37 }
 0x845   :  { %18196 = vmatprep.subr.bf16.mxu0 %v21515_v1 }
 0x847   :  { %16777 = vmatmul.mubr.msk.f32.vlgmr.msra.gmra.mrb[104].mxu0 %vm170_vm4, %v19873_v48 }
 0x848   :  { %18198 = vmatpush3.bf16.msra.mxu0 %v20103_v45  ;;  %16798 = vmatprep.mubr.msk.f32.mxu0 %vm19260_vm0, %v21513_v2 }
 0x849   :  { %18199 = vmatprep.subr.bf16.mxu0 %v21515_v1 }
 0x84c   :  { %18201 = vmatpush3.bf16.msra.mxu0 %v20116_v34 }
 0x84d   :  { %18208 = vmatprep.subr.bf16.mxu0 %v21515_v1 }
 0x84f   :  { %16799 = vmatmul.mubr.msk.f32.vlgmr.msra.gmra.mrb[106].mxu0 %vm170_vm4, %v19963_v28 }
 0x850   :  { %18210 = vmatpush3.bf16.msra.mxu0 %v20130_v50  ;;  %16820 = vmatprep.mubr.msk.f32.mxu0 %vm19260_vm0, %v21513_v2 }
 0x851   :  { %18211 = vmatprep.subr.bf16.mxu0 %v21515_v1 }
 0x854   :  { %18213 = vmatpush3.bf16.msra.mxu0 %v20142_v55 }
 0x855   :  { %18220 = vmatprep.subr.bf16.mxu0 %v21515_v1 }
 0x857   :  { %16821 = vmatmul.mubr.msk.f32.vlgmr.msra.gmra.mrb[108].mxu0 %vm170_vm4, %v19963_v28 }
 0x858   :  { %18222 = vmatpush3.bf16.msra.mxu0 %v20153_v62  ;;  %16842 = vmatprep.mubr.msk.f32.mxu0 %vm19260_vm0, %v21513_v2 }
 0x859   :  { %18223 = vmatprep.subr.bf16.mxu0 %v21515_v1 }
 0x85c   :  { %18225 = vmatpush3.bf16.msra.mxu0 %v20165_v9 }
 0x85d   :  { %18232 = vmatprep.subr.bf16.mxu0 %v21515_v1 }
 0x85f   :  { %16843 = vmatmul.mubr.msk.f32.vlgmr.msra.gmra.mrb[110].mxu0 %vm170_vm4, %v19963_v28 }
 0x860   :  { %18234 = vmatpush3.bf16.msra.mxu0 %v20176_v22  ;;  %16864 = vmatprep.mubr.msk.f32.mxu0 %vm19260_vm0, %v21513_v2 }
 0x861   :  { %18235 = vmatprep.subr.bf16.mxu0 %v21515_v1 }
 0x864   :  { %18237 = vmatpush3.bf16.msra.mxu0 %v20188_v37 }
 0x865   :  { %18244 = vmatprep.subr.bf16.mxu0 %v21515_v1 }
 0x867   :  { %16865 = vmatmul.mubr.msk.f32.vlgmr.msra.gmra.mrb[112].mxu0 %vm170_vm4, %v19963_v28 }
 0x868   :  { %18246 = vmatpush3.bf16.msra.mxu0 %v20103_v45  ;;  %16886 = vmatprep.mubr.msk.f32.mxu0 %vm19260_vm0, %v21513_v2 }
 0x869   :  { %18247 = vmatprep.subr.bf16.mxu0 %v21515_v1 }
 0x86c   :  { %18249 = vmatpush3.bf16.msra.mxu0 %v20116_v34 }
 0x86d   :  { %18256 = vmatprep.subr.bf16.mxu0 %v21515_v1 }
 0x86e   :  { %v4427_v38 = vpop.f32.mrb[54].mxu1  ;;  %v4573_v42 = vpop.f32.mrb[60].mxu0 }
 0x86f   :  { %v4503_v43 = vadd.f32 %v20249_v33, %v4427_v38  ;;  %16887 = vmatmul.mubr.msk.f32.vlgmr.msra.gmra.mrb[114].mxu0 %vm170_vm4, %v20073_v25  ;;  %v16285_v48 = vpop.f32.mrb[55].mxu1  ;;  %v16301_v28 = vpop.f32.mrb[61].mxu0 }
 0x870   :  { %18258 = vmatpush3.bf16.msra.mxu0 %v20130_v50  ;;  %16908 = vmatprep.mubr.msk.f32.mxu0 %vm19260_vm0, %v21513_v2 }
 0x871   :  { %v4506_v19 = vadd.f32 %v20048_v52, %v4503_v43  ;;  %18259 = vmatprep.subr.bf16.mxu0 %v21515_v1 }
 0x872   :  { %v4643_v44 = vpop.f32.mrb[56].mxu1  ;;  %v4784_v27 = vpop.f32.mrb[62].mxu0 }
 0x873   :  { %v14770_v21 = vmul.f32 -1.442695, %v4506_v19  ;;  %v4644_v31 = vadd.f32 %v4643_v44, %v4573_v42  ;;  %v16306_v49 = vpop.f32.mrb[57].mxu1  ;;  %v16322_v20 = vpop.f32.mrb[63].mxu0 }
 0x874   :  { %18261 = vmatpush3.bf16.msra.mxu0 %v20142_v55 }
 0x875   :  { %18846 = vpow2.f32 %v14770_v21  ;;  %v4647_v14 = vadd.f32 %v20054_v58, %v4644_v31  ;;  %18268 = vmatprep.subr.bf16.mxu0 %v21515_v1  ;;  %v20435_v21 = vld [vmem:[%s21506_s6 + $0x2] ss:$0 sm:$0xff] }
 0x877   :  { %v14771_v6 = vmul.f32 -1.442695, %v4647_v14  ;;  %16909 = vmatmul.mubr.msk.f32.vlgmr.msra.gmra.mrb[116].mxu0 %vm170_vm4, %v20073_v25 }
 0x878   :  { %18270 = vmatpush3.bf16.msra.mxu0 %v20153_v62  ;;  %16930 = vmatprep.mubr.msk.f32.mxu0 %vm19260_vm0, %v21513_v2 }
 0x879   :  { %18848 = vpow2.f32 %v14771_v6  ;;  %18271 = vmatprep.subr.bf16.mxu0 %v21515_v1 }
 0x87a   :  { %v4714_v52 = vpop.f32.mrb[58].mxu1  ;;  %v4855_v11 = vpop.f32.mrb[64].mxu0 }
 0x87b   :  { %v4785_v40 = vadd.f32 %v4784_v27, %v4714_v52  ;;  %v16317_v47 = vpop.f32.mrb[59].mxu1  ;;  %v16333_v10 = vpop.f32.mrb[65].mxu0 }
 0x87c   :  { %18273 = vmatpush3.bf16.msra.mxu0 %v20165_v9  ;;  %v20441_v47 = vld [vmem:[%s21506_s6 + $0x3] ss:$0 sm:$0xff] }
 0x87d   :  { %v4788_v58 = vadd.f32 %v20060_v7, %v4785_v40  ;;  %18280 = vmatprep.subr.bf16.mxu0 %v21515_v1 }
 0x87e   :  { %v4925_v53 = vpop.f32.mrb[60].mxu1 }
 0x87f   :  { %v18847_v54 = vpop.eup %18846  ;;  %v4926_v56 = vadd.f32 %v4925_v53, %v4855_v11  ;;  %v16338_v57 = vpop.f32.mrb[61].mxu1  ;;  %16931 = vmatmul.mubr.msk.f32.vlgmr.msra.gmra.mrb[118].mxu0 %vm170_vm4, %v20073_v25  ;;  %18850 = vtanh.f32 %v4788_v58 }
 0x880   :  { %v4933_v15 = vadd.f32 1.0, %v18847_v54  ;;  %18282 = vmatpush3.bf16.msra.mxu0 %v20176_v22  ;;  %16952 = vmatprep.mubr.msk.f32.mxu0 %vm19260_vm0, %v21513_v2 }
 0x881   :  { %v4929_v59 = vadd.f32 %v20066_v17, %v4926_v56  ;;  %18283 = vmatprep.subr.bf16.mxu0 %v21515_v1 }
 0x882   :  { %18852 = vrcp.f32 %v4933_v15  ;;  %v5159_v7 = vpop.f32.mrb[66].mxu0 }
 0x883   :  { %v18849_v0 = vpop.eup %18848  ;;  %v14772_v3 = vmul.f32 -1.442695, %v4929_v59  ;;  %v16360_v4 = vpop.f32.mrb[67].mxu0 }
 0x884   :  { %v4939_v5 = vadd.f32 1.0, %v18849_v0  ;;  %18285 = vmatpush3.bf16.msra.mxu0 %v20188_v37 }
 0x885   :  { %18854 = vpow2.f32 %v14772_v3  ;;  %18292 = vmatprep.subr.bf16.mxu0 %v21515_v1 }
 0x886   :  { %18856 = vrcp.f32 %v4939_v5  ;;  %v5089_v17 = vpop.f32.mrb[62].mxu1 }
 0x887   :  { %v5160_v13 = vadd.f32 %v5159_v7, %v5089_v17  ;;  %v16349_v41 = vpop.f32.mrb[63].mxu1  ;;  %16953 = vmatmul.mubr.msk.f32.vlgmr.msra.gmra.mrb[120].mxu0 %vm170_vm4, %v20073_v25  ;;  %v20428_v25 = vld [vmem:[%s21506_s6 + $0x1] ss:$0 sm:$0xff] }
 0x888   :  { %18294 = vmatpush3.bf16.msra.mxu0 %v20103_v45  ;;  %16974 = vmatprep.mubr.msk.f32.mxu0 %vm19260_vm0, %v21513_v2 }
 0x889   :  { %v5163_v16 = vadd.f32 %v20414_v12, %v5160_v13  ;;  %18295 = vmatprep.subr.bf16.mxu0 %v21515_v1  ;;  %v18851_v46 = vpop.eup %18850 }
 0x88a   :  { %v5300_v23 = vpop.f32.mrb[68].mxu0 }
 0x88b   :  { %v14784_v24 = vmul.f32 -1.442695, %v5163_v16  ;;  %v16382_v29 = vpop.f32.mrb[69].mxu0 }
 0x88c   :  { %v18853_v39 = vpop.eup %18852  ;;  %18297 = vmatpush3.bf16.msra.mxu0 %v20116_v34  ;;  %v9752_v29 = vld [vmem:[#allocation8 + $0x8] sm:$0xff] }
 0x88d   :  { %v4950_v36 = vmul.f32 %v18853_v39, %v18851_v46  ;;  %18858 = vpow2.f32 %v14784_v24  ;;  %18304 = vmatprep.subr.bf16.mxu0 %v21515_v1 }
 0x88e   :  { %v5230_v45 = vpop.f32.mrb[64].mxu1 }
 0x88f   :  { %v18855_v33 = vpop.eup %18854  ;;  %v5301_v63 = vadd.f32 %v5300_v23, %v5230_v45  ;;  %v16371_v38 = vpop.f32.mrb[65].mxu1  ;;  %v9754_v45 = vld [vmem:[#allocation8 + $0x18] sm:$0xff] }
 0x890   :  { %v18857_v42 = vpop.eup %18856  ;;  %v4946_v43 = vadd.f32 1.0, %v18855_v33 }
 0x891   :  { %v4949_v48 = vmul.f32 %v18857_v42, %v20070_v32  ;;  %v5304_v28 = vadd.f32 %v20428_v25, %v5301_v63  ;;  %v9757_v42 = vld [vmem:[#allocation8 + $0x28] sm:$0xff] }
 0x892   :  { %v5441_v34 = vpop.f32.mrb[70].mxu0  ;;  %18860 = vrcp.f32 %v4946_v43 }
 0x893   :  { %v4951_v19 = vadd.f32 %v4950_v36, %v4949_v48  ;;  %v14785_v44 = vmul.f32 -1.442695, %v5304_v28  ;;  %v16404_v27 = vpop.f32.mrb[71].mxu0  ;;  %v9753_v36 = vld [vmem:[#allocation8 + $0x10] sm:$0xff] }
 0x894   :  { %v20480_v63 = vpack.c.bf16 %v9754_v45, %v9753_v36 }
 0x895   :  { %18862 = vtanh.f32 %v4951_v19  ;;  %v9759_v19 = vld [vmem:[#allocation8 + $0x38] sm:$0xff] }
 0x896   :  { %18864 = vpow2.f32 %v14785_v44  ;;  %v5371_v31 = vpop.f32.mrb[66].mxu1 }
 0x897   :  { %v18859_v49 = vpop.eup %18858  ;;  %v5442_v20 = vadd.f32 %v5441_v34, %v5371_v31  ;;  %v16393_v14 = vpop.f32.mrb[67].mxu1  ;;  %v9758_v34 = vld [vmem:[#allocation8 + $0x30] sm:$0xff] }
 0x898   :  { %v5590_v6 = vadd.f32 1.0, %v18859_v49  ;;  %v20502_v31 = vpack.c.bf16 %v9759_v19, %v9758_v34  ;;  %v9761_v49 = vld [vmem:[#allocation8 + $0x40] sm:$0xff] }
 0x899   :  { %v5445_v32 = vadd.f32 %v20435_v21, %v5442_v20  ;;  %v9762_v20 = vld [vmem:[#allocation8 + $0x48] sm:$0xff] }
 0x89a   :  { %18866 = vrcp.f32 %v5590_v6  ;;  %v5582_v52 = vpop.f32.mrb[72].mxu0  ;;  %v20510_v14 = vpack.c.bf16 %v9762_v20, %v9761_v49  ;;  %v9763_v6 = vld [vmem:[#allocation8 + $0x50] sm:$0xff] }
 0x89b   :  { %18868 = vtanh.f32 %v5445_v32  ;;  %v16426_v11 = vpop.f32.mrb[73].mxu0  ;;  %v9764_v32 = vld [vmem:[#allocation8 + $0x58] sm:$0xff] }
 0x89c   :  { %v18861_v40 = vpop.eup %18860 }
 0x89e   :  { %v5512_v10 = vpop.f32.mrb[68].mxu1 }
 0x89f   :  { %v18863_v58 = vpop.eup %18862  ;;  %v5583_v53 = vadd.f32 %v5582_v52, %v5512_v10  ;;  %v16415_v54 = vpop.f32.mrb[69].mxu1  ;;  %v9766_v10 = vld [vmem:[#allocation8 + $0x60] sm:$0xff] }
 0x8a0   :  { %v18865_v56 = vpop.eup %18864  ;;  %v4953_v57 = vmul.f32 %v18863_v58, %v18861_v40  ;;  %v20524_v40 = vpack.c.bf16 %v9764_v32, %v9763_v6  ;;  %v9767_v58 = vld [vmem:[#allocation8 + $0x68] sm:$0xff]  ;;  %v9768_v54 = vld [vmem:[#allocation8 + $0x70] sm:$0xff] }
 0x8a1   :  { %v5596_v15 = vadd.f32 1.0, %v18865_v56  ;;  %v5586_v59 = vadd.f32 %v20441_v47, %v5583_v53  ;;  %v20532_v53 = vpack.c.bf16 %v9767_v58, %v9766_v10  ;;  %v9769_v56 = vld [vmem:[#allocation8 + $0x78] sm:$0xff] }
 0x8a2   :  { %v20444_v7 = vpop.f32.mrb[74].mxu0  ;;  %16975 = vmatmul.mubr.msk.f32.vlgmr.msra.gmra.mrb[122].mxu0 %vm170_vm4, %v4953_v57 }
 0x8a3   :  { %18870 = vrcp.f32 %v5596_v15  ;;  %v14786_v0 = vmul.f32 -1.442695, %v5586_v59  ;;  %v16448_v3 = vpop.f32.mrb[75].mxu0  ;;  %18306 = vmatpush3.bf16.msra.mxu0 %v20130_v50  ;;  %16996 = vmatprep.mubr.msk.f32.mxu0 %vm19260_vm0, %v21513_v2  ;;  %v20546_v59 = vpack.c.bf16 %v9769_v56, %v9768_v54 }
 0x8a4   :  { %v18867_v4 = vpop.eup %18866  ;;  %18307 = vmatprep.subr.bf16.mxu0 %v21515_v1 }
 0x8a5   :  { %v18869_v5 = vpop.eup %18868  ;;  %18872 = vpow2.f32 %v14786_v0 }
 0x8a6   :  { %v5607_v17 = vmul.f32 %v18869_v5, %v18867_v4 }
 0x8a7   :  { %18309 = vmatpush3.bf16.msra.mxu0 %v20142_v55 }
 0x8a8   :  { %18316 = vmatprep.subr.bf16.mxu0 %v21515_v1 }
 0x8aa   :  { %v20453_v13 = vpop.f32.mrb[76].mxu0  ;;  %16997 = vmatmul.mubr.msk.f32.vlgmr.msra.gmra.mrb[124].mxu0 %vm170_vm4, %v4953_v57 }
 0x8ab   :  { %v16470_v41 = vpop.f32.mrb[77].mxu0  ;;  %18318 = vmatpush3.bf16.msra.mxu0 %v20153_v62  ;;  %17018 = vmatprep.mubr.msk.f32.mxu0 %vm19260_vm0, %v21513_v2 }
 0x8ac   :  { %18319 = vmatprep.subr.bf16.mxu0 %v21515_v1 }
 0x8ad   :  { %v18871_v50 = vpop.eup %18870 }
 0x8ae   :  { %v5606_v16 = vmul.f32 0.0, %v18871_v50 }
 0x8af   :  { %v18873_v23 = vpop.eup %18872  ;;  %18321 = vmatpush3.bf16.msra.mxu0 %v20165_v9  ;;  %v9751_v9 = vld [vmem:[#allocation8] sm:$0xff] }
 0x8b0   :  { %v20461_v55 = vadd.f32 %v5607_v17, %v5606_v16  ;;  %v5603_v46 = vadd.f32 1.0, %v18873_v23  ;;  %18328 = vmatprep.subr.bf16.mxu0 %v21515_v1  ;;  %v20473_v39 = vpack.c.bf16 %v9752_v29, %v9751_v9 }
 0x8b2   :  { %18874 = vtanh.f32 %v20461_v55  ;;  %v20465_v24 = vpop.f32.mrb[78].mxu0  ;;  %17019 = vmatmul.mubr.msk.f32.vlgmr.msra.gmra.mrb[126].mxu0 %vm170_vm4, %v4953_v57 }
 0x8b3   :  { %18876 = vrcp.f32 %v5603_v46  ;;  %v16492_v62 = vpop.f32.mrb[79].mxu0  ;;  %18330 = vmatpush3.bf16.msra.mxu0 %v20176_v22  ;;  %17040 = vmatprep.mubr.msk.f32.mxu0 %vm19260_vm0, %v21513_v2 }
 0x8b4   :  { %18331 = vmatprep.subr.bf16.mxu0 %v21515_v1 }
 0x8b7   :  { %18333 = vmatpush3.bf16.msra.mxu0 %v20188_v37  ;;  %v9756_v37 = vld [vmem:[#allocation8 + $0x20] sm:$0xff] }
 0x8b8   :  { %18340 = vmatprep.subr.bf16.mxu0 %v21515_v1  ;;  %v20488_v28 = vpack.c.bf16 %v9757_v42, %v9756_v37 }
 0x8ba   :  { %v20476_v33 = vpop.f32.mrb[80].mxu0  ;;  %17041 = vmatmul.mubr.msk.f32.vlgmr.msra.gmra.mrb[128].mxu0 %vm170_vm4, %v4953_v57 }
 0x8bb   :  { %v16514_v22 = vpop.f32.mrb[81].mxu0  ;;  %18342 = vmatpush3.bf16.msra.mxu0 %v20473_v39  ;;  %17062 = vmatprep.mubr.msk.f32.mxu0 %vm19260_vm0, %v21513_v2 }
 0x8bc   :  { %v18875_v38 = vpop.eup %18874  ;;  %18343 = vmatprep.subr.bf16.mxu0 %v21515_v1 }
 0x8bd   :  { %v18877_v43 = vpop.eup %18876 }
 0x8be   :  { %v20485_v48 = vmul.f32 %v18877_v43, %v18875_v38 }
 0x8bf   :  { %18345 = vmatpush3.bf16.msra.mxu0 %v20480_v63 }
 0x8c0   :  { %16436 = vmatmul.mubr.msk.f32.vlgmr.msra.gmra.mrb[70].mxu1 %vm170_vm4, %v20485_v48  ;;  %18352 = vmatprep.subr.bf16.mxu0 %v21515_v1 }
 0x8c1   :  { %18012 = vmatpush3.bf16.msra.mxu1 %v20140_v51  ;;  %16457 = vmatprep.mubr.msk.f32.mxu1 %vm19260_vm0, %v21513_v2 }
 0x8c2   :  { %18013 = vmatprep.subr.bf16.mxu1 %v21515_v1  ;;  %v20497_v44 = vpop.f32.mrb[82].mxu0  ;;  %17063 = vmatmul.mubr.msk.f32.vlgmr.msra.gmra.mrb[130].mxu0 %vm170_vm4, %v20485_v48 }
 0x8c3   :  { %v16536_v27 = vpop.f32.mrb[83].mxu0  ;;  %18354 = vmatpush3.bf16.msra.mxu0 %v20488_v28  ;;  %17084 = vmatprep.mubr.msk.f32.mxu0 %vm19260_vm0, %v21513_v2 }
 0x8c4   :  { %18355 = vmatprep.subr.bf16.mxu0 %v21515_v1 }
 0x8c5   :  { %18015 = vmatpush3.bf16.msra.mxu1 %v20151_v61 }
 0x8c6   :  { %18022 = vmatprep.subr.bf16.mxu1 %v21515_v1 }
 0x8c7   :  { %18357 = vmatpush3.bf16.msra.mxu0 %v20502_v31 }
 0x8c8   :  { %16458 = vmatmul.mubr.msk.f32.vlgmr.msra.gmra.mrb[72].mxu1 %vm170_vm4, %v20485_v48  ;;  %18364 = vmatprep.subr.bf16.mxu0 %v21515_v1 }
 0x8c9   :  { %18024 = vmatpush3.bf16.msra.mxu1 %v20163_v8  ;;  %16479 = vmatprep.mubr.msk.f32.mxu1 %vm19260_vm0, %v21513_v2 }
 0x8ca   :  { %18025 = vmatprep.subr.bf16.mxu1 %v21515_v1  ;;  %v20519_v52 = vpop.f32.mrb[84].mxu0  ;;  %17085 = vmatmul.mubr.msk.f32.vlgmr.msra.gmra.mrb[132].mxu0 %vm170_vm4, %v20485_v48 }
 0x8cb   :  { %v16558_v11 = vpop.f32.mrb[85].mxu0  ;;  %18366 = vmatpush3.bf16.msra.mxu0 %v20510_v14  ;;  %17106 = vmatprep.mubr.msk.f32.mxu0 %vm19260_vm0, %v21513_v2 }
 0x8cc   :  { %18367 = vmatprep.subr.bf16.mxu0 %v21515_v1 }
 0x8cd   :  { %18027 = vmatpush3.bf16.msra.mxu1 %v20174_v18 }
 0x8ce   :  { %18034 = vmatprep.subr.bf16.mxu1 %v21515_v1 }
 0x8cf   :  { %18369 = vmatpush3.bf16.msra.mxu0 %v20524_v40 }
 0x8d0   :  { %16480 = vmatmul.mubr.msk.f32.vlgmr.msra.gmra.mrb[74].mxu1 %vm170_vm4, %v20485_v48  ;;  %18376 = vmatprep.subr.bf16.mxu0 %v21515_v1 }
 0x8d1   :  { %18036 = vmatpush3.bf16.msra.mxu1 %v20186_v35  ;;  %16501 = vmatprep.mubr.msk.f32.mxu1 %vm19260_vm0, %v21513_v2 }
 0x8d2   :  { %18037 = vmatprep.subr.bf16.mxu1 %v21515_v1  ;;  %v20541_v57 = vpop.f32.mrb[86].mxu0  ;;  %17107 = vmatmul.mubr.msk.f32.vlgmr.msra.gmra.mrb[134].mxu0 %vm170_vm4, %v20485_v48 }
 0x8d3   :  { %v16580_v15 = vpop.f32.mrb[87].mxu0  ;;  %18378 = vmatpush3.bf16.msra.mxu0 %v20532_v53  ;;  %17128 = vmatprep.mubr.msk.f32.mxu0 %vm19260_vm0, %v21513_v2 }
 0x8d4   :  { %18379 = vmatprep.subr.bf16.mxu0 %v21515_v1 }
 0x8d5   :  { %18039 = vmatpush3.bf16.msra.mxu1 %v20197_v60 }
 0x8d6   :  { %18046 = vmatprep.subr.bf16.mxu1 %v21515_v1 }
 0x8d7   :  { %18381 = vmatpush3.bf16.msra.mxu0 %v20546_v59 }
 0x8d8   :  { %16502 = vmatmul.mubr.msk.f32.vlgmr.msra.gmra.mrb[76].mxu1 %vm170_vm4, %v20485_v48  ;;  %18388 = vmatprep.subr.bf16.mxu0 %v21515_v1 }
 0x8d9   :  { %18048 = vmatpush3.bf16.msra.mxu1 %v20114_v26  ;;  %16523 = vmatprep.mubr.msk.f32.mxu1 %vm19260_vm0, %v21513_v2 }
 0x8da   :  { %v20560_v0 = vpop.f32.mrb[88].mxu0  ;;  %17129 = vmatmul.mubr.msk.f32.vlgmr.msra.gmra.mrb[136].mxu0 %vm170_vm4, %v20485_v48  ;;  %18049 = vmatprep.subr.bf16.mxu1 %v21515_v1 }
 0x8db   :  { %v16602_v3 = vpop.f32.mrb[89].mxu0  ;;  %18390 = vmatpush3.bf16.msra.mxu0 %v20473_v39  ;;  %17150 = vmatprep.mubr.msk.f32.mxu0 %vm19260_vm0, %v21513_v2 }
 0x8dc   :  { %18391 = vmatprep.subr.bf16.mxu0 %v21515_v1 }
 0x8dd   :  { %18051 = vmatpush3.bf16.msra.mxu1 %v20128_v30 }
 0x8de   :  { %18058 = vmatprep.subr.bf16.mxu1 %v21515_v1 }
 0x8df   :  { %18393 = vmatpush3.bf16.msra.mxu0 %v20480_v63 }
 0x8e0   :  { %18400 = vmatprep.subr.bf16.mxu0 %v21515_v1 }
 0x8e2   :  { %v20573_v4 = vpop.f32.mrb[90].mxu0 }
 0x8e3   :  { %v16624_v5 = vpop.f32.mrb[91].mxu0 }
 0x8ea   :  { %v20575_v17 = vpop.f32.mrb[92].mxu0 }
 0x8eb   :  { %v16646_v41 = vpop.f32.mrb[93].mxu0 }
 0x8f2   :  { %v20577_v50 = vpop.f32.mrb[94].mxu0 }
 0x8f3   :  { %v16668_v16 = vpop.f32.mrb[95].mxu0 }
 0x8fa   :  { %v20579_v23 = vpop.f32.mrb[96].mxu0 }
 0x8fb   :  { %v16690_v46 = vpop.f32.mrb[97].mxu0 }
 0x902   :  { %v20581_v62 = vpop.f32.mrb[98].mxu0 }
 0x903   :  { %v16712_v9 = vpop.f32.mrb[99].mxu0 }
 0x90a   :  { %v20583_v29 = vpop.f32.mrb[100].mxu0 }
 0x90b   :  { %v16734_v36 = vpop.f32.mrb[101].mxu0 }
 0x912   :  { %v20585_v45 = vpop.f32.mrb[102].mxu0 }
 0x913   :  { %v16756_v22 = vpop.f32.mrb[103].mxu0 }
 0x91a   :  { %v20587_v38 = vpop.f32.mrb[104].mxu0 }
 0x91b   :  { %v16778_v37 = vpop.f32.mrb[105].mxu0 }
 0x922   :  { %v20589_v42 = vpop.f32.mrb[106].mxu0 }
 0x923   :  { %v16800_v43 = vpop.f32.mrb[107].mxu0 }
 0x92a   :  { %v20591_v48 = vpop.f32.mrb[108].mxu0 }
 0x92b   :  { %v16822_v34 = vpop.f32.mrb[109].mxu0 }
 0x932   :  { %v20593_v19 = vpop.f32.mrb[110].mxu0 }
 0x933   :  { %v16844_v27 = vpop.f32.mrb[111].mxu0 }
 0x93a   :  { %v20595_v49 = vpop.f32.mrb[112].mxu0 }
 0x93b   :  { %v16866_v20 = vpop.f32.mrb[113].mxu0 }
 0x942   :  { %v20597_v6 = vpop.f32.mrb[114].mxu0 }
 0x943   :  { %v16888_v32 = vpop.f32.mrb[115].mxu0 }
 0x94a   :  { %v20599_v11 = vpop.f32.mrb[116].mxu0 }
 0x94b   :  { %v16910_v10 = vpop.f32.mrb[117].mxu0 }
 0x952   :  { %v20601_v58 = vpop.f32.mrb[118].mxu0 }
 0x953   :  { %v16932_v54 = vpop.f32.mrb[119].mxu0 }
 0x95a   :  { %v20603_v56 = vpop.f32.mrb[120].mxu0 }
 0x95b   :  { %v16954_v15 = vpop.f32.mrb[121].mxu0 }
 0x975   :  { %v20605_v3 = vpop.f32.mrb[122].mxu0 }
 0x976   :  { %v16976_v5 = vpop.f32.mrb[123].mxu0 }
 0x97d   :  { %v20607_v41 = vpop.f32.mrb[124].mxu0 }
 0x97e   :  { %v16998_v16 = vpop.f32.mrb[125].mxu0 }
 0x985   :  { %v20609_v46 = vpop.f32.mrb[126].mxu0 }
 0x986   :  { %v17020_v9 = vpop.f32.mrb[127].mxu0 }
 0x98d   :  { %v20611_v36 = vpop.f32.mrb[128].mxu0 }
 0x98e   :  { %v17042_v22 = vpop.f32.mrb[129].mxu0 }
 0x993   :  { %v5680_v37 = vpop.f32.mrb[70].mxu1 }
 0x994   :  { %v5751_v43 = vadd.f32 %v20444_v7, %v5680_v37  ;;  %v16437_v34 = vpop.f32.mrb[71].mxu1 }
 0x995   :  { %v20614_v27 = vpop.f32.mrb[130].mxu0 }
 0x996   :  { %v5754_v20 = vadd.f32 %v20414_v12, %v5751_v43  ;;  %v17064_v32 = vpop.f32.mrb[131].mxu0 }
 0x998   :  { %v14795_v10 = vmul.f32 -1.442695, %v5754_v20 }
 0x99a   :  { %18878 = vpow2.f32 %v14795_v10 }
 0x99b   :  { %v5821_v54 = vpop.f32.mrb[72].mxu1 }
 0x99c   :  { %v5892_v15 = vadd.f32 %v20453_v13, %v5821_v54  ;;  %v16459_v5 = vpop.f32.mrb[73].mxu1 }
 0x99d   :  { %v20618_v16 = vpop.f32.mrb[132].mxu0 }
 0x99e   :  { %v5895_v9 = vadd.f32 %v20428_v25, %v5892_v15  ;;  %v17086_v22 = vpop.f32.mrb[133].mxu0 }
 0x9a0   :  { %v14796_v2 = vmul.f32 -1.442695, %v5895_v9 }
 0x9a2   :  { %18880 = vpow2.f32 %v14796_v2 }
 0x9a3   :  { %v5962_v7 = vpop.f32.mrb[74].mxu1 }
 0x9a4   :  { %v18879_v37 = vpop.eup %18878  ;;  %v6033_v34 = vadd.f32 %v20465_v24, %v5962_v7  ;;  %v16481_v1 = vpop.f32.mrb[75].mxu1 }
 0x9a5   :  { %v6181_v43 = vadd.f32 1.0, %v18879_v37  ;;  %v20622_v32 = vpop.f32.mrb[134].mxu0 }
 0x9a6   :  { %21517 = vst [vmem:[#allocation14_spill] sm:$0xff] %v20622_v32  ;;  %v6036_v20 = vadd.f32 %v20435_v21, %v6033_v34  ;;  %v17108_v10 = vpop.f32.mrb[135].mxu0 }
 0x9a7   :  { %18882 = vrcp.f32 %v6181_v43 }
 0x9a8   :  { %18884 = vtanh.f32 %v6036_v20 }
 0x9ab   :  { %v6103_v13 = vpop.f32.mrb[76].mxu1 }
 0x9ac   :  { %v18881_v54 = vpop.eup %18880  ;;  %v6174_v15 = vadd.f32 %v20476_v33, %v6103_v13  ;;  %v16503_v5 = vpop.f32.mrb[77].mxu1 }
 0x9ad   :  { %v6187_v9 = vadd.f32 1.0, %v18881_v54  ;;  %v20626_v2 = vpop.f32.mrb[136].mxu0  ;;  %v21519_v5 = vmov 0.0|0.0  }
 0x9ae   :  { %21518 = vst [vmem:[#allocation15_spill] sm:$0xff] %v20626_v2  ;;  %v6177_v22 = vadd.f32 %v20441_v47, %v6174_v15  ;;  %v17130_v24 = vpop.f32.mrb[137].mxu0 }
 0x9af   :  { %18886 = vrcp.f32 %v6187_v9 }
 0x9b0   :  { %v14797_v1 = vmul.f32 -1.442695, %v6177_v22 }
 0x9b1   :  { %v18883_v7 = vpop.eup %18882 }
 0x9b2   :  { %v18885_v37 = vpop.eup %18884  ;;  %18888 = vpow2.f32 %v14797_v1 }
 0x9b3   :  { %v6198_v34 = vmul.f32 %v18885_v37, %v18883_v7 }
 0x9b9   :  { %v18887_v10 = vpop.eup %18886 }
 0x9ba   :  { %v6197_v43 = vmul.f32 %v18887_v10, %v20461_v55  ;;  %v21520_v55 = vmov 0.0  }
 0x9bc   :  { %v18889_v20 = vpop.eup %18888  ;;  %v20630_v32 = vadd.f32 %v6198_v34, %v6197_v43 }
 0x9bd   :  { %v6194_v33 = vadd.f32 1.0, %v18889_v20 }
 0x9be   :  { %18890 = vtanh.f32 %v20630_v32 }
 0x9bf   :  { %18892 = vrcp.f32 %v6194_v33 }
 0x9c8   :  { %v18891_v13 = vpop.eup %18890 }
 0x9c9   :  { %v18893_v54 = vpop.eup %18892 }
 0x9ca   :  { %v6201_v15 = vmul.f32 %v18893_v54, %v18891_v13 }
 0x9cc   :  { %16524 = vmatmul.mubr.msk.f32.vlgmr.msra.gmra.mrb[78].mxu1 %vm170_vm4, %v6201_v15  ;;  %17151 = vmatmul.mubr.msk.f32.vlgmr.msra.gmra.mrb[138].mxu0 %vm170_vm4, %v6201_v15 }
 0x9cd   :  { %18060 = vmatpush3.bf16.msra.mxu1 %v20140_v51  ;;  %18402 = vmatpush3.bf16.msra.mxu0 %v20488_v28 }
 0x9ce   :  { %18061 = vmatprep.subr.bf16.mxu1 %v21519_v5  ;;  %18403 = vmatprep.subr.bf16.mxu0 %v21519_v5 }
 0x9cf   :  { %16545 = vmatprep.mubr.msk.f32.mxu1 %vm19260_vm0, %v21520_v55  ;;  %17172 = vmatprep.mubr.msk.f32.mxu0 %vm19260_vm0, %v21520_v55 }
 0x9d1   :  { %18063 = vmatpush3.bf16.msra.mxu1 %v20151_v61  ;;  %18405 = vmatpush3.bf16.msra.mxu0 %v20502_v31 }
 0x9d2   :  { %18070 = vmatprep.subr.bf16.mxu1 %v21519_v5  ;;  %18412 = vmatprep.subr.bf16.mxu0 %v21519_v5 }
 0x9d4   :  { %16546 = vmatmul.mubr.msk.f32.vlgmr.msra.gmra.mrb[80].mxu1 %vm170_vm4, %v6201_v15  ;;  %17173 = vmatmul.mubr.msk.f32.vlgmr.msra.gmra.mrb[140].mxu0 %vm170_vm4, %v6201_v15 }
 0x9d5   :  { %18072 = vmatpush3.bf16.msra.mxu1 %v20163_v8  ;;  %18414 = vmatpush3.bf16.msra.mxu0 %v20510_v14 }
 0x9d6   :  { %18073 = vmatprep.subr.bf16.mxu1 %v21519_v5  ;;  %18415 = vmatprep.subr.bf16.mxu0 %v21519_v5 }
 0x9d7   :  { %16567 = vmatprep.mubr.msk.f32.mxu1 %vm19260_vm0, %v21520_v55  ;;  %17194 = vmatprep.mubr.msk.f32.mxu0 %vm19260_vm0, %v21520_v55 }
 0x9d9   :  { %18075 = vmatpush3.bf16.msra.mxu1 %v20174_v18  ;;  %18417 = vmatpush3.bf16.msra.mxu0 %v20524_v40 }
 0x9da   :  { %18082 = vmatprep.subr.bf16.mxu1 %v21519_v5  ;;  %18424 = vmatprep.subr.bf16.mxu0 %v21519_v5 }
 0x9dc   :  { %16568 = vmatmul.mubr.msk.f32.vlgmr.msra.gmra.mrb[82].mxu1 %vm170_vm4, %v6201_v15  ;;  %17195 = vmatmul.mubr.msk.f32.vlgmr.msra.gmra.mrb[142].mxu0 %vm170_vm4, %v6201_v15 }
 0x9dd   :  { %18084 = vmatpush3.bf16.msra.mxu1 %v20186_v35  ;;  %18426 = vmatpush3.bf16.msra.mxu0 %v20532_v53 }
 0x9de   :  { %18085 = vmatprep.subr.bf16.mxu1 %v21519_v5  ;;  %18427 = vmatprep.subr.bf16.mxu0 %v21519_v5 }
 0x9df   :  { %16589 = vmatprep.mubr.msk.f32.mxu1 %vm19260_vm0, %v21520_v55  ;;  %17216 = vmatprep.mubr.msk.f32.mxu0 %vm19260_vm0, %v21520_v55 }
 0x9e1   :  { %18087 = vmatpush3.bf16.msra.mxu1 %v20197_v60  ;;  %18429 = vmatpush3.bf16.msra.mxu0 %v20546_v59 }
 0x9e2   :  { %18094 = vmatprep.subr.bf16.mxu1 %v21519_v5  ;;  %18436 = vmatprep.subr.bf16.mxu0 %v21519_v5 }
 0x9e4   :  { %16590 = vmatmul.mubr.msk.f32.vlgmr.msra.gmra.mrb[84].mxu1 %vm170_vm4, %v6201_v15  ;;  %17217 = vmatmul.mubr.msk.f32.vlgmr.msra.gmra.mrb[144].mxu0 %vm170_vm4, %v6201_v15 }
 0x9e5   :  { %18096 = vmatpush3.bf16.msra.mxu1 %v20114_v26  ;;  %18438 = vmatpush3.bf16.msra.mxu0 %v20473_v39 }
 0x9e6   :  { %18097 = vmatprep.subr.bf16.mxu1 %v21519_v5  ;;  %18439 = vmatprep.subr.bf16.mxu0 %v21519_v5 }
 0x9e7   :  { %16611 = vmatprep.mubr.msk.f32.mxu1 %vm19260_vm0, %v21520_v55  ;;  %17238 = vmatprep.mubr.msk.f32.mxu0 %vm19260_vm0, %v21520_v55 }
 0x9e9   :  { %18099 = vmatpush3.bf16.msra.mxu1 %v20128_v30  ;;  %18441 = vmatpush3.bf16.msra.mxu0 %v20480_v63 }
 0x9ea   :  { %18106 = vmatprep.subr.bf16.mxu1 %v21519_v5  ;;  %18448 = vmatprep.subr.bf16.mxu0 %v21519_v5 }
 0xa9f   :  { %v6271_v9 = vpop.f32.mrb[78].mxu1  ;;  %v20689_v22 = vpop.f32.mrb[138].mxu0 }
 0xaa0   :  { %21521 = vst [vmem:[#allocation16_spill] sm:$0xff] %v20689_v22  ;;  %v6342_v24 = vadd.f32 %v20497_v44, %v6271_v9  ;;  %v16525_v1 = vpop.f32.mrb[79].mxu1  ;;  %v17152_v7 = vpop.f32.mrb[139].mxu0 }
 0xaa2   :  { %v6345_v37 = vadd.f32 %v20414_v12, %v6342_v24 }
 0xaa4   :  { %v14806_v34 = vmul.f32 -1.442695, %v6345_v37 }
 0xaa6   :  { %18894 = vpow2.f32 %v14806_v34 }
 0xaa7   :  { %v6412_v10 = vpop.f32.mrb[80].mxu1  ;;  %v20693_v43 = vpop.f32.mrb[140].mxu0 }
 0xaa8   :  { %v6483_v20 = vadd.f32 %v20519_v52, %v6412_v10  ;;  %v16547_v33 = vpop.f32.mrb[81].mxu1  ;;  %v17174_v13 = vpop.f32.mrb[141].mxu0 }
 0xaaa   :  { %v6486_v54 = vadd.f32 %v20428_v25, %v6483_v20 }
 0xaac   :  { %v14807_v15 = vmul.f32 -1.442695, %v6486_v54 }
 0xaae   :  { %18896 = vpow2.f32 %v14807_v15 }
 0xaaf   :  { %v6553_v22 = vpop.f32.mrb[82].mxu1  ;;  %v20697_v2 = vpop.f32.mrb[142].mxu0 }
 0xab0   :  { %v18895_v44 = vpop.eup %18894  ;;  %v6624_v9 = vadd.f32 %v20541_v57, %v6553_v22  ;;  %v16569_v24 = vpop.f32.mrb[83].mxu1 }
 0xab1   :  { %v17196_v1 = vpop.f32.mrb[143].mxu0  ;;  %v6772_v7 = vadd.f32 1.0, %v18895_v44 }
 0xab2   :  { %v6627_v37 = vadd.f32 %v20435_v21, %v6624_v9 }
 0xab3   :  { %18898 = vrcp.f32 %v6772_v7 }
 0xab4   :  { %18900 = vtanh.f32 %v6627_v37 }
 0xab7   :  { %v6694_v52 = vpop.f32.mrb[84].mxu1  ;;  %v20701_v34 = vpop.f32.mrb[144].mxu0 }
 0xab8   :  { %21522 = vst [vmem:[#allocation17_spill] sm:$0xff] %v20701_v34  ;;  %v18897_v10 = vpop.eup %18896  ;;  %v6765_v20 = vadd.f32 %v20560_v0, %v6694_v52  ;;  %v16591_v33 = vpop.f32.mrb[85].mxu1 }
 0xab9   :  { %v17218_v13 = vpop.f32.mrb[145].mxu0  ;;  %v6778_v54 = vadd.f32 1.0, %v18897_v10 }
 0xaba   :  { %v6768_v15 = vadd.f32 %v20441_v47, %v6765_v20 }
 0xabb   :  { %18902 = vrcp.f32 %v6778_v54 }
 0xabc   :  { %v14808_v57 = vmul.f32 -1.442695, %v6768_v15 }
 0xabd   :  { %v18899_v22 = vpop.eup %18898 }
 0xabe   :  { %v18901_v24 = vpop.eup %18900  ;;  %18904 = vpow2.f32 %v14808_v57 }
 0xabf   :  { %v6789_v44 = vmul.f32 %v18901_v24, %v18899_v22 }
 0xac5   :  { %v18903_v9 = vpop.eup %18902 }
 0xac6   :  { %v6788_v1 = vmul.f32 %v18903_v9, %v20630_v32 }
 0xac8   :  { %v18905_v7 = vpop.eup %18904  ;;  %v20706_v37 = vadd.f32 %v6789_v44, %v6788_v1 }
 0xac9   :  { %v6785_v34 = vadd.f32 1.0, %v18905_v7 }
 0xaca   :  { %18906 = vtanh.f32 %v20706_v37 }
 0xacb   :  { %18908 = vrcp.f32 %v6785_v34 }
 0xad4   :  { %v18907_v0 = vpop.eup %18906 }
 0xad5   :  { %v18909_v52 = vpop.eup %18908 }
 0xad6   :  { %v6792_v10 = vmul.f32 %v18909_v52, %v18907_v0 }
 0xad8   :  { %16612 = vmatmul.mubr.msk.f32.vlgmr.msra.gmra.mrb[86].mxu1 %vm170_vm4, %v6792_v10  ;;  %17239 = vmatmul.mubr.msk.f32.vlgmr.msra.gmra.mrb[146].mxu0 %vm170_vm4, %v6792_v10 }
 0xad9   :  { %18108 = vmatpush3.bf16.msra.mxu1 %v20140_v51  ;;  %18450 = vmatpush3.bf16.msra.mxu0 %v20488_v28 }
 0xada   :  { %18109 = vmatprep.subr.bf16.mxu1 %v21519_v5  ;;  %18451 = vmatprep.subr.bf16.mxu0 %v21519_v5 }
 0xadb   :  { %16633 = vmatprep.mubr.msk.f32.mxu1 %vm19260_vm0, %v21520_v55  ;;  %17260 = vmatprep.mubr.msk.f32.mxu0 %vm19260_vm0, %v21520_v55 }
 0xadd   :  { %18111 = vmatpush3.bf16.msra.mxu1 %v20151_v61  ;;  %18453 = vmatpush3.bf16.msra.mxu0 %v20502_v31 }
 0xade   :  { %18118 = vmatprep.subr.bf16.mxu1 %v21519_v5  ;;  %18460 = vmatprep.subr.bf16.mxu0 %v21519_v5 }
 0xae0   :  { %16634 = vmatmul.mubr.msk.f32.vlgmr.msra.gmra.mrb[88].mxu1 %vm170_vm4, %v6792_v10  ;;  %17261 = vmatmul.mubr.msk.f32.vlgmr.msra.gmra.mrb[148].mxu0 %vm170_vm4, %v6792_v10 }
 0xae1   :  { %18120 = vmatpush3.bf16.msra.mxu1 %v20163_v8  ;;  %18462 = vmatpush3.bf16.msra.mxu0 %v20510_v14 }
 0xae2   :  { %18121 = vmatprep.subr.bf16.mxu1 %v21519_v5  ;;  %18463 = vmatprep.subr.bf16.mxu0 %v21519_v5 }
 0xae3   :  { %16655 = vmatprep.mubr.msk.f32.mxu1 %vm19260_vm0, %v21520_v55  ;;  %17282 = vmatprep.mubr.msk.f32.mxu0 %vm19260_vm0, %v21520_v55 }
 0xae5   :  { %18123 = vmatpush3.bf16.msra.mxu1 %v20174_v18  ;;  %18465 = vmatpush3.bf16.msra.mxu0 %v20524_v40 }
 0xae6   :  { %18130 = vmatprep.subr.bf16.mxu1 %v21519_v5  ;;  %18472 = vmatprep.subr.bf16.mxu0 %v21519_v5 }
 0xae8   :  { %16656 = vmatmul.mubr.msk.f32.vlgmr.msra.gmra.mrb[90].mxu1 %vm170_vm4, %v6792_v10  ;;  %17283 = vmatmul.mubr.msk.f32.vlgmr.msra.gmra.mrb[150].mxu0 %vm170_vm4, %v6792_v10 }
 0xae9   :  { %18132 = vmatpush3.bf16.msra.mxu1 %v20186_v35  ;;  %18474 = vmatpush3.bf16.msra.mxu0 %v20532_v53 }
 0xaea   :  { %18133 = vmatprep.subr.bf16.mxu1 %v21519_v5  ;;  %18475 = vmatprep.subr.bf16.mxu0 %v21519_v5 }
 0xaeb   :  { %16677 = vmatprep.mubr.msk.f32.mxu1 %vm19260_vm0, %v21520_v55  ;;  %17304 = vmatprep.mubr.msk.f32.mxu0 %vm19260_vm0, %v21520_v55 }
 0xaed   :  { %18135 = vmatpush3.bf16.msra.mxu1 %v20197_v60  ;;  %18477 = vmatpush3.bf16.msra.mxu0 %v20546_v59 }
 0xaee   :  { %18142 = vmatprep.subr.bf16.mxu1 %v21519_v5  ;;  %18484 = vmatprep.subr.bf16.mxu0 %v21519_v5 }
 0xaf0   :  { %16678 = vmatmul.mubr.msk.f32.vlgmr.msra.gmra.mrb[92].mxu1 %vm170_vm4, %v6792_v10  ;;  %17305 = vmatmul.mubr.msk.f32.vlgmr.msra.gmra.mrb[152].mxu0 %vm170_vm4, %v6792_v10 }
 0xaf1   :  { %18144 = vmatpush3.bf16.msra.mxu1 %v20114_v26  ;;  %18486 = vmatpush3.bf16.msra.mxu0 %v20473_v39 }
 0xaf2   :  { %18145 = vmatprep.subr.bf16.mxu1 %v21519_v5  ;;  %18487 = vmatprep.subr.bf16.mxu0 %v21519_v5 }
 0xaf3   :  { %16699 = vmatprep.mubr.msk.f32.mxu1 %vm19260_vm0, %v21520_v55  ;;  %17326 = vmatprep.mubr.msk.f32.mxu0 %vm19260_vm0, %v21520_v55 }
 0xaf5   :  { %18147 = vmatpush3.bf16.msra.mxu1 %v20128_v30  ;;  %18489 = vmatpush3.bf16.msra.mxu0 %v20480_v63 }
 0xaf6   :  { %18154 = vmatprep.subr.bf16.mxu1 %v21519_v5  ;;  %18496 = vmatprep.subr.bf16.mxu0 %v21519_v5 }
 0xbab   :  { %v6862_v32 = vpop.f32.mrb[86].mxu1  ;;  %v20765_v34 = vpop.f32.mrb[146].mxu0 }
 0xbac   :  { %v6933_v20 = vadd.f32 %v20573_v4, %v6862_v32  ;;  %v16613_v33 = vpop.f32.mrb[87].mxu1  ;;  %v17240_v13 = vpop.f32.mrb[147].mxu0 }
 0xbae   :  { %v6936_v54 = vadd.f32 %v20414_v12, %v6933_v20 }
 0xbb0   :  { %v14817_v15 = vmul.f32 -1.442695, %v6936_v54 }
 0xbb2   :  { %18910 = vpow2.f32 %v14817_v15 }
 0xbb3   :  { %v7003_v57 = vpop.f32.mrb[88].mxu1  ;;  %v20769_v22 = vpop.f32.mrb[148].mxu0 }
 0xbb4   :  { %v7074_v24 = vadd.f32 %v20575_v17, %v7003_v57  ;;  %v16635_v44 = vpop.f32.mrb[89].mxu1  ;;  %v17262_v9 = vpop.f32.mrb[149].mxu0 }
 0xbb6   :  { %v7077_v1 = vadd.f32 %v20428_v25, %v7074_v24 }
 0xbb8   :  { %v14818_v7 = vmul.f32 -1.442695, %v7077_v1 }
 0xbba   :  { %18912 = vpow2.f32 %v14818_v7 }
 0xbbb   :  { %v7144_v0 = vpop.f32.mrb[90].mxu1  ;;  %v20773_v52 = vpop.f32.mrb[150].mxu0 }
 0xbbc   :  { %v18911_v4 = vpop.eup %18910  ;;  %v7215_v10 = vadd.f32 %v20577_v50, %v7144_v0  ;;  %v16657_v12 = vpop.f32.mrb[91].mxu1 }
 0xbbd   :  { %v17284_v32 = vpop.f32.mrb[151].mxu0  ;;  %v7363_v20 = vadd.f32 1.0, %v18911_v4 }
 0xbbe   :  { %v7218_v33 = vadd.f32 %v20435_v21, %v7215_v10 }
 0xbbf   :  { %18914 = vrcp.f32 %v7363_v20 }
 0xbc0   :  { %18916 = vtanh.f32 %v7218_v33 }
 0xbc3   :  { %v7285_v17 = vpop.f32.mrb[92].mxu1  ;;  %v20777_v13 = vpop.f32.mrb[152].mxu0 }
 0xbc4   :  { %v18913_v54 = vpop.eup %18912  ;;  %v7356_v25 = vadd.f32 %v20579_v23, %v7285_v17  ;;  %v16679_v15 = vpop.f32.mrb[93].mxu1 }
 0xbc5   :  { %v17306_v57 = vpop.f32.mrb[153].mxu0  ;;  %v7369_v24 = vadd.f32 1.0, %v18913_v54 }
 0xbc6   :  { %v7359_v44 = vadd.f32 %v20441_v47, %v7356_v25  ;;  %v20847_v57 = vld [vmem:[%s21506_s6] ss:$0 sm:$0xff] }
 0xbc7   :  { %18918 = vrcp.f32 %v7369_v24 }
 0xbc8   :  { %v14819_v50 = vmul.f32 -1.442695, %v7359_v44 }
 0xbc9   :  { %v18915_v9 = vpop.eup %18914 }
 0xbca   :  { %v18917_v1 = vpop.eup %18916  ;;  %18920 = vpow2.f32 %v14819_v50 }
 0xbcb   :  { %v7380_v7 = vmul.f32 %v18917_v1, %v18915_v9 }
 0xbd1   :  { %v18919_v0 = vpop.eup %18918 }
 0xbd2   :  { %v7379_v4 = vmul.f32 %v18919_v0, %v20706_v37 }
 0xbd4   :  { %v18921_v10 = vpop.eup %18920  ;;  %v20782_v12 = vadd.f32 %v7380_v7, %v7379_v4 }
 0xbd5   :  { %v7376_v32 = vadd.f32 1.0, %v18921_v10 }
 0xbd6   :  { %18922 = vtanh.f32 %v20782_v12 }
 0xbd7   :  { %18924 = vrcp.f32 %v7376_v32 }
 0xbe0   :  { %v18923_v23 = vpop.eup %18922 }
 0xbe1   :  { %v18925_v20 = vpop.eup %18924 }
 0xbe2   :  { %v7383_v33 = vmul.f32 %v18925_v20, %v18923_v23 }
 0xbe4   :  { %16700 = vmatmul.mubr.msk.f32.vlgmr.msra.gmra.mrb[94].mxu1 %vm170_vm4, %v7383_v33  ;;  %17327 = vmatmul.mubr.msk.f32.vlgmr.msra.gmra.mrb[154].mxu0 %vm170_vm4, %v7383_v33 }
 0xbe5   :  { %18156 = vmatpush3.bf16.msra.mxu1 %v20140_v51  ;;  %18498 = vmatpush3.bf16.msra.mxu0 %v20488_v28 }
 0xbe6   :  { %18157 = vmatprep.subr.bf16.mxu1 %v21519_v5  ;;  %18499 = vmatprep.subr.bf16.mxu0 %v21519_v5 }
 0xbe7   :  { %16721 = vmatprep.mubr.msk.f32.mxu1 %vm19260_vm0, %v21520_v55  ;;  %17348 = vmatprep.mubr.msk.f32.mxu0 %vm19260_vm0, %v21520_v55 }
 0xbe9   :  { %18159 = vmatpush3.bf16.msra.mxu1 %v20151_v61  ;;  %18501 = vmatpush3.bf16.msra.mxu0 %v20502_v31 }
 0xbea   :  { %18166 = vmatprep.subr.bf16.mxu1 %v21519_v5  ;;  %18508 = vmatprep.subr.bf16.mxu0 %v21519_v5 }
 0xbec   :  { %16722 = vmatmul.mubr.msk.f32.vlgmr.msra.gmra.mrb[96].mxu1 %vm170_vm4, %v7383_v33  ;;  %17349 = vmatmul.mubr.msk.f32.vlgmr.msra.gmra.mrb[156].mxu0 %vm170_vm4, %v7383_v33 }
 0xbed   :  { %18168 = vmatpush3.bf16.msra.mxu1 %v20163_v8  ;;  %18510 = vmatpush3.bf16.msra.mxu0 %v20510_v14 }
 0xbee   :  { %18169 = vmatprep.subr.bf16.mxu1 %v21519_v5  ;;  %18511 = vmatprep.subr.bf16.mxu0 %v21519_v5 }
 0xbef   :  { %16743 = vmatprep.mubr.msk.f32.mxu1 %vm19260_vm0, %v21520_v55  ;;  %17370 = vmatprep.mubr.msk.f32.mxu0 %vm19260_vm0, %v21520_v55 }
 0xbf1   :  { %18171 = vmatpush3.bf16.msra.mxu1 %v20174_v18  ;;  %18513 = vmatpush3.bf16.msra.mxu0 %v20524_v40 }
 0xbf2   :  { %18178 = vmatprep.subr.bf16.mxu1 %v21519_v5  ;;  %18520 = vmatprep.subr.bf16.mxu0 %v21519_v5 }
 0xbf4   :  { %16744 = vmatmul.mubr.msk.f32.vlgmr.msra.gmra.mrb[98].mxu1 %vm170_vm4, %v7383_v33  ;;  %17371 = vmatmul.mubr.msk.f32.vlgmr.msra.gmra.mrb[158].mxu0 %vm170_vm4, %v7383_v33 }
 0xbf5   :  { %18180 = vmatpush3.bf16.msra.mxu1 %v20186_v35  ;;  %18522 = vmatpush3.bf16.msra.mxu0 %v20532_v53 }
 0xbf6   :  { %18181 = vmatprep.subr.bf16.mxu1 %v21519_v5  ;;  %18523 = vmatprep.subr.bf16.mxu0 %v21519_v5 }
 0xbf7   :  { %16765 = vmatprep.mubr.msk.f32.mxu1 %vm19260_vm0, %v21520_v55  ;;  %17392 = vmatprep.mubr.msk.f32.mxu0 %vm19260_vm0, %v21520_v55 }
 0xbf9   :  { %18183 = vmatpush3.bf16.msra.mxu1 %v20197_v60  ;;  %18525 = vmatpush3.bf16.msra.mxu0 %v20546_v59 }
 0xbfa   :  { %18190 = vmatprep.subr.bf16.mxu1 %v21519_v5  ;;  %18532 = vmatprep.subr.bf16.mxu0 %v21519_v5 }
 0xbfc   :  { %16766 = vmatmul.mubr.msk.f32.vlgmr.msra.gmra.mrb[100].mxu1 %vm170_vm4, %v7383_v33  ;;  %17393 = vmatmul.mubr.msk.f32.vlgmr.msra.gmra.mrb[160].mxu0 %vm170_vm4, %v7383_v33 }
 0xbfd   :  { %18192 = vmatpush3.bf16.msra.mxu1 %v20114_v26  ;;  %18534 = vmatpush3.bf16.msra.mxu0 %v20473_v39 }
 0xbfe   :  { %18193 = vmatprep.subr.bf16.mxu1 %v21519_v5  ;;  %18535 = vmatprep.subr.bf16.mxu0 %v21519_v5 }
 0xbff   :  { %16787 = vmatprep.mubr.msk.f32.mxu1 %vm19260_vm0, %v21520_v55  ;;  %17414 = vmatprep.mubr.msk.f32.mxu0 %vm19260_vm0, %v21520_v55 }
 0xc01   :  { %18195 = vmatpush3.bf16.msra.mxu1 %v20128_v30  ;;  %18537 = vmatpush3.bf16.msra.mxu0 %v20480_v63 }
 0xc02   :  { %18202 = vmatprep.subr.bf16.mxu1 %v21519_v5  ;;  %18544 = vmatprep.subr.bf16.mxu0 %v21519_v5 }
 0xcb7   :  { %v7453_v37 = vpop.f32.mrb[94].mxu1  ;;  %v20841_v17 = vpop.f32.mrb[154].mxu0 }
 0xcb8   :  { %v7524_v54 = vadd.f32 %v20581_v62, %v7453_v37  ;;  %v16701_v25 = vpop.f32.mrb[95].mxu1  ;;  %v17328_v15 = vpop.f32.mrb[155].mxu0  ;;  %v20856_v62 = vld [vmem:[%s21506_s6 + $0x1] ss:$0 sm:$0xff] }
 0xcba   :  { %v7527_v24 = vadd.f32 %v20847_v57, %v7524_v54 }
 0xcbc   :  { %v14828_v44 = vmul.f32 -1.442695, %v7527_v24 }
 0xcbe   :  { %18926 = vpow2.f32 %v14828_v44 }
 0xcbf   :  { %v7594_v50 = vpop.f32.mrb[96].mxu1  ;;  %v20850_v9 = vpop.f32.mrb[156].mxu0 }
 0xcc0   :  { %v7665_v1 = vadd.f32 %v20583_v29, %v7594_v50  ;;  %v16723_v7 = vpop.f32.mrb[97].mxu1  ;;  %v17350_v0 = vpop.f32.mrb[157].mxu0 }
 0xcc2   :  { %v7668_v4 = vadd.f32 %v20856_v62, %v7665_v1 }
 0xcc4   :  { %v14829_v10 = vmul.f32 -1.442695, %v7668_v4 }
 0xcc6   :  { %18928 = vpow2.f32 %v14829_v10 }
 0xcc7   :  { %v7735_v32 = vpop.f32.mrb[98].mxu1  ;;  %v20859_v23 = vpop.f32.mrb[158].mxu0 }
 0xcc8   :  { %v18927_v20 = vpop.eup %18926  ;;  %v7806_v33 = vadd.f32 %v20585_v45, %v7735_v32  ;;  %v16745_v37 = vpop.f32.mrb[99].mxu1 }
 0xcc9   :  { %v17372_v54 = vpop.f32.mrb[159].mxu0  ;;  %v7954_v29 = vadd.f32 1.0, %v18927_v20 }
 0xcca   :  { %v7809_v25 = vadd.f32 %v20435_v21, %v7806_v33 }
 0xccb   :  { %18930 = vrcp.f32 %v7954_v29 }
 0xccc   :  { %18932 = vtanh.f32 %v7809_v25 }
 0xccf   :  { %v7876_v15 = vpop.f32.mrb[100].mxu1  ;;  %v20863_v24 = vpop.f32.mrb[160].mxu0 }
 0xcd0   :  { %v18929_v44 = vpop.eup %18928  ;;  %v7947_v50 = vadd.f32 %v20587_v38, %v7876_v15  ;;  %v16767_v1 = vpop.f32.mrb[101].mxu1 }
 0xcd1   :  { %v17394_v7 = vpop.f32.mrb[161].mxu0  ;;  %v7960_v0 = vadd.f32 1.0, %v18929_v44 }
 0xcd2   :  { %v7950_v4 = vadd.f32 %v20441_v47, %v7947_v50 }
 0xcd3   :  { %18934 = vrcp.f32 %v7960_v0 }
 0xcd4   :  { %v14830_v45 = vmul.f32 -1.442695, %v7950_v4 }
 0xcd5   :  { %v18931_v10 = vpop.eup %18930 }
 0xcd6   :  { %v18933_v32 = vpop.eup %18932  ;;  %18936 = vpow2.f32 %v14830_v45 }
 0xcd7   :  { %v7971_v20 = vmul.f32 %v18933_v32, %v18931_v10 }
 0xcdd   :  { %v18935_v21 = vpop.eup %18934 }
 0xcde   :  { %v7970_v33 = vmul.f32 %v18935_v21, %v20782_v12 }
 0xce0   :  { %v18937_v37 = vpop.eup %18936  ;;  %v20868_v54 = vadd.f32 %v7971_v20, %v7970_v33 }
 0xce1   :  { %v7967_v29 = vadd.f32 1.0, %v18937_v37 }
 0xce2   :  { %18938 = vtanh.f32 %v20868_v54 }
 0xce3   :  { %18940 = vrcp.f32 %v7967_v29 }
 0xcec   :  { %v18939_v38 = vpop.eup %18938 }
 0xced   :  { %v18941_v25 = vpop.eup %18940 }
 0xcee   :  { %v7974_v15 = vmul.f32 %v18941_v25, %v18939_v38 }
 0xcf0   :  { %16788 = vmatmul.mubr.msk.f32.vlgmr.msra.gmra.mrb[102].mxu1 %vm170_vm4, %v7974_v15  ;;  %17415 = vmatmul.mubr.msk.f32.vlgmr.msra.gmra.mrb[162].mxu0 %vm170_vm4, %v7974_v15 }
 0xcf1   :  { %18204 = vmatpush3.bf16.msra.mxu1 %v20140_v51  ;;  %18546 = vmatpush3.bf16.msra.mxu0 %v20488_v28 }
 0xcf2   :  { %18205 = vmatprep.subr.bf16.mxu1 %v21519_v5  ;;  %18547 = vmatprep.subr.bf16.mxu0 %v21519_v5 }
 0xcf3   :  { %16809 = vmatprep.mubr.msk.f32.mxu1 %vm19260_vm0, %v21520_v55  ;;  %17436 = vmatprep.mubr.msk.f32.mxu0 %vm19260_vm0, %v21520_v55 }
 0xcf5   :  { %18207 = vmatpush3.bf16.msra.mxu1 %v20151_v61  ;;  %18549 = vmatpush3.bf16.msra.mxu0 %v20502_v31 }
 0xcf6   :  { %18214 = vmatprep.subr.bf16.mxu1 %v21519_v5  ;;  %18556 = vmatprep.subr.bf16.mxu0 %v21519_v5 }
 0xcf8   :  { %16810 = vmatmul.mubr.msk.f32.vlgmr.msra.gmra.mrb[104].mxu1 %vm170_vm4, %v7974_v15  ;;  %17437 = vmatmul.mubr.msk.f32.vlgmr.msra.gmra.mrb[164].mxu0 %vm170_vm4, %v7974_v15 }
 0xcf9   :  { %18216 = vmatpush3.bf16.msra.mxu1 %v20163_v8  ;;  %18558 = vmatpush3.bf16.msra.mxu0 %v20510_v14 }
 0xcfa   :  { %18217 = vmatprep.subr.bf16.mxu1 %v21519_v5  ;;  %18559 = vmatprep.subr.bf16.mxu0 %v21519_v5 }
 0xcfb   :  { %16831 = vmatprep.mubr.msk.f32.mxu1 %vm19260_vm0, %v21520_v55  ;;  %17458 = vmatprep.mubr.msk.f32.mxu0 %vm19260_vm0, %v21520_v55 }
 0xcfd   :  { %18219 = vmatpush3.bf16.msra.mxu1 %v20174_v18  ;;  %18561 = vmatpush3.bf16.msra.mxu0 %v20524_v40 }
 0xcfe   :  { %18226 = vmatprep.subr.bf16.mxu1 %v21519_v5  ;;  %18568 = vmatprep.subr.bf16.mxu0 %v21519_v5 }
 0xd00   :  { %16832 = vmatmul.mubr.msk.f32.vlgmr.msra.gmra.mrb[106].mxu1 %vm170_vm4, %v7974_v15  ;;  %17459 = vmatmul.mubr.msk.f32.vlgmr.msra.gmra.mrb[166].mxu0 %vm170_vm4, %v7974_v15 }
 0xd01   :  { %18228 = vmatpush3.bf16.msra.mxu1 %v20186_v35  ;;  %18570 = vmatpush3.bf16.msra.mxu0 %v20532_v53 }
 0xd02   :  { %18229 = vmatprep.subr.bf16.mxu1 %v21519_v5  ;;  %18571 = vmatprep.subr.bf16.mxu0 %v21519_v5 }
 0xd03   :  { %16853 = vmatprep.mubr.msk.f32.mxu1 %vm19260_vm0, %v21520_v55  ;;  %17480 = vmatprep.mubr.msk.f32.mxu0 %vm19260_vm0, %v21520_v55 }
 0xd05   :  { %18231 = vmatpush3.bf16.msra.mxu1 %v20197_v60  ;;  %18573 = vmatpush3.bf16.msra.mxu0 %v20546_v59 }
 0xd06   :  { %18238 = vmatprep.subr.bf16.mxu1 %v21519_v5  ;;  %18580 = vmatprep.subr.bf16.mxu0 %v21519_v5 }
 0xd08   :  { %16854 = vmatmul.mubr.msk.f32.vlgmr.msra.gmra.mrb[108].mxu1 %vm170_vm4, %v7974_v15  ;;  %17481 = vmatmul.mubr.msk.f32.vlgmr.msra.gmra.mrb[168].mxu0 %vm170_vm4, %v7974_v15 }
 0xd09   :  { %18240 = vmatpush3.bf16.msra.mxu1 %v20114_v26  ;;  %18582 = vmatpush3.bf16.msra.mxu0 %v20473_v39 }
 0xd0a   :  { %18241 = vmatprep.subr.bf16.mxu1 %v21519_v5  ;;  %18583 = vmatprep.subr.bf16.mxu0 %v21519_v5 }
 0xd0b   :  { %16875 = vmatprep.mubr.msk.f32.mxu1 %vm19260_vm0, %v21520_v55  ;;  %17502 = vmatprep.mubr.msk.f32.mxu0 %vm19260_vm0, %v21520_v55 }
 0xd0d   :  { %18243 = vmatpush3.bf16.msra.mxu1 %v20128_v30  ;;  %18585 = vmatpush3.bf16.msra.mxu0 %v20480_v63 }
 0xd0e   :  { %18250 = vmatprep.subr.bf16.mxu1 %v21519_v5  ;;  %18592 = vmatprep.subr.bf16.mxu0 %v21519_v5 }
 0xdc3   :  { %v8044_v47 = vpop.f32.mrb[102].mxu1  ;;  %v20927_v12 = vpop.f32.mrb[162].mxu0 }
 0xdc4   :  { %v8115_v44 = vadd.f32 %v20589_v42, %v8044_v47  ;;  %v16789_v50 = vpop.f32.mrb[103].mxu1  ;;  %v17416_v1 = vpop.f32.mrb[163].mxu0 }
 0xdc6   :  { %v8118_v7 = vadd.f32 %v20847_v57, %v8115_v44  ;;  %v20941_v44 = vld [vmem:[%s21506_s6 + $0x2] ss:$0 sm:$0xff] }
 0xdc8   :  { %v14839_v0 = vmul.f32 -1.442695, %v8118_v7 }
 0xdca   :  { %18942 = vpow2.f32 %v14839_v0 }
 0xdcb   :  { %v8185_v4 = vpop.f32.mrb[104].mxu1  ;;  %v20931_v45 = vpop.f32.mrb[164].mxu0 }
 0xdcc   :  { %v8256_v10 = vadd.f32 %v20591_v48, %v8185_v4  ;;  %v16811_v32 = vpop.f32.mrb[105].mxu1  ;;  %v17438_v20 = vpop.f32.mrb[165].mxu0 }
 0xdcd   :  { %v20950_v32 = vld [vmem:[%s21506_s6 + $0x3] ss:$0 sm:$0xff] }
 0xdce   :  { %v8259_v21 = vadd.f32 %v20856_v62, %v8256_v10 }
 0xdd0   :  { %v14840_v33 = vmul.f32 -1.442695, %v8259_v21 }
 0xdd2   :  { %18944 = vpow2.f32 %v14840_v33 }
 0xdd3   :  { %v8326_v37 = vpop.f32.mrb[106].mxu1  ;;  %v20935_v29 = vpop.f32.mrb[166].mxu0 }
 0xdd4   :  { %v18943_v42 = vpop.eup %18942  ;;  %v8397_v38 = vadd.f32 %v20593_v19, %v8326_v37  ;;  %v16833_v25 = vpop.f32.mrb[107].mxu1 }
 0xdd5   :  { %v17460_v15 = vpop.f32.mrb[167].mxu0  ;;  %v8545_v47 = vadd.f32 1.0, %v18943_v42 }
 0xdd6   :  { %v8400_v48 = vadd.f32 %v20941_v44, %v8397_v38 }
 0xdd7   :  { %18946 = vrcp.f32 %v8545_v47 }
 0xdd8   :  { %18948 = vtanh.f32 %v8400_v48 }
 0xddb   :  { %v8467_v50 = vpop.f32.mrb[108].mxu1  ;;  %v20944_v1 = vpop.f32.mrb[168].mxu0 }
 0xddc   :  { %v18945_v7 = vpop.eup %18944  ;;  %v8538_v0 = vadd.f32 %v20595_v49, %v8467_v50  ;;  %v16855_v4 = vpop.f32.mrb[109].mxu1 }
 0xddd   :  { %v17482_v19 = vpop.f32.mrb[169].mxu0  ;;  %v8551_v10 = vadd.f32 1.0, %v18945_v7 }
 0xdde   :  { %v8541_v20 = vadd.f32 %v20950_v32, %v8538_v0 }
 0xddf   :  { %18950 = vrcp.f32 %v8551_v10 }
 0xde0   :  { %v14841_v21 = vmul.f32 -1.442695, %v8541_v20 }
 0xde1   :  { %v18947_v33 = vpop.eup %18946 }
 0xde2   :  { %v18949_v37 = vpop.eup %18948  ;;  %18952 = vpow2.f32 %v14841_v21 }
 0xde3   :  { %v8562_v42 = vmul.f32 %v18949_v37, %v18947_v33 }
 0xde9   :  { %v18951_v38 = vpop.eup %18950 }
 0xdea   :  { %v8561_v25 = vmul.f32 %v18951_v38, %v20868_v54 }
 0xdec   :  { %v18953_v49 = vpop.eup %18952  ;;  %v20954_v15 = vadd.f32 %v8562_v42, %v8561_v25 }
 0xded   :  { %v8558_v47 = vadd.f32 1.0, %v18953_v49 }
 0xdee   :  { %18954 = vtanh.f32 %v20954_v15 }
 0xdef   :  { %18956 = vrcp.f32 %v8558_v47 }
 0xdf8   :  { %v18955_v48 = vpop.eup %18954 }
 0xdf9   :  { %v18957_v50 = vpop.eup %18956 }
 0xdfa   :  { %v8565_v7 = vmul.f32 %v18957_v50, %v18955_v48 }
 0xdfc   :  { %16876 = vmatmul.mubr.msk.f32.vlgmr.msra.gmra.mrb[110].mxu1 %vm170_vm4, %v8565_v7  ;;  %17503 = vmatmul.mubr.msk.f32.vlgmr.msra.gmra.mrb[170].mxu0 %vm170_vm4, %v8565_v7 }
 0xdfd   :  { %18252 = vmatpush3.bf16.msra.mxu1 %v20140_v51  ;;  %18594 = vmatpush3.bf16.msra.mxu0 %v20488_v28 }
 0xdfe   :  { %18253 = vmatprep.subr.bf16.mxu1 %v21519_v5  ;;  %18595 = vmatprep.subr.bf16.mxu0 %v21519_v5 }
 0xdff   :  { %16897 = vmatprep.mubr.msk.f32.mxu1 %vm19260_vm0, %v21520_v55  ;;  %17524 = vmatprep.mubr.msk.f32.mxu0 %vm19260_vm0, %v21520_v55 }
 0xe01   :  { %18255 = vmatpush3.bf16.msra.mxu1 %v20151_v61  ;;  %18597 = vmatpush3.bf16.msra.mxu0 %v20502_v31 }
 0xe02   :  { %18262 = vmatprep.subr.bf16.mxu1 %v21519_v5  ;;  %18604 = vmatprep.subr.bf16.mxu0 %v21519_v5 }
 0xe04   :  { %16898 = vmatmul.mubr.msk.f32.vlgmr.msra.gmra.mrb[112].mxu1 %vm170_vm4, %v8565_v7  ;;  %17525 = vmatmul.mubr.msk.f32.vlgmr.msra.gmra.mrb[172].mxu0 %vm170_vm4, %v8565_v7 }
 0xe05   :  { %18264 = vmatpush3.bf16.msra.mxu1 %v20163_v8  ;;  %18606 = vmatpush3.bf16.msra.mxu0 %v20510_v14 }
 0xe06   :  { %18265 = vmatprep.subr.bf16.mxu1 %v21519_v5  ;;  %18607 = vmatprep.subr.bf16.mxu0 %v21519_v5 }
 0xe07   :  { %16919 = vmatprep.mubr.msk.f32.mxu1 %vm19260_vm0, %v21520_v55  ;;  %17546 = vmatprep.mubr.msk.f32.mxu0 %vm19260_vm0, %v21520_v55 }
 0xe09   :  { %18267 = vmatpush3.bf16.msra.mxu1 %v20174_v18  ;;  %18609 = vmatpush3.bf16.msra.mxu0 %v20524_v40 }
 0xe0a   :  { %18274 = vmatprep.subr.bf16.mxu1 %v21519_v5  ;;  %18616 = vmatprep.subr.bf16.mxu0 %v21519_v5 }
 0xe0c   :  { %16920 = vmatmul.mubr.msk.f32.vlgmr.msra.gmra.mrb[114].mxu1 %vm170_vm4, %v8565_v7  ;;  %17547 = vmatmul.mubr.msk.f32.vlgmr.msra.gmra.mrb[174].mxu0 %vm170_vm4, %v8565_v7 }
 0xe0d   :  { %18276 = vmatpush3.bf16.msra.mxu1 %v20186_v35  ;;  %18618 = vmatpush3.bf16.msra.mxu0 %v20532_v53 }
 0xe0e   :  { %18277 = vmatprep.subr.bf16.mxu1 %v21519_v5  ;;  %18619 = vmatprep.subr.bf16.mxu0 %v21519_v5 }
 0xe0f   :  { %16941 = vmatprep.mubr.msk.f32.mxu1 %vm19260_vm0, %v21520_v55  ;;  %17568 = vmatprep.mubr.msk.f32.mxu0 %vm19260_vm0, %v21520_v55 }
 0xe11   :  { %18279 = vmatpush3.bf16.msra.mxu1 %v20197_v60  ;;  %18621 = vmatpush3.bf16.msra.mxu0 %v20546_v59 }
 0xe12   :  { %18286 = vmatprep.subr.bf16.mxu1 %v21519_v5  ;;  %18628 = vmatprep.subr.bf16.mxu0 %v21519_v5 }
 0xe14   :  { %16942 = vmatmul.mubr.msk.f32.vlgmr.msra.gmra.mrb[116].mxu1 %vm170_vm4, %v8565_v7  ;;  %17569 = vmatmul.mubr.msk.f32.vlgmr.msra.gmra.mrb[176].mxu0 %vm170_vm4, %v8565_v7 }
 0xe15   :  { %18288 = vmatpush3.bf16.msra.mxu1 %v20114_v26  ;;  %18630 = vmatpush3.bf16.msra.mxu0 %v20473_v39 }
 0xe16   :  { %18289 = vmatprep.subr.bf16.mxu1 %v21519_v5  ;;  %18631 = vmatprep.subr.bf16.mxu0 %v21519_v5 }
 0xe17   :  { %16963 = vmatprep.mubr.msk.f32.mxu1 %vm19260_vm0, %v21520_v55  ;;  %17590 = vmatprep.mubr.msk.f32.mxu0 %vm19260_vm0, %v21520_v55 }
 0xe19   :  { %18291 = vmatpush3.bf16.msra.mxu1 %v20128_v30  ;;  %18633 = vmatpush3.bf16.msra.mxu0 %v20480_v63 }
 0xe1a   :  { %18298 = vmatprep.subr.bf16.mxu1 %v21519_v5  ;;  %18640 = vmatprep.subr.bf16.mxu0 %v21519_v5 }
 0xecf   :  { %v8635_v26 = vpop.f32.mrb[110].mxu1  ;;  %v21013_v54 = vpop.f32.mrb[170].mxu0 }
 0xed0   :  { %v8706_v0 = vadd.f32 %v20597_v6, %v8635_v26  ;;  %v16877_v4 = vpop.f32.mrb[111].mxu1  ;;  %v17504_v19 = vpop.f32.mrb[171].mxu0 }
 0xed2   :  { %v8709_v10 = vadd.f32 %v20847_v57, %v8706_v0 }
 0xed4   :  { %v14850_v20 = vmul.f32 -1.442695, %v8709_v10 }
 0xed6   :  { %18958 = vpow2.f32 %v14850_v20 }
 0xed7   :  { %v8776_v21 = vpop.f32.mrb[112].mxu1  ;;  %v21017_v33 = vpop.f32.mrb[172].mxu0 }
 0xed8   :  { %v8847_v30 = vadd.f32 %v20599_v11, %v8776_v21  ;;  %v16899_v37 = vpop.f32.mrb[113].mxu1  ;;  %v17526_v42 = vpop.f32.mrb[173].mxu0 }
 0xeda   :  { %v8850_v38 = vadd.f32 %v20856_v62, %v8847_v30 }
 0xedc   :  { %v14851_v25 = vmul.f32 -1.442695, %v8850_v38 }
 0xede   :  { %18960 = vpow2.f32 %v14851_v25 }
 0xedf   :  { %v8917_v49 = vpop.f32.mrb[114].mxu1  ;;  %v21021_v47 = vpop.f32.mrb[174].mxu0 }
 0xee0   :  { %v18959_v6 = vpop.eup %18958  ;;  %v8988_v48 = vadd.f32 %v20601_v58, %v8917_v49  ;;  %v16921_v50 = vpop.f32.mrb[115].mxu1 }
 0xee1   :  { %v17548_v7 = vpop.f32.mrb[175].mxu0  ;;  %v9136_v26 = vadd.f32 1.0, %v18959_v6 }
 0xee2   :  { %v8991_v0 = vadd.f32 %v20941_v44, %v8988_v48 }
 0xee3   :  { %18962 = vrcp.f32 %v9136_v26 }
 0xee4   :  { %18964 = vtanh.f32 %v8991_v0 }
 0xee7   :  { %v9058_v11 = vpop.f32.mrb[116].mxu1  ;;  %v21025_v4 = vpop.f32.mrb[176].mxu0 }
 0xee8   :  { %v18961_v19 = vpop.eup %18960  ;;  %v9129_v10 = vadd.f32 %v20603_v56, %v9058_v11  ;;  %v16943_v20 = vpop.f32.mrb[117].mxu1  ;;  %v9776_v11 = vld [vmem:[#allocation10 + $0x28] sm:$0xff] }
 0xee9   :  { %v17570_v21 = vpop.f32.mrb[177].mxu0  ;;  %v9142_v30 = vadd.f32 1.0, %v18961_v19  ;;  %v9778_v20 = vld [vmem:[#allocation10 + $0x38] sm:$0xff] }
 0xeea   :  { %v9132_v37 = vadd.f32 %v20950_v32, %v9129_v10  ;;  %v9777_v10 = vld [vmem:[#allocation10 + $0x30] sm:$0xff]  ;;  %v9780_v21 = vld [vmem:[#allocation10 + $0x40] sm:$0xff] }
 0xeeb   :  { %18966 = vrcp.f32 %v9142_v30  ;;  %v9781_v30 = vld [vmem:[#allocation10 + $0x48] sm:$0xff] }
 0xeec   :  { %v14852_v58 = vmul.f32 -1.442695, %v9132_v37  ;;  %v21103_v37 = vpack.c.bf16 %v9781_v30, %v9780_v21 }
 0xeed   :  { %v18963_v42 = vpop.eup %18962 }
 0xeee   :  { %v18965_v38 = vpop.eup %18964  ;;  %18968 = vpow2.f32 %v14852_v58  ;;  %v9783_v58 = vld [vmem:[#allocation10 + $0x58] sm:$0xff] }
 0xeef   :  { %v9153_v25 = vmul.f32 %v18965_v38, %v18963_v42  ;;  %v9785_v38 = vld [vmem:[#allocation10 + $0x60] sm:$0xff] }
 0xef5   :  { %v18967_v49 = vpop.eup %18966 }
 0xef6   :  { %v9152_v6 = vmul.f32 %v18967_v49, %v20954_v15 }
 0xef8   :  { %v18969_v48 = vpop.eup %18968  ;;  %v21030_v50 = vadd.f32 %v9153_v25, %v9152_v6  ;;  %v9786_v25 = vld [vmem:[#allocation10 + $0x68] sm:$0xff]  ;;  %v9787_v6 = vld [vmem:[#allocation10 + $0x70] sm:$0xff] }
 0xef9   :  { %v9149_v7 = vadd.f32 1.0, %v18969_v48  ;;  %v21114_v49 = vpack.c.bf16 %v9786_v25, %v9785_v38  ;;  %v9788_v48 = vld [vmem:[#allocation10 + $0x78] sm:$0xff] }
 0xefa   :  { %18970 = vtanh.f32 %v21030_v50 }
 0xefb   :  { %18972 = vrcp.f32 %v9149_v7  ;;  %v21119_v7 = vpack.c.bf16 %v9788_v48, %v9787_v6 }
 0xf04   :  { %v18971_v56 = vpop.eup %18970 }
 0xf05   :  { %v18973_v26 = vpop.eup %18972 }
 0xf06   :  { %v9156_v0 = vmul.f32 %v18973_v26, %v18971_v56 }
 0xf08   :  { %16964 = vmatmul.mubr.msk.f32.vlgmr.msra.gmra.mrb[118].mxu1 %vm170_vm4, %v9156_v0  ;;  %17591 = vmatmul.mubr.msk.f32.vlgmr.msra.gmra.mrb[178].mxu0 %vm170_vm4, %v9156_v0 }
 0xf09   :  { %18300 = vmatpush3.bf16.msra.mxu1 %v20140_v51  ;;  %18642 = vmatpush3.bf16.msra.mxu0 %v20488_v28  ;;  %v9770_v51 = vld [vmem:[#allocation10] sm:$0xff] }
 0xf0a   :  { %18301 = vmatprep.subr.bf16.mxu1 %v21519_v5  ;;  %18643 = vmatprep.subr.bf16.mxu0 %v21519_v5 }
 0xf0b   :  { %16985 = vmatprep.mubr.msk.f32.mxu1 %vm19260_vm0, %v21520_v55  ;;  %17612 = vmatprep.mubr.msk.f32.mxu0 %vm19260_vm0, %v21520_v55 }
 0xf0d   :  { %18303 = vmatpush3.bf16.msra.mxu1 %v20151_v61  ;;  %18645 = vmatpush3.bf16.msra.mxu0 %v20502_v31  ;;  %v9771_v61 = vld [vmem:[#allocation10 + $0x8] sm:$0xff] }
 0xf0e   :  { %18310 = vmatprep.subr.bf16.mxu1 %v21519_v5  ;;  %18652 = vmatprep.subr.bf16.mxu0 %v21519_v5 }
 0xf10   :  { %16986 = vmatmul.mubr.msk.f32.vlgmr.msra.gmra.mrb[120].mxu1 %vm170_vm4, %v9156_v0  ;;  %17613 = vmatmul.mubr.msk.f32.vlgmr.msra.gmra.mrb[180].mxu0 %vm170_vm4, %v9156_v0 }
 0xf11   :  { %18312 = vmatpush3.bf16.msra.mxu1 %v20163_v8  ;;  %18654 = vmatpush3.bf16.msra.mxu0 %v20510_v14  ;;  %v21073_v8 = vpack.c.bf16 %v9771_v61, %v9770_v51 }
 0xf12   :  { %18313 = vmatprep.subr.bf16.mxu1 %v21519_v5  ;;  %18655 = vmatprep.subr.bf16.mxu0 %v21519_v5 }
 0xf13   :  { %17007 = vmatprep.mubr.msk.f32.mxu1 %vm19260_vm0, %v21520_v55  ;;  %17634 = vmatprep.mubr.msk.f32.mxu0 %vm19260_vm0, %v21520_v55 }
 0xf15   :  { %18315 = vmatpush3.bf16.msra.mxu1 %v20174_v18  ;;  %18657 = vmatpush3.bf16.msra.mxu0 %v20524_v40  ;;  %v9772_v18 = vld [vmem:[#allocation10 + $0x10] sm:$0xff] }
 0xf16   :  { %18322 = vmatprep.subr.bf16.mxu1 %v21519_v5  ;;  %18664 = vmatprep.subr.bf16.mxu0 %v21519_v5 }
 0xf18   :  { %17008 = vmatmul.mubr.msk.f32.vlgmr.msra.gmra.mrb[122].mxu1 %vm170_vm4, %v9156_v0  ;;  %17635 = vmatmul.mubr.msk.f32.vlgmr.msra.gmra.mrb[182].mxu0 %vm170_vm4, %v9156_v0 }
 0xf19   :  { %18324 = vmatpush3.bf16.msra.mxu1 %v20186_v35  ;;  %18666 = vmatpush3.bf16.msra.mxu0 %v20532_v53  ;;  %v9773_v35 = vld [vmem:[#allocation10 + $0x18] sm:$0xff] }
 0xf1a   :  { %18325 = vmatprep.subr.bf16.mxu1 %v21519_v5  ;;  %18667 = vmatprep.subr.bf16.mxu0 %v21519_v5  ;;  %v21080_v15 = vpack.c.bf16 %v9773_v35, %v9772_v18 }
 0xf1b   :  { %17029 = vmatprep.mubr.msk.f32.mxu1 %vm19260_vm0, %v21520_v55  ;;  %17656 = vmatprep.mubr.msk.f32.mxu0 %vm19260_vm0, %v21520_v55 }
 0xf1d   :  { %18327 = vmatpush3.bf16.msra.mxu1 %v20197_v60  ;;  %18669 = vmatpush3.bf16.msra.mxu0 %v20546_v59  ;;  %v9775_v60 = vld [vmem:[#allocation10 + $0x20] sm:$0xff] }
 0xf1e   :  { %18334 = vmatprep.subr.bf16.mxu1 %v21519_v5  ;;  %18676 = vmatprep.subr.bf16.mxu0 %v21519_v5  ;;  %v21090_v19 = vpack.c.bf16 %v9776_v11, %v9775_v60 }
 0xf20   :  { %17030 = vmatmul.mubr.msk.f32.vlgmr.msra.gmra.mrb[124].mxu1 %vm170_vm4, %v9156_v0  ;;  %17657 = vmatmul.mubr.msk.f32.vlgmr.msra.gmra.mrb[184].mxu0 %vm170_vm4, %v9156_v0 }
 0xf21   :  { %18336 = vmatpush3.bf16.msra.mxu1 %v21073_v8  ;;  %17051 = vmatprep.mubr.msk.f32.mxu1 %vm19260_vm0, %v21520_v55 }
 0xf22   :  { %18337 = vmatprep.subr.bf16.mxu1 %v21519_v5  ;;  %18678 = vmatpush3.bf16.msra.mxu0 %v20473_v39  ;;  %v21097_v39 = vpack.c.bf16 %v9778_v20, %v9777_v10 }
 0xf23   :  { %18679 = vmatprep.subr.bf16.mxu0 %v21519_v5  ;;  %17678 = vmatprep.mubr.msk.f32.mxu0 %vm19260_vm0, %v21520_v55 }
 0xf25   :  { %18339 = vmatpush3.bf16.msra.mxu1 %v21080_v15 }
 0xf26   :  { %18346 = vmatprep.subr.bf16.mxu1 %v21519_v5  ;;  %18681 = vmatpush3.bf16.msra.mxu0 %v20480_v63  ;;  %v9782_v63 = vld [vmem:[#allocation10 + $0x50] sm:$0xff] }
 0xf27   :  { %18688 = vmatprep.subr.bf16.mxu0 %v21519_v5  ;;  %v21108_v42 = vpack.c.bf16 %v9783_v58, %v9782_v63 }
 0xf28   :  { %17052 = vmatmul.mubr.f32.vlgmr.msra.gmra.mrb[126].mxu1 %v21520_v55 }
 0xf29   :  { %18348 = vmatpush3.bf16.msra.mxu1 %v21090_v19  ;;  %17073 = vmatprep.mubr.msk.f32.mxu1 %vm19260_vm0, %v21520_v55 }
 0xf2a   :  { %18349 = vmatprep.subr.bf16.mxu1 %v21519_v5 }
 0xf2d   :  { %18351 = vmatpush3.bf16.msra.mxu1 %v21097_v39 }
 0xf2e   :  { %18358 = vmatprep.subr.bf16.mxu1 %v21519_v5 }
 0xf30   :  { %17074 = vmatmul.mubr.f32.vlgmr.msra.gmra.mrb[128].mxu1 %v21520_v55 }
 0xf31   :  { %18360 = vmatpush3.bf16.msra.mxu1 %v21103_v37  ;;  %17095 = vmatprep.mubr.msk.f32.mxu1 %vm19260_vm0, %v21520_v55 }
 0xf32   :  { %18361 = vmatprep.subr.bf16.mxu1 %v21519_v5 }
 0xf35   :  { %18363 = vmatpush3.bf16.msra.mxu1 %v21108_v42 }
 0xf36   :  { %18370 = vmatprep.subr.bf16.mxu1 %v21519_v5 }
 0xf38   :  { %17096 = vmatmul.mubr.f32.vlgmr.msra.gmra.mrb[130].mxu1 %v21520_v55 }
 0xf39   :  { %18372 = vmatpush3.bf16.msra.mxu1 %v21114_v49  ;;  %17117 = vmatprep.mubr.msk.f32.mxu1 %vm19260_vm0, %v21520_v55 }
 0xf3a   :  { %18373 = vmatprep.subr.bf16.mxu1 %v21519_v5 }
 0xf3d   :  { %18375 = vmatpush3.bf16.msra.mxu1 %v21119_v7 }
 0xf3e   :  { %18382 = vmatprep.subr.bf16.mxu1 %v21519_v5 }
 0xf40   :  { %17118 = vmatmul.mubr.f32.vlgmr.msra.gmra.mrb[132].mxu1 %v21520_v55 }
 0xf41   :  { %18384 = vmatpush3.bf16.msra.mxu1 %v21073_v8  ;;  %17139 = vmatprep.mubr.msk.f32.mxu1 %vm19260_vm0, %v21520_v55 }
 0xf42   :  { %18385 = vmatprep.subr.bf16.mxu1 %v21519_v5 }
 0xf45   :  { %18387 = vmatpush3.bf16.msra.mxu1 %v21080_v15 }
 0xf46   :  { %18394 = vmatprep.subr.bf16.mxu1 %v21519_v5 }
 0xfdb   :  { %v9226_v56 = vpop.f32.mrb[118].mxu1  ;;  %v21133_v26 = vpop.f32.mrb[178].mxu0 }
 0xfdc   :  { %v9300_v0 = vadd.f32 %v20605_v3, %v9226_v56  ;;  %v16965_v51 = vpop.f32.mrb[119].mxu1  ;;  %v17592_v61 = vpop.f32.mrb[179].mxu0 }
 0xfde   :  { %v9303_v18 = vadd.f32 %v20847_v57, %v9300_v0 }
 0xfe0   :  { %v14861_v35 = vmul.f32 -1.442695, %v9303_v18 }
 0xfe2   :  { %18974 = vpow2.f32 %v14861_v35 }
 0xfe3   :  { %v9370_v60 = vpop.f32.mrb[120].mxu1  ;;  %v21137_v11 = vpop.f32.mrb[180].mxu0 }
 0xfe4   :  { %v9441_v10 = vadd.f32 %v20607_v41, %v9370_v60  ;;  %v16987_v20 = vpop.f32.mrb[121].mxu1  ;;  %v17614_v21 = vpop.f32.mrb[181].mxu0 }
 0xfe6   :  { %v9444_v30 = vadd.f32 %v20856_v62, %v9441_v10 }
 0xfe8   :  { %v14862_v63 = vmul.f32 -1.442695, %v9444_v30 }
 0xfea   :  { %18976 = vpow2.f32 %v14862_v63 }
 0xfeb   :  { %v9511_v58 = vpop.f32.mrb[122].mxu1  ;;  %v21141_v38 = vpop.f32.mrb[182].mxu0 }
 0xfec   :  { %v18975_v3 = vpop.eup %18974  ;;  %v9582_v25 = vadd.f32 %v20609_v46, %v9511_v58  ;;  %v17009_v57 = vpop.f32.mrb[123].mxu1 }
 0xfed   :  { %v17636_v6 = vpop.f32.mrb[183].mxu0  ;;  %v9730_v48 = vadd.f32 1.0, %v18975_v3  ;;  %v21160_v57 = vld [vmem:[%s21509_s9 + $0x1] ss:$0 sm:$0xff] }
 0xfee   :  { %v9585_v56 = vadd.f32 %v20941_v44, %v9582_v25  ;;  %v21152_v44 = vld [vmem:[%s21509_s9] ss:$0 sm:$0xff] }
 0xfef   :  { %18978 = vrcp.f32 %v9730_v48 }
 0xff0   :  { %18980 = vtanh.f32 %v9585_v56 }
 0xff3   :  { %v9652_v41 = vpop.f32.mrb[124].mxu1  ;;  %v21145_v0 = vpop.f32.mrb[184].mxu0 }
 0xff4   :  { %v18977_v51 = vpop.eup %18976  ;;  %v9723_v62 = vadd.f32 %v20611_v36, %v9652_v41  ;;  %v17031_v61 = vpop.f32.mrb[125].mxu1 }
 0xff5   :  { %v17658_v18 = vpop.f32.mrb[185].mxu0  ;;  %v9736_v35 = vadd.f32 1.0, %v18977_v51 }
 0xff6   :  { %v9726_v60 = vadd.f32 %v20950_v32, %v9723_v62 }
 0xff7   :  { %18982 = vrcp.f32 %v9736_v35 }
 0xff8   :  { %v14863_v46 = vmul.f32 -1.442695, %v9726_v60  ;;  %v21523_v60 = vld [vmem:[#allocation14_spill] sm:$0xff] }
 0xff9   :  { %v18979_v10 = vpop.eup %18978 }
 0xffa   :  { %v18981_v20 = vpop.eup %18980  ;;  %18984 = vpow2.f32 %v14863_v46 }
 0xffb   :  { %v9747_v21 = vmul.f32 %v18981_v20, %v18979_v10  ;;  %v9886_v30 = vpop.f32.mrb[126].mxu1 }
 0xffc   :  { %v9957_v63 = vadd.f32 %v20614_v27, %v9886_v30  ;;  %v17053_v36 = vpop.f32.mrb[127].mxu1 }
 0xffd   :  { %v21174_v36 = vld [vmem:[%s21509_s9 + $0x3] ss:$0 sm:$0xff] }
 0xffe   :  { %v9960_v58 = vadd.f32 %v21152_v44, %v9957_v63 }
0x1000   :  { %v14875_v3 = vmul.f32 -1.442695, %v9960_v58 }
0x1001   :  { %v18983_v25 = vpop.eup %18982 }
0x1002   :  { %v9746_v32 = vmul.f32 %v18983_v25, %v21030_v50  ;;  %18986 = vpow2.f32 %v14875_v3  ;;  %v21167_v50 = vld [vmem:[%s21509_s9 + $0x2] ss:$0 sm:$0xff]  ;;  %v21524_v25 = vld [vmem:[#allocation15_spill] sm:$0xff] }
0x1003   :  { %v10027_v6 = vpop.f32.mrb[128].mxu1 }
0x1004   :  { %v18985_v48 = vpop.eup %18984  ;;  %v9748_v56 = vadd.f32 %v9747_v21, %v9746_v32  ;;  %v10098_v41 = vadd.f32 %v20618_v16, %v10027_v6  ;;  %v17075_v51 = vpop.f32.mrb[129].mxu1 }
0x1005   :  { %v9743_v27 = vadd.f32 1.0, %v18985_v48 }
0x1006   :  { %18988 = vtanh.f32 %v9748_v56  ;;  %v10101_v62 = vadd.f32 %v21160_v57, %v10098_v41 }
0x1007   :  { %18990 = vrcp.f32 %v9743_v27 }
0x1008   :  { %v14876_v61 = vmul.f32 -1.442695, %v10101_v62 }
0x100a   :  { %18992 = vpow2.f32 %v14876_v61 }
0x100b   :  { %v10168_v18 = vpop.f32.mrb[130].mxu1 }
0x100c   :  { %v18987_v35 = vpop.eup %18986  ;;  %v10239_v46 = vadd.f32 %v21523_v60, %v10168_v18  ;;  %v17097_v10 = vpop.f32.mrb[131].mxu1 }
0x100d   :  { %v10387_v20 = vadd.f32 1.0, %v18987_v35 }
0x100e   :  { %v10242_v16 = vadd.f32 %v21167_v50, %v10239_v46 }
0x100f   :  { %18994 = vrcp.f32 %v10387_v20 }
0x1010   :  { %v18989_v21 = vpop.eup %18988  ;;  %18996 = vtanh.f32 %v10242_v16 }
0x1011   :  { %v18991_v30 = vpop.eup %18990 }
0x1012   :  { %v9750_v63 = vmul.f32 %v18991_v30, %v18989_v21 }
0x1013   :  { %v10309_v58 = vpop.f32.mrb[132].mxu1 }
0x1014   :  { %v18993_v3 = vpop.eup %18992  ;;  %v10380_v32 = vadd.f32 %v21524_v25, %v10309_v58  ;;  %v17119_v6 = vpop.f32.mrb[133].mxu1  ;;  %17679 = vmatmul.mubr.msk.f32.vlgmr.msra.gmra.mrb[186].mxu0 %vm170_vm4, %v9750_v63  ;;  %v21525_v58 = vld [vmem:[#allocation16_spill] sm:$0xff] }
0x1015   :  { %v10393_v48 = vadd.f32 1.0, %v18993_v3  ;;  %18690 = vmatpush3.bf16.msra.mxu0 %v20488_v28  ;;  %17700 = vmatprep.mubr.msk.f32.mxu0 %vm19260_vm0, %v21520_v55 }
0x1016   :  { %v10383_v56 = vadd.f32 %v21174_v36, %v10380_v32  ;;  %18691 = vmatprep.subr.bf16.mxu0 %v21519_v5 }
0x1017   :  { %18998 = vrcp.f32 %v10393_v48 }
0x1018   :  { %v14877_v41 = vmul.f32 -1.442695, %v10383_v56 }
0x1019   :  { %v18995_v51 = vpop.eup %18994  ;;  %18693 = vmatpush3.bf16.msra.mxu0 %v20502_v31 }
0x101a   :  { %v18997_v27 = vpop.eup %18996  ;;  %19000 = vpow2.f32 %v14877_v41  ;;  %18700 = vmatprep.subr.bf16.mxu0 %v21519_v5 }
0x101b   :  { %v10404_v62 = vmul.f32 %v18997_v27, %v18995_v51 }
0x101c   :  { %17701 = vmatmul.mubr.msk.f32.vlgmr.msra.gmra.mrb[188].mxu0 %vm170_vm4, %v9750_v63 }
0x101d   :  { %18702 = vmatpush3.bf16.msra.mxu0 %v20510_v14  ;;  %17722 = vmatprep.mubr.msk.f32.mxu0 %vm19260_vm0, %v21520_v55 }
0x101e   :  { %18703 = vmatprep.subr.bf16.mxu0 %v21519_v5 }
0x1021   :  { %v18999_v28 = vpop.eup %18998  ;;  %18705 = vmatpush3.bf16.msra.mxu0 %v20524_v40 }
0x1022   :  { %v10403_v61 = vmul.f32 0.0, %v18999_v28  ;;  %18712 = vmatprep.subr.bf16.mxu0 %v21519_v5 }
0x1024   :  { %v19001_v31 = vpop.eup %19000  ;;  %v21192_v18 = vadd.f32 %v10404_v62, %v10403_v61  ;;  %17723 = vmatmul.mubr.msk.f32.vlgmr.msra.gmra.mrb[190].mxu0 %vm170_vm4, %v9750_v63 }
0x1025   :  { %v10400_v35 = vadd.f32 1.0, %v19001_v31  ;;  %18714 = vmatpush3.bf16.msra.mxu0 %v20532_v53  ;;  %17744 = vmatprep.mubr.msk.f32.mxu0 %vm19260_vm0, %v21520_v55 }
0x1026   :  { %19002 = vtanh.f32 %v21192_v18  ;;  %18715 = vmatprep.subr.bf16.mxu0 %v21519_v5 }
0x1027   :  { %19004 = vrcp.f32 %v10400_v35 }
0x1029   :  { %18717 = vmatpush3.bf16.msra.mxu0 %v20546_v59 }
0x102c   :  { %17745 = vmatmul.mubr.msk.f32.vlgmr.msra.gmra.mrb[192].mxu0 %vm170_vm4, %v9750_v63 }
0x1030   :  { %v19003_v14 = vpop.eup %19002 }
0x1031   :  { %v19005_v40 = vpop.eup %19004 }
0x1032   :  { %v10407_v60 = vmul.f32 %v19005_v40, %v19003_v14 }
0x1034   :  { %17140 = vmatmul.mubr.msk.f32.vlgmr.msra.gmra.mrb[134].mxu1 %vm170_vm4, %v10407_v60 }
0x1035   :  { %18396 = vmatpush3.bf16.msra.mxu1 %v21090_v19  ;;  %17161 = vmatprep.mubr.msk.f32.mxu1 %vm19260_vm0, %v21520_v55 }
0x1036   :  { %18397 = vmatprep.subr.bf16.mxu1 %v21519_v5 }
0x1039   :  { %18399 = vmatpush3.bf16.msra.mxu1 %v21097_v39 }
0x103a   :  { %18406 = vmatprep.subr.bf16.mxu1 %v21519_v5 }
0x103c   :  { %17162 = vmatmul.mubr.msk.f32.vlgmr.msra.gmra.mrb[136].mxu1 %vm170_vm4, %v10407_v60 }
0x103d   :  { %18408 = vmatpush3.bf16.msra.mxu1 %v21103_v37  ;;  %17183 = vmatprep.mubr.msk.f32.mxu1 %vm19260_vm0, %v21520_v55 }
0x103e   :  { %18409 = vmatprep.subr.bf16.mxu1 %v21519_v5 }
0x1041   :  { %18411 = vmatpush3.bf16.msra.mxu1 %v21108_v42 }
0x1042   :  { %18418 = vmatprep.subr.bf16.mxu1 %v21519_v5 }
0x1044   :  { %17184 = vmatmul.mubr.msk.f32.vlgmr.msra.gmra.mrb[138].mxu1 %vm170_vm4, %v10407_v60 }
0x1045   :  { %18420 = vmatpush3.bf16.msra.mxu1 %v21114_v49  ;;  %17205 = vmatprep.mubr.msk.f32.mxu1 %vm19260_vm0, %v21520_v55 }
0x1046   :  { %18421 = vmatprep.subr.bf16.mxu1 %v21519_v5 }
0x1049   :  { %18423 = vmatpush3.bf16.msra.mxu1 %v21119_v7 }
0x104a   :  { %18430 = vmatprep.subr.bf16.mxu1 %v21519_v5 }
0x104c   :  { %17206 = vmatmul.mubr.msk.f32.vlgmr.msra.gmra.mrb[140].mxu1 %vm170_vm4, %v10407_v60 }
0x104d   :  { %18432 = vmatpush3.bf16.msra.mxu1 %v21073_v8  ;;  %17227 = vmatprep.mubr.msk.f32.mxu1 %vm19260_vm0, %v21520_v55 }
0x104e   :  { %18433 = vmatprep.subr.bf16.mxu1 %v21519_v5 }
0x1051   :  { %18435 = vmatpush3.bf16.msra.mxu1 %v21080_v15 }
0x1052   :  { %18442 = vmatprep.subr.bf16.mxu1 %v21519_v5 }
0x10e7   :  { %v21230_v53 = vpop.f32.mrb[186].mxu0 }
0x10e8   :  { %v17680_v59 = vpop.f32.mrb[187].mxu0 }
0x10e9   :  { %v21526_v59 = vld [vmem:[#allocation17_spill] sm:$0xff] }
0x10ef   :  { %v21232_v46 = vpop.f32.mrb[188].mxu0 }
0x10f0   :  { %v17702_v10 = vpop.f32.mrb[189].mxu0 }
0x10f7   :  { %v21234_v20 = vpop.f32.mrb[190].mxu0 }
0x10f8   :  { %v17724_v16 = vpop.f32.mrb[191].mxu0 }
0x10ff   :  { %v21236_v21 = vpop.f32.mrb[192].mxu0 }
0x1100   :  { %v17746_v30 = vpop.f32.mrb[193].mxu0 }
0x1107   :  { %v10477_v63 = vpop.f32.mrb[134].mxu1 }
0x1108   :  { %v10548_v3 = vadd.f32 %v21525_v58, %v10477_v63  ;;  %v17141_v25 = vpop.f32.mrb[135].mxu1 }
0x110a   :  { %v10551_v32 = vadd.f32 %v21152_v44, %v10548_v3 }
0x110c   :  { %v14886_v6 = vmul.f32 -1.442695, %v10551_v32 }
0x110e   :  { %19006 = vpow2.f32 %v14886_v6 }
0x110f   :  { %v10618_v48 = vpop.f32.mrb[136].mxu1 }
0x1110   :  { %v10689_v56 = vadd.f32 %v20693_v43, %v10618_v48  ;;  %v17163_v41 = vpop.f32.mrb[137].mxu1 }
0x1112   :  { %v10692_v51 = vadd.f32 %v21160_v57, %v10689_v56 }
0x1114   :  { %v14887_v27 = vmul.f32 -1.442695, %v10692_v51 }
0x1116   :  { %19008 = vpow2.f32 %v14887_v27 }
0x1117   :  { %v10759_v62 = vpop.f32.mrb[138].mxu1 }
0x1118   :  { %v19007_v28 = vpop.eup %19006  ;;  %v10830_v61 = vadd.f32 %v20697_v2, %v10759_v62  ;;  %v17185_v31 = vpop.f32.mrb[139].mxu1 }
0x1119   :  { %v10978_v35 = vadd.f32 1.0, %v19007_v28 }
0x111a   :  { %v10833_v14 = vadd.f32 %v21167_v50, %v10830_v61 }
0x111b   :  { %19010 = vrcp.f32 %v10978_v35 }
0x111c   :  { %19012 = vtanh.f32 %v10833_v14 }
0x111f   :  { %v10900_v40 = vpop.f32.mrb[140].mxu1 }
0x1120   :  { %v19009_v60 = vpop.eup %19008  ;;  %v10971_v10 = vadd.f32 %v21526_v59, %v10900_v40  ;;  %v17207_v43 = vpop.f32.mrb[141].mxu1 }
0x1121   :  { %v10984_v16 = vadd.f32 1.0, %v19009_v60 }
0x1122   :  { %v10974_v30 = vadd.f32 %v21174_v36, %v10971_v10 }
0x1123   :  { %19014 = vrcp.f32 %v10984_v16 }
0x1124   :  { %v14888_v63 = vmul.f32 -1.442695, %v10974_v30 }
0x1125   :  { %v19011_v58 = vpop.eup %19010 }
0x1126   :  { %v19013_v3 = vpop.eup %19012  ;;  %19016 = vpow2.f32 %v14888_v63 }
0x1127   :  { %v10995_v2 = vmul.f32 %v19013_v3, %v19011_v58 }
0x112d   :  { %v19015_v25 = vpop.eup %19014 }
0x112e   :  { %v10994_v32 = vmul.f32 %v19015_v25, %v21192_v18 }
0x1130   :  { %v19017_v6 = vpop.eup %19016  ;;  %v21247_v48 = vadd.f32 %v10995_v2, %v10994_v32 }
0x1131   :  { %v10991_v56 = vadd.f32 1.0, %v19017_v6 }
0x1132   :  { %19018 = vtanh.f32 %v21247_v48 }
0x1133   :  { %19020 = vrcp.f32 %v10991_v56 }
0x113c   :  { %v19019_v41 = vpop.eup %19018 }
0x113d   :  { %v19021_v51 = vpop.eup %19020 }
0x113e   :  { %v10998_v27 = vmul.f32 %v19021_v51, %v19019_v41 }
0x1140   :  { %17228 = vmatmul.mubr.msk.f32.vlgmr.msra.gmra.mrb[142].mxu1 %vm170_vm4, %v10998_v27 }
0x1141   :  { %18444 = vmatpush3.bf16.msra.mxu1 %v21090_v19  ;;  %17249 = vmatprep.mubr.msk.f32.mxu1 %vm19260_vm0, %v21520_v55 }
0x1142   :  { %18445 = vmatprep.subr.bf16.mxu1 %v21519_v5 }
0x1145   :  { %18447 = vmatpush3.bf16.msra.mxu1 %v21097_v39 }
0x1146   :  { %18454 = vmatprep.subr.bf16.mxu1 %v21519_v5 }
0x1148   :  { %17250 = vmatmul.mubr.msk.f32.vlgmr.msra.gmra.mrb[144].mxu1 %vm170_vm4, %v10998_v27 }
0x1149   :  { %18456 = vmatpush3.bf16.msra.mxu1 %v21103_v37  ;;  %17271 = vmatprep.mubr.msk.f32.mxu1 %vm19260_vm0, %v21520_v55 }
0x114a   :  { %18457 = vmatprep.subr.bf16.mxu1 %v21519_v5 }
0x114d   :  { %18459 = vmatpush3.bf16.msra.mxu1 %v21108_v42 }
0x114e   :  { %18466 = vmatprep.subr.bf16.mxu1 %v21519_v5 }
0x1150   :  { %17272 = vmatmul.mubr.msk.f32.vlgmr.msra.gmra.mrb[146].mxu1 %vm170_vm4, %v10998_v27 }
0x1151   :  { %18468 = vmatpush3.bf16.msra.mxu1 %v21114_v49  ;;  %17293 = vmatprep.mubr.msk.f32.mxu1 %vm19260_vm0, %v21520_v55 }
0x1152   :  { %18469 = vmatprep.subr.bf16.mxu1 %v21519_v5 }
0x1155   :  { %18471 = vmatpush3.bf16.msra.mxu1 %v21119_v7 }
0x1156   :  { %18478 = vmatprep.subr.bf16.mxu1 %v21519_v5 }
0x1158   :  { %17294 = vmatmul.mubr.msk.f32.vlgmr.msra.gmra.mrb[148].mxu1 %vm170_vm4, %v10998_v27 }
0x1159   :  { %18480 = vmatpush3.bf16.msra.mxu1 %v21073_v8  ;;  %17315 = vmatprep.mubr.msk.f32.mxu1 %vm19260_vm0, %v21520_v55 }
0x115a   :  { %18481 = vmatprep.subr.bf16.mxu1 %v21519_v5 }
0x115d   :  { %18483 = vmatpush3.bf16.msra.mxu1 %v21080_v15 }
0x115e   :  { %18490 = vmatprep.subr.bf16.mxu1 %v21519_v5 }
0x1213   :  { %v11068_v18 = vpop.f32.mrb[142].mxu1 }
0x1214   :  { %v11139_v62 = vadd.f32 %v20765_v34, %v11068_v18  ;;  %v17229_v28 = vpop.f32.mrb[143].mxu1 }
0x1216   :  { %v11142_v61 = vadd.f32 %v21152_v44, %v11139_v62 }
0x1218   :  { %v14897_v31 = vmul.f32 -1.442695, %v11142_v61 }
0x121a   :  { %19022 = vpow2.f32 %v14897_v31 }
0x121b   :  { %v11209_v35 = vpop.f32.mrb[144].mxu1 }
0x121c   :  { %v11280_v14 = vadd.f32 %v20769_v22, %v11209_v35  ;;  %v17251_v40 = vpop.f32.mrb[145].mxu1 }
0x121e   :  { %v11283_v60 = vadd.f32 %v21160_v57, %v11280_v14 }
0x1220   :  { %v14898_v59 = vmul.f32 -1.442695, %v11283_v60 }
0x1222   :  { %19024 = vpow2.f32 %v14898_v59 }
0x1223   :  { %v11350_v10 = vpop.f32.mrb[146].mxu1 }
0x1224   :  { %v19023_v43 = vpop.eup %19022  ;;  %v11421_v16 = vadd.f32 %v20773_v52, %v11350_v10  ;;  %v17273_v30 = vpop.f32.mrb[147].mxu1 }
0x1225   :  { %v11569_v63 = vadd.f32 1.0, %v19023_v43 }
0x1226   :  { %v11424_v34 = vadd.f32 %v21167_v50, %v11421_v16 }
0x1227   :  { %19026 = vrcp.f32 %v11569_v63 }
0x1228   :  { %19028 = vtanh.f32 %v11424_v34 }
0x122b   :  { %v11491_v58 = vpop.f32.mrb[148].mxu1 }
0x122c   :  { %v19025_v3 = vpop.eup %19024  ;;  %v11562_v2 = vadd.f32 %v20777_v13, %v11491_v58  ;;  %v17295_v22 = vpop.f32.mrb[149].mxu1 }
0x122d   :  { %v11575_v25 = vadd.f32 1.0, %v19025_v3 }
0x122e   :  { %v11565_v32 = vadd.f32 %v21174_v36, %v11562_v2 }
0x122f   :  { %19030 = vrcp.f32 %v11575_v25 }
0x1230   :  { %v14899_v6 = vmul.f32 -1.442695, %v11565_v32 }
0x1231   :  { %v19027_v56 = vpop.eup %19026 }
0x1232   :  { %v19029_v41 = vpop.eup %19028  ;;  %19032 = vpow2.f32 %v14899_v6 }
0x1233   :  { %v11586_v52 = vmul.f32 %v19029_v41, %v19027_v56 }
0x1239   :  { %v19031_v51 = vpop.eup %19030 }
0x123a   :  { %v11585_v27 = vmul.f32 %v19031_v51, %v21247_v48 }
0x123c   :  { %v19033_v18 = vpop.eup %19032  ;;  %v21287_v62 = vadd.f32 %v11586_v52, %v11585_v27 }
0x123d   :  { %v11582_v28 = vadd.f32 1.0, %v19033_v18 }
0x123e   :  { %19034 = vtanh.f32 %v21287_v62 }
0x123f   :  { %19036 = vrcp.f32 %v11582_v28 }
0x1248   :  { %v19035_v13 = vpop.eup %19034 }
0x1249   :  { %v19037_v61 = vpop.eup %19036 }
0x124a   :  { %v11589_v31 = vmul.f32 %v19037_v61, %v19035_v13 }
0x124c   :  { %17316 = vmatmul.mubr.msk.f32.vlgmr.msra.gmra.mrb[150].mxu1 %vm170_vm4, %v11589_v31 }
0x124d   :  { %18492 = vmatpush3.bf16.msra.mxu1 %v21090_v19  ;;  %17337 = vmatprep.mubr.msk.f32.mxu1 %vm19260_vm0, %v21520_v55 }
0x124e   :  { %18493 = vmatprep.subr.bf16.mxu1 %v21519_v5 }
0x1251   :  { %18495 = vmatpush3.bf16.msra.mxu1 %v21097_v39 }
0x1252   :  { %18502 = vmatprep.subr.bf16.mxu1 %v21519_v5 }
0x1254   :  { %17338 = vmatmul.mubr.msk.f32.vlgmr.msra.gmra.mrb[152].mxu1 %vm170_vm4, %v11589_v31 }
0x1255   :  { %18504 = vmatpush3.bf16.msra.mxu1 %v21103_v37  ;;  %17359 = vmatprep.mubr.msk.f32.mxu1 %vm19260_vm0, %v21520_v55 }
0x1256   :  { %18505 = vmatprep.subr.bf16.mxu1 %v21519_v5 }
0x1259   :  { %18507 = vmatpush3.bf16.msra.mxu1 %v21108_v42 }
0x125a   :  { %18514 = vmatprep.subr.bf16.mxu1 %v21519_v5 }
0x125c   :  { %17360 = vmatmul.mubr.msk.f32.vlgmr.msra.gmra.mrb[154].mxu1 %vm170_vm4, %v11589_v31 }
0x125d   :  { %18516 = vmatpush3.bf16.msra.mxu1 %v21114_v49  ;;  %17381 = vmatprep.mubr.msk.f32.mxu1 %vm19260_vm0, %v21520_v55 }
0x125e   :  { %18517 = vmatprep.subr.bf16.mxu1 %v21519_v5 }
0x1261   :  { %18519 = vmatpush3.bf16.msra.mxu1 %v21119_v7 }
0x1262   :  { %18526 = vmatprep.subr.bf16.mxu1 %v21519_v5 }
0x1264   :  { %17382 = vmatmul.mubr.msk.f32.vlgmr.msra.gmra.mrb[156].mxu1 %vm170_vm4, %v11589_v31 }
0x1265   :  { %18528 = vmatpush3.bf16.msra.mxu1 %v21073_v8  ;;  %17403 = vmatprep.mubr.msk.f32.mxu1 %vm19260_vm0, %v21520_v55 }
0x1266   :  { %18529 = vmatprep.subr.bf16.mxu1 %v21519_v5 }
0x1269   :  { %18531 = vmatpush3.bf16.msra.mxu1 %v21080_v15 }
0x126a   :  { %18538 = vmatprep.subr.bf16.mxu1 %v21519_v5 }
0x131f   :  { %v11659_v48 = vpop.f32.mrb[150].mxu1 }
0x1320   :  { %v11730_v35 = vadd.f32 %v20841_v17, %v11659_v48  ;;  %v17317_v14 = vpop.f32.mrb[151].mxu1 }
0x1322   :  { %v11733_v40 = vadd.f32 %v21152_v44, %v11730_v35 }
0x1324   :  { %v14908_v60 = vmul.f32 -1.442695, %v11733_v40 }
0x1326   :  { %19038 = vpow2.f32 %v14908_v60 }
0x1327   :  { %v11800_v59 = vpop.f32.mrb[152].mxu1 }
0x1328   :  { %v11871_v10 = vadd.f32 %v20850_v9, %v11800_v59  ;;  %v17339_v43 = vpop.f32.mrb[153].mxu1 }
0x132a   :  { %v11874_v16 = vadd.f32 %v21160_v57, %v11871_v10 }
0x132c   :  { %v14909_v30 = vmul.f32 -1.442695, %v11874_v16 }
0x132e   :  { %19040 = vpow2.f32 %v14909_v30 }
0x132f   :  { %v11941_v63 = vpop.f32.mrb[154].mxu1 }
0x1330   :  { %v19039_v34 = vpop.eup %19038  ;;  %v12012_v58 = vadd.f32 %v20859_v23, %v11941_v63  ;;  %v17361_v3 = vpop.f32.mrb[155].mxu1 }
0x1331   :  { %v12160_v2 = vadd.f32 1.0, %v19039_v34 }
0x1332   :  { %v12015_v17 = vadd.f32 %v21167_v50, %v12012_v58 }
0x1333   :  { %19042 = vrcp.f32 %v12160_v2 }
0x1334   :  { %19044 = vtanh.f32 %v12015_v17 }
0x1337   :  { %v12082_v22 = vpop.f32.mrb[156].mxu1 }
0x1338   :  { %v19041_v25 = vpop.eup %19040  ;;  %v12153_v32 = vadd.f32 %v20863_v24, %v12082_v22  ;;  %v17383_v9 = vpop.f32.mrb[157].mxu1 }
0x1339   :  { %v12166_v6 = vadd.f32 1.0, %v19041_v25 }
0x133a   :  { %v12156_v56 = vadd.f32 %v21174_v36, %v12153_v32 }
0x133b   :  { %19046 = vrcp.f32 %v12166_v6 }
0x133c   :  { %v14910_v41 = vmul.f32 -1.442695, %v12156_v56 }
0x133d   :  { %v19043_v52 = vpop.eup %19042 }
0x133e   :  { %v19045_v51 = vpop.eup %19044  ;;  %19048 = vpow2.f32 %v14910_v41 }
0x133f   :  { %v12177_v23 = vmul.f32 %v19045_v51, %v19043_v52 }
0x1345   :  { %v19047_v27 = vpop.eup %19046 }
0x1346   :  { %v12176_v18 = vmul.f32 %v19047_v27, %v21287_v62 }
0x1348   :  { %v19049_v28 = vpop.eup %19048  ;;  %v21327_v13 = vadd.f32 %v12177_v23, %v12176_v18 }
0x1349   :  { %v12173_v61 = vadd.f32 1.0, %v19049_v28 }
0x134a   :  { %19050 = vtanh.f32 %v21327_v13 }
0x134b   :  { %19052 = vrcp.f32 %v12173_v61 }
0x1354   :  { %v19051_v24 = vpop.eup %19050 }
0x1355   :  { %v19053_v31 = vpop.eup %19052 }
0x1356   :  { %v12180_v48 = vmul.f32 %v19053_v31, %v19051_v24 }
0x1358   :  { %17404 = vmatmul.mubr.msk.f32.vlgmr.msra.gmra.mrb[158].mxu1 %vm170_vm4, %v12180_v48 }
0x1359   :  { %18540 = vmatpush3.bf16.msra.mxu1 %v21090_v19  ;;  %17425 = vmatprep.mubr.msk.f32.mxu1 %vm19260_vm0, %v21520_v55 }
0x135a   :  { %18541 = vmatprep.subr.bf16.mxu1 %v21519_v5 }
0x135d   :  { %18543 = vmatpush3.bf16.msra.mxu1 %v21097_v39 }
0x135e   :  { %18550 = vmatprep.subr.bf16.mxu1 %v21519_v5 }
0x1360   :  { %17426 = vmatmul.mubr.msk.f32.vlgmr.msra.gmra.mrb[160].mxu1 %vm170_vm4, %v12180_v48 }
0x1361   :  { %18552 = vmatpush3.bf16.msra.mxu1 %v21103_v37  ;;  %17447 = vmatprep.mubr.msk.f32.mxu1 %vm19260_vm0, %v21520_v55 }
0x1362   :  { %18553 = vmatprep.subr.bf16.mxu1 %v21519_v5 }
0x1365   :  { %18555 = vmatpush3.bf16.msra.mxu1 %v21108_v42 }
0x1366   :  { %18562 = vmatprep.subr.bf16.mxu1 %v21519_v5 }
0x1368   :  { %17448 = vmatmul.mubr.msk.f32.vlgmr.msra.gmra.mrb[162].mxu1 %vm170_vm4, %v12180_v48 }
0x1369   :  { %18564 = vmatpush3.bf16.msra.mxu1 %v21114_v49  ;;  %17469 = vmatprep.mubr.msk.f32.mxu1 %vm19260_vm0, %v21520_v55 }
0x136a   :  { %18565 = vmatprep.subr.bf16.mxu1 %v21519_v5 }
0x136d   :  { %18567 = vmatpush3.bf16.msra.mxu1 %v21119_v7 }
0x136e   :  { %18574 = vmatprep.subr.bf16.mxu1 %v21519_v5 }
0x1370   :  { %17470 = vmatmul.mubr.msk.f32.vlgmr.msra.gmra.mrb[164].mxu1 %vm170_vm4, %v12180_v48 }
0x1371   :  { %18576 = vmatpush3.bf16.msra.mxu1 %v21073_v8  ;;  %17491 = vmatprep.mubr.msk.f32.mxu1 %vm19260_vm0, %v21520_v55 }
0x1372   :  { %18577 = vmatprep.subr.bf16.mxu1 %v21519_v5 }
0x1375   :  { %18579 = vmatpush3.bf16.msra.mxu1 %v21080_v15 }
0x1376   :  { %18586 = vmatprep.subr.bf16.mxu1 %v21519_v5 }
0x142b   :  { %v12250_v62 = vpop.f32.mrb[158].mxu1 }
0x142c   :  { %v12321_v35 = vadd.f32 %v20927_v12, %v12250_v62  ;;  %v17405_v14 = vpop.f32.mrb[159].mxu1 }
0x142e   :  { %v12324_v40 = vadd.f32 %v21152_v44, %v12321_v35 }
0x1430   :  { %v14919_v60 = vmul.f32 -1.442695, %v12324_v40 }
0x1432   :  { %19054 = vpow2.f32 %v14919_v60 }
0x1433   :  { %v12391_v59 = vpop.f32.mrb[160].mxu1 }
0x1434   :  { %v12462_v10 = vadd.f32 %v20931_v45, %v12391_v59  ;;  %v17427_v43 = vpop.f32.mrb[161].mxu1 }
0x1436   :  { %v12465_v16 = vadd.f32 %v21160_v57, %v12462_v10 }
0x1438   :  { %v14920_v30 = vmul.f32 -1.442695, %v12465_v16 }
0x143a   :  { %19056 = vpow2.f32 %v14920_v30 }
0x143b   :  { %v12532_v63 = vpop.f32.mrb[162].mxu1 }
0x143c   :  { %v19055_v34 = vpop.eup %19054  ;;  %v12603_v58 = vadd.f32 %v20935_v29, %v12532_v63  ;;  %v17449_v3 = vpop.f32.mrb[163].mxu1 }
0x143d   :  { %v12751_v2 = vadd.f32 1.0, %v19055_v34 }
0x143e   :  { %v12606_v12 = vadd.f32 %v21167_v50, %v12603_v58 }
0x143f   :  { %19058 = vrcp.f32 %v12751_v2 }
0x1440   :  { %19060 = vtanh.f32 %v12606_v12 }
0x1443   :  { %v12673_v17 = vpop.f32.mrb[164].mxu1 }
0x1444   :  { %v19057_v22 = vpop.eup %19056  ;;  %v12744_v25 = vadd.f32 %v20944_v1, %v12673_v17  ;;  %v17471_v45 = vpop.f32.mrb[165].mxu1 }
0x1445   :  { %v12757_v32 = vadd.f32 1.0, %v19057_v22 }
0x1446   :  { %v12747_v9 = vadd.f32 %v21174_v36, %v12744_v25 }
0x1447   :  { %19062 = vrcp.f32 %v12757_v32 }
0x1448   :  { %v14921_v6 = vmul.f32 -1.442695, %v12747_v9 }
0x1449   :  { %v19059_v56 = vpop.eup %19058 }
0x144a   :  { %v19061_v41 = vpop.eup %19060  ;;  %19064 = vpow2.f32 %v14921_v6 }
0x144b   :  { %v12768_v29 = vmul.f32 %v19061_v41, %v19059_v56 }
0x1451   :  { %v19063_v52 = vpop.eup %19062 }
0x1452   :  { %v12767_v51 = vmul.f32 %v19063_v52, %v21327_v13 }
0x1454   :  { %v19065_v23 = vpop.eup %19064  ;;  %v21367_v27 = vadd.f32 %v12768_v29, %v12767_v51 }
0x1455   :  { %v12764_v18 = vadd.f32 1.0, %v19065_v23 }
0x1456   :  { %19066 = vtanh.f32 %v21367_v27 }
0x1457   :  { %19068 = vrcp.f32 %v12764_v18 }
0x1460   :  { %v19067_v1 = vpop.eup %19066 }
0x1461   :  { %v19069_v28 = vpop.eup %19068 }
0x1462   :  { %v12771_v61 = vmul.f32 %v19069_v28, %v19067_v1 }
0x1464   :  { %17492 = vmatmul.mubr.msk.f32.vlgmr.msra.gmra.mrb[166].mxu1 %vm170_vm4, %v12771_v61 }
0x1465   :  { %18588 = vmatpush3.bf16.msra.mxu1 %v21090_v19  ;;  %17513 = vmatprep.mubr.msk.f32.mxu1 %vm19260_vm0, %v21520_v55 }
0x1466   :  { %18589 = vmatprep.subr.bf16.mxu1 %v21519_v5 }
0x1469   :  { %18591 = vmatpush3.bf16.msra.mxu1 %v21097_v39 }
0x146a   :  { %18598 = vmatprep.subr.bf16.mxu1 %v21519_v5 }
0x146c   :  { %17514 = vmatmul.mubr.msk.f32.vlgmr.msra.gmra.mrb[168].mxu1 %vm170_vm4, %v12771_v61 }
0x146d   :  { %18600 = vmatpush3.bf16.msra.mxu1 %v21103_v37  ;;  %17535 = vmatprep.mubr.msk.f32.mxu1 %vm19260_vm0, %v21520_v55 }
0x146e   :  { %18601 = vmatprep.subr.bf16.mxu1 %v21519_v5 }
0x1471   :  { %18603 = vmatpush3.bf16.msra.mxu1 %v21108_v42 }
0x1472   :  { %18610 = vmatprep.subr.bf16.mxu1 %v21519_v5 }
0x1474   :  { %17536 = vmatmul.mubr.msk.f32.vlgmr.msra.gmra.mrb[170].mxu1 %vm170_vm4, %v12771_v61 }
0x1475   :  { %18612 = vmatpush3.bf16.msra.mxu1 %v21114_v49  ;;  %17557 = vmatprep.mubr.msk.f32.mxu1 %vm19260_vm0, %v21520_v55 }
0x1476   :  { %18613 = vmatprep.subr.bf16.mxu1 %v21519_v5 }
0x1479   :  { %18615 = vmatpush3.bf16.msra.mxu1 %v21119_v7 }
0x147a   :  { %18622 = vmatprep.subr.bf16.mxu1 %v21519_v5 }
0x147c   :  { %17558 = vmatmul.mubr.msk.f32.vlgmr.msra.gmra.mrb[172].mxu1 %vm170_vm4, %v12771_v61 }
0x147d   :  { %18624 = vmatpush3.bf16.msra.mxu1 %v21073_v8  ;;  %17579 = vmatprep.mubr.msk.f32.mxu1 %vm19260_vm0, %v21520_v55 }
0x147e   :  { %18625 = vmatprep.subr.bf16.mxu1 %v21519_v5 }
0x1481   :  { %18627 = vmatpush3.bf16.msra.mxu1 %v21080_v15 }
0x1482   :  { %18634 = vmatprep.subr.bf16.mxu1 %v21519_v5 }
0x1537   :  { %v12841_v13 = vpop.f32.mrb[166].mxu1 }
0x1538   :  { %v12912_v24 = vadd.f32 %v21013_v54, %v12841_v13  ;;  %v17493_v31 = vpop.f32.mrb[167].mxu1 }
0x153a   :  { %v12915_v48 = vadd.f32 %v21152_v44, %v12912_v24 }
0x153c   :  { %v14930_v62 = vmul.f32 -1.442695, %v12915_v48 }
0x153e   :  { %19070 = vpow2.f32 %v14930_v62 }
0x153f   :  { %v12982_v35 = vpop.f32.mrb[168].mxu1 }
0x1540   :  { %v13053_v14 = vadd.f32 %v21017_v33, %v12982_v35  ;;  %v17515_v40 = vpop.f32.mrb[169].mxu1 }
0x1542   :  { %v13056_v60 = vadd.f32 %v21160_v57, %v13053_v14 }
0x1544   :  { %v14931_v59 = vmul.f32 -1.442695, %v13056_v60 }
0x1546   :  { %19072 = vpow2.f32 %v14931_v59 }
0x1547   :  { %v13123_v10 = vpop.f32.mrb[170].mxu1 }
0x1548   :  { %v19071_v43 = vpop.eup %19070  ;;  %v13194_v16 = vadd.f32 %v21021_v47, %v13123_v10  ;;  %v17537_v30 = vpop.f32.mrb[171].mxu1 }
0x1549   :  { %v13342_v63 = vadd.f32 1.0, %v19071_v43 }
0x154a   :  { %v13197_v54 = vadd.f32 %v21167_v50, %v13194_v16 }
0x154b   :  { %19074 = vrcp.f32 %v13342_v63 }
0x154c   :  { %19076 = vtanh.f32 %v13197_v54 }
0x154f   :  { %v13264_v34 = vpop.f32.mrb[172].mxu1 }
0x1550   :  { %v19073_v58 = vpop.eup %19072  ;;  %v13335_v3 = vadd.f32 %v21025_v4, %v13264_v34  ;;  %v17559_v33 = vpop.f32.mrb[173].mxu1 }
0x1551   :  { %v13348_v2 = vadd.f32 1.0, %v19073_v58 }
0x1552   :  { %v13338_v12 = vadd.f32 %v21174_v36, %v13335_v3 }
0x1553   :  { %19078 = vrcp.f32 %v13348_v2 }
0x1554   :  { %v14932_v17 = vmul.f32 -1.442695, %v13338_v12 }
0x1555   :  { %v19075_v22 = vpop.eup %19074 }
0x1556   :  { %v19077_v25 = vpop.eup %19076  ;;  %19080 = vpow2.f32 %v14932_v17 }
0x1557   :  { %v13359_v47 = vmul.f32 %v19077_v25, %v19075_v22 }
0x155d   :  { %v19079_v45 = vpop.eup %19078 }
0x155e   :  { %v13358_v32 = vmul.f32 %v19079_v45, %v21367_v27 }
0x1560   :  { %v19081_v9 = vpop.eup %19080  ;;  %v21407_v6 = vadd.f32 %v13359_v47, %v13358_v32 }
0x1561   :  { %v13355_v56 = vadd.f32 1.0, %v19081_v9 }
0x1562   :  { %19082 = vtanh.f32 %v21407_v6 }
0x1563   :  { %19084 = vrcp.f32 %v13355_v56 }
0x156c   :  { %v19083_v4 = vpop.eup %19082 }
0x156d   :  { %v19085_v41 = vpop.eup %19084 }
0x156e   :  { %v13362_v29 = vmul.f32 %v19085_v41, %v19083_v4 }
0x1570   :  { %17580 = vmatmul.mubr.msk.f32.vlgmr.msra.gmra.mrb[174].mxu1 %vm170_vm4, %v13362_v29 }
0x1571   :  { %18636 = vmatpush3.bf16.msra.mxu1 %v21090_v19  ;;  %17601 = vmatprep.mubr.msk.f32.mxu1 %vm19260_vm0, %v21520_v55 }
0x1572   :  { %18637 = vmatprep.subr.bf16.mxu1 %v21519_v5 }
0x1575   :  { %18639 = vmatpush3.bf16.msra.mxu1 %v21097_v39 }
0x1576   :  { %18646 = vmatprep.subr.bf16.mxu1 %v21519_v5 }
0x1578   :  { %17602 = vmatmul.mubr.msk.f32.vlgmr.msra.gmra.mrb[176].mxu1 %vm170_vm4, %v13362_v29 }
0x1579   :  { %18648 = vmatpush3.bf16.msra.mxu1 %v21103_v37  ;;  %17623 = vmatprep.mubr.msk.f32.mxu1 %vm19260_vm0, %v21520_v55 }
0x157a   :  { %18649 = vmatprep.subr.bf16.mxu1 %v21519_v5 }
0x157d   :  { %18651 = vmatpush3.bf16.msra.mxu1 %v21108_v42 }
0x157e   :  { %18658 = vmatprep.subr.bf16.mxu1 %v21519_v5 }
0x1580   :  { %17624 = vmatmul.mubr.msk.f32.vlgmr.msra.gmra.mrb[178].mxu1 %vm170_vm4, %v13362_v29 }
0x1581   :  { %18660 = vmatpush3.bf16.msra.mxu1 %v21114_v49  ;;  %17645 = vmatprep.mubr.msk.f32.mxu1 %vm19260_vm0, %v21520_v55 }
0x1582   :  { %18661 = vmatprep.subr.bf16.mxu1 %v21519_v5 }
0x1585   :  { %18663 = vmatpush3.bf16.msra.mxu1 %v21119_v7 }
0x1586   :  { %18670 = vmatprep.subr.bf16.mxu1 %v21519_v5 }
0x1588   :  { %17646 = vmatmul.mubr.msk.f32.vlgmr.msra.gmra.mrb[180].mxu1 %vm170_vm4, %v13362_v29 }
0x1589   :  { %18672 = vmatpush3.bf16.msra.mxu1 %v21073_v8  ;;  %17667 = vmatprep.mubr.msk.f32.mxu1 %vm19260_vm0, %v21520_v55 }
0x158a   :  { %18673 = vmatprep.subr.bf16.mxu1 %v21519_v5 }
0x158d   :  { %18675 = vmatpush3.bf16.msra.mxu1 %v21080_v15 }
0x158e   :  { %18682 = vmatprep.subr.bf16.mxu1 %v21519_v5 }
0x1643   :  { %v13432_v52 = vpop.f32.mrb[174].mxu1 }
0x1644   :  { %v13503_v51 = vadd.f32 %v21133_v26, %v13432_v52  ;;  %v17581_v23 = vpop.f32.mrb[175].mxu1 }
0x1646   :  { %v13506_v27 = vadd.f32 %v21152_v44, %v13503_v51 }
0x1648   :  { %v14941_v18 = vmul.f32 -1.442695, %v13506_v27 }
0x164a   :  { %19086 = vpow2.f32 %v14941_v18 }
0x164b   :  { %v13573_v1 = vpop.f32.mrb[176].mxu1 }
0x164c   :  { %v13644_v8 = vadd.f32 %v21137_v11, %v13573_v1  ;;  %v17603_v28 = vpop.f32.mrb[177].mxu1 }
0x164e   :  { %v13647_v61 = vadd.f32 %v21160_v57, %v13644_v8 }
0x1650   :  { %v14942_v13 = vmul.f32 -1.442695, %v13647_v61 }
0x1652   :  { %19088 = vpow2.f32 %v14942_v13 }
0x1653   :  { %v13714_v24 = vpop.f32.mrb[178].mxu1 }
0x1654   :  { %v19087_v15 = vpop.eup %19086  ;;  %v13785_v31 = vadd.f32 %v21141_v38, %v13714_v24  ;;  %v17625_v48 = vpop.f32.mrb[179].mxu1 }
0x1655   :  { %v13933_v62 = vadd.f32 1.0, %v19087_v15 }
0x1656   :  { %v13788_v26 = vadd.f32 %v21167_v50, %v13785_v31 }
0x1657   :  { %19090 = vrcp.f32 %v13933_v62 }
0x1658   :  { %19092 = vtanh.f32 %v13788_v26 }
0x165b   :  { %v13855_v35 = vpop.f32.mrb[180].mxu1 }
0x165c   :  { %v19089_v14 = vpop.eup %19088  ;;  %v13926_v40 = vadd.f32 %v21145_v0, %v13855_v35  ;;  %v17647_v11 = vpop.f32.mrb[181].mxu1 }
0x165d   :  { %v13939_v60 = vadd.f32 1.0, %v19089_v14 }
0x165e   :  { %v13929_v59 = vadd.f32 %v21174_v36, %v13926_v40 }
0x165f   :  { %19094 = vrcp.f32 %v13939_v60 }
0x1660   :  { %v14943_v10 = vmul.f32 -1.442695, %v13929_v59 }
0x1661   :  { %v19091_v43 = vpop.eup %19090 }
0x1662   :  { %v19093_v16 = vpop.eup %19092  ;;  %19096 = vpow2.f32 %v14943_v10 }
0x1663   :  { %v13950_v38 = vmul.f32 %v19093_v16, %v19091_v43 }
0x1669   :  { %v19095_v30 = vpop.eup %19094 }
0x166a   :  { %v13949_v63 = vmul.f32 %v19095_v30, %v21407_v6 }
0x166c   :  { %v19097_v54 = vpop.eup %19096  ;;  %v21447_v34 = vadd.f32 %v13950_v38, %v13949_v63 }
0x166d   :  { %v13946_v58 = vadd.f32 1.0, %v19097_v54 }
0x166e   :  { %19098 = vtanh.f32 %v21447_v34 }
0x166f   :  { %19100 = vrcp.f32 %v13946_v58 }
0x1678   :  { %v19099_v0 = vpop.eup %19098 }
0x1679   :  { %v19101_v3 = vpop.eup %19100 }
0x167a   :  { %v13953_v33 = vmul.f32 %v19101_v3, %v19099_v0 }
0x167c   :  { %17668 = vmatmul.mubr.msk.f32.vlgmr.msra.gmra.mrb[182].mxu1 %vm170_vm4, %v13953_v33 }
0x167d   :  { %18684 = vmatpush3.bf16.msra.mxu1 %v21090_v19  ;;  %17689 = vmatprep.mubr.msk.f32.mxu1 %vm19260_vm0, %v21520_v55  ;;  %v14548_v19 = vld [vmem:[%s21510_s10] sm:$0xff] }
0x167e   :  { %18685 = vmatprep.subr.bf16.mxu1 %v21519_v5 }
0x1681   :  { %18687 = vmatpush3.bf16.msra.mxu1 %v21097_v39  ;;  %v14549_v39 = vld [vmem:[%s21510_s10 + $0x8] sm:$0xff] }
0x1682   :  { %18694 = vmatprep.subr.bf16.mxu1 %v21519_v5 }
0x1684   :  { %17690 = vmatmul.mubr.msk.f32.vlgmr.msra.gmra.mrb[184].mxu1 %vm170_vm4, %v13953_v33 }
0x1685   :  { %18696 = vmatpush3.bf16.msra.mxu1 %v21103_v37  ;;  %17711 = vmatprep.mubr.msk.f32.mxu1 %vm19260_vm0, %v21520_v55  ;;  %v14550_v37 = vld [vmem:[%s21510_s10 + $0x10] sm:$0xff] }
0x1686   :  { %18697 = vmatprep.subr.bf16.mxu1 %v21519_v5 }
0x1689   :  { %18699 = vmatpush3.bf16.msra.mxu1 %v21108_v42  ;;  %v18719_v42 = vpack.c.bf16 %v14549_v39, %v14548_v19 }
0x168a   :  { %18706 = vmatprep.subr.bf16.mxu1 %v21519_v5 }
0x168c   :  { %17712 = vmatmul.mubr.msk.f32.vlgmr.msra.gmra.mrb[186].mxu1 %vm170_vm4, %v13953_v33 }
0x168d   :  { %18708 = vmatpush3.bf16.msra.mxu1 %v21114_v49  ;;  %17733 = vmatprep.mubr.msk.f32.mxu1 %vm19260_vm0, %v21520_v55  ;;  %v14551_v49 = vld [vmem:[%s21510_s10 + $0x18] sm:$0xff] }
0x168e   :  { %18709 = vmatprep.subr.bf16.mxu1 %v21519_v5 }
0x1691   :  { %18711 = vmatpush3.bf16.msra.mxu1 %v21119_v7  ;;  %v18722_v7 = vpack.c.bf16 %v14551_v49, %v14550_v37 }
0x1692   :  { %18718 = vmatprep.subr.bf16.mxu1 %v21519_v5 }
0x1694   :  { %17734 = vmatmul.mubr.msk.f32.vlgmr.msra.gmra.mrb[188].mxu1 %vm170_vm4, %v13953_v33 }
0x1695   :  { %17755 = vmatprep.mubr.msk.f32.mxu1 %vm19260_vm0, %v21520_v55  ;;  %18720 = vmatpush3.bf16.msra.mxu1 %v18719_v42 }
0x1696   :  { %18721 = vmatprep.subr.bf16.mxu1 %v21519_v5 }
0x1699   :  { %18723 = vmatpush3.bf16.msra.mxu1 %v18722_v7 }
0x174f   :  { %v14023_v55 = vpop.f32.mrb[182].mxu1 }
0x1750   :  { %v14097_v2 = vadd.f32 %v21230_v53, %v14023_v55  ;;  %v17669_v12 = vpop.f32.mrb[183].mxu1 }
0x1752   :  { %v14100_v17 = vadd.f32 %v21152_v44, %v14097_v2 }
0x1754   :  { %v14952_v22 = vmul.f32 -1.442695, %v14100_v17 }
0x1756   :  { %19102 = vpow2.f32 %v14952_v22 }
0x1757   :  { %v14167_v25 = vpop.f32.mrb[184].mxu1 }
0x1758   :  { %v14238_v47 = vadd.f32 %v21232_v46, %v14167_v25  ;;  %v17691_v45 = vpop.f32.mrb[185].mxu1 }
0x175a   :  { %v14241_v32 = vadd.f32 %v21160_v57, %v14238_v47 }
0x175c   :  { %v14953_v9 = vmul.f32 -1.442695, %v14241_v32 }
0x175e   :  { %19104 = vpow2.f32 %v14953_v9 }
0x175f   :  { %v14308_v6 = vpop.f32.mrb[186].mxu1 }
0x1760   :  { %v19103_v56 = vpop.eup %19102  ;;  %v14379_v5 = vadd.f32 %v21234_v20, %v14308_v6  ;;  %v17713_v4 = vpop.f32.mrb[187].mxu1 }
0x1761   :  { %v14527_v41 = vadd.f32 1.0, %v19103_v56 }
0x1762   :  { %v14382_v53 = vadd.f32 %v21167_v50, %v14379_v5 }
0x1763   :  { %19106 = vrcp.f32 %v14527_v41 }
0x1764   :  { %19108 = vtanh.f32 %v14382_v53 }
0x1767   :  { %v14449_v44 = vpop.f32.mrb[188].mxu1 }
0x1768   :  { %v19105_v29 = vpop.eup %19104  ;;  %v14520_v52 = vadd.f32 %v21236_v21, %v14449_v44  ;;  %v17735_v46 = vpop.f32.mrb[189].mxu1 }
0x1769   :  { %v14533_v51 = vadd.f32 1.0, %v19105_v29 }
0x176a   :  { %v14523_v57 = vadd.f32 %v21174_v36, %v14520_v52  ;;  %v14955_v36 = vld [vmem:[#allocation2] ss:$0 sm:$0xff] }
0x176b   :  { %19110 = vrcp.f32 %v14533_v51 }
0x176c   :  { %v14954_v23 = vmul.f32 -1.442695, %v14523_v57 }
0x176d   :  { %v19107_v27 = vpop.eup %19106 }
0x176e   :  { %v19109_v18 = vpop.eup %19108  ;;  %19112 = vpow2.f32 %v14954_v23 }
0x176f   :  { %v14544_v20 = vmul.f32 %v19109_v18, %v19107_v27 }
0x1775   :  { %v19111_v1 = vpop.eup %19110 }
0x1776   :  { %v14543_v8 = vmul.f32 %v19111_v1, %v21447_v34 }
0x1778   :  { %v19113_v50 = vpop.eup %19112  ;;  %v14545_v28 = vadd.f32 %v14544_v20, %v14543_v8 }
0x1779   :  { %v14540_v61 = vadd.f32 1.0, %v19113_v50 }
0x177a   :  { %19114 = vtanh.f32 %v14545_v28 }
0x177b   :  { %19116 = vrcp.f32 %v14540_v61 }
0x1784   :  { %v19115_v13 = vpop.eup %19114 }
0x1785   :  { %v19117_v21 = vpop.eup %19116 }
0x1786   :  { %v14547_v24 = vmul.f32 %v19117_v21, %v19115_v13 }
0x1788   :  { %17756 = vmatmul.mubr.msk.f32.vlgmr.msra.gmra.mrb[190].mxu1 %vm170_vm4, %v14547_v24 }
0x185b   :  { %v14628_v15 = vpop.f32.mrb[190].mxu1 }
0x185c   :  { %v14629_v31 = vadd.f32 %v14955_v36, %v14628_v15  ;;  %v17757_v48 = vpop.f32.mrb[191].mxu1 }
0x185e   :  { %v14957_v62 = vmul.f32 -1.442695, %v14629_v31 }
0x1860   :  { %19118 = vpow2.f32 %v14957_v62 }
0x186a   :  { %v19119_v26 = vpop.eup %19118 }
0x186b   :  { %v14635_v35 = vadd.f32 1.0, %v19119_v26 }
0x186d   :  { %19120 = vrcp.f32 %v14635_v35 }
0x1877   :  { %v19121_v14 = vpop.eup %19120 }
0x1878   :  { %14639 = vst.msk [vmem:[%s21512_s12] sm:$0x3] %vm14638_vm5, %v19121_v14 }
0x1879   :  { %14644 = vsyncpa [#allocation4], 1 }
0x187a   :  { %14645 = vsyncpa [#allocation6], 1 }
0x187b   :  { %14646 = vsyncpa [#allocation9], 1 }

</bundles_post_ra>
